<compile_context>
chip_gen: v6e
topology: v6e:2x2x1
jax: 0.10.0
libtpu: 0.0.40
codegen_flags: <defaults>
</compile_context>

<pallas_src>
import jax
import jax.numpy as jnp
import numpy as np
from jax.experimental import pallas as pl
from jax.experimental.pallas import tpu as pltpu

# ----------------------------- configuration -------------------------------
B, T, N = 2, 6, 8          # batch, time steps, graph nodes
F_IN    = 4                # input_size
E_EXOG  = 3                # exog_size
O_OUT   = 2                # output_size
C_CTX   = 8                # context_size
HORIZON = 4                # horizon
HID     = 64               # DCRNN hidden size / MLP hidden size (fixed by module)
K_DIFF  = 2
N_TAPS  = 2 * K_DIFF + 1   # root + k forward + k backward diffusion taps


def _tree_sum(vals):
    """Pairwise-sum a list of arrays (shorter add chain than a left fold)."""
    vals = list(vals)
    while len(vals) > 1:
        nxt = [vals[i] + vals[i + 1] for i in range(0, len(vals) - 1, 2)]
        if len(vals) % 2:
            nxt.append(vals[-1])
        vals = nxt
    return vals[0]


# ====================== fused encoder + decoder kernel ======================
def _dcrnn_mlp_kernel(x_ref, u_ref, ph_ref, px_ref,
                      wxru_ref, wxc_ref, whru_ref, whc_ref, bru_ref, bc_ref,
                      g1w_ref, g1b_ref, g2w_ref, g2b_ref,
                      wdec1_ref, bdec1_ref, l1wu_ref,
                      l2w_ref, l2b_ref, l3w_ref, l3b_ref,
                      out_ref):
    f32 = jnp.float32
    m = ph_ref.shape[-1]                 # rows per step (N or B*N when folded)
    n_steps = x_ref.shape[0] // m        # T
    horizon = u_ref.shape[0]             # HORIZON
    hid = whc_ref.shape[-1]              # HID

    def dot(a, b):
        return jnp.dot(a, b, preferred_element_type=f32)

    # ---- x path hoisted out of the recurrence (all timesteps at once) ----
    xs = x_ref[...]                                               # [T*M, F]
    x_taps = (xs, dot(px_ref[0], xs), dot(px_ref[1], xs),
              dot(px_ref[2], xs), dot(px_ref[3], xs))             # 5 x [T*M, F]
    xc_ru = bru_ref[...] + _tree_sum(
        [dot(x_taps[k], wxru_ref[k]) for k in range(N_TAPS)])     # [T*M, 2*HID]
    xc_c = bc_ref[...] + _tree_sum(
        [dot(x_taps[k], wxc_ref[k]) for k in range(N_TAPS)])      # [T*M, HID]

    ph0, ph1, ph2, ph3 = ph_ref[0], ph_ref[1], ph_ref[2], ph_ref[3]

    def h_taps(z):   # Pf^2 / Pb^2 precomputed -> 4 independent matmuls
        return (z, dot(ph0, z), dot(ph1, z), dot(ph2, z), dot(ph3, z))

    # ---- graph-GRU recurrence, fully unrolled, h carried as a value ----
    h = jnp.zeros((m, hid), f32)
    for t in range(n_steps):
        hts = h_taps(h)
        pre_ru = xc_ru[t * m:(t + 1) * m] + _tree_sum(
            [dot(hts[k], whru_ref[k]) for k in range(N_TAPS)])    # [M, 2*HID]
        gates = jax.nn.sigmoid(pre_ru)
        r, ug = gates[:, :hid], gates[:, hid:]
        rts = h_taps(r * h)
        pre_c = xc_c[t * m:(t + 1) * m] + _tree_sum(
            [dot(rts[k], whc_ref[k]) for k in range(N_TAPS)])     # [M, HID]
        c = jnp.tanh(pre_c)
        h = ug * h + (1.0 - ug) * c

    # ---- MultiHorizonMLPDecoder (dropout=0): global trunk + folded readout ----
    h2 = jnp.maximum(dot(h, g1w_ref[...]) + g1b_ref[...], 0.0)
    h2 = jnp.maximum(dot(h2, g2w_ref[...]) + g2b_ref[...], 0.0)   # [M, HID]
    l1wu = l1wu_ref[...]                                          # [E, HID]
    pre1 = jnp.concatenate(
        [dot(h2, wdec1_ref[hh]) + dot(u_ref[hh], l1wu) + bdec1_ref[hh]
         for hh in range(horizon)], axis=0)                       # [H*M, HID]
    z = jnp.maximum(pre1, 0.0)
    z = jnp.maximum(dot(z, l2w_ref[...]) + l2b_ref[...], 0.0)
    out_ref[...] = (dot(z, l3w_ref[...]) + l3b_ref[...]).astype(out_ref.dtype)


# ============================ host-side packing =============================
def pack_params(enc, dec):
    """Repack PyTorch-style parameters for the kernel.

    Encoder: per-tap x / h weights kept separate (x path is hoisted), reset+update
    gates fused to a 128-lane output.  Decoder: the global-MLP readout and the
    local layer-1 context paths are pre-multiplied into per-horizon [HID, HID]
    weights (exact — no nonlinearity between them)."""
    wx, wh, bg = enc["wx"], enc["wh"], enc["b"]          # [3,5,F,H],[3,5,H,H],[3,1,H]
    g1w, g1b, g2w, g2b, g3w, g3b = dec["global"]
    l1w, l1b, l2w, l2b, l3w, l3b = dec["local"]

    l1w_ctx, l1w_gctx, l1w_u = l1w[:C_CTX], l1w[C_CTX:2 * C_CTX], l1w[2 * C_CTX:]
    g3w_g = g3w[:, HORIZON * C_CTX:]
    g3b_g = g3b[:, HORIZON * C_CTX:]
    wdec1 = jnp.stack(
        [g3w[:, h * C_CTX:(h + 1) * C_CTX] @ l1w_ctx + g3w_g @ l1w_gctx
         for h in range(HORIZON)])                        # [H, HID, HID]
    bdec1 = jnp.stack(
        [g3b[:, h * C_CTX:(h + 1) * C_CTX] @ l1w_ctx + g3b_g @ l1w_gctx + l1b
         for h in range(HORIZON)])                        # [H, 1, HID]

    return {
        "wx_ru": jnp.concatenate([wx[0], wx[1]], axis=-1),   # [5, F, 2*HID]
        "wx_c":  wx[2],                                      # [5, F, HID]
        "wh_ru": jnp.concatenate([wh[0], wh[1]], axis=-1),   # [5, HID, 2*HID]
        "wh_c":  wh[2],                                      # [5, HID, HID]
        "b_ru":  jnp.concatenate([bg[0], bg[1]], axis=-1),   # [1, 2*HID]
        "b_c":   bg[2],                                      # [1, HID]
        "g1w": g1w, "g1b": g1b, "g2w": g2w, "g2b": g2b,
        "wdec1": wdec1, "bdec1": bdec1, "l1w_u": l1w_u,
        "l2w": l2w, "l2b": l2b, "l3w": l3w, "l3b": l3b,
    }


def _build_transitions(p_fwd, p_bwd, nb, n_steps):
    """Stack [Pf, Pf^2, Pb, Pb^2] block-diagonal over the folded batch (size M=nb*N)
    and, for the hoisted x path, additionally block-diagonal over time."""
    def bd(p, k):
        return jnp.kron(jnp.eye(k, dtype=p.dtype), p)
    pf, pb = bd(p_fwd, nb), bd(p_bwd, nb)
    pf2, pb2 = pf @ pf, pb @ pb
    ph = jnp.stack([pf, pf2, pb, pb2])                         # [4, M, M]
    px = jnp.stack([bd(mat, n_steps) for mat in (pf, pf2, pb, pb2)])  # [4, T*M, T*M]
    return ph, px


# =============================== Pallas wrapper =============================
def dcrnn_mlp_pallas(x, u, p_fwd, p_bwd, params, *, fold_batch=True):
    """x: [B, T, N, F_IN], u: [B, HORIZON, N, E_EXOG] -> [B, HORIZON, N, O_OUT]."""
    bt = x.shape[0]
    nb = bt if fold_batch else 1
    grid = 1 if fold_batch else bt
    m = nb * N

    if fold_batch:   # rows ordered (t-major, then b, then n) / (b, n) for u
        x_enc = jnp.transpose(x, (1, 0, 2, 3)).reshape(1, T * m, F_IN)
        u_dec = jnp.transpose(u, (1, 0, 2, 3)).reshape(1, HORIZON, m, E_EXOG)
    else:
        x_enc = x.reshape(bt, T * N, F_IN)
        u_dec = u
    ph, px = _build_transitions(p_fwd, p_bwd, nb, T)

    weights = (params["wx_ru"], params["wx_c"], params["wh_ru"], params["wh_c"],
               params["b_ru"], params["b_c"],
               params["g1w"], params["g1b"], params["g2w"], params["g2b"],
               params["wdec1"], params["bdec1"], params["l1w_u"],
               params["l2w"], params["l2b"], params["l3w"], params["l3b"])

    def batch_spec(shape):
        nd = len(shape)
        return pl.BlockSpec((None,) + tuple(shape[1:]),
                            lambda b, _nd=nd: (b,) + (0,) * (_nd - 1))

    def full_spec(arr):
        nd = arr.ndim
        return pl.BlockSpec(tuple(arr.shape), lambda b, _nd=nd: (0,) * _nd)

    args = (x_enc, u_dec, ph, px) + weights
    in_specs = ([batch_spec(x_enc.shape), batch_spec(u_dec.shape)]
                + [full_spec(a) for a in args[2:]])

    out = pl.pallas_call(
        _dcrnn_mlp_kernel,
        out_shape=jax.ShapeDtypeStruct((grid, HORIZON * m, O_OUT), jnp.float32),
        grid_spec=pltpu.PrefetchScalarGridSpec(
            num_scalar_prefetch=0,
            grid=(grid,),
            in_specs=in_specs,
            out_specs=pl.BlockSpec((None, HORIZON * m, O_OUT),
                                   lambda b: (b, 0, 0)),
        ),
        compiler_params=pltpu.CompilerParams(
            dimension_semantics=("arbitrary",) if fold_batch else ("parallel",)),
    )(*args)

    if fold_batch:   # [1, H*B*N, O] -> [B, H, N, O]
        return jnp.transpose(out.reshape(HORIZON, bt, N, O_OUT), (1, 0, 2, 3))
    return out.reshape(bt, HORIZON, N, O_OUT)


# ============================ JAX glue code =================================
def build_support(edge_index, edge_weight, n_nodes):
    """Dense normalized forward/backward diffusion transition matrices."""
    # TODO(synk): sparse PyG-style message passing over edge_index is realized as
    # dense normalized transition matmuls (exact for any graph that fits VMEM).
    src, dst = edge_index[0], edge_index[1]
    a = jnp.zeros((n_nodes, n_nodes), jnp.float32).at[dst, src].add(edge_weight)

    def row_norm(mat):
        deg = mat.sum(axis=1, keepdims=True)
        inv = jnp.where(deg > 0, 1.0 / deg, 0.0)
        return mat * inv

    return row_norm(a), row_norm(a.T)


def _use_batch_grid():
    """True on chips with >1 TensorCore per device (v7x): keep grid=(B,) parallel."""
    try:
        kind = jax.devices()[0].device_kind.lower()
    except Exception:
        return False
    return ("v7" in kind) or ("7x" in kind)


dcrnn_mlp_forward = jax.jit(dcrnn_mlp_pallas, static_argnames=("fold_batch",))


# =========================== pure-JAX reference =============================
def _ref_forward(x, u, p_fwd, p_bwd, enc, dec):
    wx, wh, bg = enc["wx"], enc["wh"], enc["b"]
    Bt, Tt, Nn, _ = x.shape

    def taps(z):  # z: [B, N, C]
        zf1 = jnp.einsum("ij,bjc->bic", p_fwd, z)
        zf2 = jnp.einsum("ij,bjc->bic", p_fwd, zf1)
        zb1 = jnp.einsum("ij,bjc->bic", p_bwd, z)
        zb2 = jnp.einsum("ij,bjc->bic", p_bwd, zb1)
        return (z, zf1, zf2, zb1, zb2)

    def gate(g, xt_taps, h_taps):
        acc = bg[g, 0]
        for k in range(N_TAPS):
            acc = acc + xt_taps[k] @ wx[g, k] + h_taps[k] @ wh[g, k]
        return acc

    h = jnp.zeros((Bt, Nn, HID), jnp.float32)
    for t in range(Tt):
        xt_taps, h_taps = taps(x[:, t]), taps(h)
        r = jax.nn.sigmoid(gate(0, xt_taps, h_taps))
        z = jax.nn.sigmoid(gate(1, xt_taps, h_taps))
        c = jnp.tanh(gate(2, xt_taps, taps(r * h)))
        h = z * h + (1.0 - z) * c

    def mlp_ref(x2, w1, b1, w2, b2, w3, b3):
        y = jax.nn.relu(x2 @ w1 + b1)
        y = jax.nn.relu(y @ w2 + b2)
        return y @ w3 + b3

    g = mlp_ref(h.reshape(Bt * Nn, HID), *dec["global"]).reshape(
        Bt, Nn, C_CTX * (HORIZON + 1))
    ctx = jnp.transpose(g[..., : HORIZON * C_CTX].reshape(Bt, Nn, HORIZON, C_CTX),
                        (0, 2, 1, 3))
    gctx = jnp.broadcast_to(g[..., HORIZON * C_CTX:][:, None],
                            (Bt, HORIZON, Nn, C_CTX))
    x_dec = jnp.concatenate([ctx, gctx, u], axis=-1)
    y = mlp_ref(x_dec.reshape(-1, 2 * C_CTX + E_EXOG), *dec["local"])
    return y.reshape(Bt, HORIZON, Nn, O_OUT)


# ================================= main =====================================
if __name__ == "__main__":
    key = jax.random.PRNGKey(0)
    ks = list(jax.random.split(key, 24))

    def init(k, shape, scale=0.1):
        return scale * jax.random.normal(k, shape, jnp.float32)

    # ---- inputs ----
    x = init(ks[0], (B, T, N, F_IN), 1.0)
    u = init(ks[1], (B, HORIZON, N, E_EXOG), 1.0)

    # bidirectional ring graph + a few extra edges
    idx = np.arange(N)
    src = np.concatenate([idx, (idx + 1) % N, np.array([0, 2, 5])])
    dst = np.concatenate([(idx + 1) % N, idx, np.array([4, 6, 1])])
    edge_index = jnp.asarray(np.stack([src, dst]), dtype=jnp.int32)
    edge_weight = jax.random.uniform(ks[2], (edge_index.shape[1],),
                                     minval=0.5, maxval=1.5)

    # ---- deterministic synthetic parameters ----
    enc = {
        "wx": init(ks[3], (3, N_TAPS, F_IN, HID)),
        "wh": init(ks[4], (3, N_TAPS, HID, HID)),
        "b":  init(ks[5], (3, 1, HID)),
    }
    dec = {
        "global": (init(ks[6], (HID, HID)), init(ks[7], (1, HID)),
                   init(ks[8], (HID, HID)), init(ks[9], (1, HID)),
                   init(ks[10], (HID, C_CTX * (HORIZON + 1))),
                   init(ks[11], (1, C_CTX * (HORIZON + 1)))),
        "local":  (init(ks[12], (2 * C_CTX + E_EXOG, HID)), init(ks[13], (1, HID)),
                   init(ks[14], (HID, HID)), init(ks[15], (1, HID)),
                   init(ks[16], (HID, O_OUT)), init(ks[17], (1, O_OUT))),
    }

    p_fwd, p_bwd = build_support(edge_index, edge_weight, N)
    params = pack_params(enc, dec)

    # v5e/v6e (single TC): fold batch into matmul rows; v7x: batch across the 2 TCs.
    fold_batch = not _use_batch_grid()

    out = dcrnn_mlp_forward(x, u, p_fwd, p_bwd, params, fold_batch=fold_batch)
    out = jax.block_until_ready(out)
    assert out.shape == (B, HORIZON, N, O_OUT), out.shape

    ref = jax.block_until_ready(_ref_forward(x, u, p_fwd, p_bwd, enc, dec))
    np.testing.assert_allclose(np.asarray(out), np.asarray(ref),
                               rtol=1e-4, atol=1e-4)

    print("KERNEL_OK")
</pallas_src>

<mosaic_0001>
module attributes {stable_mosaic.version = 11 : i64} {
  func.func @_dcrnn_mlp_kernel(%arg0: i32, %arg1: memref<1x96x4xf32, #tpu.memory_space<vmem>>, %arg2: memref<1x4x16x3xf32, #tpu.memory_space<vmem>>, %arg3: memref<4x16x16xf32, #tpu.memory_space<vmem>>, %arg4: memref<4x96x96xf32, #tpu.memory_space<vmem>>, %arg5: memref<5x4x128xf32, #tpu.memory_space<vmem>>, %arg6: memref<5x4x64xf32, #tpu.memory_space<vmem>>, %arg7: memref<5x64x128xf32, #tpu.memory_space<vmem>>, %arg8: memref<5x64x64xf32, #tpu.memory_space<vmem>>, %arg9: memref<1x128xf32, #tpu.memory_space<vmem>>, %arg10: memref<1x64xf32, #tpu.memory_space<vmem>>, %arg11: memref<64x64xf32, #tpu.memory_space<vmem>>, %arg12: memref<1x64xf32, #tpu.memory_space<vmem>>, %arg13: memref<64x64xf32, #tpu.memory_space<vmem>>, %arg14: memref<1x64xf32, #tpu.memory_space<vmem>>, %arg15: memref<4x64x64xf32, #tpu.memory_space<vmem>>, %arg16: memref<4x1x64xf32, #tpu.memory_space<vmem>>, %arg17: memref<3x64xf32, #tpu.memory_space<vmem>>, %arg18: memref<64x64xf32, #tpu.memory_space<vmem>>, %arg19: memref<1x64xf32, #tpu.memory_space<vmem>>, %arg20: memref<64x2xf32, #tpu.memory_space<vmem>>, %arg21: memref<1x2xf32, #tpu.memory_space<vmem>>, %arg22: memref<1x64x2xf32, #tpu.memory_space<vmem>>) attributes {dimension_semantics = [#tpu.dimension_semantics<arbitrary>], iteration_bounds = array<i64: 1>, scalar_prefetch = 0 : i64, scratch_operands = 0 : i64, tpu.core_type = #tpu.core_type<tc>, window_params = [{transform_indices = @transform_0, window_bounds = array<i64: 1, 96, 4>}, {transform_indices = @transform_1, window_bounds = array<i64: 1, 4, 16, 3>}, {pipeline_mode = #tpu.pipeline_mode<synchronous>, transform_indices = @transform_2, window_bounds = array<i64: 4, 16, 16>}, {pipeline_mode = #tpu.pipeline_mode<synchronous>, transform_indices = @transform_3, window_bounds = array<i64: 4, 96, 96>}, {pipeline_mode = #tpu.pipeline_mode<synchronous>, transform_indices = @transform_4, window_bounds = array<i64: 5, 4, 128>}, {pipeline_mode = #tpu.pipeline_mode<synchronous>, transform_indices = @transform_5, window_bounds = array<i64: 5, 4, 64>}, {pipeline_mode = #tpu.pipeline_mode<synchronous>, transform_indices = @transform_6, window_bounds = array<i64: 5, 64, 128>}, {pipeline_mode = #tpu.pipeline_mode<synchronous>, transform_indices = @transform_7, window_bounds = array<i64: 5, 64, 64>}, {pipeline_mode = #tpu.pipeline_mode<synchronous>, transform_indices = @transform_8, window_bounds = array<i64: 1, 128>}, {pipeline_mode = #tpu.pipeline_mode<synchronous>, transform_indices = @transform_9, window_bounds = array<i64: 1, 64>}, {pipeline_mode = #tpu.pipeline_mode<synchronous>, transform_indices = @transform_10, window_bounds = array<i64: 64, 64>}, {pipeline_mode = #tpu.pipeline_mode<synchronous>, transform_indices = @transform_11, window_bounds = array<i64: 1, 64>}, {pipeline_mode = #tpu.pipeline_mode<synchronous>, transform_indices = @transform_12, window_bounds = array<i64: 64, 64>}, {pipeline_mode = #tpu.pipeline_mode<synchronous>, transform_indices = @transform_13, window_bounds = array<i64: 1, 64>}, {pipeline_mode = #tpu.pipeline_mode<synchronous>, transform_indices = @transform_14, window_bounds = array<i64: 4, 64, 64>}, {pipeline_mode = #tpu.pipeline_mode<synchronous>, transform_indices = @transform_15, window_bounds = array<i64: 4, 1, 64>}, {pipeline_mode = #tpu.pipeline_mode<synchronous>, transform_indices = @transform_16, window_bounds = array<i64: 3, 64>}, {pipeline_mode = #tpu.pipeline_mode<synchronous>, transform_indices = @transform_17, window_bounds = array<i64: 64, 64>}, {pipeline_mode = #tpu.pipeline_mode<synchronous>, transform_indices = @transform_18, window_bounds = array<i64: 1, 64>}, {pipeline_mode = #tpu.pipeline_mode<synchronous>, transform_indices = @transform_19, window_bounds = array<i64: 64, 2>}, {pipeline_mode = #tpu.pipeline_mode<synchronous>, transform_indices = @transform_20, window_bounds = array<i64: 1, 2>}, {transform_indices = @transform_21, window_bounds = array<i64: 1, 64, 2>}]} {
    %c0 = arith.constant 0 : index
    %c0_0 = arith.constant 0 : index
    %c0_1 = arith.constant 0 : index
    %0 = vector.load %arg1[%c0, %c0_0, %c0_1] : memref<1x96x4xf32, #tpu.memory_space<vmem>>, vector<1x96x4xf32>
    %1 = vector.shape_cast %0 : vector<1x96x4xf32> to vector<96x4xf32>
    %c0_2 = arith.constant 0 : index
    %c0_3 = arith.constant 0 : index
    %c0_4 = arith.constant 0 : index
    %2 = vector.load %arg4[%c0_2, %c0_3, %c0_4] : memref<4x96x96xf32, #tpu.memory_space<vmem>>, vector<1x96x96xf32>
    %3 = vector.shape_cast %2 : vector<1x96x96xf32> to vector<96x96xf32>
    %cst = arith.constant dense<0.000000e+00> : vector<96x4xf32>
    %4 = tpu.matmul %3, %1, %cst {dimension_numbers = #tpu.dot_dimension_numbers<[1], [0], [0], [1], [0, 0, 1, 1], [], []>} : vector<96x96xf32>, vector<96x4xf32>, vector<96x4xf32> -> vector<96x4xf32>
    %c1 = arith.constant 1 : index
    %c0_5 = arith.constant 0 : index
    %c0_6 = arith.constant 0 : index
    %5 = vector.load %arg4[%c1, %c0_5, %c0_6] : memref<4x96x96xf32, #tpu.memory_space<vmem>>, vector<1x96x96xf32>
    %6 = vector.shape_cast %5 : vector<1x96x96xf32> to vector<96x96xf32>
    %cst_7 = arith.constant dense<0.000000e+00> : vector<96x4xf32>
    %7 = tpu.matmul %6, %1, %cst_7 {dimension_numbers = #tpu.dot_dimension_numbers<[1], [0], [0], [1], [0, 0, 1, 1], [], []>} : vector<96x96xf32>, vector<96x4xf32>, vector<96x4xf32> -> vector<96x4xf32>
    %c2 = arith.constant 2 : index
    %c0_8 = arith.constant 0 : index
    %c0_9 = arith.constant 0 : index
    %8 = vector.load %arg4[%c2, %c0_8, %c0_9] : memref<4x96x96xf32, #tpu.memory_space<vmem>>, vector<1x96x96xf32>
    %9 = vector.shape_cast %8 : vector<1x96x96xf32> to vector<96x96xf32>
    %cst_10 = arith.constant dense<0.000000e+00> : vector<96x4xf32>
    %10 = tpu.matmul %9, %1, %cst_10 {dimension_numbers = #tpu.dot_dimension_numbers<[1], [0], [0], [1], [0, 0, 1, 1], [], []>} : vector<96x96xf32>, vector<96x4xf32>, vector<96x4xf32> -> vector<96x4xf32>
    %c3 = arith.constant 3 : index
    %c0_11 = arith.constant 0 : index
    %c0_12 = arith.constant 0 : index
    %11 = vector.load %arg4[%c3, %c0_11, %c0_12] : memref<4x96x96xf32, #tpu.memory_space<vmem>>, vector<1x96x96xf32>
    %12 = vector.shape_cast %11 : vector<1x96x96xf32> to vector<96x96xf32>
    %cst_13 = arith.constant dense<0.000000e+00> : vector<96x4xf32>
    %13 = tpu.matmul %12, %1, %cst_13 {dimension_numbers = #tpu.dot_dimension_numbers<[1], [0], [0], [1], [0, 0, 1, 1], [], []>} : vector<96x96xf32>, vector<96x4xf32>, vector<96x4xf32> -> vector<96x4xf32>
    %c0_14 = arith.constant 0 : index
    %c0_15 = arith.constant 0 : index
    %14 = vector.load %arg9[%c0_14, %c0_15] : memref<1x128xf32, #tpu.memory_space<vmem>>, vector<1x128xf32>
    %c0_16 = arith.constant 0 : index
    %c0_17 = arith.constant 0 : index
    %c0_18 = arith.constant 0 : index
    %15 = vector.load %arg5[%c0_16, %c0_17, %c0_18] : memref<5x4x128xf32, #tpu.memory_space<vmem>>, vector<1x4x128xf32>
    %16 = vector.shape_cast %15 : vector<1x4x128xf32> to vector<4x128xf32>
    %cst_19 = arith.constant dense<0.000000e+00> : vector<96x128xf32>
    %17 = tpu.matmul %1, %16, %cst_19 {dimension_numbers = #tpu.dot_dimension_numbers<[1], [0], [0], [1], [0, 0, 1, 1], [], []>} : vector<96x4xf32>, vector<4x128xf32>, vector<96x128xf32> -> vector<96x128xf32>
    %c1_20 = arith.constant 1 : index
    %c0_21 = arith.constant 0 : index
    %c0_22 = arith.constant 0 : index
    %18 = vector.load %arg5[%c1_20, %c0_21, %c0_22] : memref<5x4x128xf32, #tpu.memory_space<vmem>>, vector<1x4x128xf32>
    %19 = vector.shape_cast %18 : vector<1x4x128xf32> to vector<4x128xf32>
    %cst_23 = arith.constant dense<0.000000e+00> : vector<96x128xf32>
    %20 = tpu.matmul %4, %19, %cst_23 {dimension_numbers = #tpu.dot_dimension_numbers<[1], [0], [0], [1], [0, 0, 1, 1], [], []>} : vector<96x4xf32>, vector<4x128xf32>, vector<96x128xf32> -> vector<96x128xf32>
    %c2_24 = arith.constant 2 : index
    %c0_25 = arith.constant 0 : index
    %c0_26 = arith.constant 0 : index
    %21 = vector.load %arg5[%c2_24, %c0_25, %c0_26] : memref<5x4x128xf32, #tpu.memory_space<vmem>>, vector<1x4x128xf32>
    %22 = vector.shape_cast %21 : vector<1x4x128xf32> to vector<4x128xf32>
    %cst_27 = arith.constant dense<0.000000e+00> : vector<96x128xf32>
    %23 = tpu.matmul %7, %22, %cst_27 {dimension_numbers = #tpu.dot_dimension_numbers<[1], [0], [0], [1], [0, 0, 1, 1], [], []>} : vector<96x4xf32>, vector<4x128xf32>, vector<96x128xf32> -> vector<96x128xf32>
    %c3_28 = arith.constant 3 : index
    %c0_29 = arith.constant 0 : index
    %c0_30 = arith.constant 0 : index
    %24 = vector.load %arg5[%c3_28, %c0_29, %c0_30] : memref<5x4x128xf32, #tpu.memory_space<vmem>>, vector<1x4x128xf32>
    %25 = vector.shape_cast %24 : vector<1x4x128xf32> to vector<4x128xf32>
    %cst_31 = arith.constant dense<0.000000e+00> : vector<96x128xf32>
    %26 = tpu.matmul %10, %25, %cst_31 {dimension_numbers = #tpu.dot_dimension_numbers<[1], [0], [0], [1], [0, 0, 1, 1], [], []>} : vector<96x4xf32>, vector<4x128xf32>, vector<96x128xf32> -> vector<96x128xf32>
    %c4 = arith.constant 4 : index
    %c0_32 = arith.constant 0 : index
    %c0_33 = arith.constant 0 : index
    %27 = vector.load %arg5[%c4, %c0_32, %c0_33] : memref<5x4x128xf32, #tpu.memory_space<vmem>>, vector<1x4x128xf32>
    %28 = vector.shape_cast %27 : vector<1x4x128xf32> to vector<4x128xf32>
    %cst_34 = arith.constant dense<0.000000e+00> : vector<96x128xf32>
    %29 = tpu.matmul %13, %28, %cst_34 {dimension_numbers = #tpu.dot_dimension_numbers<[1], [0], [0], [1], [0, 0, 1, 1], [], []>} : vector<96x4xf32>, vector<4x128xf32>, vector<96x128xf32> -> vector<96x128xf32>
    %30 = arith.addf %17, %20 : vector<96x128xf32>
    %31 = arith.addf %23, %26 : vector<96x128xf32>
    %32 = arith.addf %30, %31 : vector<96x128xf32>
    %33 = arith.addf %32, %29 : vector<96x128xf32>
    %34 = vector.broadcast %14 : vector<1x128xf32> to vector<96x128xf32>
    %35 = arith.addf %34, %33 : vector<96x128xf32>
    %c0_35 = arith.constant 0 : index
    %c0_36 = arith.constant 0 : index
    %36 = vector.load %arg10[%c0_35, %c0_36] : memref<1x64xf32, #tpu.memory_space<vmem>>, vector<1x64xf32>
    %c0_37 = arith.constant 0 : index
    %c0_38 = arith.constant 0 : index
    %c0_39 = arith.constant 0 : index
    %37 = vector.load %arg6[%c0_37, %c0_38, %c0_39] : memref<5x4x64xf32, #tpu.memory_space<vmem>>, vector<1x4x64xf32>
    %38 = vector.shape_cast %37 : vector<1x4x64xf32> to vector<4x64xf32>
    %cst_40 = arith.constant dense<0.000000e+00> : vector<96x64xf32>
    %39 = tpu.matmul %1, %38, %cst_40 {dimension_numbers = #tpu.dot_dimension_numbers<[1], [0], [0], [1], [0, 0, 1, 1], [], []>} : vector<96x4xf32>, vector<4x64xf32>, vector<96x64xf32> -> vector<96x64xf32>
    %c1_41 = arith.constant 1 : index
    %c0_42 = arith.constant 0 : index
    %c0_43 = arith.constant 0 : index
    %40 = vector.load %arg6[%c1_41, %c0_42, %c0_43] : memref<5x4x64xf32, #tpu.memory_space<vmem>>, vector<1x4x64xf32>
    %41 = vector.shape_cast %40 : vector<1x4x64xf32> to vector<4x64xf32>
    %cst_44 = arith.constant dense<0.000000e+00> : vector<96x64xf32>
    %42 = tpu.matmul %4, %41, %cst_44 {dimension_numbers = #tpu.dot_dimension_numbers<[1], [0], [0], [1], [0, 0, 1, 1], [], []>} : vector<96x4xf32>, vector<4x64xf32>, vector<96x64xf32> -> vector<96x64xf32>
    %c2_45 = arith.constant 2 : index
    %c0_46 = arith.constant 0 : index
    %c0_47 = arith.constant 0 : index
    %43 = vector.load %arg6[%c2_45, %c0_46, %c0_47] : memref<5x4x64xf32, #tpu.memory_space<vmem>>, vector<1x4x64xf32>
    %44 = vector.shape_cast %43 : vector<1x4x64xf32> to vector<4x64xf32>
    %cst_48 = arith.constant dense<0.000000e+00> : vector<96x64xf32>
    %45 = tpu.matmul %7, %44, %cst_48 {dimension_numbers = #tpu.dot_dimension_numbers<[1], [0], [0], [1], [0, 0, 1, 1], [], []>} : vector<96x4xf32>, vector<4x64xf32>, vector<96x64xf32> -> vector<96x64xf32>
    %c3_49 = arith.constant 3 : index
    %c0_50 = arith.constant 0 : index
    %c0_51 = arith.constant 0 : index
    %46 = vector.load %arg6[%c3_49, %c0_50, %c0_51] : memref<5x4x64xf32, #tpu.memory_space<vmem>>, vector<1x4x64xf32>
    %47 = vector.shape_cast %46 : vector<1x4x64xf32> to vector<4x64xf32>
    %cst_52 = arith.constant dense<0.000000e+00> : vector<96x64xf32>
    %48 = tpu.matmul %10, %47, %cst_52 {dimension_numbers = #tpu.dot_dimension_numbers<[1], [0], [0], [1], [0, 0, 1, 1], [], []>} : vector<96x4xf32>, vector<4x64xf32>, vector<96x64xf32> -> vector<96x64xf32>
    %c4_53 = arith.constant 4 : index
    %c0_54 = arith.constant 0 : index
    %c0_55 = arith.constant 0 : index
    %49 = vector.load %arg6[%c4_53, %c0_54, %c0_55] : memref<5x4x64xf32, #tpu.memory_space<vmem>>, vector<1x4x64xf32>
    %50 = vector.shape_cast %49 : vector<1x4x64xf32> to vector<4x64xf32>
    %cst_56 = arith.constant dense<0.000000e+00> : vector<96x64xf32>
    %51 = tpu.matmul %13, %50, %cst_56 {dimension_numbers = #tpu.dot_dimension_numbers<[1], [0], [0], [1], [0, 0, 1, 1], [], []>} : vector<96x4xf32>, vector<4x64xf32>, vector<96x64xf32> -> vector<96x64xf32>
    %52 = arith.addf %39, %42 : vector<96x64xf32>
    %53 = arith.addf %45, %48 : vector<96x64xf32>
    %54 = arith.addf %52, %53 : vector<96x64xf32>
    %55 = arith.addf %54, %51 : vector<96x64xf32>
    %56 = vector.broadcast %36 : vector<1x64xf32> to vector<96x64xf32>
    %57 = arith.addf %56, %55 : vector<96x64xf32>
    %c0_57 = arith.constant 0 : index
    %c0_58 = arith.constant 0 : index
    %c0_59 = arith.constant 0 : index
    %58 = vector.load %arg3[%c0_57, %c0_58, %c0_59] : memref<4x16x16xf32, #tpu.memory_space<vmem>>, vector<1x16x16xf32>
    %59 = vector.shape_cast %58 : vector<1x16x16xf32> to vector<16x16xf32>
    %c1_60 = arith.constant 1 : index
    %c0_61 = arith.constant 0 : index
    %c0_62 = arith.constant 0 : index
    %60 = vector.load %arg3[%c1_60, %c0_61, %c0_62] : memref<4x16x16xf32, #tpu.memory_space<vmem>>, vector<1x16x16xf32>
    %61 = vector.shape_cast %60 : vector<1x16x16xf32> to vector<16x16xf32>
    %c2_63 = arith.constant 2 : index
    %c0_64 = arith.constant 0 : index
    %c0_65 = arith.constant 0 : index
    %62 = vector.load %arg3[%c2_63, %c0_64, %c0_65] : memref<4x16x16xf32, #tpu.memory_space<vmem>>, vector<1x16x16xf32>
    %63 = vector.shape_cast %62 : vector<1x16x16xf32> to vector<16x16xf32>
    %c3_66 = arith.constant 3 : index
    %c0_67 = arith.constant 0 : index
    %c0_68 = arith.constant 0 : index
    %64 = vector.load %arg3[%c3_66, %c0_67, %c0_68] : memref<4x16x16xf32, #tpu.memory_space<vmem>>, vector<1x16x16xf32>
    %65 = vector.shape_cast %64 : vector<1x16x16xf32> to vector<16x16xf32>
    %cst_69 = arith.constant 0.000000e+00 : f32
    %66 = vector.broadcast %cst_69 : f32 to vector<16x64xf32>
    %cst_70 = arith.constant dense<0.000000e+00> : vector<16x64xf32>
    %67 = tpu.matmul %59, %66, %cst_70 {dimension_numbers = #tpu.dot_dimension_numbers<[1], [0], [0], [1], [0, 0, 1, 1], [], []>} : vector<16x16xf32>, vector<16x64xf32>, vector<16x64xf32> -> vector<16x64xf32>
    %cst_71 = arith.constant dense<0.000000e+00> : vector<16x64xf32>
    %68 = tpu.matmul %61, %66, %cst_71 {dimension_numbers = #tpu.dot_dimension_numbers<[1], [0], [0], [1], [0, 0, 1, 1], [], []>} : vector<16x16xf32>, vector<16x64xf32>, vector<16x64xf32> -> vector<16x64xf32>
    %cst_72 = arith.constant dense<0.000000e+00> : vector<16x64xf32>
    %69 = tpu.matmul %63, %66, %cst_72 {dimension_numbers = #tpu.dot_dimension_numbers<[1], [0], [0], [1], [0, 0, 1, 1], [], []>} : vector<16x16xf32>, vector<16x64xf32>, vector<16x64xf32> -> vector<16x64xf32>
    %cst_73 = arith.constant dense<0.000000e+00> : vector<16x64xf32>
    %70 = tpu.matmul %65, %66, %cst_73 {dimension_numbers = #tpu.dot_dimension_numbers<[1], [0], [0], [1], [0, 0, 1, 1], [], []>} : vector<16x16xf32>, vector<16x64xf32>, vector<16x64xf32> -> vector<16x64xf32>
    %71 = vector.extract_strided_slice %35 {offsets = [0, 0], sizes = [16, 128], strides = [1, 1]} : vector<96x128xf32> to vector<16x128xf32>
    %c0_74 = arith.constant 0 : index
    %c0_75 = arith.constant 0 : index
    %c0_76 = arith.constant 0 : index
    %72 = vector.load %arg7[%c0_74, %c0_75, %c0_76] : memref<5x64x128xf32, #tpu.memory_space<vmem>>, vector<1x64x128xf32>
    %73 = vector.shape_cast %72 : vector<1x64x128xf32> to vector<64x128xf32>
    %cst_77 = arith.constant dense<0.000000e+00> : vector<16x128xf32>
    %74 = tpu.matmul %66, %73, %cst_77 {dimension_numbers = #tpu.dot_dimension_numbers<[1], [0], [0], [1], [0, 0, 1, 1], [], []>} : vector<16x64xf32>, vector<64x128xf32>, vector<16x128xf32> -> vector<16x128xf32>
    %c1_78 = arith.constant 1 : index
    %c0_79 = arith.constant 0 : index
    %c0_80 = arith.constant 0 : index
    %75 = vector.load %arg7[%c1_78, %c0_79, %c0_80] : memref<5x64x128xf32, #tpu.memory_space<vmem>>, vector<1x64x128xf32>
    %76 = vector.shape_cast %75 : vector<1x64x128xf32> to vector<64x128xf32>
    %cst_81 = arith.constant dense<0.000000e+00> : vector<16x128xf32>
    %77 = tpu.matmul %67, %76, %cst_81 {dimension_numbers = #tpu.dot_dimension_numbers<[1], [0], [0], [1], [0, 0, 1, 1], [], []>} : vector<16x64xf32>, vector<64x128xf32>, vector<16x128xf32> -> vector<16x128xf32>
    %c2_82 = arith.constant 2 : index
    %c0_83 = arith.constant 0 : index
    %c0_84 = arith.constant 0 : index
    %78 = vector.load %arg7[%c2_82, %c0_83, %c0_84] : memref<5x64x128xf32, #tpu.memory_space<vmem>>, vector<1x64x128xf32>
    %79 = vector.shape_cast %78 : vector<1x64x128xf32> to vector<64x128xf32>
    %cst_85 = arith.constant dense<0.000000e+00> : vector<16x128xf32>
    %80 = tpu.matmul %68, %79, %cst_85 {dimension_numbers = #tpu.dot_dimension_numbers<[1], [0], [0], [1], [0, 0, 1, 1], [], []>} : vector<16x64xf32>, vector<64x128xf32>, vector<16x128xf32> -> vector<16x128xf32>
    %c3_86 = arith.constant 3 : index
    %c0_87 = arith.constant 0 : index
    %c0_88 = arith.constant 0 : index
    %81 = vector.load %arg7[%c3_86, %c0_87, %c0_88] : memref<5x64x128xf32, #tpu.memory_space<vmem>>, vector<1x64x128xf32>
    %82 = vector.shape_cast %81 : vector<1x64x128xf32> to vector<64x128xf32>
    %cst_89 = arith.constant dense<0.000000e+00> : vector<16x128xf32>
    %83 = tpu.matmul %69, %82, %cst_89 {dimension_numbers = #tpu.dot_dimension_numbers<[1], [0], [0], [1], [0, 0, 1, 1], [], []>} : vector<16x64xf32>, vector<64x128xf32>, vector<16x128xf32> -> vector<16x128xf32>
    %c4_90 = arith.constant 4 : index
    %c0_91 = arith.constant 0 : index
    %c0_92 = arith.constant 0 : index
    %84 = vector.load %arg7[%c4_90, %c0_91, %c0_92] : memref<5x64x128xf32, #tpu.memory_space<vmem>>, vector<1x64x128xf32>
    %85 = vector.shape_cast %84 : vector<1x64x128xf32> to vector<64x128xf32>
    %cst_93 = arith.constant dense<0.000000e+00> : vector<16x128xf32>
    %86 = tpu.matmul %70, %85, %cst_93 {dimension_numbers = #tpu.dot_dimension_numbers<[1], [0], [0], [1], [0, 0, 1, 1], [], []>} : vector<16x64xf32>, vector<64x128xf32>, vector<16x128xf32> -> vector<16x128xf32>
    %87 = arith.addf %74, %77 : vector<16x128xf32>
    %88 = arith.addf %80, %83 : vector<16x128xf32>
    %89 = arith.addf %87, %88 : vector<16x128xf32>
    %90 = arith.addf %89, %86 : vector<16x128xf32>
    %91 = arith.addf %71, %90 : vector<16x128xf32>
    %92 = arith.negf %91 : vector<16x128xf32>
    %93 = math.exp %92 : vector<16x128xf32>
    %cst_94 = arith.constant 1.000000e+00 : f32
    %94 = vector.broadcast %cst_94 : f32 to vector<16x128xf32>
    %95 = arith.addf %94, %93 : vector<16x128xf32>
    %96 = arith.divf %94, %95 : vector<16x128xf32>
    %97 = vector.extract_strided_slice %96 {offsets = [0, 0], sizes = [16, 64], strides = [1, 1]} : vector<16x128xf32> to vector<16x64xf32>
    %98 = vector.extract_strided_slice %96 {offsets = [0, 64], sizes = [16, 64], strides = [1, 1]} : vector<16x128xf32> to vector<16x64xf32>
    %99 = arith.mulf %97, %66 : vector<16x64xf32>
    %cst_95 = arith.constant dense<0.000000e+00> : vector<16x64xf32>
    %100 = tpu.matmul %59, %99, %cst_95 {dimension_numbers = #tpu.dot_dimension_numbers<[1], [0], [0], [1], [0, 0, 1, 1], [], []>} : vector<16x16xf32>, vector<16x64xf32>, vector<16x64xf32> -> vector<16x64xf32>
    %cst_96 = arith.constant dense<0.000000e+00> : vector<16x64xf32>
    %101 = tpu.matmul %61, %99, %cst_96 {dimension_numbers = #tpu.dot_dimension_numbers<[1], [0], [0], [1], [0, 0, 1, 1], [], []>} : vector<16x16xf32>, vector<16x64xf32>, vector<16x64xf32> -> vector<16x64xf32>
    %cst_97 = arith.constant dense<0.000000e+00> : vector<16x64xf32>
    %102 = tpu.matmul %63, %99, %cst_97 {dimension_numbers = #tpu.dot_dimension_numbers<[1], [0], [0], [1], [0, 0, 1, 1], [], []>} : vector<16x16xf32>, vector<16x64xf32>, vector<16x64xf32> -> vector<16x64xf32>
    %cst_98 = arith.constant dense<0.000000e+00> : vector<16x64xf32>
    %103 = tpu.matmul %65, %99, %cst_98 {dimension_numbers = #tpu.dot_dimension_numbers<[1], [0], [0], [1], [0, 0, 1, 1], [], []>} : vector<16x16xf32>, vector<16x64xf32>, vector<16x64xf32> -> vector<16x64xf32>
    %104 = vector.extract_strided_slice %57 {offsets = [0, 0], sizes = [16, 64], strides = [1, 1]} : vector<96x64xf32> to vector<16x64xf32>
    %c0_99 = arith.constant 0 : index
    %c0_100 = arith.constant 0 : index
    %c0_101 = arith.constant 0 : index
    %105 = vector.load %arg8[%c0_99, %c0_100, %c0_101] : memref<5x64x64xf32, #tpu.memory_space<vmem>>, vector<1x64x64xf32>
    %106 = vector.shape_cast %105 : vector<1x64x64xf32> to vector<64x64xf32>
    %cst_102 = arith.constant dense<0.000000e+00> : vector<16x64xf32>
    %107 = tpu.matmul %99, %106, %cst_102 {dimension_numbers = #tpu.dot_dimension_numbers<[1], [0], [0], [1], [0, 0, 1, 1], [], []>} : vector<16x64xf32>, vector<64x64xf32>, vector<16x64xf32> -> vector<16x64xf32>
    %c1_103 = arith.constant 1 : index
    %c0_104 = arith.constant 0 : index
    %c0_105 = arith.constant 0 : index
    %108 = vector.load %arg8[%c1_103, %c0_104, %c0_105] : memref<5x64x64xf32, #tpu.memory_space<vmem>>, vector<1x64x64xf32>
    %109 = vector.shape_cast %108 : vector<1x64x64xf32> to vector<64x64xf32>
    %cst_106 = arith.constant dense<0.000000e+00> : vector<16x64xf32>
    %110 = tpu.matmul %100, %109, %cst_106 {dimension_numbers = #tpu.dot_dimension_numbers<[1], [0], [0], [1], [0, 0, 1, 1], [], []>} : vector<16x64xf32>, vector<64x64xf32>, vector<16x64xf32> -> vector<16x64xf32>
    %c2_107 = arith.constant 2 : index
    %c0_108 = arith.constant 0 : index
    %c0_109 = arith.constant 0 : index
    %111 = vector.load %arg8[%c2_107, %c0_108, %c0_109] : memref<5x64x64xf32, #tpu.memory_space<vmem>>, vector<1x64x64xf32>
    %112 = vector.shape_cast %111 : vector<1x64x64xf32> to vector<64x64xf32>
    %cst_110 = arith.constant dense<0.000000e+00> : vector<16x64xf32>
    %113 = tpu.matmul %101, %112, %cst_110 {dimension_numbers = #tpu.dot_dimension_numbers<[1], [0], [0], [1], [0, 0, 1, 1], [], []>} : vector<16x64xf32>, vector<64x64xf32>, vector<16x64xf32> -> vector<16x64xf32>
    %c3_111 = arith.constant 3 : index
    %c0_112 = arith.constant 0 : index
    %c0_113 = arith.constant 0 : index
    %114 = vector.load %arg8[%c3_111, %c0_112, %c0_113] : memref<5x64x64xf32, #tpu.memory_space<vmem>>, vector<1x64x64xf32>
    %115 = vector.shape_cast %114 : vector<1x64x64xf32> to vector<64x64xf32>
    %cst_114 = arith.constant dense<0.000000e+00> : vector<16x64xf32>
    %116 = tpu.matmul %102, %115, %cst_114 {dimension_numbers = #tpu.dot_dimension_numbers<[1], [0], [0], [1], [0, 0, 1, 1], [], []>} : vector<16x64xf32>, vector<64x64xf32>, vector<16x64xf32> -> vector<16x64xf32>
    %c4_115 = arith.constant 4 : index
    %c0_116 = arith.constant 0 : index
    %c0_117 = arith.constant 0 : index
    %117 = vector.load %arg8[%c4_115, %c0_116, %c0_117] : memref<5x64x64xf32, #tpu.memory_space<vmem>>, vector<1x64x64xf32>
    %118 = vector.shape_cast %117 : vector<1x64x64xf32> to vector<64x64xf32>
    %cst_118 = arith.constant dense<0.000000e+00> : vector<16x64xf32>
    %119 = tpu.matmul %103, %118, %cst_118 {dimension_numbers = #tpu.dot_dimension_numbers<[1], [0], [0], [1], [0, 0, 1, 1], [], []>} : vector<16x64xf32>, vector<64x64xf32>, vector<16x64xf32> -> vector<16x64xf32>
    %120 = arith.addf %107, %110 : vector<16x64xf32>
    %121 = arith.addf %113, %116 : vector<16x64xf32>
    %122 = arith.addf %120, %121 : vector<16x64xf32>
    %123 = arith.addf %122, %119 : vector<16x64xf32>
    %124 = arith.addf %104, %123 : vector<16x64xf32>
    %125 = math.tanh %124 : vector<16x64xf32>
    %126 = arith.mulf %98, %66 : vector<16x64xf32>
    %cst_119 = arith.constant 1.000000e+00 : f32
    %127 = vector.broadcast %cst_119 : f32 to vector<16x64xf32>
    %128 = arith.subf %127, %98 : vector<16x64xf32>
    %129 = arith.mulf %128, %125 : vector<16x64xf32>
    %130 = arith.addf %126, %129 : vector<16x64xf32>
    %cst_120 = arith.constant dense<0.000000e+00> : vector<16x64xf32>
    %131 = tpu.matmul %59, %130, %cst_120 {dimension_numbers = #tpu.dot_dimension_numbers<[1], [0], [0], [1], [0, 0, 1, 1], [], []>} : vector<16x16xf32>, vector<16x64xf32>, vector<16x64xf32> -> vector<16x64xf32>
    %cst_121 = arith.constant dense<0.000000e+00> : vector<16x64xf32>
    %132 = tpu.matmul %61, %130, %cst_121 {dimension_numbers = #tpu.dot_dimension_numbers<[1], [0], [0], [1], [0, 0, 1, 1], [], []>} : vector<16x16xf32>, vector<16x64xf32>, vector<16x64xf32> -> vector<16x64xf32>
    %cst_122 = arith.constant dense<0.000000e+00> : vector<16x64xf32>
    %133 = tpu.matmul %63, %130, %cst_122 {dimension_numbers = #tpu.dot_dimension_numbers<[1], [0], [0], [1], [0, 0, 1, 1], [], []>} : vector<16x16xf32>, vector<16x64xf32>, vector<16x64xf32> -> vector<16x64xf32>
    %cst_123 = arith.constant dense<0.000000e+00> : vector<16x64xf32>
    %134 = tpu.matmul %65, %130, %cst_123 {dimension_numbers = #tpu.dot_dimension_numbers<[1], [0], [0], [1], [0, 0, 1, 1], [], []>} : vector<16x16xf32>, vector<16x64xf32>, vector<16x64xf32> -> vector<16x64xf32>
    %135 = vector.extract_strided_slice %35 {offsets = [16, 0], sizes = [16, 128], strides = [1, 1]} : vector<96x128xf32> to vector<16x128xf32>
    %c0_124 = arith.constant 0 : index
    %c0_125 = arith.constant 0 : index
    %c0_126 = arith.constant 0 : index
    %136 = vector.load %arg7[%c0_124, %c0_125, %c0_126] : memref<5x64x128xf32, #tpu.memory_space<vmem>>, vector<1x64x128xf32>
    %137 = vector.shape_cast %136 : vector<1x64x128xf32> to vector<64x128xf32>
    %cst_127 = arith.constant dense<0.000000e+00> : vector<16x128xf32>
    %138 = tpu.matmul %130, %137, %cst_127 {dimension_numbers = #tpu.dot_dimension_numbers<[1], [0], [0], [1], [0, 0, 1, 1], [], []>} : vector<16x64xf32>, vector<64x128xf32>, vector<16x128xf32> -> vector<16x128xf32>
    %c1_128 = arith.constant 1 : index
    %c0_129 = arith.constant 0 : index
    %c0_130 = arith.constant 0 : index
    %139 = vector.load %arg7[%c1_128, %c0_129, %c0_130] : memref<5x64x128xf32, #tpu.memory_space<vmem>>, vector<1x64x128xf32>
    %140 = vector.shape_cast %139 : vector<1x64x128xf32> to vector<64x128xf32>
    %cst_131 = arith.constant dense<0.000000e+00> : vector<16x128xf32>
    %141 = tpu.matmul %131, %140, %cst_131 {dimension_numbers = #tpu.dot_dimension_numbers<[1], [0], [0], [1], [0, 0, 1, 1], [], []>} : vector<16x64xf32>, vector<64x128xf32>, vector<16x128xf32> -> vector<16x128xf32>
    %c2_132 = arith.constant 2 : index
    %c0_133 = arith.constant 0 : index
    %c0_134 = arith.constant 0 : index
    %142 = vector.load %arg7[%c2_132, %c0_133, %c0_134] : memref<5x64x128xf32, #tpu.memory_space<vmem>>, vector<1x64x128xf32>
    %143 = vector.shape_cast %142 : vector<1x64x128xf32> to vector<64x128xf32>
    %cst_135 = arith.constant dense<0.000000e+00> : vector<16x128xf32>
    %144 = tpu.matmul %132, %143, %cst_135 {dimension_numbers = #tpu.dot_dimension_numbers<[1], [0], [0], [1], [0, 0, 1, 1], [], []>} : vector<16x64xf32>, vector<64x128xf32>, vector<16x128xf32> -> vector<16x128xf32>
    %c3_136 = arith.constant 3 : index
    %c0_137 = arith.constant 0 : index
    %c0_138 = arith.constant 0 : index
    %145 = vector.load %arg7[%c3_136, %c0_137, %c0_138] : memref<5x64x128xf32, #tpu.memory_space<vmem>>, vector<1x64x128xf32>
    %146 = vector.shape_cast %145 : vector<1x64x128xf32> to vector<64x128xf32>
    %cst_139 = arith.constant dense<0.000000e+00> : vector<16x128xf32>
    %147 = tpu.matmul %133, %146, %cst_139 {dimension_numbers = #tpu.dot_dimension_numbers<[1], [0], [0], [1], [0, 0, 1, 1], [], []>} : vector<16x64xf32>, vector<64x128xf32>, vector<16x128xf32> -> vector<16x128xf32>
    %c4_140 = arith.constant 4 : index
    %c0_141 = arith.constant 0 : index
    %c0_142 = arith.constant 0 : index
    %148 = vector.load %arg7[%c4_140, %c0_141, %c0_142] : memref<5x64x128xf32, #tpu.memory_space<vmem>>, vector<1x64x128xf32>
    %149 = vector.shape_cast %148 : vector<1x64x128xf32> to vector<64x128xf32>
    %cst_143 = arith.constant dense<0.000000e+00> : vector<16x128xf32>
    %150 = tpu.matmul %134, %149, %cst_143 {dimension_numbers = #tpu.dot_dimension_numbers<[1], [0], [0], [1], [0, 0, 1, 1], [], []>} : vector<16x64xf32>, vector<64x128xf32>, vector<16x128xf32> -> vector<16x128xf32>
    %151 = arith.addf %138, %141 : vector<16x128xf32>
    %152 = arith.addf %144, %147 : vector<16x128xf32>
    %153 = arith.addf %151, %152 : vector<16x128xf32>
    %154 = arith.addf %153, %150 : vector<16x128xf32>
    %155 = arith.addf %135, %154 : vector<16x128xf32>
    %156 = arith.negf %155 : vector<16x128xf32>
    %157 = math.exp %156 : vector<16x128xf32>
    %cst_144 = arith.constant 1.000000e+00 : f32
    %158 = vector.broadcast %cst_144 : f32 to vector<16x128xf32>
    %159 = arith.addf %158, %157 : vector<16x128xf32>
    %160 = arith.divf %158, %159 : vector<16x128xf32>
    %161 = vector.extract_strided_slice %160 {offsets = [0, 0], sizes = [16, 64], strides = [1, 1]} : vector<16x128xf32> to vector<16x64xf32>
    %162 = vector.extract_strided_slice %160 {offsets = [0, 64], sizes = [16, 64], strides = [1, 1]} : vector<16x128xf32> to vector<16x64xf32>
    %163 = arith.mulf %161, %130 : vector<16x64xf32>
    %cst_145 = arith.constant dense<0.000000e+00> : vector<16x64xf32>
    %164 = tpu.matmul %59, %163, %cst_145 {dimension_numbers = #tpu.dot_dimension_numbers<[1], [0], [0], [1], [0, 0, 1, 1], [], []>} : vector<16x16xf32>, vector<16x64xf32>, vector<16x64xf32> -> vector<16x64xf32>
    %cst_146 = arith.constant dense<0.000000e+00> : vector<16x64xf32>
    %165 = tpu.matmul %61, %163, %cst_146 {dimension_numbers = #tpu.dot_dimension_numbers<[1], [0], [0], [1], [0, 0, 1, 1], [], []>} : vector<16x16xf32>, vector<16x64xf32>, vector<16x64xf32> -> vector<16x64xf32>
    %cst_147 = arith.constant dense<0.000000e+00> : vector<16x64xf32>
    %166 = tpu.matmul %63, %163, %cst_147 {dimension_numbers = #tpu.dot_dimension_numbers<[1], [0], [0], [1], [0, 0, 1, 1], [], []>} : vector<16x16xf32>, vector<16x64xf32>, vector<16x64xf32> -> vector<16x64xf32>
    %cst_148 = arith.constant dense<0.000000e+00> : vector<16x64xf32>
    %167 = tpu.matmul %65, %163, %cst_148 {dimension_numbers = #tpu.dot_dimension_numbers<[1], [0], [0], [1], [0, 0, 1, 1], [], []>} : vector<16x16xf32>, vector<16x64xf32>, vector<16x64xf32> -> vector<16x64xf32>
    %168 = vector.extract_strided_slice %57 {offsets = [16, 0], sizes = [16, 64], strides = [1, 1]} : vector<96x64xf32> to vector<16x64xf32>
    %c0_149 = arith.constant 0 : index
    %c0_150 = arith.constant 0 : index
    %c0_151 = arith.constant 0 : index
    %169 = vector.load %arg8[%c0_149, %c0_150, %c0_151] : memref<5x64x64xf32, #tpu.memory_space<vmem>>, vector<1x64x64xf32>
    %170 = vector.shape_cast %169 : vector<1x64x64xf32> to vector<64x64xf32>
    %cst_152 = arith.constant dense<0.000000e+00> : vector<16x64xf32>
    %171 = tpu.matmul %163, %170, %cst_152 {dimension_numbers = #tpu.dot_dimension_numbers<[1], [0], [0], [1], [0, 0, 1, 1], [], []>} : vector<16x64xf32>, vector<64x64xf32>, vector<16x64xf32> -> vector<16x64xf32>
    %c1_153 = arith.constant 1 : index
    %c0_154 = arith.constant 0 : index
    %c0_155 = arith.constant 0 : index
    %172 = vector.load %arg8[%c1_153, %c0_154, %c0_155] : memref<5x64x64xf32, #tpu.memory_space<vmem>>, vector<1x64x64xf32>
    %173 = vector.shape_cast %172 : vector<1x64x64xf32> to vector<64x64xf32>
    %cst_156 = arith.constant dense<0.000000e+00> : vector<16x64xf32>
    %174 = tpu.matmul %164, %173, %cst_156 {dimension_numbers = #tpu.dot_dimension_numbers<[1], [0], [0], [1], [0, 0, 1, 1], [], []>} : vector<16x64xf32>, vector<64x64xf32>, vector<16x64xf32> -> vector<16x64xf32>
    %c2_157 = arith.constant 2 : index
    %c0_158 = arith.constant 0 : index
    %c0_159 = arith.constant 0 : index
    %175 = vector.load %arg8[%c2_157, %c0_158, %c0_159] : memref<5x64x64xf32, #tpu.memory_space<vmem>>, vector<1x64x64xf32>
    %176 = vector.shape_cast %175 : vector<1x64x64xf32> to vector<64x64xf32>
    %cst_160 = arith.constant dense<0.000000e+00> : vector<16x64xf32>
    %177 = tpu.matmul %165, %176, %cst_160 {dimension_numbers = #tpu.dot_dimension_numbers<[1], [0], [0], [1], [0, 0, 1, 1], [], []>} : vector<16x64xf32>, vector<64x64xf32>, vector<16x64xf32> -> vector<16x64xf32>
    %c3_161 = arith.constant 3 : index
    %c0_162 = arith.constant 0 : index
    %c0_163 = arith.constant 0 : index
    %178 = vector.load %arg8[%c3_161, %c0_162, %c0_163] : memref<5x64x64xf32, #tpu.memory_space<vmem>>, vector<1x64x64xf32>
    %179 = vector.shape_cast %178 : vector<1x64x64xf32> to vector<64x64xf32>
    %cst_164 = arith.constant dense<0.000000e+00> : vector<16x64xf32>
    %180 = tpu.matmul %166, %179, %cst_164 {dimension_numbers = #tpu.dot_dimension_numbers<[1], [0], [0], [1], [0, 0, 1, 1], [], []>} : vector<16x64xf32>, vector<64x64xf32>, vector<16x64xf32> -> vector<16x64xf32>
    %c4_165 = arith.constant 4 : index
    %c0_166 = arith.constant 0 : index
    %c0_167 = arith.constant 0 : index
    %181 = vector.load %arg8[%c4_165, %c0_166, %c0_167] : memref<5x64x64xf32, #tpu.memory_space<vmem>>, vector<1x64x64xf32>
    %182 = vector.shape_cast %181 : vector<1x64x64xf32> to vector<64x64xf32>
    %cst_168 = arith.constant dense<0.000000e+00> : vector<16x64xf32>
    %183 = tpu.matmul %167, %182, %cst_168 {dimension_numbers = #tpu.dot_dimension_numbers<[1], [0], [0], [1], [0, 0, 1, 1], [], []>} : vector<16x64xf32>, vector<64x64xf32>, vector<16x64xf32> -> vector<16x64xf32>
    %184 = arith.addf %171, %174 : vector<16x64xf32>
    %185 = arith.addf %177, %180 : vector<16x64xf32>
    %186 = arith.addf %184, %185 : vector<16x64xf32>
    %187 = arith.addf %186, %183 : vector<16x64xf32>
    %188 = arith.addf %168, %187 : vector<16x64xf32>
    %189 = math.tanh %188 : vector<16x64xf32>
    %190 = arith.mulf %162, %130 : vector<16x64xf32>
    %cst_169 = arith.constant 1.000000e+00 : f32
    %191 = vector.broadcast %cst_169 : f32 to vector<16x64xf32>
    %192 = arith.subf %191, %162 : vector<16x64xf32>
    %193 = arith.mulf %192, %189 : vector<16x64xf32>
    %194 = arith.addf %190, %193 : vector<16x64xf32>
    %cst_170 = arith.constant dense<0.000000e+00> : vector<16x64xf32>
    %195 = tpu.matmul %59, %194, %cst_170 {dimension_numbers = #tpu.dot_dimension_numbers<[1], [0], [0], [1], [0, 0, 1, 1], [], []>} : vector<16x16xf32>, vector<16x64xf32>, vector<16x64xf32> -> vector<16x64xf32>
    %cst_171 = arith.constant dense<0.000000e+00> : vector<16x64xf32>
    %196 = tpu.matmul %61, %194, %cst_171 {dimension_numbers = #tpu.dot_dimension_numbers<[1], [0], [0], [1], [0, 0, 1, 1], [], []>} : vector<16x16xf32>, vector<16x64xf32>, vector<16x64xf32> -> vector<16x64xf32>
    %cst_172 = arith.constant dense<0.000000e+00> : vector<16x64xf32>
    %197 = tpu.matmul %63, %194, %cst_172 {dimension_numbers = #tpu.dot_dimension_numbers<[1], [0], [0], [1], [0, 0, 1, 1], [], []>} : vector<16x16xf32>, vector<16x64xf32>, vector<16x64xf32> -> vector<16x64xf32>
    %cst_173 = arith.constant dense<0.000000e+00> : vector<16x64xf32>
    %198 = tpu.matmul %65, %194, %cst_173 {dimension_numbers = #tpu.dot_dimension_numbers<[1], [0], [0], [1], [0, 0, 1, 1], [], []>} : vector<16x16xf32>, vector<16x64xf32>, vector<16x64xf32> -> vector<16x64xf32>
    %199 = vector.extract_strided_slice %35 {offsets = [32, 0], sizes = [16, 128], strides = [1, 1]} : vector<96x128xf32> to vector<16x128xf32>
    %c0_174 = arith.constant 0 : index
    %c0_175 = arith.constant 0 : index
    %c0_176 = arith.constant 0 : index
    %200 = vector.load %arg7[%c0_174, %c0_175, %c0_176] : memref<5x64x128xf32, #tpu.memory_space<vmem>>, vector<1x64x128xf32>
    %201 = vector.shape_cast %200 : vector<1x64x128xf32> to vector<64x128xf32>
    %cst_177 = arith.constant dense<0.000000e+00> : vector<16x128xf32>
    %202 = tpu.matmul %194, %201, %cst_177 {dimension_numbers = #tpu.dot_dimension_numbers<[1], [0], [0], [1], [0, 0, 1, 1], [], []>} : vector<16x64xf32>, vector<64x128xf32>, vector<16x128xf32> -> vector<16x128xf32>
    %c1_178 = arith.constant 1 : index
    %c0_179 = arith.constant 0 : index
    %c0_180 = arith.constant 0 : index
    %203 = vector.load %arg7[%c1_178, %c0_179, %c0_180] : memref<5x64x128xf32, #tpu.memory_space<vmem>>, vector<1x64x128xf32>
    %204 = vector.shape_cast %203 : vector<1x64x128xf32> to vector<64x128xf32>
    %cst_181 = arith.constant dense<0.000000e+00> : vector<16x128xf32>
    %205 = tpu.matmul %195, %204, %cst_181 {dimension_numbers = #tpu.dot_dimension_numbers<[1], [0], [0], [1], [0, 0, 1, 1], [], []>} : vector<16x64xf32>, vector<64x128xf32>, vector<16x128xf32> -> vector<16x128xf32>
    %c2_182 = arith.constant 2 : index
    %c0_183 = arith.constant 0 : index
    %c0_184 = arith.constant 0 : index
    %206 = vector.load %arg7[%c2_182, %c0_183, %c0_184] : memref<5x64x128xf32, #tpu.memory_space<vmem>>, vector<1x64x128xf32>
    %207 = vector.shape_cast %206 : vector<1x64x128xf32> to vector<64x128xf32>
    %cst_185 = arith.constant dense<0.000000e+00> : vector<16x128xf32>
    %208 = tpu.matmul %196, %207, %cst_185 {dimension_numbers = #tpu.dot_dimension_numbers<[1], [0], [0], [1], [0, 0, 1, 1], [], []>} : vector<16x64xf32>, vector<64x128xf32>, vector<16x128xf32> -> vector<16x128xf32>
    %c3_186 = arith.constant 3 : index
    %c0_187 = arith.constant 0 : index
    %c0_188 = arith.constant 0 : index
    %209 = vector.load %arg7[%c3_186, %c0_187, %c0_188] : memref<5x64x128xf32, #tpu.memory_space<vmem>>, vector<1x64x128xf32>
    %210 = vector.shape_cast %209 : vector<1x64x128xf32> to vector<64x128xf32>
    %cst_189 = arith.constant dense<0.000000e+00> : vector<16x128xf32>
    %211 = tpu.matmul %197, %210, %cst_189 {dimension_numbers = #tpu.dot_dimension_numbers<[1], [0], [0], [1], [0, 0, 1, 1], [], []>} : vector<16x64xf32>, vector<64x128xf32>, vector<16x128xf32> -> vector<16x128xf32>
    %c4_190 = arith.constant 4 : index
    %c0_191 = arith.constant 0 : index
    %c0_192 = arith.constant 0 : index
    %212 = vector.load %arg7[%c4_190, %c0_191, %c0_192] : memref<5x64x128xf32, #tpu.memory_space<vmem>>, vector<1x64x128xf32>
    %213 = vector.shape_cast %212 : vector<1x64x128xf32> to vector<64x128xf32>
    %cst_193 = arith.constant dense<0.000000e+00> : vector<16x128xf32>
    %214 = tpu.matmul %198, %213, %cst_193 {dimension_numbers = #tpu.dot_dimension_numbers<[1], [0], [0], [1], [0, 0, 1, 1], [], []>} : vector<16x64xf32>, vector<64x128xf32>, vector<16x128xf32> -> vector<16x128xf32>
    %215 = arith.addf %202, %205 : vector<16x128xf32>
    %216 = arith.addf %208, %211 : vector<16x128xf32>
    %217 = arith.addf %215, %216 : vector<16x128xf32>
    %218 = arith.addf %217, %214 : vector<16x128xf32>
    %219 = arith.addf %199, %218 : vector<16x128xf32>
    %220 = arith.negf %219 : vector<16x128xf32>
    %221 = math.exp %220 : vector<16x128xf32>
    %cst_194 = arith.constant 1.000000e+00 : f32
    %222 = vector.broadcast %cst_194 : f32 to vector<16x128xf32>
    %223 = arith.addf %222, %221 : vector<16x128xf32>
    %224 = arith.divf %222, %223 : vector<16x128xf32>
    %225 = vector.extract_strided_slice %224 {offsets = [0, 0], sizes = [16, 64], strides = [1, 1]} : vector<16x128xf32> to vector<16x64xf32>
    %226 = vector.extract_strided_slice %224 {offsets = [0, 64], sizes = [16, 64], strides = [1, 1]} : vector<16x128xf32> to vector<16x64xf32>
    %227 = arith.mulf %225, %194 : vector<16x64xf32>
    %cst_195 = arith.constant dense<0.000000e+00> : vector<16x64xf32>
    %228 = tpu.matmul %59, %227, %cst_195 {dimension_numbers = #tpu.dot_dimension_numbers<[1], [0], [0], [1], [0, 0, 1, 1], [], []>} : vector<16x16xf32>, vector<16x64xf32>, vector<16x64xf32> -> vector<16x64xf32>
    %cst_196 = arith.constant dense<0.000000e+00> : vector<16x64xf32>
    %229 = tpu.matmul %61, %227, %cst_196 {dimension_numbers = #tpu.dot_dimension_numbers<[1], [0], [0], [1], [0, 0, 1, 1], [], []>} : vector<16x16xf32>, vector<16x64xf32>, vector<16x64xf32> -> vector<16x64xf32>
    %cst_197 = arith.constant dense<0.000000e+00> : vector<16x64xf32>
    %230 = tpu.matmul %63, %227, %cst_197 {dimension_numbers = #tpu.dot_dimension_numbers<[1], [0], [0], [1], [0, 0, 1, 1], [], []>} : vector<16x16xf32>, vector<16x64xf32>, vector<16x64xf32> -> vector<16x64xf32>
    %cst_198 = arith.constant dense<0.000000e+00> : vector<16x64xf32>
    %231 = tpu.matmul %65, %227, %cst_198 {dimension_numbers = #tpu.dot_dimension_numbers<[1], [0], [0], [1], [0, 0, 1, 1], [], []>} : vector<16x16xf32>, vector<16x64xf32>, vector<16x64xf32> -> vector<16x64xf32>
    %232 = vector.extract_strided_slice %57 {offsets = [32, 0], sizes = [16, 64], strides = [1, 1]} : vector<96x64xf32> to vector<16x64xf32>
    %c0_199 = arith.constant 0 : index
    %c0_200 = arith.constant 0 : index
    %c0_201 = arith.constant 0 : index
    %233 = vector.load %arg8[%c0_199, %c0_200, %c0_201] : memref<5x64x64xf32, #tpu.memory_space<vmem>>, vector<1x64x64xf32>
    %234 = vector.shape_cast %233 : vector<1x64x64xf32> to vector<64x64xf32>
    %cst_202 = arith.constant dense<0.000000e+00> : vector<16x64xf32>
    %235 = tpu.matmul %227, %234, %cst_202 {dimension_numbers = #tpu.dot_dimension_numbers<[1], [0], [0], [1], [0, 0, 1, 1], [], []>} : vector<16x64xf32>, vector<64x64xf32>, vector<16x64xf32> -> vector<16x64xf32>
    %c1_203 = arith.constant 1 : index
    %c0_204 = arith.constant 0 : index
    %c0_205 = arith.constant 0 : index
    %236 = vector.load %arg8[%c1_203, %c0_204, %c0_205] : memref<5x64x64xf32, #tpu.memory_space<vmem>>, vector<1x64x64xf32>
    %237 = vector.shape_cast %236 : vector<1x64x64xf32> to vector<64x64xf32>
    %cst_206 = arith.constant dense<0.000000e+00> : vector<16x64xf32>
    %238 = tpu.matmul %228, %237, %cst_206 {dimension_numbers = #tpu.dot_dimension_numbers<[1], [0], [0], [1], [0, 0, 1, 1], [], []>} : vector<16x64xf32>, vector<64x64xf32>, vector<16x64xf32> -> vector<16x64xf32>
    %c2_207 = arith.constant 2 : index
    %c0_208 = arith.constant 0 : index
    %c0_209 = arith.constant 0 : index
    %239 = vector.load %arg8[%c2_207, %c0_208, %c0_209] : memref<5x64x64xf32, #tpu.memory_space<vmem>>, vector<1x64x64xf32>
    %240 = vector.shape_cast %239 : vector<1x64x64xf32> to vector<64x64xf32>
    %cst_210 = arith.constant dense<0.000000e+00> : vector<16x64xf32>
    %241 = tpu.matmul %229, %240, %cst_210 {dimension_numbers = #tpu.dot_dimension_numbers<[1], [0], [0], [1], [0, 0, 1, 1], [], []>} : vector<16x64xf32>, vector<64x64xf32>, vector<16x64xf32> -> vector<16x64xf32>
    %c3_211 = arith.constant 3 : index
    %c0_212 = arith.constant 0 : index
    %c0_213 = arith.constant 0 : index
    %242 = vector.load %arg8[%c3_211, %c0_212, %c0_213] : memref<5x64x64xf32, #tpu.memory_space<vmem>>, vector<1x64x64xf32>
    %243 = vector.shape_cast %242 : vector<1x64x64xf32> to vector<64x64xf32>
    %cst_214 = arith.constant dense<0.000000e+00> : vector<16x64xf32>
    %244 = tpu.matmul %230, %243, %cst_214 {dimension_numbers = #tpu.dot_dimension_numbers<[1], [0], [0], [1], [0, 0, 1, 1], [], []>} : vector<16x64xf32>, vector<64x64xf32>, vector<16x64xf32> -> vector<16x64xf32>
    %c4_215 = arith.constant 4 : index
    %c0_216 = arith.constant 0 : index
    %c0_217 = arith.constant 0 : index
    %245 = vector.load %arg8[%c4_215, %c0_216, %c0_217] : memref<5x64x64xf32, #tpu.memory_space<vmem>>, vector<1x64x64xf32>
    %246 = vector.shape_cast %245 : vector<1x64x64xf32> to vector<64x64xf32>
    %cst_218 = arith.constant dense<0.000000e+00> : vector<16x64xf32>
    %247 = tpu.matmul %231, %246, %cst_218 {dimension_numbers = #tpu.dot_dimension_numbers<[1], [0], [0], [1], [0, 0, 1, 1], [], []>} : vector<16x64xf32>, vector<64x64xf32>, vector<16x64xf32> -> vector<16x64xf32>
    %248 = arith.addf %235, %238 : vector<16x64xf32>
    %249 = arith.addf %241, %244 : vector<16x64xf32>
    %250 = arith.addf %248, %249 : vector<16x64xf32>
    %251 = arith.addf %250, %247 : vector<16x64xf32>
    %252 = arith.addf %232, %251 : vector<16x64xf32>
    %253 = math.tanh %252 : vector<16x64xf32>
    %254 = arith.mulf %226, %194 : vector<16x64xf32>
    %cst_219 = arith.constant 1.000000e+00 : f32
    %255 = vector.broadcast %cst_219 : f32 to vector<16x64xf32>
    %256 = arith.subf %255, %226 : vector<16x64xf32>
    %257 = arith.mulf %256, %253 : vector<16x64xf32>
    %258 = arith.addf %254, %257 : vector<16x64xf32>
    %cst_220 = arith.constant dense<0.000000e+00> : vector<16x64xf32>
    %259 = tpu.matmul %59, %258, %cst_220 {dimension_numbers = #tpu.dot_dimension_numbers<[1], [0], [0], [1], [0, 0, 1, 1], [], []>} : vector<16x16xf32>, vector<16x64xf32>, vector<16x64xf32> -> vector<16x64xf32>
    %cst_221 = arith.constant dense<0.000000e+00> : vector<16x64xf32>
    %260 = tpu.matmul %61, %258, %cst_221 {dimension_numbers = #tpu.dot_dimension_numbers<[1], [0], [0], [1], [0, 0, 1, 1], [], []>} : vector<16x16xf32>, vector<16x64xf32>, vector<16x64xf32> -> vector<16x64xf32>
    %cst_222 = arith.constant dense<0.000000e+00> : vector<16x64xf32>
    %261 = tpu.matmul %63, %258, %cst_222 {dimension_numbers = #tpu.dot_dimension_numbers<[1], [0], [0], [1], [0, 0, 1, 1], [], []>} : vector<16x16xf32>, vector<16x64xf32>, vector<16x64xf32> -> vector<16x64xf32>
    %cst_223 = arith.constant dense<0.000000e+00> : vector<16x64xf32>
    %262 = tpu.matmul %65, %258, %cst_223 {dimension_numbers = #tpu.dot_dimension_numbers<[1], [0], [0], [1], [0, 0, 1, 1], [], []>} : vector<16x16xf32>, vector<16x64xf32>, vector<16x64xf32> -> vector<16x64xf32>
    %263 = vector.extract_strided_slice %35 {offsets = [48, 0], sizes = [16, 128], strides = [1, 1]} : vector<96x128xf32> to vector<16x128xf32>
    %c0_224 = arith.constant 0 : index
    %c0_225 = arith.constant 0 : index
    %c0_226 = arith.constant 0 : index
    %264 = vector.load %arg7[%c0_224, %c0_225, %c0_226] : memref<5x64x128xf32, #tpu.memory_space<vmem>>, vector<1x64x128xf32>
    %265 = vector.shape_cast %264 : vector<1x64x128xf32> to vector<64x128xf32>
    %cst_227 = arith.constant dense<0.000000e+00> : vector<16x128xf32>
    %266 = tpu.matmul %258, %265, %cst_227 {dimension_numbers = #tpu.dot_dimension_numbers<[1], [0], [0], [1], [0, 0, 1, 1], [], []>} : vector<16x64xf32>, vector<64x128xf32>, vector<16x128xf32> -> vector<16x128xf32>
    %c1_228 = arith.constant 1 : index
    %c0_229 = arith.constant 0 : index
    %c0_230 = arith.constant 0 : index
    %267 = vector.load %arg7[%c1_228, %c0_229, %c0_230] : memref<5x64x128xf32, #tpu.memory_space<vmem>>, vector<1x64x128xf32>
    %268 = vector.shape_cast %267 : vector<1x64x128xf32> to vector<64x128xf32>
    %cst_231 = arith.constant dense<0.000000e+00> : vector<16x128xf32>
    %269 = tpu.matmul %259, %268, %cst_231 {dimension_numbers = #tpu.dot_dimension_numbers<[1], [0], [0], [1], [0, 0, 1, 1], [], []>} : vector<16x64xf32>, vector<64x128xf32>, vector<16x128xf32> -> vector<16x128xf32>
    %c2_232 = arith.constant 2 : index
    %c0_233 = arith.constant 0 : index
    %c0_234 = arith.constant 0 : index
    %270 = vector.load %arg7[%c2_232, %c0_233, %c0_234] : memref<5x64x128xf32, #tpu.memory_space<vmem>>, vector<1x64x128xf32>
    %271 = vector.shape_cast %270 : vector<1x64x128xf32> to vector<64x128xf32>
    %cst_235 = arith.constant dense<0.000000e+00> : vector<16x128xf32>
    %272 = tpu.matmul %260, %271, %cst_235 {dimension_numbers = #tpu.dot_dimension_numbers<[1], [0], [0], [1], [0, 0, 1, 1], [], []>} : vector<16x64xf32>, vector<64x128xf32>, vector<16x128xf32> -> vector<16x128xf32>
    %c3_236 = arith.constant 3 : index
    %c0_237 = arith.constant 0 : index
    %c0_238 = arith.constant 0 : index
    %273 = vector.load %arg7[%c3_236, %c0_237, %c0_238] : memref<5x64x128xf32, #tpu.memory_space<vmem>>, vector<1x64x128xf32>
    %274 = vector.shape_cast %273 : vector<1x64x128xf32> to vector<64x128xf32>
    %cst_239 = arith.constant dense<0.000000e+00> : vector<16x128xf32>
    %275 = tpu.matmul %261, %274, %cst_239 {dimension_numbers = #tpu.dot_dimension_numbers<[1], [0], [0], [1], [0, 0, 1, 1], [], []>} : vector<16x64xf32>, vector<64x128xf32>, vector<16x128xf32> -> vector<16x128xf32>
    %c4_240 = arith.constant 4 : index
    %c0_241 = arith.constant 0 : index
    %c0_242 = arith.constant 0 : index
    %276 = vector.load %arg7[%c4_240, %c0_241, %c0_242] : memref<5x64x128xf32, #tpu.memory_space<vmem>>, vector<1x64x128xf32>
    %277 = vector.shape_cast %276 : vector<1x64x128xf32> to vector<64x128xf32>
    %cst_243 = arith.constant dense<0.000000e+00> : vector<16x128xf32>
    %278 = tpu.matmul %262, %277, %cst_243 {dimension_numbers = #tpu.dot_dimension_numbers<[1], [0], [0], [1], [0, 0, 1, 1], [], []>} : vector<16x64xf32>, vector<64x128xf32>, vector<16x128xf32> -> vector<16x128xf32>
    %279 = arith.addf %266, %269 : vector<16x128xf32>
    %280 = arith.addf %272, %275 : vector<16x128xf32>
    %281 = arith.addf %279, %280 : vector<16x128xf32>
    %282 = arith.addf %281, %278 : vector<16x128xf32>
    %283 = arith.addf %263, %282 : vector<16x128xf32>
    %284 = arith.negf %283 : vector<16x128xf32>
    %285 = math.exp %284 : vector<16x128xf32>
    %cst_244 = arith.constant 1.000000e+00 : f32
    %286 = vector.broadcast %cst_244 : f32 to vector<16x128xf32>
    %287 = arith.addf %286, %285 : vector<16x128xf32>
    %288 = arith.divf %286, %287 : vector<16x128xf32>
    %289 = vector.extract_strided_slice %288 {offsets = [0, 0], sizes = [16, 64], strides = [1, 1]} : vector<16x128xf32> to vector<16x64xf32>
    %290 = vector.extract_strided_slice %288 {offsets = [0, 64], sizes = [16, 64], strides = [1, 1]} : vector<16x128xf32> to vector<16x64xf32>
    %291 = arith.mulf %289, %258 : vector<16x64xf32>
    %cst_245 = arith.constant dense<0.000000e+00> : vector<16x64xf32>
    %292 = tpu.matmul %59, %291, %cst_245 {dimension_numbers = #tpu.dot_dimension_numbers<[1], [0], [0], [1], [0, 0, 1, 1], [], []>} : vector<16x16xf32>, vector<16x64xf32>, vector<16x64xf32> -> vector<16x64xf32>
    %cst_246 = arith.constant dense<0.000000e+00> : vector<16x64xf32>
    %293 = tpu.matmul %61, %291, %cst_246 {dimension_numbers = #tpu.dot_dimension_numbers<[1], [0], [0], [1], [0, 0, 1, 1], [], []>} : vector<16x16xf32>, vector<16x64xf32>, vector<16x64xf32> -> vector<16x64xf32>
    %cst_247 = arith.constant dense<0.000000e+00> : vector<16x64xf32>
    %294 = tpu.matmul %63, %291, %cst_247 {dimension_numbers = #tpu.dot_dimension_numbers<[1], [0], [0], [1], [0, 0, 1, 1], [], []>} : vector<16x16xf32>, vector<16x64xf32>, vector<16x64xf32> -> vector<16x64xf32>
    %cst_248 = arith.constant dense<0.000000e+00> : vector<16x64xf32>
    %295 = tpu.matmul %65, %291, %cst_248 {dimension_numbers = #tpu.dot_dimension_numbers<[1], [0], [0], [1], [0, 0, 1, 1], [], []>} : vector<16x16xf32>, vector<16x64xf32>, vector<16x64xf32> -> vector<16x64xf32>
    %296 = vector.extract_strided_slice %57 {offsets = [48, 0], sizes = [16, 64], strides = [1, 1]} : vector<96x64xf32> to vector<16x64xf32>
    %c0_249 = arith.constant 0 : index
    %c0_250 = arith.constant 0 : index
    %c0_251 = arith.constant 0 : index
    %297 = vector.load %arg8[%c0_249, %c0_250, %c0_251] : memref<5x64x64xf32, #tpu.memory_space<vmem>>, vector<1x64x64xf32>
    %298 = vector.shape_cast %297 : vector<1x64x64xf32> to vector<64x64xf32>
    %cst_252 = arith.constant dense<0.000000e+00> : vector<16x64xf32>
    %299 = tpu.matmul %291, %298, %cst_252 {dimension_numbers = #tpu.dot_dimension_numbers<[1], [0], [0], [1], [0, 0, 1, 1], [], []>} : vector<16x64xf32>, vector<64x64xf32>, vector<16x64xf32> -> vector<16x64xf32>
    %c1_253 = arith.constant 1 : index
    %c0_254 = arith.constant 0 : index
    %c0_255 = arith.constant 0 : index
    %300 = vector.load %arg8[%c1_253, %c0_254, %c0_255] : memref<5x64x64xf32, #tpu.memory_space<vmem>>, vector<1x64x64xf32>
    %301 = vector.shape_cast %300 : vector<1x64x64xf32> to vector<64x64xf32>
    %cst_256 = arith.constant dense<0.000000e+00> : vector<16x64xf32>
    %302 = tpu.matmul %292, %301, %cst_256 {dimension_numbers = #tpu.dot_dimension_numbers<[1], [0], [0], [1], [0, 0, 1, 1], [], []>} : vector<16x64xf32>, vector<64x64xf32>, vector<16x64xf32> -> vector<16x64xf32>
    %c2_257 = arith.constant 2 : index
    %c0_258 = arith.constant 0 : index
    %c0_259 = arith.constant 0 : index
    %303 = vector.load %arg8[%c2_257, %c0_258, %c0_259] : memref<5x64x64xf32, #tpu.memory_space<vmem>>, vector<1x64x64xf32>
    %304 = vector.shape_cast %303 : vector<1x64x64xf32> to vector<64x64xf32>
    %cst_260 = arith.constant dense<0.000000e+00> : vector<16x64xf32>
    %305 = tpu.matmul %293, %304, %cst_260 {dimension_numbers = #tpu.dot_dimension_numbers<[1], [0], [0], [1], [0, 0, 1, 1], [], []>} : vector<16x64xf32>, vector<64x64xf32>, vector<16x64xf32> -> vector<16x64xf32>
    %c3_261 = arith.constant 3 : index
    %c0_262 = arith.constant 0 : index
    %c0_263 = arith.constant 0 : index
    %306 = vector.load %arg8[%c3_261, %c0_262, %c0_263] : memref<5x64x64xf32, #tpu.memory_space<vmem>>, vector<1x64x64xf32>
    %307 = vector.shape_cast %306 : vector<1x64x64xf32> to vector<64x64xf32>
    %cst_264 = arith.constant dense<0.000000e+00> : vector<16x64xf32>
    %308 = tpu.matmul %294, %307, %cst_264 {dimension_numbers = #tpu.dot_dimension_numbers<[1], [0], [0], [1], [0, 0, 1, 1], [], []>} : vector<16x64xf32>, vector<64x64xf32>, vector<16x64xf32> -> vector<16x64xf32>
    %c4_265 = arith.constant 4 : index
    %c0_266 = arith.constant 0 : index
    %c0_267 = arith.constant 0 : index
    %309 = vector.load %arg8[%c4_265, %c0_266, %c0_267] : memref<5x64x64xf32, #tpu.memory_space<vmem>>, vector<1x64x64xf32>
    %310 = vector.shape_cast %309 : vector<1x64x64xf32> to vector<64x64xf32>
    %cst_268 = arith.constant dense<0.000000e+00> : vector<16x64xf32>
    %311 = tpu.matmul %295, %310, %cst_268 {dimension_numbers = #tpu.dot_dimension_numbers<[1], [0], [0], [1], [0, 0, 1, 1], [], []>} : vector<16x64xf32>, vector<64x64xf32>, vector<16x64xf32> -> vector<16x64xf32>
    %312 = arith.addf %299, %302 : vector<16x64xf32>
    %313 = arith.addf %305, %308 : vector<16x64xf32>
    %314 = arith.addf %312, %313 : vector<16x64xf32>
    %315 = arith.addf %314, %311 : vector<16x64xf32>
    %316 = arith.addf %296, %315 : vector<16x64xf32>
    %317 = math.tanh %316 : vector<16x64xf32>
    %318 = arith.mulf %290, %258 : vector<16x64xf32>
    %cst_269 = arith.constant 1.000000e+00 : f32
    %319 = vector.broadcast %cst_269 : f32 to vector<16x64xf32>
    %320 = arith.subf %319, %290 : vector<16x64xf32>
    %321 = arith.mulf %320, %317 : vector<16x64xf32>
    %322 = arith.addf %318, %321 : vector<16x64xf32>
    %cst_270 = arith.constant dense<0.000000e+00> : vector<16x64xf32>
    %323 = tpu.matmul %59, %322, %cst_270 {dimension_numbers = #tpu.dot_dimension_numbers<[1], [0], [0], [1], [0, 0, 1, 1], [], []>} : vector<16x16xf32>, vector<16x64xf32>, vector<16x64xf32> -> vector<16x64xf32>
    %cst_271 = arith.constant dense<0.000000e+00> : vector<16x64xf32>
    %324 = tpu.matmul %61, %322, %cst_271 {dimension_numbers = #tpu.dot_dimension_numbers<[1], [0], [0], [1], [0, 0, 1, 1], [], []>} : vector<16x16xf32>, vector<16x64xf32>, vector<16x64xf32> -> vector<16x64xf32>
    %cst_272 = arith.constant dense<0.000000e+00> : vector<16x64xf32>
    %325 = tpu.matmul %63, %322, %cst_272 {dimension_numbers = #tpu.dot_dimension_numbers<[1], [0], [0], [1], [0, 0, 1, 1], [], []>} : vector<16x16xf32>, vector<16x64xf32>, vector<16x64xf32> -> vector<16x64xf32>
    %cst_273 = arith.constant dense<0.000000e+00> : vector<16x64xf32>
    %326 = tpu.matmul %65, %322, %cst_273 {dimension_numbers = #tpu.dot_dimension_numbers<[1], [0], [0], [1], [0, 0, 1, 1], [], []>} : vector<16x16xf32>, vector<16x64xf32>, vector<16x64xf32> -> vector<16x64xf32>
    %327 = vector.extract_strided_slice %35 {offsets = [64, 0], sizes = [16, 128], strides = [1, 1]} : vector<96x128xf32> to vector<16x128xf32>
    %c0_274 = arith.constant 0 : index
    %c0_275 = arith.constant 0 : index
    %c0_276 = arith.constant 0 : index
    %328 = vector.load %arg7[%c0_274, %c0_275, %c0_276] : memref<5x64x128xf32, #tpu.memory_space<vmem>>, vector<1x64x128xf32>
    %329 = vector.shape_cast %328 : vector<1x64x128xf32> to vector<64x128xf32>
    %cst_277 = arith.constant dense<0.000000e+00> : vector<16x128xf32>
    %330 = tpu.matmul %322, %329, %cst_277 {dimension_numbers = #tpu.dot_dimension_numbers<[1], [0], [0], [1], [0, 0, 1, 1], [], []>} : vector<16x64xf32>, vector<64x128xf32>, vector<16x128xf32> -> vector<16x128xf32>
    %c1_278 = arith.constant 1 : index
    %c0_279 = arith.constant 0 : index
    %c0_280 = arith.constant 0 : index
    %331 = vector.load %arg7[%c1_278, %c0_279, %c0_280] : memref<5x64x128xf32, #tpu.memory_space<vmem>>, vector<1x64x128xf32>
    %332 = vector.shape_cast %331 : vector<1x64x128xf32> to vector<64x128xf32>
    %cst_281 = arith.constant dense<0.000000e+00> : vector<16x128xf32>
    %333 = tpu.matmul %323, %332, %cst_281 {dimension_numbers = #tpu.dot_dimension_numbers<[1], [0], [0], [1], [0, 0, 1, 1], [], []>} : vector<16x64xf32>, vector<64x128xf32>, vector<16x128xf32> -> vector<16x128xf32>
    %c2_282 = arith.constant 2 : index
    %c0_283 = arith.constant 0 : index
    %c0_284 = arith.constant 0 : index
    %334 = vector.load %arg7[%c2_282, %c0_283, %c0_284] : memref<5x64x128xf32, #tpu.memory_space<vmem>>, vector<1x64x128xf32>
    %335 = vector.shape_cast %334 : vector<1x64x128xf32> to vector<64x128xf32>
    %cst_285 = arith.constant dense<0.000000e+00> : vector<16x128xf32>
    %336 = tpu.matmul %324, %335, %cst_285 {dimension_numbers = #tpu.dot_dimension_numbers<[1], [0], [0], [1], [0, 0, 1, 1], [], []>} : vector<16x64xf32>, vector<64x128xf32>, vector<16x128xf32> -> vector<16x128xf32>
    %c3_286 = arith.constant 3 : index
    %c0_287 = arith.constant 0 : index
    %c0_288 = arith.constant 0 : index
    %337 = vector.load %arg7[%c3_286, %c0_287, %c0_288] : memref<5x64x128xf32, #tpu.memory_space<vmem>>, vector<1x64x128xf32>
    %338 = vector.shape_cast %337 : vector<1x64x128xf32> to vector<64x128xf32>
    %cst_289 = arith.constant dense<0.000000e+00> : vector<16x128xf32>
    %339 = tpu.matmul %325, %338, %cst_289 {dimension_numbers = #tpu.dot_dimension_numbers<[1], [0], [0], [1], [0, 0, 1, 1], [], []>} : vector<16x64xf32>, vector<64x128xf32>, vector<16x128xf32> -> vector<16x128xf32>
    %c4_290 = arith.constant 4 : index
    %c0_291 = arith.constant 0 : index
    %c0_292 = arith.constant 0 : index
    %340 = vector.load %arg7[%c4_290, %c0_291, %c0_292] : memref<5x64x128xf32, #tpu.memory_space<vmem>>, vector<1x64x128xf32>
    %341 = vector.shape_cast %340 : vector<1x64x128xf32> to vector<64x128xf32>
    %cst_293 = arith.constant dense<0.000000e+00> : vector<16x128xf32>
    %342 = tpu.matmul %326, %341, %cst_293 {dimension_numbers = #tpu.dot_dimension_numbers<[1], [0], [0], [1], [0, 0, 1, 1], [], []>} : vector<16x64xf32>, vector<64x128xf32>, vector<16x128xf32> -> vector<16x128xf32>
    %343 = arith.addf %330, %333 : vector<16x128xf32>
    %344 = arith.addf %336, %339 : vector<16x128xf32>
    %345 = arith.addf %343, %344 : vector<16x128xf32>
    %346 = arith.addf %345, %342 : vector<16x128xf32>
    %347 = arith.addf %327, %346 : vector<16x128xf32>
    %348 = arith.negf %347 : vector<16x128xf32>
    %349 = math.exp %348 : vector<16x128xf32>
    %cst_294 = arith.constant 1.000000e+00 : f32
    %350 = vector.broadcast %cst_294 : f32 to vector<16x128xf32>
    %351 = arith.addf %350, %349 : vector<16x128xf32>
    %352 = arith.divf %350, %351 : vector<16x128xf32>
    %353 = vector.extract_strided_slice %352 {offsets = [0, 0], sizes = [16, 64], strides = [1, 1]} : vector<16x128xf32> to vector<16x64xf32>
    %354 = vector.extract_strided_slice %352 {offsets = [0, 64], sizes = [16, 64], strides = [1, 1]} : vector<16x128xf32> to vector<16x64xf32>
    %355 = arith.mulf %353, %322 : vector<16x64xf32>
    %cst_295 = arith.constant dense<0.000000e+00> : vector<16x64xf32>
    %356 = tpu.matmul %59, %355, %cst_295 {dimension_numbers = #tpu.dot_dimension_numbers<[1], [0], [0], [1], [0, 0, 1, 1], [], []>} : vector<16x16xf32>, vector<16x64xf32>, vector<16x64xf32> -> vector<16x64xf32>
    %cst_296 = arith.constant dense<0.000000e+00> : vector<16x64xf32>
    %357 = tpu.matmul %61, %355, %cst_296 {dimension_numbers = #tpu.dot_dimension_numbers<[1], [0], [0], [1], [0, 0, 1, 1], [], []>} : vector<16x16xf32>, vector<16x64xf32>, vector<16x64xf32> -> vector<16x64xf32>
    %cst_297 = arith.constant dense<0.000000e+00> : vector<16x64xf32>
    %358 = tpu.matmul %63, %355, %cst_297 {dimension_numbers = #tpu.dot_dimension_numbers<[1], [0], [0], [1], [0, 0, 1, 1], [], []>} : vector<16x16xf32>, vector<16x64xf32>, vector<16x64xf32> -> vector<16x64xf32>
    %cst_298 = arith.constant dense<0.000000e+00> : vector<16x64xf32>
    %359 = tpu.matmul %65, %355, %cst_298 {dimension_numbers = #tpu.dot_dimension_numbers<[1], [0], [0], [1], [0, 0, 1, 1], [], []>} : vector<16x16xf32>, vector<16x64xf32>, vector<16x64xf32> -> vector<16x64xf32>
    %360 = vector.extract_strided_slice %57 {offsets = [64, 0], sizes = [16, 64], strides = [1, 1]} : vector<96x64xf32> to vector<16x64xf32>
    %c0_299 = arith.constant 0 : index
    %c0_300 = arith.constant 0 : index
    %c0_301 = arith.constant 0 : index
    %361 = vector.load %arg8[%c0_299, %c0_300, %c0_301] : memref<5x64x64xf32, #tpu.memory_space<vmem>>, vector<1x64x64xf32>
    %362 = vector.shape_cast %361 : vector<1x64x64xf32> to vector<64x64xf32>
    %cst_302 = arith.constant dense<0.000000e+00> : vector<16x64xf32>
    %363 = tpu.matmul %355, %362, %cst_302 {dimension_numbers = #tpu.dot_dimension_numbers<[1], [0], [0], [1], [0, 0, 1, 1], [], []>} : vector<16x64xf32>, vector<64x64xf32>, vector<16x64xf32> -> vector<16x64xf32>
    %c1_303 = arith.constant 1 : index
    %c0_304 = arith.constant 0 : index
    %c0_305 = arith.constant 0 : index
    %364 = vector.load %arg8[%c1_303, %c0_304, %c0_305] : memref<5x64x64xf32, #tpu.memory_space<vmem>>, vector<1x64x64xf32>
    %365 = vector.shape_cast %364 : vector<1x64x64xf32> to vector<64x64xf32>
    %cst_306 = arith.constant dense<0.000000e+00> : vector<16x64xf32>
    %366 = tpu.matmul %356, %365, %cst_306 {dimension_numbers = #tpu.dot_dimension_numbers<[1], [0], [0], [1], [0, 0, 1, 1], [], []>} : vector<16x64xf32>, vector<64x64xf32>, vector<16x64xf32> -> vector<16x64xf32>
    %c2_307 = arith.constant 2 : index
    %c0_308 = arith.constant 0 : index
    %c0_309 = arith.constant 0 : index
    %367 = vector.load %arg8[%c2_307, %c0_308, %c0_309] : memref<5x64x64xf32, #tpu.memory_space<vmem>>, vector<1x64x64xf32>
    %368 = vector.shape_cast %367 : vector<1x64x64xf32> to vector<64x64xf32>
    %cst_310 = arith.constant dense<0.000000e+00> : vector<16x64xf32>
    %369 = tpu.matmul %357, %368, %cst_310 {dimension_numbers = #tpu.dot_dimension_numbers<[1], [0], [0], [1], [0, 0, 1, 1], [], []>} : vector<16x64xf32>, vector<64x64xf32>, vector<16x64xf32> -> vector<16x64xf32>
    %c3_311 = arith.constant 3 : index
    %c0_312 = arith.constant 0 : index
    %c0_313 = arith.constant 0 : index
    %370 = vector.load %arg8[%c3_311, %c0_312, %c0_313] : memref<5x64x64xf32, #tpu.memory_space<vmem>>, vector<1x64x64xf32>
    %371 = vector.shape_cast %370 : vector<1x64x64xf32> to vector<64x64xf32>
    %cst_314 = arith.constant dense<0.000000e+00> : vector<16x64xf32>
    %372 = tpu.matmul %358, %371, %cst_314 {dimension_numbers = #tpu.dot_dimension_numbers<[1], [0], [0], [1], [0, 0, 1, 1], [], []>} : vector<16x64xf32>, vector<64x64xf32>, vector<16x64xf32> -> vector<16x64xf32>
    %c4_315 = arith.constant 4 : index
    %c0_316 = arith.constant 0 : index
    %c0_317 = arith.constant 0 : index
    %373 = vector.load %arg8[%c4_315, %c0_316, %c0_317] : memref<5x64x64xf32, #tpu.memory_space<vmem>>, vector<1x64x64xf32>
    %374 = vector.shape_cast %373 : vector<1x64x64xf32> to vector<64x64xf32>
    %cst_318 = arith.constant dense<0.000000e+00> : vector<16x64xf32>
    %375 = tpu.matmul %359, %374, %cst_318 {dimension_numbers = #tpu.dot_dimension_numbers<[1], [0], [0], [1], [0, 0, 1, 1], [], []>} : vector<16x64xf32>, vector<64x64xf32>, vector<16x64xf32> -> vector<16x64xf32>
    %376 = arith.addf %363, %366 : vector<16x64xf32>
    %377 = arith.addf %369, %372 : vector<16x64xf32>
    %378 = arith.addf %376, %377 : vector<16x64xf32>
    %379 = arith.addf %378, %375 : vector<16x64xf32>
    %380 = arith.addf %360, %379 : vector<16x64xf32>
    %381 = math.tanh %380 : vector<16x64xf32>
    %382 = arith.mulf %354, %322 : vector<16x64xf32>
    %cst_319 = arith.constant 1.000000e+00 : f32
    %383 = vector.broadcast %cst_319 : f32 to vector<16x64xf32>
    %384 = arith.subf %383, %354 : vector<16x64xf32>
    %385 = arith.mulf %384, %381 : vector<16x64xf32>
    %386 = arith.addf %382, %385 : vector<16x64xf32>
    %cst_320 = arith.constant dense<0.000000e+00> : vector<16x64xf32>
    %387 = tpu.matmul %59, %386, %cst_320 {dimension_numbers = #tpu.dot_dimension_numbers<[1], [0], [0], [1], [0, 0, 1, 1], [], []>} : vector<16x16xf32>, vector<16x64xf32>, vector<16x64xf32> -> vector<16x64xf32>
    %cst_321 = arith.constant dense<0.000000e+00> : vector<16x64xf32>
    %388 = tpu.matmul %61, %386, %cst_321 {dimension_numbers = #tpu.dot_dimension_numbers<[1], [0], [0], [1], [0, 0, 1, 1], [], []>} : vector<16x16xf32>, vector<16x64xf32>, vector<16x64xf32> -> vector<16x64xf32>
    %cst_322 = arith.constant dense<0.000000e+00> : vector<16x64xf32>
    %389 = tpu.matmul %63, %386, %cst_322 {dimension_numbers = #tpu.dot_dimension_numbers<[1], [0], [0], [1], [0, 0, 1, 1], [], []>} : vector<16x16xf32>, vector<16x64xf32>, vector<16x64xf32> -> vector<16x64xf32>
    %cst_323 = arith.constant dense<0.000000e+00> : vector<16x64xf32>
    %390 = tpu.matmul %65, %386, %cst_323 {dimension_numbers = #tpu.dot_dimension_numbers<[1], [0], [0], [1], [0, 0, 1, 1], [], []>} : vector<16x16xf32>, vector<16x64xf32>, vector<16x64xf32> -> vector<16x64xf32>
    %391 = vector.extract_strided_slice %35 {offsets = [80, 0], sizes = [16, 128], strides = [1, 1]} : vector<96x128xf32> to vector<16x128xf32>
    %c0_324 = arith.constant 0 : index
    %c0_325 = arith.constant 0 : index
    %c0_326 = arith.constant 0 : index
    %392 = vector.load %arg7[%c0_324, %c0_325, %c0_326] : memref<5x64x128xf32, #tpu.memory_space<vmem>>, vector<1x64x128xf32>
    %393 = vector.shape_cast %392 : vector<1x64x128xf32> to vector<64x128xf32>
    %cst_327 = arith.constant dense<0.000000e+00> : vector<16x128xf32>
    %394 = tpu.matmul %386, %393, %cst_327 {dimension_numbers = #tpu.dot_dimension_numbers<[1], [0], [0], [1], [0, 0, 1, 1], [], []>} : vector<16x64xf32>, vector<64x128xf32>, vector<16x128xf32> -> vector<16x128xf32>
    %c1_328 = arith.constant 1 : index
    %c0_329 = arith.constant 0 : index
    %c0_330 = arith.constant 0 : index
    %395 = vector.load %arg7[%c1_328, %c0_329, %c0_330] : memref<5x64x128xf32, #tpu.memory_space<vmem>>, vector<1x64x128xf32>
    %396 = vector.shape_cast %395 : vector<1x64x128xf32> to vector<64x128xf32>
    %cst_331 = arith.constant dense<0.000000e+00> : vector<16x128xf32>
    %397 = tpu.matmul %387, %396, %cst_331 {dimension_numbers = #tpu.dot_dimension_numbers<[1], [0], [0], [1], [0, 0, 1, 1], [], []>} : vector<16x64xf32>, vector<64x128xf32>, vector<16x128xf32> -> vector<16x128xf32>
    %c2_332 = arith.constant 2 : index
    %c0_333 = arith.constant 0 : index
    %c0_334 = arith.constant 0 : index
    %398 = vector.load %arg7[%c2_332, %c0_333, %c0_334] : memref<5x64x128xf32, #tpu.memory_space<vmem>>, vector<1x64x128xf32>
    %399 = vector.shape_cast %398 : vector<1x64x128xf32> to vector<64x128xf32>
    %cst_335 = arith.constant dense<0.000000e+00> : vector<16x128xf32>
    %400 = tpu.matmul %388, %399, %cst_335 {dimension_numbers = #tpu.dot_dimension_numbers<[1], [0], [0], [1], [0, 0, 1, 1], [], []>} : vector<16x64xf32>, vector<64x128xf32>, vector<16x128xf32> -> vector<16x128xf32>
    %c3_336 = arith.constant 3 : index
    %c0_337 = arith.constant 0 : index
    %c0_338 = arith.constant 0 : index
    %401 = vector.load %arg7[%c3_336, %c0_337, %c0_338] : memref<5x64x128xf32, #tpu.memory_space<vmem>>, vector<1x64x128xf32>
    %402 = vector.shape_cast %401 : vector<1x64x128xf32> to vector<64x128xf32>
    %cst_339 = arith.constant dense<0.000000e+00> : vector<16x128xf32>
    %403 = tpu.matmul %389, %402, %cst_339 {dimension_numbers = #tpu.dot_dimension_numbers<[1], [0], [0], [1], [0, 0, 1, 1], [], []>} : vector<16x64xf32>, vector<64x128xf32>, vector<16x128xf32> -> vector<16x128xf32>
    %c4_340 = arith.constant 4 : index
    %c0_341 = arith.constant 0 : index
    %c0_342 = arith.constant 0 : index
    %404 = vector.load %arg7[%c4_340, %c0_341, %c0_342] : memref<5x64x128xf32, #tpu.memory_space<vmem>>, vector<1x64x128xf32>
    %405 = vector.shape_cast %404 : vector<1x64x128xf32> to vector<64x128xf32>
    %cst_343 = arith.constant dense<0.000000e+00> : vector<16x128xf32>
    %406 = tpu.matmul %390, %405, %cst_343 {dimension_numbers = #tpu.dot_dimension_numbers<[1], [0], [0], [1], [0, 0, 1, 1], [], []>} : vector<16x64xf32>, vector<64x128xf32>, vector<16x128xf32> -> vector<16x128xf32>
    %407 = arith.addf %394, %397 : vector<16x128xf32>
    %408 = arith.addf %400, %403 : vector<16x128xf32>
    %409 = arith.addf %407, %408 : vector<16x128xf32>
    %410 = arith.addf %409, %406 : vector<16x128xf32>
    %411 = arith.addf %391, %410 : vector<16x128xf32>
    %412 = arith.negf %411 : vector<16x128xf32>
    %413 = math.exp %412 : vector<16x128xf32>
    %cst_344 = arith.constant 1.000000e+00 : f32
    %414 = vector.broadcast %cst_344 : f32 to vector<16x128xf32>
    %415 = arith.addf %414, %413 : vector<16x128xf32>
    %416 = arith.divf %414, %415 : vector<16x128xf32>
    %417 = vector.extract_strided_slice %416 {offsets = [0, 0], sizes = [16, 64], strides = [1, 1]} : vector<16x128xf32> to vector<16x64xf32>
    %418 = vector.extract_strided_slice %416 {offsets = [0, 64], sizes = [16, 64], strides = [1, 1]} : vector<16x128xf32> to vector<16x64xf32>
    %419 = arith.mulf %417, %386 : vector<16x64xf32>
    %cst_345 = arith.constant dense<0.000000e+00> : vector<16x64xf32>
    %420 = tpu.matmul %59, %419, %cst_345 {dimension_numbers = #tpu.dot_dimension_numbers<[1], [0], [0], [1], [0, 0, 1, 1], [], []>} : vector<16x16xf32>, vector<16x64xf32>, vector<16x64xf32> -> vector<16x64xf32>
    %cst_346 = arith.constant dense<0.000000e+00> : vector<16x64xf32>
    %421 = tpu.matmul %61, %419, %cst_346 {dimension_numbers = #tpu.dot_dimension_numbers<[1], [0], [0], [1], [0, 0, 1, 1], [], []>} : vector<16x16xf32>, vector<16x64xf32>, vector<16x64xf32> -> vector<16x64xf32>
    %cst_347 = arith.constant dense<0.000000e+00> : vector<16x64xf32>
    %422 = tpu.matmul %63, %419, %cst_347 {dimension_numbers = #tpu.dot_dimension_numbers<[1], [0], [0], [1], [0, 0, 1, 1], [], []>} : vector<16x16xf32>, vector<16x64xf32>, vector<16x64xf32> -> vector<16x64xf32>
    %cst_348 = arith.constant dense<0.000000e+00> : vector<16x64xf32>
    %423 = tpu.matmul %65, %419, %cst_348 {dimension_numbers = #tpu.dot_dimension_numbers<[1], [0], [0], [1], [0, 0, 1, 1], [], []>} : vector<16x16xf32>, vector<16x64xf32>, vector<16x64xf32> -> vector<16x64xf32>
    %424 = vector.extract_strided_slice %57 {offsets = [80, 0], sizes = [16, 64], strides = [1, 1]} : vector<96x64xf32> to vector<16x64xf32>
    %c0_349 = arith.constant 0 : index
    %c0_350 = arith.constant 0 : index
    %c0_351 = arith.constant 0 : index
    %425 = vector.load %arg8[%c0_349, %c0_350, %c0_351] : memref<5x64x64xf32, #tpu.memory_space<vmem>>, vector<1x64x64xf32>
    %426 = vector.shape_cast %425 : vector<1x64x64xf32> to vector<64x64xf32>
    %cst_352 = arith.constant dense<0.000000e+00> : vector<16x64xf32>
    %427 = tpu.matmul %419, %426, %cst_352 {dimension_numbers = #tpu.dot_dimension_numbers<[1], [0], [0], [1], [0, 0, 1, 1], [], []>} : vector<16x64xf32>, vector<64x64xf32>, vector<16x64xf32> -> vector<16x64xf32>
    %c1_353 = arith.constant 1 : index
    %c0_354 = arith.constant 0 : index
    %c0_355 = arith.constant 0 : index
    %428 = vector.load %arg8[%c1_353, %c0_354, %c0_355] : memref<5x64x64xf32, #tpu.memory_space<vmem>>, vector<1x64x64xf32>
    %429 = vector.shape_cast %428 : vector<1x64x64xf32> to vector<64x64xf32>
    %cst_356 = arith.constant dense<0.000000e+00> : vector<16x64xf32>
    %430 = tpu.matmul %420, %429, %cst_356 {dimension_numbers = #tpu.dot_dimension_numbers<[1], [0], [0], [1], [0, 0, 1, 1], [], []>} : vector<16x64xf32>, vector<64x64xf32>, vector<16x64xf32> -> vector<16x64xf32>
    %c2_357 = arith.constant 2 : index
    %c0_358 = arith.constant 0 : index
    %c0_359 = arith.constant 0 : index
    %431 = vector.load %arg8[%c2_357, %c0_358, %c0_359] : memref<5x64x64xf32, #tpu.memory_space<vmem>>, vector<1x64x64xf32>
    %432 = vector.shape_cast %431 : vector<1x64x64xf32> to vector<64x64xf32>
    %cst_360 = arith.constant dense<0.000000e+00> : vector<16x64xf32>
    %433 = tpu.matmul %421, %432, %cst_360 {dimension_numbers = #tpu.dot_dimension_numbers<[1], [0], [0], [1], [0, 0, 1, 1], [], []>} : vector<16x64xf32>, vector<64x64xf32>, vector<16x64xf32> -> vector<16x64xf32>
    %c3_361 = arith.constant 3 : index
    %c0_362 = arith.constant 0 : index
    %c0_363 = arith.constant 0 : index
    %434 = vector.load %arg8[%c3_361, %c0_362, %c0_363] : memref<5x64x64xf32, #tpu.memory_space<vmem>>, vector<1x64x64xf32>
    %435 = vector.shape_cast %434 : vector<1x64x64xf32> to vector<64x64xf32>
    %cst_364 = arith.constant dense<0.000000e+00> : vector<16x64xf32>
    %436 = tpu.matmul %422, %435, %cst_364 {dimension_numbers = #tpu.dot_dimension_numbers<[1], [0], [0], [1], [0, 0, 1, 1], [], []>} : vector<16x64xf32>, vector<64x64xf32>, vector<16x64xf32> -> vector<16x64xf32>
    %c4_365 = arith.constant 4 : index
    %c0_366 = arith.constant 0 : index
    %c0_367 = arith.constant 0 : index
    %437 = vector.load %arg8[%c4_365, %c0_366, %c0_367] : memref<5x64x64xf32, #tpu.memory_space<vmem>>, vector<1x64x64xf32>
    %438 = vector.shape_cast %437 : vector<1x64x64xf32> to vector<64x64xf32>
    %cst_368 = arith.constant dense<0.000000e+00> : vector<16x64xf32>
    %439 = tpu.matmul %423, %438, %cst_368 {dimension_numbers = #tpu.dot_dimension_numbers<[1], [0], [0], [1], [0, 0, 1, 1], [], []>} : vector<16x64xf32>, vector<64x64xf32>, vector<16x64xf32> -> vector<16x64xf32>
    %440 = arith.addf %427, %430 : vector<16x64xf32>
    %441 = arith.addf %433, %436 : vector<16x64xf32>
    %442 = arith.addf %440, %441 : vector<16x64xf32>
    %443 = arith.addf %442, %439 : vector<16x64xf32>
    %444 = arith.addf %424, %443 : vector<16x64xf32>
    %445 = math.tanh %444 : vector<16x64xf32>
    %446 = arith.mulf %418, %386 : vector<16x64xf32>
    %cst_369 = arith.constant 1.000000e+00 : f32
    %447 = vector.broadcast %cst_369 : f32 to vector<16x64xf32>
    %448 = arith.subf %447, %418 : vector<16x64xf32>
    %449 = arith.mulf %448, %445 : vector<16x64xf32>
    %450 = arith.addf %446, %449 : vector<16x64xf32>
    %c0_370 = arith.constant 0 : index
    %c0_371 = arith.constant 0 : index
    %451 = vector.load %arg11[%c0_370, %c0_371] : memref<64x64xf32, #tpu.memory_space<vmem>>, vector<64x64xf32>
    %cst_372 = arith.constant dense<0.000000e+00> : vector<16x64xf32>
    %452 = tpu.matmul %450, %451, %cst_372 {dimension_numbers = #tpu.dot_dimension_numbers<[1], [0], [0], [1], [0, 0, 1, 1], [], []>} : vector<16x64xf32>, vector<64x64xf32>, vector<16x64xf32> -> vector<16x64xf32>
    %c0_373 = arith.constant 0 : index
    %c0_374 = arith.constant 0 : index
    %453 = vector.load %arg12[%c0_373, %c0_374] : memref<1x64xf32, #tpu.memory_space<vmem>>, vector<1x64xf32>
    %454 = vector.broadcast %453 : vector<1x64xf32> to vector<16x64xf32>
    %455 = arith.addf %452, %454 : vector<16x64xf32>
    %cst_375 = arith.constant 0.000000e+00 : f32
    %456 = vector.broadcast %cst_375 : f32 to vector<16x64xf32>
    %457 = arith.maximumf %455, %456 : vector<16x64xf32>
    %c0_376 = arith.constant 0 : index
    %c0_377 = arith.constant 0 : index
    %458 = vector.load %arg13[%c0_376, %c0_377] : memref<64x64xf32, #tpu.memory_space<vmem>>, vector<64x64xf32>
    %cst_378 = arith.constant dense<0.000000e+00> : vector<16x64xf32>
    %459 = tpu.matmul %457, %458, %cst_378 {dimension_numbers = #tpu.dot_dimension_numbers<[1], [0], [0], [1], [0, 0, 1, 1], [], []>} : vector<16x64xf32>, vector<64x64xf32>, vector<16x64xf32> -> vector<16x64xf32>
    %c0_379 = arith.constant 0 : index
    %c0_380 = arith.constant 0 : index
    %460 = vector.load %arg14[%c0_379, %c0_380] : memref<1x64xf32, #tpu.memory_space<vmem>>, vector<1x64xf32>
    %461 = vector.broadcast %460 : vector<1x64xf32> to vector<16x64xf32>
    %462 = arith.addf %459, %461 : vector<16x64xf32>
    %cst_381 = arith.constant 0.000000e+00 : f32
    %463 = vector.broadcast %cst_381 : f32 to vector<16x64xf32>
    %464 = arith.maximumf %462, %463 : vector<16x64xf32>
    %c0_382 = arith.constant 0 : index
    %c0_383 = arith.constant 0 : index
    %465 = vector.load %arg17[%c0_382, %c0_383] : memref<3x64xf32, #tpu.memory_space<vmem>>, vector<3x64xf32>
    %c0_384 = arith.constant 0 : index
    %c0_385 = arith.constant 0 : index
    %c0_386 = arith.constant 0 : index
    %466 = vector.load %arg15[%c0_384, %c0_385, %c0_386] : memref<4x64x64xf32, #tpu.memory_space<vmem>>, vector<1x64x64xf32>
    %467 = vector.shape_cast %466 : vector<1x64x64xf32> to vector<64x64xf32>
    %cst_387 = arith.constant dense<0.000000e+00> : vector<16x64xf32>
    %468 = tpu.matmul %464, %467, %cst_387 {dimension_numbers = #tpu.dot_dimension_numbers<[1], [0], [0], [1], [0, 0, 1, 1], [], []>} : vector<16x64xf32>, vector<64x64xf32>, vector<16x64xf32> -> vector<16x64xf32>
    %c0_388 = arith.constant 0 : index
    %c0_389 = arith.constant 0 : index
    %c0_390 = arith.constant 0 : index
    %c0_391 = arith.constant 0 : index
    %469 = vector.load %arg2[%c0_388, %c0_389, %c0_390, %c0_391] : memref<1x4x16x3xf32, #tpu.memory_space<vmem>>, vector<1x1x16x3xf32>
    %470 = vector.shape_cast %469 : vector<1x1x16x3xf32> to vector<16x3xf32>
    %cst_392 = arith.constant dense<0.000000e+00> : vector<16x64xf32>
    %471 = tpu.matmul %470, %465, %cst_392 {dimension_numbers = #tpu.dot_dimension_numbers<[1], [0], [0], [1], [0, 0, 1, 1], [], []>} : vector<16x3xf32>, vector<3x64xf32>, vector<16x64xf32> -> vector<16x64xf32>
    %472 = arith.addf %468, %471 : vector<16x64xf32>
    %c0_393 = arith.constant 0 : index
    %c0_394 = arith.constant 0 : index
    %c0_395 = arith.constant 0 : index
    %473 = vector.load %arg16[%c0_393, %c0_394, %c0_395] : memref<4x1x64xf32, #tpu.memory_space<vmem>>, vector<1x1x64xf32>
    %474 = vector.shape_cast %473 : vector<1x1x64xf32> to vector<1x64xf32>
    %475 = vector.broadcast %474 : vector<1x64xf32> to vector<16x64xf32>
    %476 = arith.addf %472, %475 : vector<16x64xf32>
    %c1_396 = arith.constant 1 : index
    %c0_397 = arith.constant 0 : index
    %c0_398 = arith.constant 0 : index
    %477 = vector.load %arg15[%c1_396, %c0_397, %c0_398] : memref<4x64x64xf32, #tpu.memory_space<vmem>>, vector<1x64x64xf32>
    %478 = vector.shape_cast %477 : vector<1x64x64xf32> to vector<64x64xf32>
    %cst_399 = arith.constant dense<0.000000e+00> : vector<16x64xf32>
    %479 = tpu.matmul %464, %478, %cst_399 {dimension_numbers = #tpu.dot_dimension_numbers<[1], [0], [0], [1], [0, 0, 1, 1], [], []>} : vector<16x64xf32>, vector<64x64xf32>, vector<16x64xf32> -> vector<16x64xf32>
    %c0_400 = arith.constant 0 : index
    %c1_401 = arith.constant 1 : index
    %c0_402 = arith.constant 0 : index
    %c0_403 = arith.constant 0 : index
    %480 = vector.load %arg2[%c0_400, %c1_401, %c0_402, %c0_403] : memref<1x4x16x3xf32, #tpu.memory_space<vmem>>, vector<1x1x16x3xf32>
    %481 = vector.shape_cast %480 : vector<1x1x16x3xf32> to vector<16x3xf32>
    %cst_404 = arith.constant dense<0.000000e+00> : vector<16x64xf32>
    %482 = tpu.matmul %481, %465, %cst_404 {dimension_numbers = #tpu.dot_dimension_numbers<[1], [0], [0], [1], [0, 0, 1, 1], [], []>} : vector<16x3xf32>, vector<3x64xf32>, vector<16x64xf32> -> vector<16x64xf32>
    %483 = arith.addf %479, %482 : vector<16x64xf32>
    %c1_405 = arith.constant 1 : index
    %c0_406 = arith.constant 0 : index
    %c0_407 = arith.constant 0 : index
    %484 = vector.load %arg16[%c1_405, %c0_406, %c0_407] : memref<4x1x64xf32, #tpu.memory_space<vmem>>, vector<1x1x64xf32>
    %485 = vector.shape_cast %484 : vector<1x1x64xf32> to vector<1x64xf32>
    %486 = vector.broadcast %485 : vector<1x64xf32> to vector<16x64xf32>
    %487 = arith.addf %483, %486 : vector<16x64xf32>
    %c2_408 = arith.constant 2 : index
    %c0_409 = arith.constant 0 : index
    %c0_410 = arith.constant 0 : index
    %488 = vector.load %arg15[%c2_408, %c0_409, %c0_410] : memref<4x64x64xf32, #tpu.memory_space<vmem>>, vector<1x64x64xf32>
    %489 = vector.shape_cast %488 : vector<1x64x64xf32> to vector<64x64xf32>
    %cst_411 = arith.constant dense<0.000000e+00> : vector<16x64xf32>
    %490 = tpu.matmul %464, %489, %cst_411 {dimension_numbers = #tpu.dot_dimension_numbers<[1], [0], [0], [1], [0, 0, 1, 1], [], []>} : vector<16x64xf32>, vector<64x64xf32>, vector<16x64xf32> -> vector<16x64xf32>
    %c0_412 = arith.constant 0 : index
    %c2_413 = arith.constant 2 : index
    %c0_414 = arith.constant 0 : index
    %c0_415 = arith.constant 0 : index
    %491 = vector.load %arg2[%c0_412, %c2_413, %c0_414, %c0_415] : memref<1x4x16x3xf32, #tpu.memory_space<vmem>>, vector<1x1x16x3xf32>
    %492 = vector.shape_cast %491 : vector<1x1x16x3xf32> to vector<16x3xf32>
    %cst_416 = arith.constant dense<0.000000e+00> : vector<16x64xf32>
    %493 = tpu.matmul %492, %465, %cst_416 {dimension_numbers = #tpu.dot_dimension_numbers<[1], [0], [0], [1], [0, 0, 1, 1], [], []>} : vector<16x3xf32>, vector<3x64xf32>, vector<16x64xf32> -> vector<16x64xf32>
    %494 = arith.addf %490, %493 : vector<16x64xf32>
    %c2_417 = arith.constant 2 : index
    %c0_418 = arith.constant 0 : index
    %c0_419 = arith.constant 0 : index
    %495 = vector.load %arg16[%c2_417, %c0_418, %c0_419] : memref<4x1x64xf32, #tpu.memory_space<vmem>>, vector<1x1x64xf32>
    %496 = vector.shape_cast %495 : vector<1x1x64xf32> to vector<1x64xf32>
    %497 = vector.broadcast %496 : vector<1x64xf32> to vector<16x64xf32>
    %498 = arith.addf %494, %497 : vector<16x64xf32>
    %c3_420 = arith.constant 3 : index
    %c0_421 = arith.constant 0 : index
    %c0_422 = arith.constant 0 : index
    %499 = vector.load %arg15[%c3_420, %c0_421, %c0_422] : memref<4x64x64xf32, #tpu.memory_space<vmem>>, vector<1x64x64xf32>
    %500 = vector.shape_cast %499 : vector<1x64x64xf32> to vector<64x64xf32>
    %cst_423 = arith.constant dense<0.000000e+00> : vector<16x64xf32>
    %501 = tpu.matmul %464, %500, %cst_423 {dimension_numbers = #tpu.dot_dimension_numbers<[1], [0], [0], [1], [0, 0, 1, 1], [], []>} : vector<16x64xf32>, vector<64x64xf32>, vector<16x64xf32> -> vector<16x64xf32>
    %c0_424 = arith.constant 0 : index
    %c3_425 = arith.constant 3 : index
    %c0_426 = arith.constant 0 : index
    %c0_427 = arith.constant 0 : index
    %502 = vector.load %arg2[%c0_424, %c3_425, %c0_426, %c0_427] : memref<1x4x16x3xf32, #tpu.memory_space<vmem>>, vector<1x1x16x3xf32>
    %503 = vector.shape_cast %502 : vector<1x1x16x3xf32> to vector<16x3xf32>
    %cst_428 = arith.constant dense<0.000000e+00> : vector<16x64xf32>
    %504 = tpu.matmul %503, %465, %cst_428 {dimension_numbers = #tpu.dot_dimension_numbers<[1], [0], [0], [1], [0, 0, 1, 1], [], []>} : vector<16x3xf32>, vector<3x64xf32>, vector<16x64xf32> -> vector<16x64xf32>
    %505 = arith.addf %501, %504 : vector<16x64xf32>
    %c3_429 = arith.constant 3 : index
    %c0_430 = arith.constant 0 : index
    %c0_431 = arith.constant 0 : index
    %506 = vector.load %arg16[%c3_429, %c0_430, %c0_431] : memref<4x1x64xf32, #tpu.memory_space<vmem>>, vector<1x1x64xf32>
    %507 = vector.shape_cast %506 : vector<1x1x64xf32> to vector<1x64xf32>
    %508 = vector.broadcast %507 : vector<1x64xf32> to vector<16x64xf32>
    %509 = arith.addf %505, %508 : vector<16x64xf32>
    %510 = tpu.concatenate %476, %487, %498, %509 in 0 : vector<16x64xf32>, vector<16x64xf32>, vector<16x64xf32>, vector<16x64xf32> -> vector<64x64xf32>
    %cst_432 = arith.constant 0.000000e+00 : f32
    %511 = vector.broadcast %cst_432 : f32 to vector<64x64xf32>
    %512 = arith.maximumf %510, %511 : vector<64x64xf32>
    %c0_433 = arith.constant 0 : index
    %c0_434 = arith.constant 0 : index
    %513 = vector.load %arg18[%c0_433, %c0_434] : memref<64x64xf32, #tpu.memory_space<vmem>>, vector<64x64xf32>
    %cst_435 = arith.constant dense<0.000000e+00> : vector<64x64xf32>
    %514 = tpu.matmul %512, %513, %cst_435 {dimension_numbers = #tpu.dot_dimension_numbers<[1], [0], [0], [1], [0, 0, 1, 1], [], []>} : vector<64x64xf32>, vector<64x64xf32>, vector<64x64xf32> -> vector<64x64xf32>
    %c0_436 = arith.constant 0 : index
    %c0_437 = arith.constant 0 : index
    %515 = vector.load %arg19[%c0_436, %c0_437] : memref<1x64xf32, #tpu.memory_space<vmem>>, vector<1x64xf32>
    %516 = vector.broadcast %515 : vector<1x64xf32> to vector<64x64xf32>
    %517 = arith.addf %514, %516 : vector<64x64xf32>
    %cst_438 = arith.constant 0.000000e+00 : f32
    %518 = vector.broadcast %cst_438 : f32 to vector<64x64xf32>
    %519 = arith.maximumf %517, %518 : vector<64x64xf32>
    %c0_439 = arith.constant 0 : index
    %c0_440 = arith.constant 0 : index
    %520 = vector.load %arg20[%c0_439, %c0_440] : memref<64x2xf32, #tpu.memory_space<vmem>>, vector<64x2xf32>
    %cst_441 = arith.constant dense<0.000000e+00> : vector<64x2xf32>
    %521 = tpu.matmul %519, %520, %cst_441 {dimension_numbers = #tpu.dot_dimension_numbers<[1], [0], [0], [1], [0, 0, 1, 1], [], []>} : vector<64x64xf32>, vector<64x2xf32>, vector<64x2xf32> -> vector<64x2xf32>
    %c0_442 = arith.constant 0 : index
    %c0_443 = arith.constant 0 : index
    %522 = vector.load %arg21[%c0_442, %c0_443] : memref<1x2xf32, #tpu.memory_space<vmem>>, vector<1x2xf32>
    %523 = vector.broadcast %522 : vector<1x2xf32> to vector<64x2xf32>
    %524 = arith.addf %521, %523 : vector<64x2xf32>
    %c0_444 = arith.constant 0 : index
    %c0_445 = arith.constant 0 : index
    %c0_446 = arith.constant 0 : index
    %525 = vector.load %arg22[%c0_444, %c0_445, %c0_446] : memref<1x64x2xf32, #tpu.memory_space<vmem>>, vector<1x64x2xf32>
    %526 = vector.shape_cast %525 : vector<1x64x2xf32> to vector<64x2xf32>
    %527 = vector.shape_cast %524 : vector<64x2xf32> to vector<1x64x2xf32>
    tpu.vector_store %arg22[%c0_444, %c0_445, %c0_446], %527 {strides = array<i32>} : memref<1x64x2xf32, #tpu.memory_space<vmem>>, vector<1x64x2xf32>,
    return
  }
  func.func @transform_0(%arg0: i32) -> (i32, i32, i32) {
    %c0_i32 = arith.constant 0 : i32
    %c0_i32_0 = arith.constant 0 : i32
    %c0_i32_1 = arith.constant 0 : i32
    return %arg0, %c0_i32, %c0_i32_0 : i32, i32, i32
  }
  func.func @transform_1(%arg0: i32) -> (i32, i32, i32, i32) {
    %c0_i32 = arith.constant 0 : i32
    %c0_i32_0 = arith.constant 0 : i32
    %c0_i32_1 = arith.constant 0 : i32
    %c0_i32_2 = arith.constant 0 : i32
    return %arg0, %c0_i32, %c0_i32_0, %c0_i32_1 : i32, i32, i32, i32
  }
  func.func @transform_2(%arg0: i32) -> (i32, i32, i32) {
    %c0_i32 = arith.constant 0 : i32
    %c0_i32_0 = arith.constant 0 : i32
    %c0_i32_1 = arith.constant 0 : i32
    %c0_i32_2 = arith.constant 0 : i32
    return %c0_i32, %c0_i32_0, %c0_i32_1 : i32, i32, i32
  }
  func.func @transform_3(%arg0: i32) -> (i32, i32, i32) {
    %c0_i32 = arith.constant 0 : i32
    %c0_i32_0 = arith.constant 0 : i32
    %c0_i32_1 = arith.constant 0 : i32
    %c0_i32_2 = arith.constant 0 : i32
    return %c0_i32, %c0_i32_0, %c0_i32_1 : i32, i32, i32
  }
  func.func @transform_4(%arg0: i32) -> (i32, i32, i32) {
    %c0_i32 = arith.constant 0 : i32
    %c0_i32_0 = arith.constant 0 : i32
    %c0_i32_1 = arith.constant 0 : i32
    %c0_i32_2 = arith.constant 0 : i32
    return %c0_i32, %c0_i32_0, %c0_i32_1 : i32, i32, i32
  }
  func.func @transform_5(%arg0: i32) -> (i32, i32, i32) {
    %c0_i32 = arith.constant 0 : i32
    %c0_i32_0 = arith.constant 0 : i32
    %c0_i32_1 = arith.constant 0 : i32
    %c0_i32_2 = arith.constant 0 : i32
    return %c0_i32, %c0_i32_0, %c0_i32_1 : i32, i32, i32
  }
  func.func @transform_6(%arg0: i32) -> (i32, i32, i32) {
    %c0_i32 = arith.constant 0 : i32
    %c0_i32_0 = arith.constant 0 : i32
    %c0_i32_1 = arith.constant 0 : i32
    %c0_i32_2 = arith.constant 0 : i32
    return %c0_i32, %c0_i32_0, %c0_i32_1 : i32, i32, i32
  }
  func.func @transform_7(%arg0: i32) -> (i32, i32, i32) {
    %c0_i32 = arith.constant 0 : i32
    %c0_i32_0 = arith.constant 0 : i32
    %c0_i32_1 = arith.constant 0 : i32
    %c0_i32_2 = arith.constant 0 : i32
    return %c0_i32, %c0_i32_0, %c0_i32_1 : i32, i32, i32
  }
  func.func @transform_8(%arg0: i32) -> (i32, i32) {
    %c0_i32 = arith.constant 0 : i32
    %c0_i32_0 = arith.constant 0 : i32
    %c0_i32_1 = arith.constant 0 : i32
    return %c0_i32, %c0_i32_0 : i32, i32
  }
  func.func @transform_9(%arg0: i32) -> (i32, i32) {
    %c0_i32 = arith.constant 0 : i32
    %c0_i32_0 = arith.constant 0 : i32
    %c0_i32_1 = arith.constant 0 : i32
    return %c0_i32, %c0_i32_0 : i32, i32
  }
  func.func @transform_10(%arg0: i32) -> (i32, i32) {
    %c0_i32 = arith.constant 0 : i32
    %c0_i32_0 = arith.constant 0 : i32
    %c0_i32_1 = arith.constant 0 : i32
    return %c0_i32, %c0_i32_0 : i32, i32
  }
  func.func @transform_11(%arg0: i32) -> (i32, i32) {
    %c0_i32 = arith.constant 0 : i32
    %c0_i32_0 = arith.constant 0 : i32
    %c0_i32_1 = arith.constant 0 : i32
    return %c0_i32, %c0_i32_0 : i32, i32
  }
  func.func @transform_12(%arg0: i32) -> (i32, i32) {
    %c0_i32 = arith.constant 0 : i32
    %c0_i32_0 = arith.constant 0 : i32
    %c0_i32_1 = arith.constant 0 : i32
    return %c0_i32, %c0_i32_0 : i32, i32
  }
  func.func @transform_13(%arg0: i32) -> (i32, i32) {
    %c0_i32 = arith.constant 0 : i32
    %c0_i32_0 = arith.constant 0 : i32
    %c0_i32_1 = arith.constant 0 : i32
    return %c0_i32, %c0_i32_0 : i32, i32
  }
  func.func @transform_14(%arg0: i32) -> (i32, i32, i32) {
    %c0_i32 = arith.constant 0 : i32
    %c0_i32_0 = arith.constant 0 : i32
    %c0_i32_1 = arith.constant 0 : i32
    %c0_i32_2 = arith.constant 0 : i32
    return %c0_i32, %c0_i32_0, %c0_i32_1 : i32, i32, i32
  }
  func.func @transform_15(%arg0: i32) -> (i32, i32, i32) {
    %c0_i32 = arith.constant 0 : i32
    %c0_i32_0 = arith.constant 0 : i32
    %c0_i32_1 = arith.constant 0 : i32
    %c0_i32_2 = arith.constant 0 : i32
    return %c0_i32, %c0_i32_0, %c0_i32_1 : i32, i32, i32
  }
  func.func @transform_16(%arg0: i32) -> (i32, i32) {
    %c0_i32 = arith.constant 0 : i32
    %c0_i32_0 = arith.constant 0 : i32
    %c0_i32_1 = arith.constant 0 : i32
    return %c0_i32, %c0_i32_0 : i32, i32
  }
  func.func @transform_17(%arg0: i32) -> (i32, i32) {
    %c0_i32 = arith.constant 0 : i32
    %c0_i32_0 = arith.constant 0 : i32
    %c0_i32_1 = arith.constant 0 : i32
    return %c0_i32, %c0_i32_0 : i32, i32
  }
  func.func @transform_18(%arg0: i32) -> (i32, i32) {
    %c0_i32 = arith.constant 0 : i32
    %c0_i32_0 = arith.constant 0 : i32
    %c0_i32_1 = arith.constant 0 : i32
    return %c0_i32, %c0_i32_0 : i32, i32
  }
  func.func @transform_19(%arg0: i32) -> (i32, i32) {
    %c0_i32 = arith.constant 0 : i32
    %c0_i32_0 = arith.constant 0 : i32
    %c0_i32_1 = arith.constant 0 : i32
    return %c0_i32, %c0_i32_0 : i32, i32
  }
  func.func @transform_20(%arg0: i32) -> (i32, i32) {
    %c0_i32 = arith.constant 0 : i32
    %c0_i32_0 = arith.constant 0 : i32
    %c0_i32_1 = arith.constant 0 : i32
    return %c0_i32, %c0_i32_0 : i32, i32
  }
  func.func @transform_21(%arg0: i32) -> (i32, i32, i32) {
    %c0_i32 = arith.constant 0 : i32
    %c0_i32_0 = arith.constant 0 : i32
    %c0_i32_1 = arith.constant 0 : i32
    return %arg0, %c0_i32, %c0_i32_0 : i32, i32, i32
  }
}

</mosaic_0001>

<bundles_post_ra>
// kernel: dcrnn_mlp_pallas.1
= control target key start
LH: loop header
LB: loop body
LE: loop exit
PB: predicated region body
PF: predicated region fallthrough
CT: control target
= control target key end

     0   :  { %vm92_vm0 = vcmask 785408   ;;  %vm817_vm1 = vcmask 1043456   ;;  %vm780_vm2 = vcmask 31744   ;;  %vm2353_vm3 = vcmask 130048   ;;  %s16481_s23 = smov 64   ;;  %s20947_s0 = inlined_call_operand.vmem [shape: f32[1,96,4], index: 0, kind: input, shape index: {}]   ;;  %s20948_s3 = inlined_call_operand.vmem [shape: f32[4,96,96], index: 3, kind: input, shape index: {}]   ;;  %s20949_s4 = inlined_call_operand.vmem [shape: f32[5,4,128], index: 4, kind: input, shape index: {}]   ;;  %s20950_s5 = inlined_call_operand.vmem [shape: f32[5,4,64], index: 5, kind: input, shape index: {}]   ;;  %s20951_s2 = inlined_call_operand.vmem [shape: f32[4,16,16], index: 2, kind: input, shape index: {}]   ;;  %s20952_s6 = inlined_call_operand.vmem [shape: f32[5,64,128], index: 6, kind: input, shape index: {}]   ;;  %s20953_s8 = inlined_call_operand.vmem [shape: f32[1,128], index: 8, kind: input, shape index: {}]   ;;  %s20954_s9 = inlined_call_operand.vmem [shape: f32[1,64], index: 9, kind: input, shape index: {}]   ;;  %s20955_s7 = inlined_call_operand.vmem [shape: f32[5,64,64], index: 7, kind: input, shape index: {}]   ;;  %s20956_s10 = inlined_call_operand.vmem [shape: f32[64,64], index: 10, kind: input, shape index: {}]   ;;  %s20957_s12 = inlined_call_operand.vmem [shape: f32[64,64], index: 12, kind: input, shape index: {}]   ;;  %s20958_s16 = inlined_call_operand.vmem [shape: f32[3,64], index: 16, kind: input, shape index: {}]   ;;  %s20959_s1 = inlined_call_operand.vmem [shape: f32[1,4,16,3], index: 1, kind: input, shape index: {}]   ;;  %s20960_s14 = inlined_call_operand.vmem [shape: f32[4,64,64], index: 14, kind: input, shape index: {}]   ;;  %s20961_s11 = inlined_call_operand.vmem [shape: f32[1,64], index: 11, kind: input, shape index: {}]   ;;  %s20962_s13 = inlined_call_operand.vmem [shape: f32[1,64], index: 13, kind: input, shape index: {}]   ;;  %s20963_s17 = inlined_call_operand.vmem [shape: f32[64,64], index: 17, kind: input, shape index: {}]   ;;  %s20964_s19 = inlined_call_operand.vmem [shape: f32[64,2], index: 19, kind: input, shape index: {}]   ;;  %s20965_s15 = inlined_call_operand.vmem [shape: f32[4,1,64], index: 15, kind: input, shape index: {}]   ;;  %s20966_s18 = inlined_call_operand.vmem [shape: f32[1,64], index: 18, kind: input, shape index: {}]   ;;  %s20967_s20 = inlined_call_operand.vmem [shape: f32[1,2], index: 20, kind: input, shape index: {}]   ;;  %s20968_s21 = inlined_call_operand.vmem [shape: f32[1,64,2], index: 21, kind: output, shape index: {}]  }
   0x1   :  { %21187 = sst [smem:[#allocation86_spill]] %s20947_s0  ;;  %vm2695_vm4 = vcmask 523264   ;;  %vm11434_vm5 = vcmask 1042432   ;;  %vm11427_vm6 = vcmask 23552   ;;  %vm12441_vm7 = vcmask 15360  }
   0x2   :  { %21188 = sst [smem:[#allocation87_spill]] %s20948_s3 }
   0x3   :  { %21189 = sst [smem:[#allocation88_spill]] %s20949_s4 }
   0x4   :  { %21190 = sst [smem:[#allocation89_spill]] %s20950_s5 }
   0x5   :  { %21191 = sst [smem:[#allocation90_spill]] %s20951_s2 }
   0x6   :  { %21192 = sst [smem:[#allocation91_spill]] %s20952_s6 }
   0x7   :  { %s21193_s26 = sld [smem:[#allocation86_spill]] }
   0x8   :  { %s21194_s3 = sld [smem:[#allocation87_spill]] }
   0x9   :  { %s21195_s27 = sld [smem:[#allocation88_spill]] }
   0xa   :  { %s21196_s30 = sld [smem:[#allocation89_spill]] }
   0xb   :  { %s21197_s29 = sld [smem:[#allocation90_spill]] }
   0xc   :  { %s21200_s2 = sld [smem:[#allocation91_spill]] }
   0xd   :  { %v16595_v0 = vld [vmem:[%s21193_s26 + $0x58] sm:$0xff]  ;;  %v16600_v1 = vld [vmem:[%s21193_s26 + $0x50] sm:$0xff]  ;;  %v16609_v2 = vld [vmem:[%s21193_s26 + $0x48] sm:$0xff] }
   0xe   :  { %14173 = vmatprep.subr.mxu0 %v16595_v0  ;;  %14215 = vmatprep.subr.mxu1 %v16595_v0  ;;  %v16618_v3 = vld [vmem:[%s21193_s26 + $0x40] sm:$0xff]  ;;  %v16627_v4 = vld [vmem:[%s21193_s26 + $0x38] sm:$0xff]  ;;  %v16636_v5 = vld [vmem:[%s21193_s26 + $0x30] sm:$0xff] }
   0xf   :  { %14174 = vmatpush3.msra.mxu0 %v16595_v0  ;;  %14216 = vmatpush3.msra.mxu1 %v16595_v0  ;;  %v16645_v6 = vld [vmem:[%s21193_s26 + $0x28] sm:$0xff]  ;;  %v16654_v7 = vld [vmem:[%s21193_s26 + $0x20] sm:$0xff]  ;;  %v16663_v8 = vld [vmem:[%s21193_s26 + $0x18] sm:$0xff] }
  0x10   :  { %14175 = vmatprep.subr.mxu0 %v16600_v1  ;;  %14217 = vmatprep.subr.mxu1 %v16600_v1  ;;  %v16672_v9 = vld [vmem:[%s21193_s26 + $0x10] sm:$0xff]  ;;  %v16681_v10 = vld [vmem:[%s21193_s26 + $0x8] sm:$0xff]  ;;  %v16690_v11 = vld [vmem:[%s21193_s26] sm:$0xff] }
  0x11   :  { %14176 = vmatpush3.msra.mxu0 %v16600_v1  ;;  %14218 = vmatpush3.msra.mxu1 %v16600_v1  ;;  %v80_v12 = vld [vmem:[%s21194_s3] sm:$0xff]  ;;  %v81_v14 = vld [vmem:[%s21194_s3 + $0x8] sm:$0xff]  ;;  %v82_v16 = vld [vmem:[%s21194_s3 + $0x10] sm:$0xff] }
  0x12   :  { %14177 = vmatprep.subr.mxu0 %v16609_v2  ;;  %14219 = vmatprep.subr.mxu1 %v16609_v2  ;;  %v12466_v13 = vld [vmem:[%s21194_s3 + $0x60] sm:$0xff]  ;;  %v12467_v15 = vld [vmem:[%s21194_s3 + $0x68] sm:$0xff]  ;;  %v12468_v17 = vld [vmem:[%s21194_s3 + $0x70] sm:$0xff] }
  0x13   :  { %14178 = vmatpush3.msra.mxu0 %v16609_v2  ;;  %14220 = vmatpush3.msra.mxu1 %v16609_v2  ;;  %v83_v18 = vld [vmem:[%s21194_s3 + $0x18] sm:$0xff]  ;;  %v84_v20 = vld [vmem:[%s21194_s3 + $0x20] sm:$0xff]  ;;  %v85_v22 = vld [vmem:[%s21194_s3 + $0x28] sm:$0xff] }
  0x14   :  { %14179 = vmatprep.subr.mxu0 %v16618_v3  ;;  %14221 = vmatprep.subr.mxu1 %v16618_v3  ;;  %v12469_v19 = vld [vmem:[%s21194_s3 + $0x78] sm:$0xff]  ;;  %v12470_v21 = vld [vmem:[%s21194_s3 + $0x80] sm:$0xff]  ;;  %v12471_v23 = vld [vmem:[%s21194_s3 + $0x88] sm:$0xff] }
  0x15   :  { %14180 = vmatpush3.msra.mxu0 %v16618_v3  ;;  %14222 = vmatpush3.msra.mxu1 %v16618_v3  ;;  %v86_v24 = vld [vmem:[%s21194_s3 + $0x30] sm:$0xff]  ;;  %v87_v26 = vld [vmem:[%s21194_s3 + $0x38] sm:$0xff]  ;;  %v88_v28 = vld [vmem:[%s21194_s3 + $0x40] sm:$0xff] }
  0x16   :  { %14181 = vmatprep.subr.mxu0 %v16627_v4  ;;  %14223 = vmatprep.subr.mxu1 %v16627_v4  ;;  %v12472_v25 = vld [vmem:[%s21194_s3 + $0x90] sm:$0xff]  ;;  %v12473_v27 = vld [vmem:[%s21194_s3 + $0x98] sm:$0xff]  ;;  %v12474_v29 = vld [vmem:[%s21194_s3 + $0xa0] sm:$0xff] }
  0x17   :  { %14182 = vmatpush3.msra.mxu0 %v16627_v4  ;;  %14224 = vmatpush3.msra.mxu1 %v16627_v4  ;;  %v89_v30 = vld [vmem:[%s21194_s3 + $0x48] sm:$0xff]  ;;  %v90_v32 = vld [vmem:[%s21194_s3 + $0x50] sm:$0xff]  ;;  %v91_v34 = vld [vmem:[%s21194_s3 + $0x58] sm:$0xff] }
  0x18   :  { %14183 = vmatprep.subr.mxu0 %v16636_v5  ;;  %14225 = vmatprep.subr.mxu1 %v16636_v5  ;;  %v12475_v31 = vld [vmem:[%s21194_s3 + $0xa8] sm:$0xff]  ;;  %v12476_v33 = vld [vmem:[%s21194_s3 + $0xb0] sm:$0xff]  ;;  %v12477_v35 = vld [vmem:[%s21194_s3 + $0xb8] sm:$0xff] }
  0x19   :  { %14184 = vmatpush3.msra.mxu0 %v16636_v5  ;;  %14226 = vmatpush3.msra.mxu1 %v16636_v5  ;;  %v12490_v36 = vld [vmem:[%s21194_s3 + $0xc0] sm:$0xff]  ;;  %v12491_v38 = vld [vmem:[%s21194_s3 + $0xc8] sm:$0xff]  ;;  %v12492_v40 = vld [vmem:[%s21194_s3 + $0xd0] sm:$0xff] }
  0x1a   :  { %14185 = vmatprep.subr.mxu0 %v16645_v6  ;;  %14227 = vmatprep.subr.mxu1 %v16645_v6  ;;  %v12514_v37 = vld [vmem:[%s21194_s3 + $0x120] sm:$0xff]  ;;  %v12515_v39 = vld [vmem:[%s21194_s3 + $0x128] sm:$0xff]  ;;  %v12516_v41 = vld [vmem:[%s21194_s3 + $0x130] sm:$0xff] }
  0x1b   :  { %14186 = vmatpush3.msra.mxu0 %v16645_v6  ;;  %14228 = vmatpush3.msra.mxu1 %v16645_v6  ;;  %v12538_v42 = vld [vmem:[%s21195_s27 + $0x4] sm:$0xf]  ;;  %v12493_v43 = vld [vmem:[%s21194_s3 + $0xd8] sm:$0xff]  ;;  %v12495_v47 = vld [vmem:[%s21194_s3 + $0xe8] sm:$0xff] }
  0x1c   :  { %14187 = vmatprep.subr.mxu0 %v16654_v7  ;;  %14229 = vmatprep.subr.mxu1 %v16654_v7  ;;  %v12517_v44 = vld [vmem:[%s21194_s3 + $0x138] sm:$0xff]  ;;  %v12494_v45 = vld [vmem:[%s21194_s3 + $0xe0] sm:$0xff]  ;;  %v12519_v48 = vld [vmem:[%s21194_s3 + $0x148] sm:$0xff] }
  0x1d   :  { %14188 = vmatpush3.msra.mxu0 %v16654_v7  ;;  %14230 = vmatpush3.msra.mxu1 %v16654_v7  ;;  %v12518_v46 = vld [vmem:[%s21194_s3 + $0x140] sm:$0xff]  ;;  %v12496_v49 = vld [vmem:[%s21194_s3 + $0xf0] sm:$0xff]  ;;  %v12497_v51 = vld [vmem:[%s21194_s3 + $0xf8] sm:$0xff] }
  0x1e   :  { %14189 = vmatprep.subr.mxu0 %v16663_v8  ;;  %14231 = vmatprep.subr.mxu1 %v16663_v8  ;;  %v12520_v50 = vld [vmem:[%s21194_s3 + $0x150] sm:$0xff]  ;;  %v12521_v52 = vld [vmem:[%s21194_s3 + $0x158] sm:$0xff]  ;;  %v12498_v53 = vld [vmem:[%s21194_s3 + $0x100] sm:$0xff] }
  0x1f   :  { %14190 = vmatpush3.msra.mxu0 %v16663_v8  ;;  %14232 = vmatpush3.msra.mxu1 %v16663_v8  ;;  %v12522_v54 = vld [vmem:[%s21194_s3 + $0x160] sm:$0xff]  ;;  %v12499_v55 = vld [vmem:[%s21194_s3 + $0x108] sm:$0xff]  ;;  %v12500_v57 = vld [vmem:[%s21194_s3 + $0x110] sm:$0xff] }
  0x20   :  { %14191 = vmatprep.subr.mxu0 %v16672_v9  ;;  %14233 = vmatprep.subr.mxu1 %v16672_v9  ;;  %v12523_v56 = vld [vmem:[%s21194_s3 + $0x168] sm:$0xff]  ;;  %v12524_v58 = vld [vmem:[%s21194_s3 + $0x170] sm:$0xff]  ;;  %v12501_v59 = vld [vmem:[%s21194_s3 + $0x118] sm:$0xff] }
  0x21   :  { %14192 = vmatpush3.msra.mxu0 %v16672_v9  ;;  %14234 = vmatpush3.msra.mxu1 %v16672_v9  ;;  %v12525_v60 = vld [vmem:[%s21194_s3 + $0x178] sm:$0xff]  ;;  %v12553_v61 = vld [vmem:[%s21195_s27 + $0xc] sm:$0xf]  ;;  %v12567_v62 = vld [vmem:[%s21195_s27 + $0x10] sm:$0xf] }
  0x22   :  { %14193 = vmatprep.subr.mxu0 %v16681_v10  ;;  %14235 = vmatprep.subr.mxu1 %v16681_v10 }
  0x23   :  { %14194 = vmatpush3.msra.mxu0 %v16681_v10  ;;  %14236 = vmatpush3.msra.mxu1 %v16681_v10 }
  0x24   :  { %14195 = vmatprep.subr.mxu0 %v16690_v11  ;;  %14237 = vmatprep.subr.mxu1 %v16690_v11 }
  0x25   :  { %14196 = vmatpush3.msra.mxu0 %v16690_v11  ;;  %14197 = vmatprep.mubr.msk.f32.mxu0 %vm92_vm0, %v80_v12 }
  0x26   :  { %14238 = vmatpush3.msra.mxu1 %v16690_v11  ;;  %14239 = vmatprep.mubr.msk.f32.mxu1 %vm92_vm0, %v12466_v13 }
  0x27   :  { %14198 = vmatmul.mubr.msk.f32.vlgmr.msra.gmra.mxu0 %vm92_vm0, %v81_v14  ;;  %14240 = vmatmul.mubr.msk.f32.vlgmr.msra.gmra.mxu1 %vm92_vm0, %v12467_v15  ;;  %v12552_v15 = vld [vmem:[%s21195_s27 + $0x8] sm:$0xf] }
  0x28   :  { %14257 = vmatprep.subr.mxu0 %v16595_v0  ;;  %14299 = vmatprep.subr.mxu1 %v16595_v0 }
  0x29   :  { %14258 = vmatpush3.msra.mxu0 %v16595_v0  ;;  %14300 = vmatpush3.msra.mxu1 %v16595_v0 }
  0x2a   :  { %14259 = vmatprep.subr.mxu0 %v16600_v1  ;;  %14301 = vmatprep.subr.mxu1 %v16600_v1 }
  0x2b   :  { %14200 = vmatprep.mubr.msk.f32.mxu0 %vm92_vm0, %v82_v16  ;;  %14242 = vmatprep.mubr.msk.f32.mxu1 %vm92_vm0, %v12468_v17 }
  0x2c   :  { %14260 = vmatpush3.msra.mxu0 %v16600_v1  ;;  %14302 = vmatpush3.msra.mxu1 %v16600_v1 }
  0x2d   :  { %14201 = vmatmul.mubr.msk.f32.gmra.mxu0 %vm92_vm0, %v83_v18  ;;  %14243 = vmatmul.mubr.msk.f32.gmra.mxu1 %vm92_vm0, %v12469_v19 }
  0x2e   :  { %14261 = vmatprep.subr.mxu0 %v16609_v2  ;;  %14303 = vmatprep.subr.mxu1 %v16609_v2 }
  0x2f   :  { %14262 = vmatpush3.msra.mxu0 %v16609_v2  ;;  %14304 = vmatpush3.msra.mxu1 %v16609_v2 }
  0x30   :  { %14263 = vmatprep.subr.mxu0 %v16618_v3  ;;  %14305 = vmatprep.subr.mxu1 %v16618_v3 }
  0x31   :  { %14203 = vmatprep.mubr.msk.f32.mxu0 %vm92_vm0, %v84_v20  ;;  %14245 = vmatprep.mubr.msk.f32.mxu1 %vm92_vm0, %v12470_v21 }
  0x32   :  { %14264 = vmatpush3.msra.mxu0 %v16618_v3  ;;  %14306 = vmatpush3.msra.mxu1 %v16618_v3 }
  0x33   :  { %14204 = vmatmul.mubr.msk.f32.gmra.mxu0 %vm92_vm0, %v85_v22  ;;  %14246 = vmatmul.mubr.msk.f32.gmra.mxu1 %vm92_vm0, %v12471_v23 }
  0x34   :  { %14265 = vmatprep.subr.mxu0 %v16627_v4  ;;  %14307 = vmatprep.subr.mxu1 %v16627_v4 }
  0x35   :  { %14266 = vmatpush3.msra.mxu0 %v16627_v4  ;;  %14308 = vmatpush3.msra.mxu1 %v16627_v4 }
  0x36   :  { %14267 = vmatprep.subr.mxu0 %v16636_v5  ;;  %14309 = vmatprep.subr.mxu1 %v16636_v5 }
  0x37   :  { %14206 = vmatprep.mubr.msk.f32.mxu0 %vm92_vm0, %v86_v24  ;;  %14248 = vmatprep.mubr.msk.f32.mxu1 %vm92_vm0, %v12472_v25 }
  0x38   :  { %14268 = vmatpush3.msra.mxu0 %v16636_v5  ;;  %14310 = vmatpush3.msra.mxu1 %v16636_v5 }
  0x39   :  { %14207 = vmatmul.mubr.msk.f32.gmra.mxu0 %vm92_vm0, %v87_v26  ;;  %14249 = vmatmul.mubr.msk.f32.gmra.mxu1 %vm92_vm0, %v12473_v27 }
  0x3a   :  { %14269 = vmatprep.subr.mxu0 %v16645_v6  ;;  %14311 = vmatprep.subr.mxu1 %v16645_v6 }
  0x3b   :  { %14270 = vmatpush3.msra.mxu0 %v16645_v6  ;;  %14312 = vmatpush3.msra.mxu1 %v16645_v6 }
  0x3c   :  { %14271 = vmatprep.subr.mxu0 %v16654_v7  ;;  %14313 = vmatprep.subr.mxu1 %v16654_v7 }
  0x3d   :  { %14209 = vmatprep.mubr.msk.f32.mxu0 %vm92_vm0, %v88_v28  ;;  %14251 = vmatprep.mubr.msk.f32.mxu1 %vm92_vm0, %v12474_v29 }
  0x3e   :  { %14272 = vmatpush3.msra.mxu0 %v16654_v7  ;;  %14314 = vmatpush3.msra.mxu1 %v16654_v7 }
  0x3f   :  { %14210 = vmatmul.mubr.msk.f32.gmra.mxu0 %vm92_vm0, %v89_v30  ;;  %14252 = vmatmul.mubr.msk.f32.gmra.mxu1 %vm92_vm0, %v12475_v31 }
  0x40   :  { %14273 = vmatprep.subr.mxu0 %v16663_v8  ;;  %14315 = vmatprep.subr.mxu1 %v16663_v8 }
  0x41   :  { %14274 = vmatpush3.msra.mxu0 %v16663_v8  ;;  %14316 = vmatpush3.msra.mxu1 %v16663_v8 }
  0x42   :  { %14275 = vmatprep.subr.mxu0 %v16672_v9  ;;  %14317 = vmatprep.subr.mxu1 %v16672_v9 }
  0x43   :  { %14212 = vmatprep.mubr.msk.f32.mxu0 %vm92_vm0, %v90_v32  ;;  %14254 = vmatprep.mubr.msk.f32.mxu1 %vm92_vm0, %v12476_v33  ;;  %v777_v32 = vld [vmem:[%s21195_s27] sm:$0xf] }
  0x44   :  { %14276 = vmatpush3.msra.mxu0 %v16672_v9  ;;  %14318 = vmatpush3.msra.mxu1 %v16672_v9 }
  0x45   :  { %14213 = vmatmul.mubr.msk.f32.gmra.mxu0 %vm92_vm0, %v91_v34  ;;  %14255 = vmatmul.mubr.msk.f32.gmra.mxu1 %vm92_vm0, %v12477_v35 }
  0x46   :  { %14277 = vmatprep.subr.mxu0 %v16681_v10  ;;  %14319 = vmatprep.subr.mxu1 %v16681_v10 }
  0x47   :  { %14278 = vmatpush3.msra.mxu0 %v16681_v10  ;;  %14320 = vmatpush3.msra.mxu1 %v16681_v10 }
  0x48   :  { %14279 = vmatprep.subr.mxu0 %v16690_v11  ;;  %14321 = vmatprep.subr.mxu1 %v16690_v11 }
  0x49   :  { %14280 = vmatpush3.msra.mxu0 %v16690_v11  ;;  %14281 = vmatprep.mubr.msk.f32.mxu0 %vm92_vm0, %v12490_v36 }
  0x4a   :  { %14322 = vmatpush3.msra.mxu1 %v16690_v11  ;;  %14323 = vmatprep.mubr.msk.f32.mxu1 %vm92_vm0, %v12514_v37 }
  0x4b   :  { %14282 = vmatmul.mubr.msk.f32.vlgmr.msra.gmra.mxu0 %vm92_vm0, %v12491_v38  ;;  %14324 = vmatmul.mubr.msk.f32.vlgmr.msra.gmra.mxu1 %vm92_vm0, %v12515_v39 }
  0x4c   :  { %14284 = vmatprep.mubr.msk.f32.mxu0 %vm92_vm0, %v12492_v40  ;;  %14326 = vmatprep.mubr.msk.f32.mxu1 %vm92_vm0, %v12516_v41  ;;  %v12608_v41 = vld [vmem:[%s21196_s30 + $0x4] sm:$0xf] }
  0x4d   :  { %16199 = vmatprep.subr.msk.mxu1 %vm817_vm1, %v12538_v42  ;;  %14341 = vmatprep.subr.msk.mxu0 %vm817_vm1, %v12538_v42 }
  0x4e   :  { %16200 = vmatpush3.msk.msra.mxu1 %vm817_vm1, %v12538_v42  ;;  %14342 = vmatpush3.msk.msra.mxu0 %vm817_vm1, %v12538_v42  ;;  %v12623_v42 = vld [vmem:[%s21196_s30 + $0xc] sm:$0xf] }
  0x4f   :  { %14285 = vmatmul.mubr.msk.f32.gmra.mxu0 %vm92_vm0, %v12493_v43  ;;  %14327 = vmatmul.mubr.msk.f32.gmra.mxu1 %vm92_vm0, %v12517_v44 }
  0x50   :  { %14287 = vmatprep.mubr.msk.f32.mxu0 %vm92_vm0, %v12494_v45  ;;  %14329 = vmatprep.mubr.msk.f32.mxu1 %vm92_vm0, %v12518_v46 }
  0x51   :  { %14361 = vmatprep.subr.msk.mxu1 %vm817_vm1, %v12553_v61  ;;  %14381 = vmatprep.subr.msk.mxu0 %vm817_vm1, %v12567_v62 }
  0x53   :  { %14288 = vmatmul.mubr.msk.f32.gmra.mxu0 %vm92_vm0, %v12495_v47  ;;  %14330 = vmatmul.mubr.msk.f32.gmra.mxu1 %vm92_vm0, %v12519_v48 }
  0x54   :  { %14290 = vmatprep.mubr.msk.f32.mxu0 %vm92_vm0, %v12496_v49  ;;  %14332 = vmatprep.mubr.msk.f32.mxu1 %vm92_vm0, %v12520_v50 }
  0x57   :  { %14291 = vmatmul.mubr.msk.f32.gmra.mxu0 %vm92_vm0, %v12497_v51  ;;  %14333 = vmatmul.mubr.msk.f32.gmra.mxu1 %vm92_vm0, %v12521_v52 }
  0x58   :  { %14293 = vmatprep.mubr.msk.f32.mxu0 %vm92_vm0, %v12498_v53  ;;  %14335 = vmatprep.mubr.msk.f32.mxu1 %vm92_vm0, %v12522_v54 }
  0x5b   :  { %14294 = vmatmul.mubr.msk.f32.gmra.mxu0 %vm92_vm0, %v12499_v55  ;;  %14336 = vmatmul.mubr.msk.f32.gmra.mxu1 %vm92_vm0, %v12523_v56 }
  0x5c   :  { %14296 = vmatprep.mubr.msk.f32.mxu0 %vm92_vm0, %v12500_v57  ;;  %14338 = vmatprep.mubr.msk.f32.mxu1 %vm92_vm0, %v12524_v58 }
  0x5f   :  { %14297 = vmatmul.mubr.msk.f32.gmra.mxu0 %vm92_vm0, %v12501_v59  ;;  %14339 = vmatmul.mubr.msk.f32.gmra.mxu1 %vm92_vm0, %v12525_v60 }
  0xe7   :  { %v16955_v63 = vpop.f32.mrf.mxu0  ;;  %v16957_v12 = vpop.f32.mrf.mxu1 }
  0xe9   :  { %v16959_v13 = vpop.f32.mrf.mxu0  ;;  %v16961_v14 = vpop.f32.mrf.mxu1 }
  0xea   :  { %14343 = vmatprep.mubr.msk.f32.mxu0 %vm780_vm2, %v16959_v13 }
  0xeb   :  { %14344 = vmatmul.mubr.msk.f32.vlgmr.msra.gmra.mxu0 %vm780_vm2, %v16955_v63 }
  0xec   :  { %14382 = vmatpush3.msk.msra.mxu0 %vm817_vm1, %v12567_v62 }
  0xed   :  { %v16971_v16 = vpop.f32.mrf.mxu0  ;;  %v16973_v17 = vpop.f32.mrf.mxu1  ;;  %14421 = vmatprep.subr.msk.mxu0 %vm817_vm1, %v12552_v15 }
  0xef   :  { %v16976_v18 = vpop.f32.mrf.mxu0  ;;  %v16978_v19 = vpop.f32.mrf.mxu1 }
  0xf0   :  { %14346 = vmatprep.mubr.msk.f32.mxu0 %vm780_vm2, %v16976_v18 }
  0xf1   :  { %14347 = vmatmul.mubr.msk.f32.gmra.mxu0 %vm780_vm2, %v16971_v16 }
  0xf3   :  { %v16984_v20 = vpop.f32.mrf.mxu0  ;;  %v16986_v21 = vpop.f32.mrf.mxu1 }
  0xf5   :  { %v16988_v22 = vpop.f32.mrf.mxu0  ;;  %v16990_v23 = vpop.f32.mrf.mxu1 }
  0xf6   :  { %14349 = vmatprep.mubr.msk.f32.mxu0 %vm780_vm2, %v16988_v22 }
  0xf7   :  { %14350 = vmatmul.mubr.msk.f32.gmra.mxu0 %vm780_vm2, %v16984_v20 }
  0xf9   :  { %v16996_v24 = vpop.f32.mrf.mxu0  ;;  %v16998_v25 = vpop.f32.mrf.mxu1 }
  0xfb   :  { %v17000_v26 = vpop.f32.mrf.mxu0  ;;  %v17002_v27 = vpop.f32.mrf.mxu1 }
  0xfc   :  { %14352 = vmatprep.mubr.msk.f32.mxu0 %vm780_vm2, %v17000_v26 }
  0xfd   :  { %14353 = vmatmul.mubr.msk.f32.gmra.mxu0 %vm780_vm2, %v16996_v24 }
  0xff   :  { %v17008_v28 = vpop.f32.mrf.mxu0  ;;  %v17010_v29 = vpop.f32.mrf.mxu1 }
 0x101   :  { %v17012_v30 = vpop.f32.mrf.mxu0  ;;  %v17014_v31 = vpop.f32.mrf.mxu1 }
 0x102   :  { %14355 = vmatprep.mubr.msk.f32.mxu1 %vm780_vm2, %v17012_v30 }
 0x103   :  { %14356 = vmatmul.mubr.msk.f32.vlgmr.msra.gmra.mxu1 %vm780_vm2, %v17008_v28 }
 0x104   :  { %14362 = vmatpush3.msk.msra.mxu1 %vm817_vm1, %v12553_v61 }
 0x105   :  { %v17024_v33 = vpop.f32.mrf.mxu0  ;;  %v17026_v34 = vpop.f32.mrf.mxu1  ;;  %14401 = vmatprep.subr.msk.mxu1 %vm817_vm1, %v777_v32 }
 0x107   :  { %v17029_v35 = vpop.f32.mrf.mxu0  ;;  %v17031_v36 = vpop.f32.mrf.mxu1 }
 0x108   :  { %14358 = vmatprep.mubr.msk.f32.mxu1 %vm780_vm2, %v17029_v35 }
 0x109   :  { %14359 = vmatmul.mubr.msk.f32.gmra.mxu1 %vm780_vm2, %v17024_v33 }
 0x10b   :  { %v17037_v37 = vpop.f32.mrf.mxu0  ;;  %v17039_v38 = vpop.f32.mrf.mxu1 }
 0x10d   :  { %v17041_v39 = vpop.f32.mrf.mxu0  ;;  %v17043_v40 = vpop.f32.mrf.mxu1 }
 0x10e   :  { %14363 = vmatprep.mubr.msk.f32.mxu1 %vm780_vm2, %v17041_v39  ;;  %14383 = vmatprep.mubr.msk.f32.mxu0 %vm780_vm2, %v17043_v40 }
 0x10f   :  { %v17055_v43 = vpop.f32.mrf.mxu0  ;;  %v17057_v44 = vpop.f32.mrf.mxu1  ;;  %14364 = vmatmul.mubr.msk.f32.vlgmr.msra.gmra.mxu1 %vm780_vm2, %v17037_v37  ;;  %14384 = vmatmul.mubr.msk.f32.vlgmr.msra.gmra.mxu0 %vm780_vm2, %v17039_v38 }
 0x110   :  { %14402 = vmatpush3.msk.msra.mxu1 %vm817_vm1, %v777_v32  ;;  %14422 = vmatpush3.msk.msra.mxu0 %vm817_vm1, %v12552_v15  ;;  %v12637_v15 = vld [vmem:[%s21196_s30 + $0x10] sm:$0xf]  ;;  %v1651_v32 = vld [vmem:[%s21196_s30] sm:$0xf] }
 0x111   :  { %v17065_v45 = vpop.f32.mrf.mxu0  ;;  %v17067_v46 = vpop.f32.mrf.mxu1  ;;  %14441 = vmatprep.subr.msk.mxu1 %vm817_vm1, %v12608_v41  ;;  %14461 = vmatprep.subr.msk.mxu0 %vm817_vm1, %v12623_v42 }
 0x112   :  { %14366 = vmatprep.mubr.msk.f32.mxu1 %vm780_vm2, %v17065_v45  ;;  %14386 = vmatprep.mubr.msk.f32.mxu0 %vm780_vm2, %v17067_v46 }
 0x113   :  { %v17075_v47 = vpop.f32.mrf.mxu0  ;;  %v17077_v48 = vpop.f32.mrf.mxu1  ;;  %14367 = vmatmul.mubr.msk.f32.gmra.mxu1 %vm780_vm2, %v17055_v43  ;;  %14387 = vmatmul.mubr.msk.f32.gmra.mxu0 %vm780_vm2, %v17057_v44 }
 0x115   :  { %v17083_v49 = vpop.f32.mrf.mxu0  ;;  %v17085_v50 = vpop.f32.mrf.mxu1 }
 0x116   :  { %14369 = vmatprep.mubr.msk.f32.mxu1 %vm780_vm2, %v17083_v49  ;;  %14389 = vmatprep.mubr.msk.f32.mxu0 %vm780_vm2, %v17085_v50 }
 0x117   :  { %v17091_v51 = vpop.f32.mrf.mxu0  ;;  %v17093_v52 = vpop.f32.mrf.mxu1  ;;  %14370 = vmatmul.mubr.msk.f32.gmra.mxu1 %vm780_vm2, %v17075_v47  ;;  %14390 = vmatmul.mubr.msk.f32.gmra.mxu0 %vm780_vm2, %v17077_v48 }
 0x119   :  { %v17099_v53 = vpop.f32.mrf.mxu0  ;;  %v17101_v54 = vpop.f32.mrf.mxu1 }
 0x11a   :  { %14372 = vmatprep.mubr.msk.f32.mxu1 %vm780_vm2, %v17099_v53  ;;  %14392 = vmatprep.mubr.msk.f32.mxu0 %vm780_vm2, %v17101_v54 }
 0x11b   :  { %v17107_v55 = vpop.f32.mrf.mxu0  ;;  %v17109_v56 = vpop.f32.mrf.mxu1  ;;  %14373 = vmatmul.mubr.msk.f32.gmra.mxu1 %vm780_vm2, %v17091_v51  ;;  %14393 = vmatmul.mubr.msk.f32.gmra.mxu0 %vm780_vm2, %v17093_v52 }
 0x11d   :  { %v17115_v57 = vpop.f32.mrf.mxu0  ;;  %v17117_v58 = vpop.f32.mrf.mxu1 }
 0x11e   :  { %14375 = vmatprep.mubr.msk.f32.mxu1 %vm780_vm2, %v17115_v57  ;;  %14395 = vmatprep.mubr.msk.f32.mxu0 %vm780_vm2, %v17117_v58 }
 0x11f   :  { %v17123_v59 = vpop.f32.mrf.mxu0  ;;  %v17125_v60 = vpop.f32.mrf.mxu1  ;;  %14376 = vmatmul.mubr.msk.f32.gmra.mxu1 %vm780_vm2, %v17107_v55  ;;  %14396 = vmatmul.mubr.msk.f32.gmra.mxu0 %vm780_vm2, %v17109_v56 }
 0x121   :  { %v17131_v61 = vpop.f32.mrf.mxu0  ;;  %v17133_v62 = vpop.f32.mrf.mxu1 }
 0x122   :  { %14378 = vmatprep.mubr.msk.f32.mxu1 %vm780_vm2, %v17131_v61  ;;  %14398 = vmatprep.mubr.msk.f32.mxu0 %vm780_vm2, %v17133_v62 }
 0x123   :  { %14379 = vmatmul.mubr.msk.f32.gmra.mxu1 %vm780_vm2, %v17123_v59  ;;  %14399 = vmatmul.mubr.msk.f32.gmra.mxu0 %vm780_vm2, %v17125_v60 }
 0x124   :  { %14423 = vmatprep.mubr.msk.f32.mxu0 %vm780_vm2, %v16961_v14  ;;  %14403 = vmatprep.mubr.msk.f32.mxu1 %vm780_vm2, %v16690_v11 }
 0x127   :  { %14404 = vmatmul.mubr.msk.f32.vlgmr.msra.gmra.mxu1 %vm780_vm2, %v16681_v10  ;;  %14424 = vmatmul.mubr.msk.f32.vlgmr.msra.gmra.mxu0 %vm780_vm2, %v16957_v12 }
 0x128   :  { %14426 = vmatprep.mubr.msk.f32.mxu0 %vm780_vm2, %v16978_v19  ;;  %14442 = vmatpush3.msk.msra.mxu1 %vm817_vm1, %v12608_v41  ;;  %v12622_v41 = vld [vmem:[%s21196_s30 + $0x8] sm:$0xf] }
 0x129   :  { %14406 = vmatprep.mubr.msk.f32.mxu1 %vm780_vm2, %v16672_v9  ;;  %14462 = vmatpush3.msk.msra.mxu0 %vm817_vm1, %v12623_v42 }
 0x12a   :  { %14481 = vmatprep.subr.msk.mxu1 %vm817_vm1, %v12637_v15  ;;  %14501 = vmatprep.subr.msk.mxu0 %vm817_vm1, %v1651_v32 }
 0x12b   :  { %14407 = vmatmul.mubr.msk.f32.gmra.mxu1 %vm780_vm2, %v16663_v8  ;;  %14427 = vmatmul.mubr.msk.f32.gmra.mxu0 %vm780_vm2, %v16973_v17 }
 0x12c   :  { %14429 = vmatprep.mubr.msk.f32.mxu0 %vm780_vm2, %v16990_v23  ;;  %14409 = vmatprep.mubr.msk.f32.mxu1 %vm780_vm2, %v16654_v7 }
 0x12f   :  { %14410 = vmatmul.mubr.msk.f32.gmra.mxu1 %vm780_vm2, %v16645_v6  ;;  %14430 = vmatmul.mubr.msk.f32.gmra.mxu0 %vm780_vm2, %v16986_v21 }
 0x130   :  { %14432 = vmatprep.mubr.msk.f32.mxu0 %vm780_vm2, %v17002_v27  ;;  %14412 = vmatprep.mubr.msk.f32.mxu1 %vm780_vm2, %v16636_v5 }
 0x133   :  { %14413 = vmatmul.mubr.msk.f32.gmra.mxu1 %vm780_vm2, %v16627_v4  ;;  %14433 = vmatmul.mubr.msk.f32.gmra.mxu0 %vm780_vm2, %v16998_v25 }
 0x134   :  { %14435 = vmatprep.mubr.msk.f32.mxu0 %vm780_vm2, %v17014_v31  ;;  %14415 = vmatprep.mubr.msk.f32.mxu1 %vm780_vm2, %v16618_v3 }
 0x137   :  { %14416 = vmatmul.mubr.msk.f32.gmra.mxu1 %vm780_vm2, %v16609_v2  ;;  %14436 = vmatmul.mubr.msk.f32.gmra.mxu0 %vm780_vm2, %v17010_v29 }
 0x138   :  { %14438 = vmatprep.mubr.msk.f32.mxu0 %vm780_vm2, %v17031_v36  ;;  %14418 = vmatprep.mubr.msk.f32.mxu1 %vm780_vm2, %v16600_v1 }
 0x13b   :  { %14419 = vmatmul.mubr.msk.f32.gmra.mxu1 %vm780_vm2, %v16595_v0  ;;  %14439 = vmatmul.mubr.msk.f32.gmra.mxu0 %vm780_vm2, %v17026_v34 }
 0x13c   :  { %14443 = vmatprep.mubr.msk.f32.mxu1 %vm780_vm2, %v16959_v13  ;;  %14463 = vmatprep.mubr.msk.f32.mxu0 %vm780_vm2, %v17041_v39  ;;  %v12714_v13 = vld [vmem:[%s21200_s2 + $0xe0] sm:$0xff] }
 0x13f   :  { %14444 = vmatmul.mubr.msk.f32.vlgmr.msra.gmra.mxu1 %vm780_vm2, %v16955_v63  ;;  %14464 = vmatmul.mubr.msk.f32.vlgmr.msra.gmra.mxu0 %vm780_vm2, %v17037_v37  ;;  %v20975_v63 = vmov 0.0  }
 0x140   :  { %14446 = vmatprep.mubr.msk.f32.mxu1 %vm780_vm2, %v16976_v18  ;;  %14466 = vmatprep.mubr.msk.f32.mxu0 %vm780_vm2, %v17065_v45  ;;  %v12712_v18 = vld [vmem:[%s21200_s2 + $0xd0] sm:$0xff] }
 0x141   :  { %14482 = vmatpush3.msk.msra.mxu1 %vm817_vm1, %v12637_v15  ;;  %14502 = vmatpush3.msk.msra.mxu0 %vm817_vm1, %v1651_v32 }
 0x142   :  { %14521 = vmatprep.subr.msk.mxu1 %vm817_vm1, %v12622_v41  ;;  %14541 = vmatprep.subr.mxu0 %v20975_v63 }
 0x143   :  { %14447 = vmatmul.mubr.msk.f32.gmra.mxu1 %vm780_vm2, %v16971_v16  ;;  %14467 = vmatmul.mubr.msk.f32.gmra.mxu0 %vm780_vm2, %v17055_v43  ;;  %v12713_v16 = vld [vmem:[%s21200_s2 + $0xd8] sm:$0xff] }
 0x144   :  { %14449 = vmatprep.mubr.msk.f32.mxu1 %vm780_vm2, %v16988_v22  ;;  %14469 = vmatprep.mubr.msk.f32.mxu0 %vm780_vm2, %v17083_v49  ;;  %v12694_v22 = vld [vmem:[%s21200_s2 + $0x50] sm:$0xff] }
 0x147   :  { %14450 = vmatmul.mubr.msk.f32.gmra.mxu1 %vm780_vm2, %v16984_v20  ;;  %14470 = vmatmul.mubr.msk.f32.gmra.mxu0 %vm780_vm2, %v17075_v47  ;;  %v12695_v20 = vld [vmem:[%s21200_s2 + $0x58] sm:$0xff] }
 0x148   :  { %14452 = vmatprep.mubr.msk.f32.mxu1 %vm780_vm2, %v17000_v26  ;;  %14472 = vmatprep.mubr.msk.f32.mxu0 %vm780_vm2, %v17099_v53  ;;  %v17444_v26 = vld [vmem:[%s21200_s2 + $0x38] sm:$0xff] }
 0x14b   :  { %14453 = vmatmul.mubr.msk.f32.gmra.mxu1 %vm780_vm2, %v16996_v24  ;;  %14473 = vmatmul.mubr.msk.f32.gmra.mxu0 %vm780_vm2, %v17091_v51 }
 0x14c   :  { %14455 = vmatprep.mubr.msk.f32.mxu1 %vm780_vm2, %v17012_v30  ;;  %14475 = vmatprep.mubr.msk.f32.mxu0 %vm780_vm2, %v17115_v57  ;;  %v17455_v30 = vld [vmem:[%s21200_s2 + $0x138] sm:$0xff] }
 0x14f   :  { %14456 = vmatmul.mubr.msk.f32.gmra.mxu1 %vm780_vm2, %v17008_v28  ;;  %14476 = vmatmul.mubr.msk.f32.gmra.mxu0 %vm780_vm2, %v17107_v55 }
 0x150   :  { %14458 = vmatprep.mubr.msk.f32.mxu1 %vm780_vm2, %v17029_v35  ;;  %14478 = vmatprep.mubr.msk.f32.mxu0 %vm780_vm2, %v17131_v61 }
 0x153   :  { %14459 = vmatmul.mubr.msk.f32.gmra.mxu1 %vm780_vm2, %v17024_v33  ;;  %14479 = vmatmul.mubr.msk.f32.gmra.mxu0 %vm780_vm2, %v17123_v59 }
 0x154   :  { %14483 = vmatprep.mubr.msk.f32.mxu1 %vm780_vm2, %v17043_v40  ;;  %14503 = vmatprep.mubr.msk.f32.mxu0 %vm780_vm2, %v16690_v11  ;;  %v12715_v11 = vld [vmem:[%s21200_s2 + $0xe8] sm:$0xff] }
 0x157   :  { %14484 = vmatmul.mubr.msk.f32.vlgmr.msra.gmra.mxu1 %vm780_vm2, %v17039_v38  ;;  %14504 = vmatmul.mubr.msk.f32.vlgmr.msra.gmra.mxu0 %vm780_vm2, %v16681_v10  ;;  %v12699_v10 = vld [vmem:[%s21200_s2 + $0x78] sm:$0xff] }
 0x158   :  { %14486 = vmatprep.mubr.msk.f32.mxu1 %vm780_vm2, %v17067_v46  ;;  %14522 = vmatpush3.msk.msra.mxu1 %vm817_vm1, %v12622_v41 }
 0x159   :  { %14506 = vmatprep.mubr.msk.f32.mxu0 %vm780_vm2, %v16672_v9  ;;  %14542 = vmatpush3.msra.mxu0 %v20975_v63  ;;  %v12716_v9 = vld [vmem:[%s21200_s2 + $0xf0] sm:$0xff] }
 0x15a   :  { %14546 = vmatprep.subr.mxu1 %v20975_v63  ;;  %14551 = vmatprep.subr.mxu0 %v20975_v63 }
 0x15b   :  { %14487 = vmatmul.mubr.msk.f32.gmra.mxu1 %vm780_vm2, %v17057_v44  ;;  %14507 = vmatmul.mubr.msk.f32.gmra.mxu0 %vm780_vm2, %v16663_v8  ;;  %v12717_v8 = vld [vmem:[%s21200_s2 + $0xf8] sm:$0xff] }
 0x15c   :  { %14489 = vmatprep.mubr.msk.f32.mxu1 %vm780_vm2, %v17085_v50  ;;  %14509 = vmatprep.mubr.msk.f32.mxu0 %vm780_vm2, %v16654_v7  ;;  %v17388_v7 = vld [vmem:[%s21197_s29 + $0x38] sm:$0xff] }
 0x15d   :  { %21199 = vst [vmem:[#allocation3_spill] sm:$0xff] %v17388_v7 }
 0x15f   :  { %14490 = vmatmul.mubr.msk.f32.gmra.mxu1 %vm780_vm2, %v17077_v48  ;;  %14510 = vmatmul.mubr.msk.f32.gmra.mxu0 %vm780_vm2, %v16645_v6  ;;  %v17378_v6 = vld [vmem:[%s21197_s29 + $0x30] sm:$0xff] }
 0x160   :  { %14492 = vmatprep.mubr.msk.f32.mxu1 %vm780_vm2, %v17101_v54  ;;  %14512 = vmatprep.mubr.msk.f32.mxu0 %vm780_vm2, %v16636_v5  ;;  %v17373_v5 = vld [vmem:[%s21197_s29 + $0x18] sm:$0xff]  ;;  %21198 = vst [vmem:[#allocation2_spill] sm:$0xff] %v17378_v6 }
 0x163   :  { %14493 = vmatmul.mubr.msk.f32.gmra.mxu1 %vm780_vm2, %v17093_v52  ;;  %14513 = vmatmul.mubr.msk.f32.gmra.mxu0 %vm780_vm2, %v16627_v4  ;;  %v17307_v4 = vld [vmem:[%s21197_s29] sm:$0xff] }
 0x164   :  { %14495 = vmatprep.mubr.msk.f32.mxu1 %vm780_vm2, %v17117_v58  ;;  %14515 = vmatprep.mubr.msk.f32.mxu0 %vm780_vm2, %v16618_v3  ;;  %v17364_v3 = vld [vmem:[%s21197_s29 + $0x10] sm:$0xff] }
 0x167   :  { %14496 = vmatmul.mubr.msk.f32.gmra.mxu1 %vm780_vm2, %v17109_v56  ;;  %14516 = vmatmul.mubr.msk.f32.gmra.mxu0 %vm780_vm2, %v16609_v2  ;;  %v17325_v2 = vld [vmem:[%s21197_s29 + $0x20] sm:$0xff] }
 0x168   :  { %14498 = vmatprep.mubr.msk.f32.mxu1 %vm780_vm2, %v17133_v62  ;;  %14518 = vmatprep.mubr.msk.f32.mxu0 %vm780_vm2, %v16600_v1  ;;  %v17320_v1 = vld [vmem:[%s21197_s29 + $0x8] sm:$0xff] }
 0x16b   :  { %14499 = vmatmul.mubr.msk.f32.gmra.mxu1 %vm780_vm2, %v17125_v60  ;;  %14519 = vmatmul.mubr.msk.f32.gmra.mxu0 %vm780_vm2, %v16595_v0  ;;  %v17337_v0 = vld [vmem:[%s21197_s29 + $0x28] sm:$0xff] }
 0x16c   :  { %14523 = vmatprep.mubr.msk.f32.mxu1 %vm780_vm2, %v16961_v14  ;;  %14543 = vmatprep.mubr.msk.f32.mxu0 %vm2353_vm3, %v17307_v4  ;;  %v12697_v14 = vld [vmem:[%s21200_s2 + $0x68] sm:$0xff] }
 0x16f   :  { %14524 = vmatmul.mubr.msk.f32.vlgmr.msra.gmra.mxu1 %vm780_vm2, %v16957_v12  ;;  %14544 = vmatmul.mubr.msk.f32.vlgmr.msra.gmra.mxu0 %vm2353_vm3, %v17320_v1  ;;  %v12698_v12 = vld [vmem:[%s21200_s2 + $0x70] sm:$0xff] }
 0x170   :  { %14526 = vmatprep.mubr.msk.f32.mxu1 %vm780_vm2, %v16978_v19  ;;  %14547 = vmatpush3.msra.mxu1 %v20975_v63 }
 0x171   :  { %14552 = vmatpush3.msra.mxu0 %v20975_v63  ;;  %14553 = vmatprep.mubr.msk.f32.mxu0 %vm2353_vm3, %v17325_v2 }
 0x172   :  { %14556 = vmatprep.subr.mxu1 %v20975_v63  ;;  %14561 = vmatprep.subr.mxu0 %v12699_v10 }
 0x173   :  { %14527 = vmatmul.mubr.msk.f32.gmra.mxu1 %vm780_vm2, %v16973_v17  ;;  %14554 = vmatmul.mubr.msk.f32.vlgmr.msra.gmra.mxu0 %vm2353_vm3, %v17337_v0  ;;  %v12696_v17 = vld [vmem:[%s21200_s2 + $0x60] sm:$0xff] }
 0x174   :  { %14529 = vmatprep.mubr.msk.f32.mxu1 %vm780_vm2, %v16990_v23  ;;  %14562 = vmatpush3.msra.mxu0 %v12699_v10  ;;  %v12710_v23 = vld [vmem:[%s21200_s2 + $0xc0] sm:$0xff] }
 0x175   :  { %14563 = vmatprep.subr.mxu0 %v12698_v12 }
 0x176   :  { %14564 = vmatpush3.msra.mxu0 %v12698_v12 }
 0x177   :  { %14530 = vmatmul.mubr.msk.f32.gmra.mxu1 %vm780_vm2, %v16986_v21  ;;  %14565 = vmatprep.subr.mxu0 %v12697_v14  ;;  %v12711_v21 = vld [vmem:[%s21200_s2 + $0xc8] sm:$0xff] }
 0x178   :  { %14532 = vmatprep.mubr.msk.f32.mxu1 %vm780_vm2, %v17002_v27  ;;  %14566 = vmatpush3.msra.mxu0 %v12697_v14  ;;  %v12692_v27 = vld [vmem:[%s21200_s2 + $0x40] sm:$0xff] }
 0x179   :  { %14567 = vmatprep.subr.mxu0 %v12696_v17 }
 0x17a   :  { %14568 = vmatpush3.msra.mxu0 %v12696_v17 }
 0x17b   :  { %14533 = vmatmul.mubr.msk.f32.gmra.mxu1 %vm780_vm2, %v16998_v25  ;;  %14569 = vmatprep.subr.mxu0 %v12695_v20  ;;  %v12693_v25 = vld [vmem:[%s21200_s2 + $0x48] sm:$0xff] }
 0x17c   :  { %14535 = vmatprep.mubr.msk.f32.mxu1 %vm780_vm2, %v17014_v31  ;;  %14570 = vmatpush3.msra.mxu0 %v12695_v20 }
 0x17d   :  { %14571 = vmatprep.subr.mxu0 %v12694_v22 }
 0x17e   :  { %14572 = vmatpush3.msra.mxu0 %v12694_v22 }
 0x17f   :  { %14536 = vmatmul.mubr.msk.f32.gmra.mxu1 %vm780_vm2, %v17010_v29  ;;  %14573 = vmatprep.subr.mxu0 %v12693_v25 }
 0x180   :  { %14538 = vmatprep.mubr.msk.f32.mxu1 %vm780_vm2, %v17031_v36  ;;  %14574 = vmatpush3.msra.mxu0 %v12693_v25 }
 0x181   :  { %14575 = vmatprep.subr.mxu0 %v12692_v27 }
 0x182   :  { %14576 = vmatpush3.msra.mxu0 %v12692_v27 }
 0x183   :  { %14539 = vmatmul.mubr.msk.f32.gmra.mxu1 %vm780_vm2, %v17026_v34  ;;  %14599 = vmatprep.subr.mxu0 %v17455_v30 }
 0x184   :  { %14548 = vmatprep.mubr.msk.f32.mxu1 %vm2353_vm3, %v17364_v3 }
 0x187   :  { %14549 = vmatmul.mubr.msk.f32.vlgmr.msra.gmra.mxu1 %vm2353_vm3, %v17373_v5 }
 0x188   :  { %14557 = vmatpush3.msra.mxu1 %v20975_v63  ;;  %14558 = vmatprep.mubr.msk.f32.mxu1 %vm2353_vm3, %v17378_v6 }
 0x189   :  { %14580 = vmatprep.subr.mxu1 %v12717_v8 }
 0x18b   :  { %14559 = vmatmul.mubr.msk.f32.vlgmr.msra.gmra.mxu1 %vm2353_vm3, %v17388_v7 }
 0x18c   :  { %14581 = vmatpush3.msra.mxu1 %v12717_v8 }
 0x18d   :  { %14582 = vmatprep.subr.mxu1 %v12716_v9 }
 0x18e   :  { %14583 = vmatpush3.msra.mxu1 %v12716_v9 }
 0x18f   :  { %14584 = vmatprep.subr.mxu1 %v12715_v11 }
 0x190   :  { %14585 = vmatpush3.msra.mxu1 %v12715_v11 }
 0x191   :  { %14586 = vmatprep.subr.mxu1 %v12714_v13 }
 0x192   :  { %14587 = vmatpush3.msra.mxu1 %v12714_v13 }
 0x193   :  { %14588 = vmatprep.subr.mxu1 %v12713_v16 }
 0x194   :  { %14589 = vmatpush3.msra.mxu1 %v12713_v16 }
 0x195   :  { %14590 = vmatprep.subr.mxu1 %v12712_v18 }
 0x196   :  { %14591 = vmatpush3.msra.mxu1 %v12712_v18 }
 0x197   :  { %14592 = vmatprep.subr.mxu1 %v12711_v21 }
 0x198   :  { %14593 = vmatpush3.msra.mxu1 %v12711_v21 }
 0x199   :  { %14594 = vmatprep.subr.mxu1 %v12710_v23 }
 0x19a   :  { %14595 = vmatpush3.msra.mxu1 %v12710_v23 }
 0x19b   :  { %14618 = vmatprep.subr.mxu1 %v17444_v26 }
 0x1ab   :  { %v17422_v19 = vpop.f32.mrf.mxu0 }
 0x1ad   :  { %v17436_v24 = vpop.f32.mrf.mxu0 }
 0x1b1   :  { %v14348_v28 = vpop.f32.mrf.mxu0 }
 0x1b3   :  { %v17450_v29 = vpop.f32.mrf.mxu0 }
 0x1b4   :  { %21201 = vst [vmem:[#allocation4_spill] sm:$0xff] %v17450_v29 }
 0x1b7   :  { %v14351_v31 = vpop.f32.mrf.mxu0 }
 0x1b9   :  { %v17460_v34 = vpop.f32.mrf.mxu0 }
 0x1ba   :  { %21202 = vst [vmem:[#allocation5_spill] sm:$0xff] %v17460_v34 }
 0x1bd   :  { %v14354_v36 = vpop.f32.mrf.mxu0 }
 0x1bf   :  { %v17468_v39 = vpop.f32.mrf.mxu0 }
 0x1c0   :  { %21205 = vst [vmem:[#allocation8_spill] sm:$0xff] %v17468_v39 }
 0x1c3   :  { %v17458_v33 = vpop.f32.mrf.mxu1 }
 0x1c5   :  { %v17462_v35 = vpop.f32.mrf.mxu1 }
 0x1c6   :  { %21203 = vst [vmem:[#allocation6_spill] sm:$0xff] %v17462_v35 }
 0x1c9   :  { %v17464_v37 = vpop.f32.mrf.mxu1 }
 0x1cb   :  { %v17466_v38 = vpop.f32.mrf.mxu1 }
 0x1cc   :  { %21204 = vst [vmem:[#allocation7_spill] sm:$0xff] %v17466_v38 }
 0x1cf   :  { %v14365_v40 = vpop.f32.mrf.mxu1  ;;  %v14385_v42 = vpop.f32.mrf.mxu0 }
 0x1d1   :  { %v17470_v43 = vpop.f32.mrf.mxu1  ;;  %v17472_v44 = vpop.f32.mrf.mxu0 }
 0x1d3   :  { %v14368_v45 = vpop.f32.mrf.mxu1  ;;  %v14388_v46 = vpop.f32.mrf.mxu0 }
 0x1d5   :  { %v17474_v47 = vpop.f32.mrf.mxu1  ;;  %v17476_v48 = vpop.f32.mrf.mxu0 }
 0x1d6   :  { %21206 = vst [vmem:[#allocation9_spill] sm:$0xff] %v17474_v47  ;;  %21207 = vst [vmem:[#allocation10_spill] sm:$0xff] %v17476_v48 }
 0x1d7   :  { %v14371_v49 = vpop.f32.mrf.mxu1  ;;  %v14391_v50 = vpop.f32.mrf.mxu0 }
 0x1d9   :  { %v17478_v51 = vpop.f32.mrf.mxu1  ;;  %v17480_v52 = vpop.f32.mrf.mxu0 }
 0x1da   :  { %21208 = vst [vmem:[#allocation11_spill] sm:$0xff] %v17478_v51  ;;  %21209 = vst [vmem:[#allocation12_spill] sm:$0xff] %v17480_v52 }
 0x1db   :  { %v14374_v53 = vpop.f32.mrf.mxu1  ;;  %v14394_v54 = vpop.f32.mrf.mxu0 }
 0x1dd   :  { %v17482_v55 = vpop.f32.mrf.mxu1  ;;  %v17484_v56 = vpop.f32.mrf.mxu0 }
 0x1de   :  { %21210 = vst [vmem:[#allocation13_spill] sm:$0xff] %v17482_v55  ;;  %21211 = vst [vmem:[#allocation14_spill] sm:$0xff] %v17484_v56 }
 0x1df   :  { %v14377_v57 = vpop.f32.mrf.mxu1  ;;  %v14397_v58 = vpop.f32.mrf.mxu0 }
 0x1e1   :  { %v17486_v59 = vpop.f32.mrf.mxu1  ;;  %v17488_v60 = vpop.f32.mrf.mxu0 }
 0x1e2   :  { %21212 = vst [vmem:[#allocation15_spill] sm:$0xff] %v17486_v59  ;;  %21213 = vst [vmem:[#allocation16_spill] sm:$0xff] %v17488_v60 }
 0x1e3   :  { %v14380_v61 = vpop.f32.mrf.mxu1  ;;  %v14400_v62 = vpop.f32.mrf.mxu0 }
 0x1e5   :  { %v17490_v15 = vpop.f32.mrf.mxu1  ;;  %v17492_v32 = vpop.f32.mrf.mxu0 }
 0x1e6   :  { %21214 = vst [vmem:[#allocation17_spill] sm:$0xff] %v17490_v15  ;;  %21215 = vst [vmem:[#allocation18_spill] sm:$0xff] %v17492_v32 }
 0x1e7   :  { %v14405_v41 = vpop.f32.mrf.mxu1  ;;  %v14425_v8 = vpop.f32.mrf.mxu0 }
 0x1e8   :  { %v1391_v9 = vadd.f32 %v14405_v41, %v17422_v19  ;;  %v1555_v10 = vadd.f32 %v14425_v8, %v14365_v40  ;;  %v17508_v8 = vld [vmem:[%s20953_s8] ss:$0 sm:$0xff] }
 0x1e9   :  { %v17495_v11 = vpop.f32.mrf.mxu1  ;;  %v17497_v12 = vpop.f32.mrf.mxu0 }
 0x1ea   :  { %v1609_v13 = vadd.f32 %v1555_v10, %v1391_v9 }
 0x1eb   :  { %v14408_v14 = vpop.f32.mrf.mxu1  ;;  %v14428_v16 = vpop.f32.mrf.mxu0 }
 0x1ec   :  { %v17499_v17 = vadd.f32 %v14385_v42, %v1609_v13  ;;  %v1401_v18 = vadd.f32 %v14408_v14, %v14348_v28  ;;  %v1565_v20 = vadd.f32 %v14428_v16, %v14368_v45 }
 0x1ed   :  { %v17501_v21 = vpop.f32.mrf.mxu1  ;;  %v17503_v22 = vpop.f32.mrf.mxu0 }
 0x1ee   :  { %21216 = vst [vmem:[#allocation19_spill] sm:$0xff] %v17501_v21  ;;  %21217 = vst [vmem:[#allocation20_spill] sm:$0xff] %v17503_v22  ;;  %v1611_v23 = vadd.f32 %v1565_v20, %v1401_v18 }
 0x1ef   :  { %v14411_v25 = vpop.f32.mrf.mxu1  ;;  %v14431_v27 = vpop.f32.mrf.mxu0 }
 0x1f0   :  { %v1623_v19 = vadd.f32 %v14388_v46, %v1611_v23  ;;  %v1411_v40 = vadd.f32 %v14411_v25, %v14351_v31  ;;  %v1575_v41 = vadd.f32 %v14431_v27, %v14371_v49 }
 0x1f1   :  { %v17510_v9 = vpop.f32.mrf.mxu1  ;;  %v17512_v42 = vpop.f32.mrf.mxu0 }
 0x1f2   :  { %21218 = vst [vmem:[#allocation21_spill] sm:$0xff] %v17510_v9  ;;  %21219 = vst [vmem:[#allocation22_spill] sm:$0xff] %v17512_v42  ;;  %v17515_v28 = vadd.f32 %v17508_v8, %v1623_v19  ;;  %v1613_v45 = vadd.f32 %v1575_v41, %v1411_v40 }
 0x1f3   :  { %v14414_v10 = vpop.f32.mrf.mxu1  ;;  %v14434_v13 = vpop.f32.mrf.mxu0 }
 0x1f4   :  { %21220 = vst [vmem:[#allocation23_spill] sm:$0xff] %v17515_v28  ;;  %v1625_v14 = vadd.f32 %v14391_v50, %v1613_v45  ;;  %v1421_v16 = vadd.f32 %v14414_v10, %v14354_v36  ;;  %v1585_v46 = vadd.f32 %v14434_v13, %v14374_v53 }
 0x1f5   :  { %v17517_v31 = vpop.f32.mrf.mxu1  ;;  %v17519_v49 = vpop.f32.mrf.mxu0 }
 0x1f6   :  { %21221 = vst [vmem:[#allocation24_spill] sm:$0xff] %v17517_v31  ;;  %21222 = vst [vmem:[#allocation25_spill] sm:$0xff] %v17519_v49  ;;  %v17522_v18 = vadd.f32 %v17508_v8, %v1625_v14  ;;  %v1615_v20 = vadd.f32 %v1585_v46, %v1421_v16 }
 0x1f7   :  { %v14417_v23 = vpop.f32.mrf.mxu1  ;;  %v14437_v25 = vpop.f32.mrf.mxu0 }
 0x1f8   :  { %21223 = vst [vmem:[#allocation26_spill] sm:$0xff] %v17522_v18  ;;  %v1627_v27 = vadd.f32 %v14394_v54, %v1615_v20  ;;  %v1431_v19 = vadd.f32 %v14417_v23, %v17458_v33  ;;  %v1595_v63 = vadd.f32 %v14437_v25, %v14377_v57 }
 0x1f9   :  { %v17525_v40 = vpop.f32.mrf.mxu1  ;;  %v17527_v41 = vpop.f32.mrf.mxu0 }
 0x1fa   :  { %21224 = vst [vmem:[#allocation27_spill] sm:$0xff] %v17525_v40  ;;  %21225 = vst [vmem:[#allocation28_spill] sm:$0xff] %v17527_v41  ;;  %v17530_v36 = vadd.f32 %v17508_v8, %v1627_v27  ;;  %v1617_v50 = vadd.f32 %v1595_v63, %v1431_v19 }
 0x1fb   :  { %v14420_v53 = vpop.f32.mrf.mxu1  ;;  %v14440_v45 = vpop.f32.mrf.mxu0 }
 0x1fc   :  { %21226 = vst [vmem:[#allocation29_spill] sm:$0xff] %v17530_v36  ;;  %v1629_v10 = vadd.f32 %v14397_v58, %v1617_v50  ;;  %v1441_v13 = vadd.f32 %v14420_v53, %v17464_v37  ;;  %v1605_v14 = vadd.f32 %v14440_v45, %v14380_v61 }
 0x1fd   :  { %v17533_v16 = vpop.f32.mrf.mxu1  ;;  %v17535_v54 = vpop.f32.mrf.mxu0 }
 0x1fe   :  { %21227 = vst [vmem:[#allocation30_spill] sm:$0xff] %v17533_v16  ;;  %21228 = vst [vmem:[#allocation31_spill] sm:$0xff] %v17535_v54  ;;  %v17538_v33 = vadd.f32 %v17508_v8, %v1629_v10  ;;  %v1619_v57 = vadd.f32 %v1605_v14, %v1441_v13 }
 0x1ff   :  { %v14445_v46 = vpop.f32.mrf.mxu1  ;;  %v14465_v20 = vpop.f32.mrf.mxu0 }
 0x200   :  { %21229 = vst [vmem:[#allocation32_spill] sm:$0xff] %v17538_v33  ;;  %v1631_v23 = vadd.f32 %v14400_v62, %v1619_v57 }
 0x201   :  { %v17540_v25 = vpop.f32.mrf.mxu1  ;;  %v17542_v63 = vpop.f32.mrf.mxu0 }
 0x202   :  { %21230 = vst [vmem:[#allocation33_spill] sm:$0xff] %v17540_v25  ;;  %21231 = vst [vmem:[#allocation34_spill] sm:$0xff] %v17542_v63  ;;  %v17545_v58 = vadd.f32 %v17508_v8, %v1631_v23  ;;  %v17613_v63 = vld [vmem:[%s21200_s2 + $0x130] sm:$0xff] }
 0x203   :  { %v14448_v37 = vpop.f32.mrf.mxu1  ;;  %v14468_v61 = vpop.f32.mrf.mxu0 }
 0x204   :  { %21232 = vst [vmem:[#allocation35_spill] sm:$0xff] %v17545_v58 }
 0x205   :  { %v17547_v27 = vpop.f32.mrf.mxu1  ;;  %v17549_v19 = vpop.f32.mrf.mxu0 }
 0x207   :  { %v14451_v50 = vpop.f32.mrf.mxu1  ;;  %v17551_v53 = vpop.f32.mrf.mxu0 }
 0x209   :  { %v17553_v45 = vpop.f32.mrf.mxu1  ;;  %v17555_v10 = vpop.f32.mrf.mxu0 }
 0x20b   :  { %v14454_v62 = vpop.f32.mrf.mxu1  ;;  %v17557_v13 = vpop.f32.mrf.mxu0 }
 0x20d   :  { %v17559_v14 = vpop.f32.mrf.mxu1  ;;  %v17561_v57 = vpop.f32.mrf.mxu0 }
 0x20f   :  { %v14457_v23 = vpop.f32.mrf.mxu1  ;;  %v17563_v58 = vpop.f32.mrf.mxu0 }
 0x211   :  { %v17565_v32 = vpop.f32.mrf.mxu1  ;;  %v17567_v54 = vpop.f32.mrf.mxu0 }
 0x213   :  { %v14460_v15 = vpop.f32.mrf.mxu1  ;;  %v17569_v16 = vpop.f32.mrf.mxu0 }
 0x215   :  { %v17571_v38 = vpop.f32.mrf.mxu1  ;;  %v17573_v33 = vpop.f32.mrf.mxu0 }
 0x217   :  { %v14485_v60 = vpop.f32.mrf.mxu1  ;;  %v14505_v41 = vpop.f32.mrf.mxu0 }
 0x218   :  { %v2119_v59 = vadd.f32 %v14505_v41, %v14445_v46 }
 0x219   :  { %v17575_v40 = vpop.f32.mrf.mxu1  ;;  %v17577_v35 = vpop.f32.mrf.mxu0 }
 0x21a   :  { %21233 = vst [vmem:[#allocation36_spill] sm:$0xff] %v17575_v40  ;;  %21234 = vst [vmem:[#allocation37_spill] sm:$0xff] %v17577_v35 }
 0x21b   :  { %v14488_v36 = vpop.f32.mrf.mxu1  ;;  %v14508_v56 = vpop.f32.mrf.mxu0 }
 0x21c   :  { %v2129_v49 = vadd.f32 %v14508_v56, %v14448_v37 }
 0x21d   :  { %v1995_v55 = vpop.f32.mrf.mxu1  ;;  %v2123_v31 = vpop.f32.mrf.mxu0 }
 0x21f   :  { %v17579_v39 = vpop.f32.mrf.mxu1  ;;  %v14511_v18 = vpop.f32.mrf.mxu0 }
 0x220   :  { %v2139_v52 = vadd.f32 %v14511_v18, %v14451_v50 }
 0x221   :  { %v17581_v42 = vpop.f32.mrf.mxu1  ;;  %v2133_v51 = vpop.f32.mrf.mxu0 }
 0x223   :  { %v17583_v9 = vpop.f32.mrf.mxu1  ;;  %v14514_v34 = vpop.f32.mrf.mxu0 }
 0x224   :  { %v17585_v41 = vadd.f32 %v14514_v34, %v14454_v62 }
 0x225   :  { %v17587_v46 = vpop.f32.mrf.mxu1  ;;  %v17589_v28 = vpop.f32.mrf.mxu0 }
 0x227   :  { %v17591_v48 = vpop.f32.mrf.mxu1  ;;  %v14517_v56 = vpop.f32.mrf.mxu0 }
 0x228   :  { %v17593_v37 = vadd.f32 %v14517_v56, %v14457_v23 }
 0x229   :  { %v17595_v22 = vpop.f32.mrf.mxu1  ;;  %v17597_v18 = vpop.f32.mrf.mxu0 }
 0x22b   :  { %v17599_v50 = vpop.f32.mrf.mxu1  ;;  %v14520_v47 = vpop.f32.mrf.mxu0 }
 0x22c   :  { %v17601_v21 = vadd.f32 %v14520_v47, %v14460_v15 }
 0x22d   :  { %v17603_v34 = vpop.f32.mrf.mxu1  ;;  %v17605_v62 = vpop.f32.mrf.mxu0 }
 0x22f   :  { %v14525_v29 = vpop.f32.mrf.mxu1  ;;  %v14545_v40 = vpop.f32.mrf.mxu0 }
 0x230   :  { %v2247_v35 = vadd.f32 %v14525_v29, %v14465_v20 }
 0x231   :  { %v17607_v25 = vpop.f32.mrf.mxu1  ;;  %v2426_v23 = vpop.f32.mrf.mxu0 }
 0x232   :  { %v2301_v56 = vadd.f32 %v2247_v35, %v2119_v59  ;;  %14577 = vmatprep.mubr.msk.f32.mxu0 %vm2695_vm4, %v2426_v23  ;;  %v2124_v35 = vadd.f32 %v2123_v31, %v17547_v27  ;;  %v2134_v27 = vadd.f32 %v2133_v51, %v17553_v45  ;;  %v17658_v51 = vld [vmem:[%s21200_s2 + $0x20] sm:$0xff] }
 0x233   :  { %v14528_v47 = vpop.f32.mrf.mxu1  ;;  %v14555_v15 = vpop.f32.mrf.mxu0  ;;  %14578 = vmatmul.mubr.msk.f32.vlgmr.msra.gmra.mxu0 %vm2695_vm4, %v14545_v40  ;;  %v17626_v40 = vld [vmem:[%s21200_s2 + $0x30] sm:$0xff]  ;;  %v17663_v45 = vld [vmem:[%s21200_s2 + $0x120] sm:$0xff] }
 0x234   :  { %v17616_v7 = vadd.f32 %v14485_v60, %v2301_v56  ;;  %v2257_v6 = vadd.f32 %v14528_v47, %v14468_v61  ;;  %14600 = vmatpush3.msra.mxu0 %v17455_v30  ;;  %v17631_v30 = vld [vmem:[%s21200_s2 + $0x128] sm:$0xff] }
 0x235   :  { %v2251_v29 = vpop.f32.mrf.mxu1  ;;  %v2588_v20 = vpop.f32.mrf.mxu0  ;;  %14601 = vmatprep.subr.mxu0 %v17613_v63  ;;  %v17640_v61 = vld [vmem:[%s21200_s2 + $0x28] sm:$0xff] }
 0x236   :  { %v2303_v59 = vadd.f32 %v2257_v6, %v2129_v49  ;;  %v2252_v23 = vadd.f32 %v2251_v29, %v17549_v19  ;;  %14596 = vmatprep.mubr.msk.f32.mxu1 %vm2695_vm4, %v2588_v20  ;;  %14602 = vmatpush3.msra.mxu0 %v17613_v63  ;;  %v17646_v19 = vld [vmem:[%s20954_s9] ss:$0 sm:$0xff]  ;;  %v17676_v20 = vld [vmem:[%s21200_s2 + $0x18] sm:$0xff] }
 0x237   :  { %v14531_v60 = vpop.f32.mrf.mxu1  ;;  %14597 = vmatmul.mubr.msk.f32.vlgmr.msra.gmra.mxu1 %vm2695_vm4, %v14555_v15  ;;  %14603 = vmatprep.subr.mxu0 %v17631_v30 }
 0x238   :  { %v2315_v6 = vadd.f32 %v14488_v36, %v2303_v59  ;;  %v2302_v31 = vadd.f32 %v2252_v23, %v2124_v35  ;;  %v2267_v49 = vadd.f32 %v14531_v60, %v17551_v53  ;;  %14619 = vmatpush3.msra.mxu1 %v17444_v26  ;;  %14604 = vmatpush3.msra.mxu0 %v17631_v30 }
 0x239   :  { %14620 = vmatprep.subr.mxu1 %v17626_v40  ;;  %v2261_v36 = vpop.f32.mrf.mxu1  ;;  %v2144_v35 = vadd.f32 %v17589_v28, %v17559_v14  ;;  %14605 = vmatprep.subr.mxu0 %v17663_v45  ;;  %v17692_v28 = vld [vmem:[%s21200_s2 + $0x10] sm:$0xff] }
 0x23a   :  { %v17651_v53 = vadd.f32 %v17646_v19, %v2315_v6  ;;  %v2314_v26 = vadd.f32 %v2302_v31, %v1995_v55  ;;  %v2305_v56 = vadd.f32 %v2267_v49, %v2139_v52  ;;  %v2262_v47 = vadd.f32 %v2261_v36, %v17555_v10  ;;  %14621 = vmatpush3.msra.mxu1 %v17626_v40  ;;  %v17705_v31 = vld [vmem:[%s21200_s2 + $0x8] sm:$0xff]  ;;  %v17710_v49 = vld [vmem:[%s21200_s2 + $0x118] sm:$0xff] }
 0x23b   :  { %14622 = vmatprep.subr.mxu1 %v17640_v61  ;;  %v14534_v15 = vpop.f32.mrf.mxu1  ;;  %14606 = vmatpush3.msra.mxu0 %v17663_v45  ;;  %v21239_v36 = vmov 0.0  }
 0x23c   :  { %21235 = vst [vmem:[#allocation38_spill] sm:$0xff] %v17651_v53  ;;  %v17668_v52 = vadd.f32 %v17646_v19, %v2314_v26  ;;  %v2317_v55 = vadd.f32 %v17579_v39, %v2305_v56  ;;  %v2304_v10 = vadd.f32 %v2262_v47, %v2134_v27  ;;  %v2277_v29 = vadd.f32 %v14534_v15, %v17557_v13 }
 0x23d   :  { %14623 = vmatpush3.msra.mxu1 %v17640_v61  ;;  %v2271_v59 = vpop.f32.mrf.mxu1  ;;  %v2154_v27 = vadd.f32 %v17597_v18, %v17565_v32  ;;  %14634 = vmatprep.mubr.f32.mxu1 %v21239_v36  ;;  %v17726_v32 = vld [vmem:[%s21200_s2] sm:$0xff]  ;;  %v1639_v53 = vadd.f32 %v17508_v8, %v17499_v17 }
 0x23e   :  { %21236 = vst [vmem:[#allocation39_spill] sm:$0xff] %v17668_v52  ;;  %14624 = vmatprep.subr.mxu1 %v17658_v51  ;;  %v17683_v39 = vadd.f32 %v17646_v19, %v2317_v55  ;;  %v2316_v13 = vadd.f32 %v2304_v10, %v17581_v42  ;;  %v2307_v23 = vadd.f32 %v2277_v29, %v17585_v41  ;;  %v17739_v55 = vld [vmem:[%s21200_s2 + $0x110] sm:$0xff] }
 0x23f   :  { %v2272_v60 = vadd.f32 %v2271_v59, %v17561_v57  ;;  %14625 = vmatpush3.msra.mxu1 %v17658_v51  ;;  %v14537_v14 = vpop.f32.mrf.mxu1  ;;  %14607 = vmatprep.subr.mxu0 %v17710_v49  ;;  %v2164_v10 = vadd.f32 %v17605_v62, %v17571_v38  ;;  %v17755_v38 = vld [vmem:[%s21200_s2 + $0x108] sm:$0xff] }
 0x240   :  { %21237 = vst [vmem:[#allocation40_spill] sm:$0xff] %v17683_v39  ;;  %14626 = vmatprep.subr.mxu1 %v17676_v20  ;;  %v17697_v6 = vadd.f32 %v17646_v19, %v2316_v13  ;;  %v2319_v42 = vadd.f32 %v17583_v9, %v2307_v23  ;;  %v2287_v57 = vadd.f32 %v14537_v14, %v17563_v58 }
 0x241   :  { %v2306_v41 = vadd.f32 %v2272_v60, %v2144_v35  ;;  %14627 = vmatpush3.msra.mxu1 %v17676_v20  ;;  %v2281_v9 = vpop.f32.mrf.mxu1  ;;  %14608 = vmatpush3.msra.mxu0 %v17710_v49 }
 0x242   :  { %21238 = vst [vmem:[#allocation41_spill] sm:$0xff] %v17697_v6  ;;  %14628 = vmatprep.subr.mxu1 %v17692_v28  ;;  %v17717_v58 = vadd.f32 %v17646_v19, %v2319_v42  ;;  %v2309_v56 = vadd.f32 %v2287_v57, %v17593_v37  ;;  %v2282_v47 = vadd.f32 %v2281_v9, %v17567_v54  ;;  %v17800_v57 = vld [vmem:[%s21200_s2 + $0xa8] sm:$0xff]  ;;  %v17814_v9 = vld [vmem:[%s21200_s2 + $0x98] sm:$0xff] }
 0x243   :  { %v2318_v26 = vadd.f32 %v2306_v41, %v17587_v46  ;;  %14629 = vmatpush3.msra.mxu1 %v17692_v28  ;;  %v14540_v18 = vpop.f32.mrf.mxu1  ;;  %14609 = vmatprep.subr.mxu0 %v17739_v55 }
 0x244   :  { %21240 = vst [vmem:[#allocation42_spill] sm:$0xff] %v17717_v58  ;;  %14630 = vmatprep.subr.mxu1 %v17705_v31  ;;  %v2321_v46 = vadd.f32 %v17591_v48, %v2309_v56  ;;  %v2308_v37 = vadd.f32 %v2282_v47, %v2154_v27  ;;  %v2297_v54 = vadd.f32 %v14540_v18, %v17569_v16  ;;  %v17807_v27 = vld [vmem:[%s21200_s2 + $0xa0] sm:$0xff]  ;;  %v17845_v47 = vld [vmem:[%s20955_s7 + $0x78] sm:$0xff]  ;;  %v17850_v18 = vld [vmem:[%s20955_s7 + $0x70] sm:$0xff] }
 0x245   :  { %v17731_v15 = vadd.f32 %v17646_v19, %v2318_v26  ;;  %14631 = vmatpush3.msra.mxu1 %v17705_v31  ;;  %v2291_v29 = vpop.f32.mrf.mxu1  ;;  %14610 = vmatpush3.msra.mxu0 %v17739_v55  ;;  %v17828_v26 = vld [vmem:[%s21200_s2 + $0x88] sm:$0xff]  ;;  %v17835_v56 = vld [vmem:[%s21200_s2 + $0x80] sm:$0xff] }
 0x246   :  { %14632 = vmatprep.subr.mxu1 %v17726_v32  ;;  %v17746_v48 = vadd.f32 %v17646_v19, %v2321_v46  ;;  %v2320_v16 = vadd.f32 %v2308_v37, %v17595_v22  ;;  %v2311_v35 = vadd.f32 %v2297_v54, %v17601_v21  ;;  %v2292_v59 = vadd.f32 %v2291_v29, %v17573_v33  ;;  %v17767_v33 = vld [vmem:[%s21200_s2 + $0x100] sm:$0xff]  ;;  %v17857_v46 = vld [vmem:[%s20955_s7 + $0x68] sm:$0xff]  ;;  %v17871_v54 = vld [vmem:[%s20955_s7 + $0x58] sm:$0xff] }
 0x247   :  { %21241 = vst [vmem:[#allocation43_spill] sm:$0xff] %v17731_v15  ;;  %14633 = vmatpush3.msra.mxu1 %v17726_v32  ;;  %v14550_v62 = vpop.f32.mrf.mxu1  ;;  %14611 = vmatprep.subr.mxu0 %v17755_v38  ;;  %v17864_v37 = vld [vmem:[%s20955_s7 + $0x60] sm:$0xff]  ;;  %v17885_v29 = vld [vmem:[%s20955_s7 + $0x48] sm:$0xff] }
 0x248   :  { %21242 = vst [vmem:[#allocation44_spill] sm:$0xff] %v17746_v48  ;;  %14635 = vmatmul.mubr.f32.vlgmr.msra.gmra.mxu1 %v21239_v36  ;;  %v17760_v13 = vadd.f32 %v17646_v19, %v2320_v16  ;;  %v2323_v22 = vadd.f32 %v17599_v50, %v2311_v35  ;;  %v2310_v21 = vadd.f32 %v2292_v59, %v2164_v10  ;;  %v17780_v50 = vld [vmem:[%s21200_s2 + $0xb8] sm:$0xff]  ;;  %v17821_v36 = vld [vmem:[%s21200_s2 + $0x90] sm:$0xff]  ;;  %21246 = vst [vmem:[#allocation48_spill] sm:$0xff] %v17885_v29 }
 0x249   :  { %14660 = vmatprep.mubr.msk.f32.mxu1 %vm2353_vm3, %v17307_v4  ;;  %v2507_v23 = vpop.f32.mrf.mxu1  ;;  %14612 = vmatpush3.msra.mxu0 %v17755_v38  ;;  %v17878_v10 = vld [vmem:[%s20955_s7 + $0x50] sm:$0xff] }
 0x24a   :  { %21243 = vst [vmem:[#allocation45_spill] sm:$0xff] %v17760_v13  ;;  %v17773_v60 = vadd.f32 %v17646_v19, %v2323_v22  ;;  %v2322_v14 = vadd.f32 %v2310_v21, %v17603_v34  ;;  %14613 = vmatprep.subr.mxu0 %v17767_v33  ;;  %v17792_v34 = vld [vmem:[%s21200_s2 + $0xb0] sm:$0xff]  ;;  %v1386_v21 = vadd.f32 %v17495_v11, %v17436_v24 }
 0x24b   :  { %v14560_v42 = vpop.f32.mrf.mxu1  ;;  %14614 = vmatpush3.msra.mxu0 %v17767_v33 }
 0x24c   :  { %21244 = vst [vmem:[#allocation46_spill] sm:$0xff] %v17773_v60  ;;  %v17784_v4 = vadd.f32 %v17646_v19, %v2322_v14  ;;  %14637 = vmatprep.subr.mxu0 %v17780_v50 }
 0x24d   :  { %v2669_v41 = vpop.f32.mrf.mxu1 }
 0x24e   :  { %21245 = vst [vmem:[#allocation47_spill] sm:$0xff] %v17784_v4  ;;  %14615 = vmatprep.mubr.msk.f32.mxu0 %vm2695_vm4, %v2669_v41 }
 0x24f   :  { %14616 = vmatmul.mubr.msk.f32.vlgmr.msra.gmra.mxu0 %vm2695_vm4, %v14560_v42 }
 0x250   :  { %14638 = vmatpush3.msra.mxu0 %v17780_v50  ;;  %14653 = vmatprep.mubr.msk.f32.mxu0 %vm2695_vm4, %v2507_v23  ;;  %v1550_v23 = vadd.f32 %v17497_v12, %v17470_v43 }
 0x251   :  { %14639 = vmatprep.subr.mxu0 %v17792_v34 }
 0x252   :  { %14640 = vmatpush3.msra.mxu0 %v17792_v34  ;;  %v1608_v41 = vadd.f32 %v1550_v23, %v1386_v21 }
 0x253   :  { %14641 = vmatprep.subr.mxu0 %v17800_v57 }
 0x254   :  { %14642 = vmatpush3.msra.mxu0 %v17800_v57  ;;  %v1620_v58 = vadd.f32 %v1608_v41, %v17472_v44  ;;  %v18027_v41 = vld [vmem:[%s20955_s7 + $0x128] sm:$0xff] }
 0x255   :  { %14643 = vmatprep.subr.mxu0 %v17807_v27  ;;  %21259 = vst [vmem:[#allocation57_spill] sm:$0xff] %v18027_v41 }
 0x256   :  { %14644 = vmatpush3.msra.mxu0 %v17807_v27  ;;  %v1638_v43 = vadd.f32 %v17508_v8, %v1620_v58  ;;  %v17982_v58 = vld [vmem:[%s20955_s7 + $0x138] sm:$0xff] }
 0x257   :  { %14645 = vmatprep.subr.mxu0 %v17814_v9 }
 0x258   :  { %14646 = vmatpush3.msra.mxu0 %v17814_v9 }
 0x259   :  { %14647 = vmatprep.subr.mxu0 %v17821_v36 }
 0x25a   :  { %14648 = vmatpush3.msra.mxu0 %v17821_v36 }
 0x25b   :  { %14649 = vmatprep.subr.mxu0 %v17828_v26 }
 0x25c   :  { %14650 = vmatpush3.msra.mxu0 %v17828_v26 }
 0x25d   :  { %14651 = vmatprep.subr.mxu0 %v17835_v56 }
 0x25e   :  { %14652 = vmatpush3.msra.mxu0 %v17835_v56 }
 0x25f   :  { %14654 = vmatmul.mubr.msk.f32.vlgmr.msra.gmra.mxu0 %vm2695_vm4, %v14550_v62  ;;  %14684 = vmatprep.subr.mxu0 %v17845_v47 }
 0x260   :  { %14685 = vmatpush3.msra.mxu0 %v17845_v47 }
 0x261   :  { %14686 = vmatprep.subr.mxu0 %v17850_v18 }
 0x262   :  { %14687 = vmatpush3.msra.mxu0 %v17850_v18 }
 0x263   :  { %14688 = vmatprep.subr.mxu0 %v17857_v46 }
 0x264   :  { %14689 = vmatpush3.msra.mxu0 %v17857_v46 }
 0x265   :  { %14690 = vmatprep.subr.mxu0 %v17864_v37 }
 0x266   :  { %14691 = vmatpush3.msra.mxu0 %v17864_v37 }
 0x267   :  { %14692 = vmatprep.subr.mxu0 %v17871_v54 }
 0x268   :  { %14693 = vmatpush3.msra.mxu0 %v17871_v54 }
 0x269   :  { %14694 = vmatprep.subr.mxu0 %v17878_v10 }
 0x26a   :  { %14695 = vmatpush3.msra.mxu0 %v17878_v10 }
 0x26b   :  { %14696 = vmatprep.subr.mxu0 %v17885_v29 }
 0x26c   :  { %14697 = vmatpush3.msra.mxu0 %v17885_v29 }
 0x2f3   :  { %v14579_v16 = vpop.f32.mrf.mxu0 }
 0x2f5   :  { %v2768_v59 = vpop.f32.mrf.mxu0 }
 0x2f7   :  { %v14598_v35 = vpop.f32.mrf.mxu1 }
 0x2f9   :  { %v2867_v62 = vpop.f32.mrf.mxu1 }
 0x308   :  { %v14636_v14 = vpop.f32.mrf.mxu1 }
 0x309   :  { %v3041_v13 = vadd.f32 %v14636_v14, %v14579_v16  ;;  %v18018_v14 = vld [vmem:[%s20955_s7 + $0x130] sm:$0xff] }
 0x30a   :  { %v3035_v4 = vpop.f32.mrf.mxu1  ;;  %21258 = vst [vmem:[#allocation56_spill] sm:$0xff] %v18018_v14 }
 0x30b   :  { %v3036_v6 = vadd.f32 %v3035_v4, %v2768_v59  ;;  %v17997_v4 = vld [vmem:[%s20955_s7 + $0xc8] sm:$0xff]  ;;  %v18011_v59 = vld [vmem:[%s20955_s7 + $0x38] sm:$0xff] }
 0x30c   :  { %21255 = vst [vmem:[#allocation53_spill] sm:$0xff] %v17997_v4  ;;  %21257 = vst [vmem:[#allocation55_spill] sm:$0xff] %v18011_v59 }
 0x30f   :  { %v14617_v22 = vpop.f32.mrf.mxu0 }
 0x311   :  { %v2957_v42 = vpop.f32.mrf.mxu0 }
 0x31f   :  { %v14655_v60 = vpop.f32.mrf.mxu0 }
 0x320   :  { %v3122_v48 = vadd.f32 %v14655_v60, %v14598_v35 }
 0x321   :  { %v3116_v15 = vpop.f32.mrf.mxu0 }
 0x322   :  { %v3126_v39 = vadd.f32 %v3122_v48, %v3041_v13  ;;  %v3117_v52 = vadd.f32 %v3116_v15, %v2867_v62  ;;  %v17990_v13 = vld [vmem:[%s20955_s7 + $0xd0] sm:$0xff] }
 0x323   :  { %21254 = vst [vmem:[#allocation52_spill] sm:$0xff] %v17990_v13 }
 0x324   :  { %v3128_v24 = vadd.f32 %v14617_v22, %v3126_v39  ;;  %v3125_v11 = vadd.f32 %v3117_v52, %v3036_v6  ;;  %v17968_v39 = vld [vmem:[%s20955_s7 + $0xe0] sm:$0xff]  ;;  %v17977_v6 = vld [vmem:[%s20955_s7 + $0xd8] sm:$0xff] }
 0x325   :  { %21252 = vst [vmem:[#allocation50_spill] sm:$0xff] %v17968_v39  ;;  %21253 = vst [vmem:[#allocation51_spill] sm:$0xff] %v17977_v6 }
 0x326   :  { %v3130_v12 = vadd.f32 %v3128_v24, %v1639_v53  ;;  %v3127_v29 = vadd.f32 %v3125_v11, %v2957_v42  ;;  %v17963_v53 = vld [vmem:[%s20955_s7 + $0x40] sm:$0xff] }
 0x327   :  { %14698 = vmatprep.subr.mxu0 %v17963_v53  ;;  %v18034_v11 = vld [vmem:[%s20955_s7 + $0x120] sm:$0xff] }
 0x328   :  { %v12733_v21 = vmul.f32 -1.442695, %v3130_v12  ;;  %v3129_v23 = vadd.f32 %v3127_v29, %v1638_v43  ;;  %14699 = vmatpush3.msra.mxu0 %v17963_v53  ;;  %v18004_v29 = vld [vmem:[%s20955_s7 + $0xc0] sm:$0xff]  ;;  %21260 = vst [vmem:[#allocation58_spill] sm:$0xff] %v18034_v11  ;;  %v18041_v12 = vld [vmem:[%s20955_s7 + $0x118] sm:$0xff] }
 0x329   :  { %14722 = vmatprep.subr.mxu0 %v17982_v58  ;;  %21256 = vst [vmem:[#allocation54_spill] sm:$0xff] %v18004_v29  ;;  %21261 = vst [vmem:[#allocation59_spill] sm:$0xff] %v18041_v12 }
 0x32a   :  { %16203 = vpow2.f32 %v12733_v21  ;;  %v12732_v16 = vmul.f32 -1.442695, %v3129_v23  ;;  %v18049_v23 = vld [vmem:[%s20955_s7 + $0x110] sm:$0xff] }
 0x32b   :  { %21262 = vst [vmem:[#allocation60_spill] sm:$0xff] %v18049_v23 }
 0x32c   :  { %16205 = vpow2.f32 %v12732_v16  ;;  %v18054_v16 = vld [vmem:[%s20955_s7 + $0x30] sm:$0xff] }
 0x32d   :  { %21263 = vst [vmem:[#allocation61_spill] sm:$0xff] %v18054_v16 }
 0x337   :  { %v16204_v60 = vpop.eup %16203 }
 0x338   :  { %v3138_v35 = vadd.f32 1.0, %v16204_v60 }
 0x339   :  { %v16206_v44 = vpop.eup %16205 }
 0x33a   :  { %16207 = vrcp.f32 %v3138_v35  ;;  %v3137_v48 = vadd.f32 1.0, %v16206_v44  ;;  %v18063_v35 = vld [vmem:[%s20955_s7 + $0x108] sm:$0xff] }
 0x33b   :  { %21264 = vst [vmem:[#allocation62_spill] sm:$0xff] %v18063_v35  ;;  %v18070_v44 = vld [vmem:[%s20955_s7 + $0x28] sm:$0xff] }
 0x33c   :  { %16209 = vrcp.f32 %v3137_v48  ;;  %21265 = vst [vmem:[#allocation63_spill] sm:$0xff] %v18070_v44  ;;  %v18078_v48 = vld [vmem:[%s20955_s7 + $0x100] sm:$0xff] }
 0x33d   :  { %21266 = vst [vmem:[#allocation64_spill] sm:$0xff] %v18078_v48 }
 0x347   :  { %v17899_v15 = vpop.eup %16207 }
 0x348   :  { %v17902_v17 = vmul.f32 0.0, %v17899_v15 }
 0x349   :  { %v17904_v52 = vpop.eup %16209 }
 0x34a   :  { %v17907_v8 = vmul.f32 0.0, %v17904_v52  ;;  %14656 = vmatprep.subr.mxu1 %v17902_v17 }
 0x34b   :  { %14657 = vmatpush3.msra.mxu1 %v17902_v17 }
 0x34c   :  { %14658 = vmatprep.subr.mxu1 %v17907_v8 }
 0x34d   :  { %14659 = vmatpush3.msra.mxu1 %v17907_v8 }
 0x34e   :  { %14661 = vmatmul.mubr.msk.f32.vlgmr.msra.gmra.mxu1 %vm2353_vm3, %v17320_v1  ;;  %14663 = vmatprep.subr.mxu1 %v17902_v17  ;;  %v21247_v1 = vld [vmem:[#allocation2_spill] sm:$0xff] }
 0x34f   :  { %14664 = vmatpush3.msra.mxu1 %v17902_v17  ;;  %14667 = vmatprep.mubr.msk.f32.mxu1 %vm2353_vm3, %v17364_v3  ;;  %v17938_v3 = vld [vmem:[%s20955_s7 + $0xf8] sm:$0xff] }
 0x350   :  { %14665 = vmatprep.subr.mxu1 %v17907_v8  ;;  %21248 = vst [vmem:[#allocation2_spill] sm:$0xff] %v17938_v3 }
 0x351   :  { %14666 = vmatpush3.msra.mxu1 %v17907_v8 }
 0x352   :  { %14668 = vmatmul.mubr.msk.f32.vlgmr.msra.gmra.mxu1 %vm2353_vm3, %v17373_v5  ;;  %14670 = vmatprep.subr.mxu1 %v17902_v17  ;;  %v17954_v5 = vld [vmem:[%s20955_s7 + $0xe8] sm:$0xff] }
 0x353   :  { %14671 = vmatpush3.msra.mxu1 %v17902_v17  ;;  %14674 = vmatprep.mubr.msk.f32.mxu1 %vm2353_vm3, %v17325_v2  ;;  %v17945_v2 = vld [vmem:[%s20955_s7 + $0xf0] sm:$0xff] }
 0x354   :  { %14672 = vmatprep.subr.mxu1 %v17907_v8  ;;  %21249 = vst [vmem:[#allocation49_spill] sm:$0xff] %v17945_v2 }
 0x355   :  { %14673 = vmatpush3.msra.mxu1 %v17907_v8 }
 0x356   :  { %14675 = vmatmul.mubr.msk.f32.vlgmr.msra.gmra.mxu1 %vm2353_vm3, %v17337_v0  ;;  %14677 = vmatprep.subr.mxu1 %v17902_v17  ;;  %v21250_v0 = vld [vmem:[#allocation3_spill] sm:$0xff] }
 0x357   :  { %14678 = vmatpush3.msra.mxu1 %v17902_v17  ;;  %14681 = vmatprep.mubr.msk.f32.mxu1 %vm2353_vm3, %v21247_v1  ;;  %21251 = vst [vmem:[#allocation3_spill] sm:$0xff] %v17954_v5 }
 0x358   :  { %14679 = vmatprep.subr.mxu1 %v17907_v8 }
 0x359   :  { %14680 = vmatpush3.msra.mxu1 %v17907_v8 }
 0x35a   :  { %14682 = vmatmul.mubr.msk.f32.vlgmr.msra.gmra.mxu1 %vm2353_vm3, %v21250_v0  ;;  %14703 = vmatprep.subr.mxu1 %v17938_v3  ;;  %v18085_v0 = vld [vmem:[%s20955_s7 + $0x20] sm:$0xff] }
 0x35b   :  { %14704 = vmatpush3.msra.mxu1 %v17938_v3  ;;  %21267 = vst [vmem:[#allocation65_spill] sm:$0xff] %v18085_v0 }
 0x35c   :  { %14705 = vmatprep.subr.mxu1 %v17945_v2 }
 0x35d   :  { %14706 = vmatpush3.msra.mxu1 %v17945_v2  ;;  %v2331_v2 = vadd.f32 %v17646_v19, %v17616_v7 }
 0x35e   :  { %14707 = vmatprep.subr.mxu1 %v17954_v5 }
 0x35f   :  { %14708 = vmatpush3.msra.mxu1 %v17954_v5 }
 0x360   :  { %14709 = vmatprep.subr.mxu1 %v17968_v39 }
 0x361   :  { %14710 = vmatpush3.msra.mxu1 %v17968_v39 }
 0x362   :  { %14711 = vmatprep.subr.mxu1 %v17977_v6 }
 0x363   :  { %14712 = vmatpush3.msra.mxu1 %v17977_v6 }
 0x364   :  { %14713 = vmatprep.subr.mxu1 %v17990_v13 }
 0x365   :  { %14714 = vmatpush3.msra.mxu1 %v17990_v13 }
 0x366   :  { %14715 = vmatprep.subr.mxu1 %v17997_v4 }
 0x367   :  { %14716 = vmatpush3.msra.mxu1 %v17997_v4  ;;  %v21291_v4 = vld [vmem:[#allocation36_spill] sm:$0xff] }
 0x368   :  { %14717 = vmatprep.subr.mxu1 %v18004_v29 }
 0x369   :  { %14718 = vmatpush3.msra.mxu1 %v18004_v29 }
 0x36a   :  { %14741 = vmatprep.subr.mxu1 %v18011_v59 }
 0x40e   :  { %v14662_v62 = vpop.f32.mrf.mxu1 }
 0x410   :  { %v3211_v22 = vpop.f32.mrf.mxu1 }
 0x411   :  { %14700 = vmatprep.mubr.msk.f32.mxu0 %vm2695_vm4, %v3211_v22  ;;  %v18101_v22 = vld [vmem:[%s20955_s7 + $0xb8] sm:$0xff] }
 0x412   :  { %v18020_v42 = vpop.f32.mrf.mxu1  ;;  %14701 = vmatmul.mubr.msk.f32.vlgmr.msra.gmra.mxu0 %vm2695_vm4, %v14662_v62  ;;  %v18094_v62 = vld [vmem:[%s20955_s7 + $0x18] sm:$0xff]  ;;  %21269 = vst [vmem:[#allocation67_spill] sm:$0xff] %v18101_v22 }
 0x413   :  { %14723 = vmatpush3.msra.mxu0 %v17982_v58  ;;  %21268 = vst [vmem:[#allocation66_spill] sm:$0xff] %v18094_v62 }
 0x414   :  { %14724 = vmatprep.subr.mxu0 %v18018_v14  ;;  %v3286_v24 = vpop.f32.mrf.mxu1 }
 0x415   :  { %14725 = vmatpush3.msra.mxu0 %v18018_v14 }
 0x416   :  { %14726 = vmatprep.subr.mxu0 %v18027_v41  ;;  %v14676_v43 = vpop.f32.mrf.mxu1 }
 0x417   :  { %14727 = vmatpush3.msra.mxu0 %v18027_v41 }
 0x418   :  { %14728 = vmatprep.subr.mxu0 %v18034_v11  ;;  %v3361_v21 = vpop.f32.mrf.mxu1 }
 0x419   :  { %14729 = vmatpush3.msra.mxu0 %v18034_v11  ;;  %14719 = vmatprep.mubr.msk.f32.mxu1 %vm2695_vm4, %v3361_v21  ;;  %v18115_v21 = vld [vmem:[%s20955_s7 + $0xb0] sm:$0xff] }
 0x41a   :  { %14730 = vmatprep.subr.mxu0 %v18041_v12  ;;  %14720 = vmatmul.mubr.msk.f32.vlgmr.msra.gmra.mxu1 %vm2695_vm4, %v14676_v43  ;;  %v14683_v60 = vpop.f32.mrf.mxu1  ;;  %v18110_v43 = vld [vmem:[%s20955_s7 + $0x10] sm:$0xff]  ;;  %21271 = vst [vmem:[#allocation69_spill] sm:$0xff] %v18115_v21 }
 0x41b   :  { %14731 = vmatpush3.msra.mxu0 %v18041_v12  ;;  %14742 = vmatpush3.msra.mxu1 %v18011_v59  ;;  %21270 = vst [vmem:[#allocation68_spill] sm:$0xff] %v18110_v43 }
 0x41c   :  { %14732 = vmatprep.subr.mxu0 %v18049_v23  ;;  %14743 = vmatprep.subr.mxu1 %v18054_v16  ;;  %v3436_v1 = vpop.f32.mrf.mxu1 }
 0x41d   :  { %14757 = vmatprep.mubr.msk.f32.mxu1 %vm2695_vm4, %v17907_v8  ;;  %14733 = vmatpush3.msra.mxu0 %v18049_v23 }
 0x41e   :  { %14744 = vmatpush3.msra.mxu1 %v18054_v16  ;;  %14734 = vmatprep.subr.mxu0 %v18063_v35  ;;  %v21290_v16 = vld [vmem:[#allocation37_spill] sm:$0xff] }
 0x41f   :  { %14745 = vmatprep.subr.mxu1 %v18070_v44  ;;  %14735 = vmatpush3.msra.mxu0 %v18063_v35  ;;  %v21289_v35 = vld [vmem:[#allocation33_spill] sm:$0xff] }
 0x420   :  { %14746 = vmatpush3.msra.mxu1 %v18070_v44  ;;  %14736 = vmatprep.subr.mxu0 %v18078_v48  ;;  %v2114_v23 = vadd.f32 %v21290_v16, %v21289_v35 }
 0x421   :  { %14738 = vmatprep.mubr.msk.f32.mxu0 %vm2695_vm4, %v3436_v1  ;;  %14747 = vmatprep.subr.mxu1 %v18085_v0  ;;  %v18129_v1 = vld [vmem:[%s20955_s7 + $0xa8] sm:$0xff] }
 0x422   :  { %14737 = vmatpush3.msra.mxu0 %v18078_v48  ;;  %14748 = vmatpush3.msra.mxu1 %v18085_v0  ;;  %21273 = vst [vmem:[#allocation71_spill] sm:$0xff] %v18129_v1  ;;  %v21288_v0 = vld [vmem:[#allocation34_spill] sm:$0xff] }
 0x423   :  { %14739 = vmatmul.mubr.msk.f32.vlgmr.msra.gmra.mxu0 %vm2695_vm4, %v14683_v60  ;;  %14749 = vmatprep.subr.mxu1 %v18094_v62  ;;  %v18124_v60 = vld [vmem:[%s20955_s7 + $0x8] sm:$0xff]  ;;  %v2242_v48 = vadd.f32 %v17607_v25, %v21288_v0 }
 0x424   :  { %14760 = vmatprep.subr.mxu0 %v18101_v22  ;;  %14750 = vmatpush3.msra.mxu1 %v18094_v62  ;;  %21272 = vst [vmem:[#allocation70_spill] sm:$0xff] %v18124_v60 }
 0x425   :  { %14761 = vmatpush3.msra.mxu0 %v18101_v22  ;;  %14776 = vmatprep.mubr.msk.f32.mxu0 %vm2695_vm4, %v3286_v24  ;;  %v18138_v24 = vld [vmem:[%s20955_s7] sm:$0xff]  ;;  %v2300_v12 = vadd.f32 %v2242_v48, %v2114_v23  ;;  %v18355_v48 = vld [vmem:[%s21200_s2 + $0xf0] sm:$0xff] }
 0x426   :  { %14751 = vmatprep.subr.mxu1 %v18110_v43  ;;  %14762 = vmatprep.subr.mxu0 %v18115_v21  ;;  %21274 = vst [vmem:[#allocation72_spill] sm:$0xff] %v18138_v24  ;;  %v18143_v22 = vld [vmem:[%s20955_s7 + $0xa0] sm:$0xff] }
 0x427   :  { %14752 = vmatpush3.msra.mxu1 %v18110_v43  ;;  %14763 = vmatpush3.msra.mxu0 %v18115_v21  ;;  %21275 = vst [vmem:[#allocation73_spill] sm:$0xff] %v18143_v22  ;;  %v18152_v21 = vld [vmem:[%s20955_s7 + $0x98] sm:$0xff]  ;;  %v18161_v43 = vld [vmem:[%s20955_s7 + $0x90] sm:$0xff]  ;;  %v2312_v13 = vadd.f32 %v2300_v12, %v21291_v4 }
 0x428   :  { %14753 = vmatprep.subr.mxu1 %v18124_v60  ;;  %14764 = vmatprep.subr.mxu0 %v18129_v1  ;;  %21276 = vst [vmem:[#allocation74_spill] sm:$0xff] %v18152_v21  ;;  %21277 = vst [vmem:[#allocation75_spill] sm:$0xff] %v18161_v43  ;;  %v18348_v12 = vld [vmem:[%s21200_s2 + $0xf8] sm:$0xff] }
 0x429   :  { %14754 = vmatpush3.msra.mxu1 %v18124_v60  ;;  %14765 = vmatpush3.msra.mxu0 %v18129_v1  ;;  %v18170_v1 = vld [vmem:[%s20955_s7 + $0x88] sm:$0xff]  ;;  %v2330_v3 = vadd.f32 %v17646_v19, %v2312_v13  ;;  %v18314_v13 = vld [vmem:[%s21197_s29 + $0x20] sm:$0xff] }
 0x42a   :  { %14755 = vmatprep.subr.mxu1 %v18138_v24  ;;  %14766 = vmatprep.subr.mxu0 %v18143_v22  ;;  %21278 = vst [vmem:[#allocation76_spill] sm:$0xff] %v18170_v1 }
 0x42b   :  { %14756 = vmatpush3.msra.mxu1 %v18138_v24  ;;  %14767 = vmatpush3.msra.mxu0 %v18143_v22  ;;  %v18175_v22 = vld [vmem:[%s21197_s29] sm:$0xff] }
 0x42c   :  { %14758 = vmatmul.mubr.msk.f32.vlgmr.msra.gmra.mxu1 %vm2695_vm4, %v17902_v17  ;;  %14768 = vmatprep.subr.mxu0 %v18152_v21 }
 0x42d   :  { %14769 = vmatpush3.msra.mxu0 %v18152_v21  ;;  %14783 = vmatprep.mubr.msk.f32.mxu1 %vm2353_vm3, %v18175_v22  ;;  %v18184_v21 = vld [vmem:[%s20955_s7 + $0x80] sm:$0xff] }
 0x42e   :  { %14770 = vmatprep.subr.mxu0 %v18161_v43  ;;  %21279 = vst [vmem:[#allocation77_spill] sm:$0xff] %v18184_v21 }
 0x42f   :  { %14771 = vmatpush3.msra.mxu0 %v18161_v43  ;;  %v18195_v43 = vld [vmem:[%s21200_s2 + $0x78] sm:$0xff] }
 0x430   :  { %14772 = vmatprep.subr.mxu0 %v18170_v1  ;;  %21280 = vst [vmem:[#allocation78_spill] sm:$0xff] %v18195_v43 }
 0x431   :  { %14773 = vmatpush3.msra.mxu0 %v18170_v1  ;;  %v18202_v1 = vld [vmem:[%s21200_s2 + $0x70] sm:$0xff] }
 0x432   :  { %14774 = vmatprep.subr.mxu0 %v18184_v21  ;;  %21281 = vst [vmem:[#allocation79_spill] sm:$0xff] %v18202_v1 }
 0x433   :  { %14775 = vmatpush3.msra.mxu0 %v18184_v21 }
 0x434   :  { %14777 = vmatmul.mubr.msk.f32.vlgmr.msra.gmra.mxu0 %vm2695_vm4, %v18020_v42  ;;  %14807 = vmatprep.subr.mxu0 %v18195_v43  ;;  %v18209_v42 = vld [vmem:[%s21200_s2 + $0x68] sm:$0xff] }
 0x435   :  { %14808 = vmatpush3.msra.mxu0 %v18195_v43  ;;  %21282 = vst [vmem:[#allocation80_spill] sm:$0xff] %v18209_v42  ;;  %v18216_v43 = vld [vmem:[%s21200_s2 + $0x60] sm:$0xff] }
 0x436   :  { %14809 = vmatprep.subr.mxu0 %v18202_v1  ;;  %21283 = vst [vmem:[#allocation81_spill] sm:$0xff] %v18216_v43 }
 0x437   :  { %14810 = vmatpush3.msra.mxu0 %v18202_v1  ;;  %v18223_v1 = vld [vmem:[%s21200_s2 + $0x58] sm:$0xff] }
 0x438   :  { %14811 = vmatprep.subr.mxu0 %v18209_v42  ;;  %21284 = vst [vmem:[#allocation82_spill] sm:$0xff] %v18223_v1 }
 0x439   :  { %14812 = vmatpush3.msra.mxu0 %v18209_v42  ;;  %v18230_v42 = vld [vmem:[%s21200_s2 + $0x50] sm:$0xff] }
 0x43a   :  { %14813 = vmatprep.subr.mxu0 %v18216_v43  ;;  %21285 = vst [vmem:[#allocation83_spill] sm:$0xff] %v18230_v42 }
 0x43b   :  { %14814 = vmatpush3.msra.mxu0 %v18216_v43  ;;  %v18237_v43 = vld [vmem:[%s21200_s2 + $0x48] sm:$0xff] }
 0x43c   :  { %14815 = vmatprep.subr.mxu0 %v18223_v1  ;;  %21286 = vst [vmem:[#allocation84_spill] sm:$0xff] %v18237_v43 }
 0x43d   :  { %14816 = vmatpush3.msra.mxu0 %v18223_v1  ;;  %v18244_v1 = vld [vmem:[%s21200_s2 + $0x40] sm:$0xff] }
 0x43e   :  { %14817 = vmatprep.subr.mxu0 %v18230_v42  ;;  %21287 = vst [vmem:[#allocation85_spill] sm:$0xff] %v18244_v1 }
 0x43f   :  { %14818 = vmatpush3.msra.mxu0 %v18230_v42  ;;  %v18251_v42 = vld [vmem:[%s21200_s2 + $0x138] sm:$0xff] }
 0x440   :  { %14819 = vmatprep.subr.mxu0 %v18237_v43 }
 0x441   :  { %14820 = vmatpush3.msra.mxu0 %v18237_v43 }
 0x442   :  { %14821 = vmatprep.subr.mxu0 %v18244_v1 }
 0x443   :  { %14822 = vmatpush3.msra.mxu0 %v18244_v1 }
 0x444   :  { %14845 = vmatprep.subr.mxu0 %v18251_v42 }
 0x4d2   :  { %v14702_v21 = vpop.f32.mrf.mxu0 }
 0x4d4   :  { %v3534_v60 = vpop.f32.mrf.mxu0 }
 0x4da   :  { %v14721_v24 = vpop.f32.mrf.mxu1 }
 0x4dc   :  { %v3633_v43 = vpop.f32.mrf.mxu1 }
 0x4e3   :  { %v14740_v62 = vpop.f32.mrf.mxu0 }
 0x4e5   :  { %v3723_v1 = vpop.f32.mrf.mxu0 }
 0x4ec   :  { %v14759_v44 = vpop.f32.mrf.mxu1 }
 0x4ed   :  { %v3810_v14 = vadd.f32 %v14759_v44, %v14702_v21  ;;  %v18376_v21 = vld [vmem:[%s21200_s2 + $0xd8] sm:$0xff] }
 0x4ee   :  { %v3804_v11 = vpop.f32.mrf.mxu1 }
 0x4ef   :  { %v3805_v6 = vadd.f32 %v3804_v11, %v3534_v60  ;;  %v18341_v11 = vld [vmem:[%s21197_s29 + $0x38] sm:$0xff]  ;;  %v18383_v60 = vld [vmem:[%s21200_s2 + $0xd0] sm:$0xff] }
 0x4f4   :  { %v14778_v41 = vpop.f32.mrf.mxu0 }
 0x4f5   :  { %v3891_v59 = vadd.f32 %v14778_v41, %v14721_v24  ;;  %v18332_v41 = vld [vmem:[%s21197_s29 + $0x30] sm:$0xff]  ;;  %v18397_v24 = vld [vmem:[%s21200_s2 + $0xc0] sm:$0xff] }
 0x4f6   :  { %v3885_v29 = vpop.f32.mrf.mxu0 }
 0x4f7   :  { %v3895_v39 = vadd.f32 %v3891_v59, %v3810_v14  ;;  %v3886_v5 = vadd.f32 %v3885_v29, %v3633_v43  ;;  %v3903_v29 = vsub.f32 1.0, %v17899_v15  ;;  %v18323_v14 = vld [vmem:[%s21197_s29 + $0x28] sm:$0xff]  ;;  %v18369_v43 = vld [vmem:[%s21200_s2 + $0xe0] sm:$0xff] }
 0x4f9   :  { %v3897_v25 = vadd.f32 %v14740_v62, %v3895_v39  ;;  %v3894_v0 = vadd.f32 %v3886_v5, %v3805_v6  ;;  %v3902_v5 = vsub.f32 1.0, %v17904_v52  ;;  %v18296_v52 = vld [vmem:[%s21197_s29 + $0x10] sm:$0xff]  ;;  %v18362_v62 = vld [vmem:[%s21200_s2 + $0xe8] sm:$0xff] }
 0x4fb   :  { %v3899_v16 = vadd.f32 %v3897_v25, %v2331_v2  ;;  %v3896_v35 = vadd.f32 %v3894_v0, %v3723_v1  ;;  %v18390_v1 = vld [vmem:[%s21200_s2 + $0xc8] sm:$0xff]  ;;  %v18404_v25 = vld [vmem:[%s21200_s2 + $0x38] sm:$0xff] }
 0x4fd   :  { %16211 = vtanh.f32 %v3899_v16  ;;  %v3898_v23 = vadd.f32 %v3896_v35, %v2330_v3 }
 0x4ff   :  { %16213 = vtanh.f32 %v3898_v23 }
 0x50a   :  { %v16212_v44 = vpop.eup %16211 }
 0x50b   :  { %3908 = vrot.lane.b32.xlu0 %v16212_v44, %s16481_s23 }
 0x50c   :  { %v16214_v4 = vpop.eup %16213 }
 0x50f   :  { %3906 = vrot.lane.b32.xlu0 %v16214_v4, %s16481_s23 }
 0x57d   :  { %v3909_v59 = vpop.permute.xlu0 %3908 }
 0x57e   :  { %v3913_v7 = vmul.f32 %v3909_v59, %v3903_v29 }
 0x580   :  { %v18267_v19 = vadd.f32 %v3913_v7, %v17902_v17  ;;  %v18287_v17 = vld [vmem:[%s21197_s29 + $0x8] sm:$0xff] }
 0x581   :  { %v3907_v2 = vpop.permute.xlu0 %3906  ;;  %v21298_v7 = vld [vmem:[#allocation23_spill] sm:$0xff] }
 0x582   :  { %v3912_v39 = vmul.f32 %v3907_v2, %v3902_v5  ;;  %3920 = vrot.lane.b32.xlu1 %v18267_v19, %s16481_s23 }
 0x584   :  { %v18272_v3 = vadd.f32 %v3912_v39, %v17907_v8  ;;  %v18305_v8 = vld [vmem:[%s21197_s29 + $0x18] sm:$0xff] }
 0x586   :  { %3918 = vrot.lane.b32.xlu1 %v18272_v3, %s16481_s23 }
 0x5f4   :  { %v18276_v6 = vpop.permute.xlu1 %3920 }
 0x5f5   :  { %14779 = vmatprep.subr.mxu1 %v18276_v6 }
 0x5f6   :  { %14780 = vmatpush3.msra.mxu1 %v18276_v6 }
 0x5f8   :  { %v18280_v15 = vpop.permute.xlu1 %3918 }
 0x5f9   :  { %14781 = vmatprep.subr.mxu1 %v18280_v15 }
 0x5fa   :  { %14782 = vmatpush3.msra.mxu1 %v18280_v15 }
 0x5fb   :  { %14784 = vmatmul.mubr.msk.f32.vlgmr.msra.gmra.mxu1 %vm2353_vm3, %v18287_v17  ;;  %14786 = vmatprep.subr.mxu1 %v18276_v6 }
 0x5fc   :  { %14787 = vmatpush3.msra.mxu1 %v18276_v6  ;;  %14790 = vmatprep.mubr.msk.f32.mxu1 %vm2353_vm3, %v18296_v52 }
 0x5fd   :  { %14788 = vmatprep.subr.mxu1 %v18280_v15 }
 0x5fe   :  { %14789 = vmatpush3.msra.mxu1 %v18280_v15 }
 0x5ff   :  { %14791 = vmatmul.mubr.msk.f32.vlgmr.msra.gmra.mxu1 %vm2353_vm3, %v18305_v8  ;;  %14793 = vmatprep.subr.mxu1 %v18276_v6 }
 0x600   :  { %14794 = vmatpush3.msra.mxu1 %v18276_v6  ;;  %14797 = vmatprep.mubr.msk.f32.mxu1 %vm2353_vm3, %v18314_v13 }
 0x601   :  { %14795 = vmatprep.subr.mxu1 %v18280_v15 }
 0x602   :  { %14796 = vmatpush3.msra.mxu1 %v18280_v15 }
 0x603   :  { %14798 = vmatmul.mubr.msk.f32.vlgmr.msra.gmra.mxu1 %vm2353_vm3, %v18323_v14  ;;  %14800 = vmatprep.subr.mxu1 %v18276_v6 }
 0x604   :  { %14801 = vmatpush3.msra.mxu1 %v18276_v6  ;;  %14804 = vmatprep.mubr.msk.f32.mxu1 %vm2353_vm3, %v18332_v41 }
 0x605   :  { %14802 = vmatprep.subr.mxu1 %v18280_v15 }
 0x606   :  { %14803 = vmatpush3.msra.mxu1 %v18280_v15 }
 0x607   :  { %14805 = vmatmul.mubr.msk.f32.vlgmr.msra.gmra.mxu1 %vm2353_vm3, %v18341_v11  ;;  %14826 = vmatprep.subr.mxu1 %v18348_v12 }
 0x608   :  { %14827 = vmatpush3.msra.mxu1 %v18348_v12 }
 0x609   :  { %14828 = vmatprep.subr.mxu1 %v18355_v48 }
 0x60a   :  { %14829 = vmatpush3.msra.mxu1 %v18355_v48 }
 0x60b   :  { %14830 = vmatprep.subr.mxu1 %v18362_v62 }
 0x60c   :  { %14831 = vmatpush3.msra.mxu1 %v18362_v62 }
 0x60d   :  { %14832 = vmatprep.subr.mxu1 %v18369_v43 }
 0x60e   :  { %14833 = vmatpush3.msra.mxu1 %v18369_v43 }
 0x60f   :  { %14834 = vmatprep.subr.mxu1 %v18376_v21 }
 0x610   :  { %14835 = vmatpush3.msra.mxu1 %v18376_v21 }
 0x611   :  { %14836 = vmatprep.subr.mxu1 %v18383_v60 }
 0x612   :  { %14837 = vmatpush3.msra.mxu1 %v18383_v60 }
 0x613   :  { %14838 = vmatprep.subr.mxu1 %v18390_v1 }
 0x614   :  { %14839 = vmatpush3.msra.mxu1 %v18390_v1 }
 0x615   :  { %14840 = vmatprep.subr.mxu1 %v18397_v24 }
 0x616   :  { %14841 = vmatpush3.msra.mxu1 %v18397_v24 }
 0x617   :  { %14864 = vmatprep.subr.mxu1 %v18404_v25 }
 0x6bb   :  { %v14785_v0 = vpop.f32.mrf.mxu1 }
 0x6bd   :  { %v3990_v16 = vpop.f32.mrf.mxu1 }
 0x6be   :  { %14823 = vmatprep.mubr.msk.f32.mxu0 %vm2695_vm4, %v3990_v16 }
 0x6bf   :  { %v14792_v35 = vpop.f32.mrf.mxu1  ;;  %14824 = vmatmul.mubr.msk.f32.vlgmr.msra.gmra.mxu0 %vm2695_vm4, %v14785_v0 }
 0x6c0   :  { %14846 = vmatpush3.msra.mxu0 %v18251_v42 }
 0x6c1   :  { %14847 = vmatprep.subr.mxu0 %v17613_v63  ;;  %v4065_v23 = vpop.f32.mrf.mxu1 }
 0x6c2   :  { %14848 = vmatpush3.msra.mxu0 %v17613_v63 }
 0x6c3   :  { %14849 = vmatprep.subr.mxu0 %v17631_v30  ;;  %v14799_v44 = vpop.f32.mrf.mxu1 }
 0x6c4   :  { %14850 = vmatpush3.msra.mxu0 %v17631_v30 }
 0x6c5   :  { %14851 = vmatprep.subr.mxu0 %v17663_v45  ;;  %v4140_v4 = vpop.f32.mrf.mxu1 }
 0x6c6   :  { %14852 = vmatpush3.msra.mxu0 %v17663_v45  ;;  %14842 = vmatprep.mubr.msk.f32.mxu1 %vm2695_vm4, %v4140_v4 }
 0x6c7   :  { %14853 = vmatprep.subr.mxu0 %v17710_v49  ;;  %14843 = vmatmul.mubr.msk.f32.vlgmr.msra.gmra.mxu1 %vm2695_vm4, %v14799_v44  ;;  %v14806_v29 = vpop.f32.mrf.mxu1 }
 0x6c8   :  { %14854 = vmatpush3.msra.mxu0 %v17710_v49  ;;  %14865 = vmatpush3.msra.mxu1 %v18404_v25 }
 0x6c9   :  { %14855 = vmatprep.subr.mxu0 %v17739_v55  ;;  %14866 = vmatprep.subr.mxu1 %v17626_v40  ;;  %v4215_v63 = vpop.f32.mrf.mxu1 }
 0x6ca   :  { %14880 = vmatprep.mubr.msk.f32.mxu1 %vm2695_vm4, %v18280_v15  ;;  %14856 = vmatpush3.msra.mxu0 %v17739_v55  ;;  %v21296_v55 = vld [vmem:[#allocation20_spill] sm:$0xff] }
 0x6cb   :  { %14867 = vmatpush3.msra.mxu1 %v17626_v40  ;;  %14857 = vmatprep.subr.mxu0 %v17755_v38  ;;  %v21292_v40 = vld [vmem:[#allocation48_spill] sm:$0xff] }
 0x6cc   :  { %14868 = vmatprep.subr.mxu1 %v17640_v61  ;;  %14858 = vmatpush3.msra.mxu0 %v17755_v38 }
 0x6cd   :  { %14869 = vmatpush3.msra.mxu1 %v17640_v61  ;;  %14859 = vmatprep.subr.mxu0 %v17767_v33 }
 0x6ce   :  { %14861 = vmatprep.mubr.msk.f32.mxu0 %vm2695_vm4, %v4215_v63  ;;  %14870 = vmatprep.subr.mxu1 %v17658_v51 }
 0x6cf   :  { %14860 = vmatpush3.msra.mxu0 %v17767_v33  ;;  %14871 = vmatpush3.msra.mxu1 %v17658_v51 }
 0x6d0   :  { %14862 = vmatmul.mubr.msk.f32.vlgmr.msra.gmra.mxu0 %vm2695_vm4, %v14806_v29  ;;  %14872 = vmatprep.subr.mxu1 %v17676_v20 }
 0x6d1   :  { %14883 = vmatprep.subr.mxu0 %v17780_v50  ;;  %14873 = vmatpush3.msra.mxu1 %v17676_v20 }
 0x6d2   :  { %14884 = vmatpush3.msra.mxu0 %v17780_v50  ;;  %14899 = vmatprep.mubr.msk.f32.mxu0 %vm2695_vm4, %v4065_v23 }
 0x6d3   :  { %14874 = vmatprep.subr.mxu1 %v17692_v28  ;;  %14885 = vmatprep.subr.mxu0 %v17792_v34 }
 0x6d4   :  { %14875 = vmatpush3.msra.mxu1 %v17692_v28  ;;  %14886 = vmatpush3.msra.mxu0 %v17792_v34  ;;  %v21293_v28 = vld [vmem:[#allocation4_spill] sm:$0xff] }
 0x6d5   :  { %14876 = vmatprep.subr.mxu1 %v17705_v31  ;;  %14887 = vmatprep.subr.mxu0 %v17800_v57 }
 0x6d6   :  { %14877 = vmatpush3.msra.mxu1 %v17705_v31  ;;  %14888 = vmatpush3.msra.mxu0 %v17800_v57  ;;  %v21294_v31 = vld [vmem:[#allocation19_spill] sm:$0xff] }
 0x6d7   :  { %14878 = vmatprep.subr.mxu1 %v17726_v32  ;;  %14889 = vmatprep.subr.mxu0 %v17807_v27  ;;  %v1396_v49 = vadd.f32 %v21294_v31, %v21293_v28  ;;  %v21305_v28 = vld [vmem:[#allocation53_spill] sm:$0xff]  ;;  %v21306_v31 = vld [vmem:[#allocation54_spill] sm:$0xff] }
 0x6d8   :  { %14879 = vmatpush3.msra.mxu1 %v17726_v32  ;;  %14890 = vmatpush3.msra.mxu0 %v17807_v27  ;;  %v21295_v32 = vld [vmem:[#allocation9_spill] sm:$0xff] }
 0x6d9   :  { %14881 = vmatmul.mubr.msk.f32.vlgmr.msra.gmra.mxu1 %vm2695_vm4, %v18276_v6  ;;  %14891 = vmatprep.subr.mxu0 %v17814_v9  ;;  %v1560_v38 = vadd.f32 %v21296_v55, %v21295_v32 }
 0x6da   :  { %14892 = vmatpush3.msra.mxu0 %v17814_v9  ;;  %14906 = vmatprep.mubr.msk.f32.mxu1 %vm2353_vm3, %v18175_v22 }
 0x6db   :  { %14893 = vmatprep.subr.mxu0 %v17821_v36  ;;  %v1610_v34 = vadd.f32 %v1560_v38, %v1396_v49  ;;  %v21307_v49 = vld [vmem:[#allocation55_spill] sm:$0xff] }
 0x6dc   :  { %14894 = vmatpush3.msra.mxu0 %v17821_v36 }
 0x6dd   :  { %14895 = vmatprep.subr.mxu0 %v17828_v26 }
 0x6de   :  { %14896 = vmatpush3.msra.mxu0 %v17828_v26 }
 0x6df   :  { %14897 = vmatprep.subr.mxu0 %v17835_v56 }
 0x6e0   :  { %14898 = vmatpush3.msra.mxu0 %v17835_v56  ;;  %v21297_v56 = vld [vmem:[#allocation10_spill] sm:$0xff] }
 0x6e1   :  { %14900 = vmatmul.mubr.msk.f32.vlgmr.msra.gmra.mxu0 %vm2695_vm4, %v14792_v35  ;;  %14930 = vmatprep.subr.mxu0 %v17845_v47 }
 0x6e2   :  { %14931 = vmatpush3.msra.mxu0 %v17845_v47  ;;  %v1622_v47 = vadd.f32 %v1610_v34, %v21297_v56  ;;  %v21309_v34 = vld [vmem:[#allocation57_spill] sm:$0xff] }
 0x6e3   :  { %14932 = vmatprep.subr.mxu0 %v17850_v18  ;;  %v21313_v56 = vld [vmem:[#allocation61_spill] sm:$0xff] }
 0x6e4   :  { %14933 = vmatpush3.msra.mxu0 %v17850_v18 }
 0x6e5   :  { %14934 = vmatprep.subr.mxu0 %v17857_v46 }
 0x6e6   :  { %14935 = vmatpush3.msra.mxu0 %v17857_v46 }
 0x6e7   :  { %14936 = vmatprep.subr.mxu0 %v17864_v37 }
 0x6e8   :  { %14937 = vmatpush3.msra.mxu0 %v17864_v37 }
 0x6e9   :  { %14938 = vmatprep.subr.mxu0 %v17871_v54 }
 0x6ea   :  { %14939 = vmatpush3.msra.mxu0 %v17871_v54 }
 0x6eb   :  { %14940 = vmatprep.subr.mxu0 %v17878_v10 }
 0x6ec   :  { %14941 = vmatpush3.msra.mxu0 %v17878_v10 }
 0x6ed   :  { %14942 = vmatprep.subr.mxu0 %v21292_v40 }
 0x6ee   :  { %14943 = vmatpush3.msra.mxu0 %v21292_v40 }
 0x6ef   :  { %14944 = vmatprep.subr.mxu0 %v17963_v53 }
 0x6f0   :  { %14945 = vmatpush3.msra.mxu0 %v17963_v53  ;;  %v18492_v53 = vld [vmem:[%s20953_s8] ss:$0 sm:$0xff] }
 0x6f1   :  { %14968 = vmatprep.subr.mxu0 %v17982_v58  ;;  %v1640_v59 = vadd.f32 %v18492_v53, %v1622_v47  ;;  %v21314_v47 = vld [vmem:[#allocation62_spill] sm:$0xff] }
 0x77f   :  { %v14825_v30 = vpop.f32.mrf.mxu0 }
 0x781   :  { %v4296_v51 = vpop.f32.mrf.mxu0 }
 0x787   :  { %v14844_v61 = vpop.f32.mrf.mxu1 }
 0x789   :  { %v4377_v45 = vpop.f32.mrf.mxu1 }
 0x790   :  { %v14863_v20 = vpop.f32.mrf.mxu0 }
 0x792   :  { %v4458_v50 = vpop.f32.mrf.mxu0 }
 0x799   :  { %v14882_v33 = vpop.f32.mrf.mxu1 }
 0x79a   :  { %v4543_v9 = vadd.f32 %v14882_v33, %v14825_v30  ;;  %v21308_v33 = vld [vmem:[#allocation56_spill] sm:$0xff] }
 0x79b   :  { %v4537_v57 = vpop.f32.mrf.mxu1 }
 0x79c   :  { %v4538_v18 = vadd.f32 %v4537_v57, %v4296_v51  ;;  %v21302_v51 = vld [vmem:[#allocation50_spill] sm:$0xff] }
 0x7a1   :  { %v14901_v27 = vpop.f32.mrf.mxu0 }
 0x7a2   :  { %v4624_v36 = vadd.f32 %v14901_v27, %v14844_v61  ;;  %v21301_v61 = vld [vmem:[#allocation3_spill] sm:$0xff]  ;;  %v21310_v27 = vld [vmem:[#allocation58_spill] sm:$0xff] }
 0x7a3   :  { %v4618_v26 = vpop.f32.mrf.mxu0 }
 0x7a4   :  { %v4628_v46 = vadd.f32 %v4624_v36, %v4543_v9  ;;  %v4619_v37 = vadd.f32 %v4618_v26, %v4377_v45  ;;  %v21303_v45 = vld [vmem:[#allocation51_spill] sm:$0xff]  ;;  %v21312_v26 = vld [vmem:[#allocation60_spill] sm:$0xff] }
 0x7a5   :  { %v21311_v36 = vld [vmem:[#allocation59_spill] sm:$0xff] }
 0x7a6   :  { %v4630_v54 = vadd.f32 %v14863_v20, %v4628_v46  ;;  %v4627_v10 = vadd.f32 %v4619_v37, %v4538_v18  ;;  %v21304_v20 = vld [vmem:[#allocation52_spill] sm:$0xff]  ;;  %v21315_v46 = vld [vmem:[#allocation63_spill] sm:$0xff] }
 0x7a7   :  { %v21316_v37 = vld [vmem:[#allocation64_spill] sm:$0xff] }
 0x7a8   :  { %v4632_v5 = vadd.f32 %v4630_v54, %v21298_v7  ;;  %v4629_v2 = vadd.f32 %v4627_v10, %v4458_v50  ;;  %v21317_v54 = vld [vmem:[#allocation65_spill] sm:$0xff]  ;;  %v21318_v10 = vld [vmem:[#allocation66_spill] sm:$0xff]  ;;  %v21320_v7 = vld [vmem:[#allocation68_spill] sm:$0xff] }
 0x7aa   :  { %v12803_v39 = vmul.f32 -1.442695, %v4632_v5  ;;  %v4631_v0 = vadd.f32 %v4629_v2, %v1640_v59  ;;  %v21319_v59 = vld [vmem:[#allocation67_spill] sm:$0xff]  ;;  %v21321_v5 = vld [vmem:[#allocation69_spill] sm:$0xff]  ;;  %v21322_v2 = vld [vmem:[#allocation70_spill] sm:$0xff] }
 0x7ac   :  { %16215 = vpow2.f32 %v12803_v39  ;;  %v12802_v16 = vmul.f32 -1.442695, %v4631_v0  ;;  %v21323_v39 = vld [vmem:[#allocation71_spill] sm:$0xff]  ;;  %v21324_v0 = vld [vmem:[#allocation72_spill] sm:$0xff] }
 0x7ae   :  { %16217 = vpow2.f32 %v12802_v16  ;;  %v21325_v16 = vld [vmem:[#allocation73_spill] sm:$0xff] }
 0x7b9   :  { %v16216_v35 = vpop.eup %16215 }
 0x7ba   :  { %v4640_v23 = vadd.f32 1.0, %v16216_v35  ;;  %v21326_v35 = vld [vmem:[#allocation74_spill] sm:$0xff] }
 0x7bb   :  { %v16218_v44 = vpop.eup %16217 }
 0x7bc   :  { %16219 = vrcp.f32 %v4640_v23  ;;  %v4639_v4 = vadd.f32 1.0, %v16218_v44  ;;  %v21327_v23 = vld [vmem:[#allocation75_spill] sm:$0xff]  ;;  %v21328_v44 = vld [vmem:[#allocation76_spill] sm:$0xff] }
 0x7be   :  { %16221 = vrcp.f32 %v4639_v4  ;;  %v21329_v4 = vld [vmem:[#allocation77_spill] sm:$0xff] }
 0x7c9   :  { %v18496_v29 = vpop.eup %16219 }
 0x7ca   :  { %v18500_v63 = vmul.f32 %v18496_v29, %v18276_v6  ;;  %v21299_v6 = vld [vmem:[#allocation2_spill] sm:$0xff] }
 0x7cb   :  { %v18502_v40 = vpop.eup %16221 }
 0x7cc   :  { %14902 = vmatprep.subr.mxu1 %v18500_v63  ;;  %v18507_v30 = vmul.f32 %v18502_v40, %v18280_v15  ;;  %v21300_v15 = vld [vmem:[#allocation49_spill] sm:$0xff] }
 0x7cd   :  { %14903 = vmatpush3.msra.mxu1 %v18500_v63 }
 0x7ce   :  { %14904 = vmatprep.subr.mxu1 %v18507_v30 }
 0x7cf   :  { %14905 = vmatpush3.msra.mxu1 %v18507_v30 }
 0x7d0   :  { %14907 = vmatmul.mubr.msk.f32.vlgmr.msra.gmra.mxu1 %vm2353_vm3, %v18287_v17  ;;  %14909 = vmatprep.subr.mxu1 %v18500_v63 }
 0x7d1   :  { %14910 = vmatpush3.msra.mxu1 %v18500_v63  ;;  %14913 = vmatprep.mubr.msk.f32.mxu1 %vm2353_vm3, %v18296_v52 }
 0x7d2   :  { %14911 = vmatprep.subr.mxu1 %v18507_v30 }
 0x7d3   :  { %14912 = vmatpush3.msra.mxu1 %v18507_v30 }
 0x7d4   :  { %14914 = vmatmul.mubr.msk.f32.vlgmr.msra.gmra.mxu1 %vm2353_vm3, %v18305_v8  ;;  %14916 = vmatprep.subr.mxu1 %v18500_v63 }
 0x7d5   :  { %14917 = vmatpush3.msra.mxu1 %v18500_v63  ;;  %14920 = vmatprep.mubr.msk.f32.mxu1 %vm2353_vm3, %v18314_v13 }
 0x7d6   :  { %14918 = vmatprep.subr.mxu1 %v18507_v30 }
 0x7d7   :  { %14919 = vmatpush3.msra.mxu1 %v18507_v30 }
 0x7d8   :  { %14921 = vmatmul.mubr.msk.f32.vlgmr.msra.gmra.mxu1 %vm2353_vm3, %v18323_v14  ;;  %14923 = vmatprep.subr.mxu1 %v18500_v63 }
 0x7d9   :  { %14924 = vmatpush3.msra.mxu1 %v18500_v63  ;;  %14927 = vmatprep.mubr.msk.f32.mxu1 %vm2353_vm3, %v18332_v41 }
 0x7da   :  { %14925 = vmatprep.subr.mxu1 %v18507_v30 }
 0x7db   :  { %14926 = vmatpush3.msra.mxu1 %v18507_v30 }
 0x7dc   :  { %14928 = vmatmul.mubr.msk.f32.vlgmr.msra.gmra.mxu1 %vm2353_vm3, %v18341_v11  ;;  %14949 = vmatprep.subr.mxu1 %v21299_v6 }
 0x7dd   :  { %14950 = vmatpush3.msra.mxu1 %v21299_v6  ;;  %v21332_v6 = vld [vmem:[#allocation80_spill] sm:$0xff] }
 0x7de   :  { %14951 = vmatprep.subr.mxu1 %v21300_v15 }
 0x7df   :  { %14952 = vmatpush3.msra.mxu1 %v21300_v15  ;;  %v21333_v15 = vld [vmem:[#allocation81_spill] sm:$0xff] }
 0x7e0   :  { %14953 = vmatprep.subr.mxu1 %v21301_v61 }
 0x7e1   :  { %14954 = vmatpush3.msra.mxu1 %v21301_v61  ;;  %v21334_v61 = vld [vmem:[#allocation82_spill] sm:$0xff] }
 0x7e2   :  { %14955 = vmatprep.subr.mxu1 %v21302_v51 }
 0x7e3   :  { %14956 = vmatpush3.msra.mxu1 %v21302_v51  ;;  %v21335_v51 = vld [vmem:[#allocation83_spill] sm:$0xff] }
 0x7e4   :  { %14957 = vmatprep.subr.mxu1 %v21303_v45 }
 0x7e5   :  { %14958 = vmatpush3.msra.mxu1 %v21303_v45  ;;  %v21336_v45 = vld [vmem:[#allocation84_spill] sm:$0xff] }
 0x7e6   :  { %14959 = vmatprep.subr.mxu1 %v21304_v20 }
 0x7e7   :  { %14960 = vmatpush3.msra.mxu1 %v21304_v20  ;;  %v21337_v20 = vld [vmem:[#allocation85_spill] sm:$0xff] }
 0x7e8   :  { %14961 = vmatprep.subr.mxu1 %v21305_v28 }
 0x7e9   :  { %14962 = vmatpush3.msra.mxu1 %v21305_v28 }
 0x7ea   :  { %14963 = vmatprep.subr.mxu1 %v21306_v31 }
 0x7eb   :  { %14964 = vmatpush3.msra.mxu1 %v21306_v31 }
 0x7ec   :  { %14987 = vmatprep.subr.mxu1 %v21307_v49 }
 0x890   :  { %v14908_v32 = vpop.f32.mrf.mxu1 }
 0x892   :  { %v4713_v55 = vpop.f32.mrf.mxu1 }
 0x893   :  { %14946 = vmatprep.mubr.msk.f32.mxu0 %vm2695_vm4, %v4713_v55 }
 0x894   :  { %v14915_v38 = vpop.f32.mrf.mxu1  ;;  %14947 = vmatmul.mubr.msk.f32.vlgmr.msra.gmra.mxu0 %vm2695_vm4, %v14908_v32 }
 0x895   :  { %14969 = vmatpush3.msra.mxu0 %v17982_v58 }
 0x896   :  { %14970 = vmatprep.subr.mxu0 %v21308_v33  ;;  %v4788_v50 = vpop.f32.mrf.mxu1 }
 0x897   :  { %14971 = vmatpush3.msra.mxu0 %v21308_v33 }
 0x898   :  { %14972 = vmatprep.subr.mxu0 %v21309_v34  ;;  %v14922_v57 = vpop.f32.mrf.mxu1 }
 0x899   :  { %14973 = vmatpush3.msra.mxu0 %v21309_v34 }
 0x89a   :  { %14974 = vmatprep.subr.mxu0 %v21310_v27  ;;  %v4863_v9 = vpop.f32.mrf.mxu1 }
 0x89b   :  { %14975 = vmatpush3.msra.mxu0 %v21310_v27  ;;  %14965 = vmatprep.mubr.msk.f32.mxu1 %vm2695_vm4, %v4863_v9 }
 0x89c   :  { %14976 = vmatprep.subr.mxu0 %v21311_v36  ;;  %14966 = vmatmul.mubr.msk.f32.vlgmr.msra.gmra.mxu1 %vm2695_vm4, %v14922_v57  ;;  %v14929_v58 = vpop.f32.mrf.mxu1 }
 0x89d   :  { %14977 = vmatpush3.msra.mxu0 %v21311_v36  ;;  %14988 = vmatpush3.msra.mxu1 %v21307_v49 }
 0x89e   :  { %14978 = vmatprep.subr.mxu0 %v21312_v26  ;;  %14989 = vmatprep.subr.mxu1 %v21313_v56  ;;  %v4938_v18 = vpop.f32.mrf.mxu1 }
 0x89f   :  { %15003 = vmatprep.mubr.msk.f32.mxu1 %vm2695_vm4, %v18507_v30  ;;  %14979 = vmatpush3.msra.mxu0 %v21312_v26  ;;  %v21331_v30 = vld [vmem:[#allocation79_spill] sm:$0xff] }
 0x8a0   :  { %14990 = vmatpush3.msra.mxu1 %v21313_v56  ;;  %14980 = vmatprep.subr.mxu0 %v21314_v47 }
 0x8a1   :  { %14991 = vmatprep.subr.mxu1 %v21315_v46  ;;  %14981 = vmatpush3.msra.mxu0 %v21314_v47 }
 0x8a2   :  { %14992 = vmatpush3.msra.mxu1 %v21315_v46  ;;  %14982 = vmatprep.subr.mxu0 %v21316_v37 }
 0x8a3   :  { %14984 = vmatprep.mubr.msk.f32.mxu0 %vm2695_vm4, %v4938_v18  ;;  %14993 = vmatprep.subr.mxu1 %v21317_v54  ;;  %v21338_v18 = vld [vmem:[#allocation38_spill] sm:$0xff] }
 0x8a4   :  { %14983 = vmatpush3.msra.mxu0 %v21316_v37  ;;  %14994 = vmatpush3.msra.mxu1 %v21317_v54  ;;  %v21339_v54 = vld [vmem:[#allocation39_spill] sm:$0xff] }
 0x8a5   :  { %14985 = vmatmul.mubr.msk.f32.vlgmr.msra.gmra.mxu0 %vm2695_vm4, %v14929_v58  ;;  %14995 = vmatprep.subr.mxu1 %v21318_v10 }
 0x8a6   :  { %15006 = vmatprep.subr.mxu0 %v21319_v59  ;;  %14996 = vmatpush3.msra.mxu1 %v21318_v10 }
 0x8a7   :  { %15007 = vmatpush3.msra.mxu0 %v21319_v59  ;;  %15022 = vmatprep.mubr.msk.f32.mxu0 %vm2695_vm4, %v4788_v50 }
 0x8a8   :  { %14997 = vmatprep.subr.mxu1 %v21320_v7  ;;  %15008 = vmatprep.subr.mxu0 %v21321_v5 }
 0x8a9   :  { %14998 = vmatpush3.msra.mxu1 %v21320_v7  ;;  %15009 = vmatpush3.msra.mxu0 %v21321_v5  ;;  %v5363_v5 = vsub.f32 1.0, %v18496_v29 }
 0x8aa   :  { %14999 = vmatprep.subr.mxu1 %v21322_v2  ;;  %15010 = vmatprep.subr.mxu0 %v21323_v39 }
 0x8ab   :  { %15000 = vmatpush3.msra.mxu1 %v21322_v2  ;;  %15011 = vmatpush3.msra.mxu0 %v21323_v39  ;;  %v5361_v39 = vmul.f32 %v18496_v29, %v18267_v19 }
 0x8ac   :  { %15001 = vmatprep.subr.mxu1 %v21324_v0  ;;  %15012 = vmatprep.subr.mxu0 %v21325_v16 }
 0x8ad   :  { %15002 = vmatpush3.msra.mxu1 %v21324_v0  ;;  %15013 = vmatpush3.msra.mxu0 %v21325_v16  ;;  %v5362_v16 = vsub.f32 1.0, %v18502_v40 }
 0x8ae   :  { %15004 = vmatmul.mubr.msk.f32.vlgmr.msra.gmra.mxu1 %vm2695_vm4, %v18500_v63  ;;  %15014 = vmatprep.subr.mxu0 %v21326_v35  ;;  %v21330_v63 = vld [vmem:[#allocation78_spill] sm:$0xff] }
 0x8af   :  { %15015 = vmatpush3.msra.mxu0 %v21326_v35  ;;  %15029 = vmatprep.mubr.msk.f32.mxu1 %vm2353_vm3, %v18175_v22 }
 0x8b0   :  { %15016 = vmatprep.subr.mxu0 %v21327_v23 }
 0x8b1   :  { %15017 = vmatpush3.msra.mxu0 %v21327_v23 }
 0x8b2   :  { %15018 = vmatprep.subr.mxu0 %v21328_v44 }
 0x8b3   :  { %15019 = vmatpush3.msra.mxu0 %v21328_v44  ;;  %v5360_v44 = vmul.f32 %v18502_v40, %v18272_v3  ;;  %v18740_v40 = vld [vmem:[%s21200_s2 + $0x110] sm:$0xff] }
 0x8b4   :  { %15020 = vmatprep.subr.mxu0 %v21329_v4 }
 0x8b5   :  { %15021 = vmatpush3.msra.mxu0 %v21329_v4 }
 0x8b6   :  { %15023 = vmatmul.mubr.msk.f32.vlgmr.msra.gmra.mxu0 %vm2695_vm4, %v14915_v38  ;;  %15053 = vmatprep.subr.mxu0 %v21330_v63 }
 0x8b7   :  { %15054 = vmatpush3.msra.mxu0 %v21330_v63 }
 0x8b8   :  { %15055 = vmatprep.subr.mxu0 %v21331_v30 }
 0x8b9   :  { %15056 = vmatpush3.msra.mxu0 %v21331_v30 }
 0x8ba   :  { %15057 = vmatprep.subr.mxu0 %v21332_v6 }
 0x8bb   :  { %15058 = vmatpush3.msra.mxu0 %v21332_v6  ;;  %v18746_v6 = vld [vmem:[%s21200_s2 + $0x30] sm:$0xff] }
 0x8bc   :  { %15059 = vmatprep.subr.mxu0 %v21333_v15 }
 0x8bd   :  { %15060 = vmatpush3.msra.mxu0 %v21333_v15 }
 0x8be   :  { %15061 = vmatprep.subr.mxu0 %v21334_v61 }
 0x8bf   :  { %15062 = vmatpush3.msra.mxu0 %v21334_v61  ;;  %v18762_v61 = vld [vmem:[%s21200_s2 + $0x28] sm:$0xff] }
 0x8c0   :  { %15063 = vmatprep.subr.mxu0 %v21335_v51 }
 0x8c1   :  { %15064 = vmatpush3.msra.mxu0 %v21335_v51  ;;  %v18770_v51 = vld [vmem:[%s21200_s2 + $0x100] sm:$0xff] }
 0x8c2   :  { %15065 = vmatprep.subr.mxu0 %v21336_v45 }
 0x8c3   :  { %15066 = vmatpush3.msra.mxu0 %v21336_v45  ;;  %v18777_v45 = vld [vmem:[%s21200_s2 + $0x20] sm:$0xff] }
 0x8c4   :  { %15067 = vmatprep.subr.mxu0 %v21337_v20 }
 0x8c5   :  { %15068 = vmatpush3.msra.mxu0 %v21337_v20  ;;  %v18786_v20 = vld [vmem:[%s21200_s2 + $0x18] sm:$0xff] }
 0x8c6   :  { %15091 = vmatprep.subr.mxu0 %v18251_v42 }
 0x954   :  { %v14948_v28 = vpop.f32.mrf.mxu0 }
 0x956   :  { %v5019_v49 = vpop.f32.mrf.mxu0 }
 0x95c   :  { %v14967_v31 = vpop.f32.mrf.mxu1 }
 0x95e   :  { %v5100_v32 = vpop.f32.mrf.mxu1 }
 0x965   :  { %v14986_v55 = vpop.f32.mrf.mxu0 }
 0x967   :  { %v5181_v33 = vpop.f32.mrf.mxu0 }
 0x96e   :  { %v15005_v38 = vpop.f32.mrf.mxu1 }
 0x96f   :  { %v5268_v57 = vadd.f32 %v15005_v38, %v14948_v28  ;;  %v18792_v28 = vld [vmem:[%s21200_s2 + $0xb8] sm:$0xff]  ;;  %v18829_v38 = vld [vmem:[%s21200_s2] sm:$0xff] }
 0x970   :  { %v5262_v50 = vpop.f32.mrf.mxu1 }
 0x971   :  { %v5263_v36 = vadd.f32 %v5262_v50, %v5019_v49  ;;  %v18807_v49 = vld [vmem:[%s21200_s2 + $0xb0] sm:$0xff]  ;;  %v18845_v50 = vld [vmem:[%s21200_s2 + $0x98] sm:$0xff] }
 0x976   :  { %v15024_v34 = vpop.f32.mrf.mxu0 }
 0x977   :  { %v5349_v27 = vadd.f32 %v15024_v34, %v14967_v31  ;;  %v18801_v31 = vld [vmem:[%s21200_s2 + $0x10] sm:$0xff] }
 0x978   :  { %v5343_v9 = vpop.f32.mrf.mxu0  ;;  %v18854_v34 = vld [vmem:[%s21200_s2 + $0x90] sm:$0xff] }
 0x979   :  { %v5353_v58 = vadd.f32 %v5349_v27, %v5268_v57  ;;  %v5344_v26 = vadd.f32 %v5343_v9, %v5100_v32  ;;  %v18815_v32 = vld [vmem:[%s21200_s2 + $0x8] sm:$0xff]  ;;  %v18877_v27 = vld [vmem:[%s20955_s7 + $0x78] sm:$0xff]  ;;  %v18884_v9 = vld [vmem:[%s20955_s7 + $0x70] sm:$0xff] }
 0x97a   :  { %v18861_v57 = vld [vmem:[%s21200_s2 + $0x88] sm:$0xff]  ;;  %21340 = vst [vmem:[#allocation34_spill] sm:$0xff] %v18884_v9 }
 0x97b   :  { %v5355_v56 = vadd.f32 %v14986_v55, %v5353_v58  ;;  %v5352_v47 = vadd.f32 %v5344_v26, %v5263_v36  ;;  %v18821_v55 = vld [vmem:[%s21200_s2 + $0xa8] sm:$0xff]  ;;  %v18898_v58 = vld [vmem:[%s20955_s7 + $0x60] sm:$0xff]  ;;  %v18905_v26 = vld [vmem:[%s20955_s7 + $0x58] sm:$0xff] }
 0x97c   :  { %v18891_v36 = vld [vmem:[%s20955_s7 + $0x68] sm:$0xff]  ;;  %21342 = vst [vmem:[#allocation37_spill] sm:$0xff] %v18898_v58  ;;  %21343 = vst [vmem:[#allocation36_spill] sm:$0xff] %v18905_v26 }
 0x97d   :  { %v5357_v46 = vadd.f32 %v5355_v56, %v21338_v18  ;;  %v5354_v37 = vadd.f32 %v5352_v47, %v5181_v33  ;;  %v18835_v33 = vld [vmem:[%s21200_s2 + $0xa0] sm:$0xff]  ;;  %21341 = vst [vmem:[#allocation33_spill] sm:$0xff] %v18891_v36  ;;  %v18912_v56 = vld [vmem:[%s20955_s7 + $0x50] sm:$0xff]  ;;  %v18919_v47 = vld [vmem:[%s20955_s7 + $0x48] sm:$0xff] }
 0x97e   :  { %21344 = vst [vmem:[#allocation48_spill] sm:$0xff] %v18912_v56  ;;  %21345 = vst [vmem:[#allocation4_spill] sm:$0xff] %v18919_v47  ;;  %v18926_v18 = vld [vmem:[%s20955_s7 + $0x40] sm:$0xff] }
 0x97f   :  { %16223 = vtanh.f32 %v5357_v46  ;;  %v5356_v10 = vadd.f32 %v5354_v37, %v21339_v54  ;;  %21346 = vst [vmem:[#allocation19_spill] sm:$0xff] %v18926_v18  ;;  %v18933_v46 = vld [vmem:[%s20955_s7 + $0x138] sm:$0xff] }
 0x981   :  { %16225 = vtanh.f32 %v5356_v10 }
 0x98c   :  { %v16224_v59 = vpop.eup %16223 }
 0x98d   :  { %5368 = vrot.lane.b32.xlu0 %v16224_v59, %s16481_s23 }
 0x98e   :  { %v16226_v7 = vpop.eup %16225 }
 0x98f   :  { %5366 = vrot.lane.b32.xlu1 %v16226_v7, %s16481_s23 }
 0x9ff   :  { %v5369_v2 = vpop.permute.xlu0 %5368 }
 0xa00   :  { %v5373_v0 = vmul.f32 %v5369_v2, %v5363_v5  ;;  %v21347_v5 = vld [vmem:[#allocation5_spill] sm:$0xff] }
 0xa01   :  { %v5367_v35 = vpop.permute.xlu1 %5366  ;;  %v21348_v2 = vld [vmem:[#allocation21_spill] sm:$0xff] }
 0xa02   :  { %v18640_v23 = vadd.f32 %v5373_v0, %v5361_v39  ;;  %v5372_v4 = vmul.f32 %v5367_v35, %v5362_v16  ;;  %v1406_v39 = vadd.f32 %v21348_v2, %v21347_v5  ;;  %v21349_v0 = vld [vmem:[#allocation11_spill] sm:$0xff]  ;;  %v21350_v16 = vld [vmem:[#allocation22_spill] sm:$0xff] }
 0xa03   :  { %v1570_v35 = vadd.f32 %v21350_v16, %v21349_v0  ;;  %v21352_v2 = vld [vmem:[#allocation26_spill] sm:$0xff] }
 0xa04   :  { %v18644_v63 = vadd.f32 %v5372_v4, %v5360_v44  ;;  %5380 = vrot.lane.b32.xlu0 %v18640_v23, %s16481_s23 }
 0xa06   :  { %5378 = vrot.lane.b32.xlu1 %v18644_v63, %s16481_s23 }
 0xa76   :  { %v18650_v30 = vpop.permute.xlu0 %5380 }
 0xa77   :  { %15025 = vmatprep.subr.mxu1 %v18650_v30 }
 0xa78   :  { %15026 = vmatpush3.msra.mxu1 %v18650_v30  ;;  %v18654_v19 = vpop.permute.xlu1 %5378 }
 0xa79   :  { %15027 = vmatprep.subr.mxu1 %v18654_v19 }
 0xa7a   :  { %15028 = vmatpush3.msra.mxu1 %v18654_v19 }
 0xa7b   :  { %15030 = vmatmul.mubr.msk.f32.vlgmr.msra.gmra.mxu1 %vm2353_vm3, %v18287_v17  ;;  %15032 = vmatprep.subr.mxu1 %v18650_v30 }
 0xa7c   :  { %15033 = vmatpush3.msra.mxu1 %v18650_v30  ;;  %15036 = vmatprep.mubr.msk.f32.mxu1 %vm2353_vm3, %v18296_v52 }
 0xa7d   :  { %15034 = vmatprep.subr.mxu1 %v18654_v19 }
 0xa7e   :  { %15035 = vmatpush3.msra.mxu1 %v18654_v19 }
 0xa7f   :  { %15037 = vmatmul.mubr.msk.f32.vlgmr.msra.gmra.mxu1 %vm2353_vm3, %v18305_v8  ;;  %15039 = vmatprep.subr.mxu1 %v18650_v30 }
 0xa80   :  { %15040 = vmatpush3.msra.mxu1 %v18650_v30  ;;  %15043 = vmatprep.mubr.msk.f32.mxu1 %vm2353_vm3, %v18314_v13 }
 0xa81   :  { %15041 = vmatprep.subr.mxu1 %v18654_v19 }
 0xa82   :  { %15042 = vmatpush3.msra.mxu1 %v18654_v19 }
 0xa83   :  { %15044 = vmatmul.mubr.msk.f32.vlgmr.msra.gmra.mxu1 %vm2353_vm3, %v18323_v14  ;;  %15046 = vmatprep.subr.mxu1 %v18650_v30 }
 0xa84   :  { %15047 = vmatpush3.msra.mxu1 %v18650_v30  ;;  %15050 = vmatprep.mubr.msk.f32.mxu1 %vm2353_vm3, %v18332_v41 }
 0xa85   :  { %15048 = vmatprep.subr.mxu1 %v18654_v19 }
 0xa86   :  { %15049 = vmatpush3.msra.mxu1 %v18654_v19 }
 0xa87   :  { %15051 = vmatmul.mubr.msk.f32.vlgmr.msra.gmra.mxu1 %vm2353_vm3, %v18341_v11  ;;  %15072 = vmatprep.subr.mxu1 %v18348_v12 }
 0xa88   :  { %15073 = vmatpush3.msra.mxu1 %v18348_v12 }
 0xa89   :  { %15074 = vmatprep.subr.mxu1 %v18355_v48 }
 0xa8a   :  { %15075 = vmatpush3.msra.mxu1 %v18355_v48 }
 0xa8b   :  { %15076 = vmatprep.subr.mxu1 %v18362_v62 }
 0xa8c   :  { %15077 = vmatpush3.msra.mxu1 %v18362_v62  ;;  %v18709_v62 = vld [vmem:[%s21200_s2 + $0x130] sm:$0xff] }
 0xa8d   :  { %15078 = vmatprep.subr.mxu1 %v18369_v43 }
 0xa8e   :  { %15079 = vmatpush3.msra.mxu1 %v18369_v43 }
 0xa8f   :  { %15080 = vmatprep.subr.mxu1 %v18376_v21 }
 0xa90   :  { %15081 = vmatpush3.msra.mxu1 %v18376_v21  ;;  %v18716_v21 = vld [vmem:[%s21200_s2 + $0x128] sm:$0xff] }
 0xa91   :  { %15082 = vmatprep.subr.mxu1 %v18383_v60 }
 0xa92   :  { %15083 = vmatpush3.msra.mxu1 %v18383_v60 }
 0xa93   :  { %15084 = vmatprep.subr.mxu1 %v18390_v1 }
 0xa94   :  { %15085 = vmatpush3.msra.mxu1 %v18390_v1 }
 0xa95   :  { %15086 = vmatprep.subr.mxu1 %v18397_v24 }
 0xa96   :  { %15087 = vmatpush3.msra.mxu1 %v18397_v24  ;;  %v18731_v24 = vld [vmem:[%s21200_s2 + $0x118] sm:$0xff] }
 0xa97   :  { %15110 = vmatprep.subr.mxu1 %v18404_v25 }
 0xb3b   :  { %v15031_v3 = vpop.f32.mrf.mxu1 }
 0xb3d   :  { %v5450_v12 = vpop.f32.mrf.mxu1 }
 0xb3e   :  { %15069 = vmatprep.mubr.msk.f32.mxu0 %vm2695_vm4, %v5450_v12 }
 0xb3f   :  { %v18702_v48 = vpop.f32.mrf.mxu1  ;;  %15070 = vmatmul.mubr.msk.f32.vlgmr.msra.gmra.mxu0 %vm2695_vm4, %v15031_v3  ;;  %v1612_v3 = vadd.f32 %v1570_v35, %v1406_v39 }
 0xb40   :  { %15092 = vmatpush3.msra.mxu0 %v18251_v42  ;;  %v18723_v42 = vld [vmem:[%s21200_s2 + $0x120] sm:$0xff] }
 0xb41   :  { %15093 = vmatprep.subr.mxu0 %v18709_v62  ;;  %v5525_v43 = vpop.f32.mrf.mxu1 }
 0xb42   :  { %15094 = vmatpush3.msra.mxu0 %v18709_v62 }
 0xb43   :  { %15095 = vmatprep.subr.mxu0 %v18716_v21  ;;  %v15045_v60 = vpop.f32.mrf.mxu1 }
 0xb44   :  { %15096 = vmatpush3.msra.mxu0 %v18716_v21 }
 0xb45   :  { %15097 = vmatprep.subr.mxu0 %v18723_v42  ;;  %v5600_v1 = vpop.f32.mrf.mxu1 }
 0xb46   :  { %15098 = vmatpush3.msra.mxu0 %v18723_v42  ;;  %15088 = vmatprep.mubr.msk.f32.mxu1 %vm2695_vm4, %v5600_v1 }
 0xb47   :  { %15099 = vmatprep.subr.mxu0 %v18731_v24  ;;  %15089 = vmatmul.mubr.msk.f32.vlgmr.msra.gmra.mxu1 %vm2695_vm4, %v15045_v60  ;;  %v15052_v29 = vpop.f32.mrf.mxu1 }
 0xb48   :  { %15100 = vmatpush3.msra.mxu0 %v18731_v24  ;;  %15111 = vmatpush3.msra.mxu1 %v18404_v25  ;;  %v18756_v25 = vld [vmem:[%s21200_s2 + $0x108] sm:$0xff] }
 0xb49   :  { %15101 = vmatprep.subr.mxu0 %v18740_v40  ;;  %15112 = vmatprep.subr.mxu1 %v18746_v6  ;;  %v5675_v15 = vpop.f32.mrf.mxu1 }
 0xb4a   :  { %15126 = vmatprep.mubr.msk.f32.mxu1 %vm2695_vm4, %v18654_v19  ;;  %15102 = vmatpush3.msra.mxu0 %v18740_v40 }
 0xb4b   :  { %15113 = vmatpush3.msra.mxu1 %v18746_v6  ;;  %15103 = vmatprep.subr.mxu0 %v18756_v25 }
 0xb4c   :  { %15114 = vmatprep.subr.mxu1 %v18762_v61  ;;  %15104 = vmatpush3.msra.mxu0 %v18756_v25 }
 0xb4d   :  { %15115 = vmatpush3.msra.mxu1 %v18762_v61  ;;  %15105 = vmatprep.subr.mxu0 %v18770_v51 }
 0xb4e   :  { %15107 = vmatprep.mubr.msk.f32.mxu0 %vm2695_vm4, %v5675_v15  ;;  %15116 = vmatprep.subr.mxu1 %v18777_v45 }
 0xb4f   :  { %15106 = vmatpush3.msra.mxu0 %v18770_v51  ;;  %15117 = vmatpush3.msra.mxu1 %v18777_v45 }
 0xb50   :  { %15108 = vmatmul.mubr.msk.f32.vlgmr.msra.gmra.mxu0 %vm2695_vm4, %v15052_v29  ;;  %15118 = vmatprep.subr.mxu1 %v18786_v20  ;;  %v21351_v29 = vld [vmem:[#allocation12_spill] sm:$0xff] }
 0xb51   :  { %15129 = vmatprep.subr.mxu0 %v18792_v28  ;;  %15119 = vmatpush3.msra.mxu1 %v18786_v20  ;;  %v1624_v15 = vadd.f32 %v1612_v3, %v21351_v29 }
 0xb52   :  { %15130 = vmatpush3.msra.mxu0 %v18792_v28  ;;  %15145 = vmatprep.mubr.msk.f32.mxu0 %vm2695_vm4, %v5525_v43 }
 0xb53   :  { %15120 = vmatprep.subr.mxu1 %v18801_v31  ;;  %15131 = vmatprep.subr.mxu0 %v18807_v49  ;;  %v1642_v5 = vadd.f32 %v18492_v53, %v1624_v15  ;;  %v19108_v15 = vld [vmem:[%s20955_s7 + $0x28] sm:$0xff] }
 0xb54   :  { %15121 = vmatpush3.msra.mxu1 %v18801_v31  ;;  %15132 = vmatpush3.msra.mxu0 %v18807_v49  ;;  %21359 = vst [vmem:[#allocation3_spill] sm:$0xff] %v19108_v15 }
 0xb55   :  { %15122 = vmatprep.subr.mxu1 %v18815_v32  ;;  %15133 = vmatprep.subr.mxu0 %v18821_v55 }
 0xb56   :  { %15123 = vmatpush3.msra.mxu1 %v18815_v32  ;;  %15134 = vmatpush3.msra.mxu0 %v18821_v55 }
 0xb57   :  { %15124 = vmatprep.subr.mxu1 %v18829_v38  ;;  %15135 = vmatprep.subr.mxu0 %v18835_v33 }
 0xb58   :  { %15125 = vmatpush3.msra.mxu1 %v18829_v38  ;;  %15136 = vmatpush3.msra.mxu0 %v18835_v33 }
 0xb59   :  { %15127 = vmatmul.mubr.msk.f32.vlgmr.msra.gmra.mxu1 %vm2695_vm4, %v18650_v30  ;;  %15137 = vmatprep.subr.mxu0 %v18845_v50 }
 0xb5a   :  { %15138 = vmatpush3.msra.mxu0 %v18845_v50  ;;  %15152 = vmatprep.mubr.msk.f32.mxu1 %vm2353_vm3, %v18175_v22  ;;  %v18868_v22 = vld [vmem:[%s21200_s2 + $0x80] sm:$0xff] }
 0xb5b   :  { %15139 = vmatprep.subr.mxu0 %v18854_v34 }
 0xb5c   :  { %15140 = vmatpush3.msra.mxu0 %v18854_v34 }
 0xb5d   :  { %15141 = vmatprep.subr.mxu0 %v18861_v57 }
 0xb5e   :  { %15142 = vmatpush3.msra.mxu0 %v18861_v57 }
 0xb5f   :  { %15143 = vmatprep.subr.mxu0 %v18868_v22 }
 0xb60   :  { %15144 = vmatpush3.msra.mxu0 %v18868_v22 }
 0xb61   :  { %15146 = vmatmul.mubr.msk.f32.vlgmr.msra.gmra.mxu0 %vm2695_vm4, %v18702_v48  ;;  %15176 = vmatprep.subr.mxu0 %v18877_v27 }
 0xb62   :  { %15177 = vmatpush3.msra.mxu0 %v18877_v27 }
 0xb63   :  { %15178 = vmatprep.subr.mxu0 %v18884_v9 }
 0xb64   :  { %15179 = vmatpush3.msra.mxu0 %v18884_v9 }
 0xb65   :  { %15180 = vmatprep.subr.mxu0 %v18891_v36 }
 0xb66   :  { %15181 = vmatpush3.msra.mxu0 %v18891_v36 }
 0xb67   :  { %15182 = vmatprep.subr.mxu0 %v18898_v58 }
 0xb68   :  { %15183 = vmatpush3.msra.mxu0 %v18898_v58 }
 0xb69   :  { %15184 = vmatprep.subr.mxu0 %v18905_v26 }
 0xb6a   :  { %15185 = vmatpush3.msra.mxu0 %v18905_v26 }
 0xb6b   :  { %15186 = vmatprep.subr.mxu0 %v18912_v56 }
 0xb6c   :  { %15187 = vmatpush3.msra.mxu0 %v18912_v56 }
 0xb6d   :  { %15188 = vmatprep.subr.mxu0 %v18919_v47 }
 0xb6e   :  { %15189 = vmatpush3.msra.mxu0 %v18919_v47 }
 0xb6f   :  { %15190 = vmatprep.subr.mxu0 %v18926_v18 }
 0xb70   :  { %15191 = vmatpush3.msra.mxu0 %v18926_v18 }
 0xb71   :  { %15214 = vmatprep.subr.mxu0 %v18933_v46 }
 0xbff   :  { %v15071_v37 = vpop.f32.mrf.mxu0 }
 0xc01   :  { %v5756_v10 = vpop.f32.mrf.mxu0 }
 0xc07   :  { %v15090_v54 = vpop.f32.mrf.mxu1 }
 0xc09   :  { %v5837_v59 = vpop.f32.mrf.mxu1 }
 0xc10   :  { %v15109_v7 = vpop.f32.mrf.mxu0 }
 0xc12   :  { %v5918_v4 = vpop.f32.mrf.mxu0 }
 0xc19   :  { %v15128_v44 = vpop.f32.mrf.mxu1 }
 0xc1a   :  { %v6003_v43 = vadd.f32 %v15128_v44, %v15071_v37 }
 0xc1b   :  { %v5997_v12 = vpop.f32.mrf.mxu1 }
 0xc1c   :  { %v5998_v18 = vadd.f32 %v5997_v12, %v5756_v10  ;;  %v19077_v12 = vld [vmem:[%s20955_s7 + $0x118] sm:$0xff] }
 0xc1d   :  { %21355 = vst [vmem:[#allocation10_spill] sm:$0xff] %v19077_v12 }
 0xc21   :  { %v15147_v48 = vpop.f32.mrf.mxu0 }
 0xc22   :  { %v6084_v60 = vadd.f32 %v15147_v48, %v15090_v54 }
 0xc23   :  { %v6078_v1 = vpop.f32.mrf.mxu0 }
 0xc24   :  { %v6088_v47 = vadd.f32 %v6084_v60, %v6003_v43  ;;  %v6079_v56 = vadd.f32 %v6078_v1, %v5837_v59  ;;  %v19062_v59 = vld [vmem:[%s20955_s7 + $0x128] sm:$0xff]  ;;  %v19086_v43 = vld [vmem:[%s20955_s7 + $0x110] sm:$0xff] }
 0xc25   :  { %21353 = vst [vmem:[#allocation9_spill] sm:$0xff] %v19062_v59  ;;  %21356 = vst [vmem:[#allocation23_spill] sm:$0xff] %v19086_v43  ;;  %v19092_v60 = vld [vmem:[%s20955_s7 + $0x30] sm:$0xff]  ;;  %v19102_v1 = vld [vmem:[%s20955_s7 + $0x108] sm:$0xff] }
 0xc26   :  { %v6090_v26 = vadd.f32 %v15109_v7, %v6088_v47  ;;  %v6087_v58 = vadd.f32 %v6079_v56, %v5998_v18  ;;  %v19055_v47 = vld [vmem:[%s20955_s7 + $0x130] sm:$0xff]  ;;  %21357 = vst [vmem:[#allocation2_spill] sm:$0xff] %v19092_v60  ;;  %21358 = vst [vmem:[#allocation49_spill] sm:$0xff] %v19102_v1 }
 0xc28   :  { %v6092_v36 = vadd.f32 %v6090_v26, %v21352_v2  ;;  %v6089_v0 = vadd.f32 %v6087_v58, %v5918_v4  ;;  %v19069_v4 = vld [vmem:[%s20955_s7 + $0x120] sm:$0xff] }
 0xc29   :  { %21354 = vst [vmem:[#allocation20_spill] sm:$0xff] %v19069_v4  ;;  %v19123_v2 = vld [vmem:[%s20955_s7 + $0x20] sm:$0xff] }
 0xc2a   :  { %v12841_v16 = vmul.f32 -1.442695, %v6092_v36  ;;  %v6091_v9 = vadd.f32 %v6089_v0, %v1642_v5  ;;  %v19116_v5 = vld [vmem:[%s20955_s7 + $0x100] sm:$0xff]  ;;  %21361 = vst [vmem:[#allocation51_spill] sm:$0xff] %v19123_v2  ;;  %v19132_v0 = vld [vmem:[%s20955_s7 + $0x18] sm:$0xff] }
 0xc2b   :  { %21360 = vst [vmem:[#allocation50_spill] sm:$0xff] %v19116_v5  ;;  %21362 = vst [vmem:[#allocation52_spill] sm:$0xff] %v19132_v0 }
 0xc2c   :  { %16227 = vpow2.f32 %v12841_v16  ;;  %v12840_v39 = vmul.f32 -1.442695, %v6091_v9  ;;  %v19138_v16 = vld [vmem:[%s20955_s7 + $0xb8] sm:$0xff] }
 0xc2d   :  { %21363 = vst [vmem:[#allocation53_spill] sm:$0xff] %v19138_v16 }
 0xc2e   :  { %16229 = vpow2.f32 %v12840_v39  ;;  %v19147_v39 = vld [vmem:[%s20955_s7 + $0x10] sm:$0xff] }
 0xc2f   :  { %21364 = vst [vmem:[#allocation54_spill] sm:$0xff] %v19147_v39 }
 0xc39   :  { %v16228_v37 = vpop.eup %16227 }
 0xc3a   :  { %v6100_v54 = vadd.f32 1.0, %v16228_v37  ;;  %v19153_v37 = vld [vmem:[%s20955_s7 + $0xb0] sm:$0xff] }
 0xc3b   :  { %v16230_v35 = vpop.eup %16229  ;;  %21365 = vst [vmem:[#allocation55_spill] sm:$0xff] %v19153_v37 }
 0xc3c   :  { %16231 = vrcp.f32 %v6100_v54  ;;  %v6099_v44 = vadd.f32 1.0, %v16230_v35  ;;  %v19161_v54 = vld [vmem:[%s20955_s7 + $0x8] sm:$0xff] }
 0xc3d   :  { %21366 = vst [vmem:[#allocation56_spill] sm:$0xff] %v19161_v54  ;;  %v19167_v35 = vld [vmem:[%s20955_s7 + $0xa8] sm:$0xff] }
 0xc3e   :  { %16233 = vrcp.f32 %v6099_v44  ;;  %21367 = vst [vmem:[#allocation57_spill] sm:$0xff] %v19167_v35  ;;  %v19175_v44 = vld [vmem:[%s20955_s7] sm:$0xff] }
 0xc3f   :  { %21368 = vst [vmem:[#allocation58_spill] sm:$0xff] %v19175_v44 }
 0xc49   :  { %v18943_v10 = vpop.eup %16231 }
 0xc4a   :  { %v18947_v56 = vmul.f32 %v18943_v10, %v18650_v30  ;;  %v19037_v30 = vld [vmem:[%s20955_s7 + $0xc0] sm:$0xff] }
 0xc4b   :  { %v18949_v53 = vpop.eup %16233 }
 0xc4c   :  { %15148 = vmatprep.subr.mxu1 %v18947_v56  ;;  %v18954_v9 = vmul.f32 %v18949_v53, %v18654_v19  ;;  %v19044_v19 = vld [vmem:[%s20955_s7 + $0x38] sm:$0xff] }
 0xc4d   :  { %15149 = vmatpush3.msra.mxu1 %v18947_v56 }
 0xc4e   :  { %15150 = vmatprep.subr.mxu1 %v18954_v9 }
 0xc4f   :  { %15151 = vmatpush3.msra.mxu1 %v18954_v9 }
 0xc50   :  { %15153 = vmatmul.mubr.msk.f32.vlgmr.msra.gmra.mxu1 %vm2353_vm3, %v18287_v17  ;;  %15155 = vmatprep.subr.mxu1 %v18947_v56  ;;  %v18988_v17 = vld [vmem:[%s20955_s7 + $0xf8] sm:$0xff] }
 0xc51   :  { %15156 = vmatpush3.msra.mxu1 %v18947_v56  ;;  %15159 = vmatprep.mubr.msk.f32.mxu1 %vm2353_vm3, %v18296_v52  ;;  %v18995_v52 = vld [vmem:[%s20955_s7 + $0xf0] sm:$0xff] }
 0xc52   :  { %15157 = vmatprep.subr.mxu1 %v18954_v9 }
 0xc53   :  { %15158 = vmatpush3.msra.mxu1 %v18954_v9 }
 0xc54   :  { %15160 = vmatmul.mubr.msk.f32.vlgmr.msra.gmra.mxu1 %vm2353_vm3, %v18305_v8  ;;  %15162 = vmatprep.subr.mxu1 %v18947_v56  ;;  %v19002_v8 = vld [vmem:[%s20955_s7 + $0xe8] sm:$0xff] }
 0xc55   :  { %15163 = vmatpush3.msra.mxu1 %v18947_v56  ;;  %15166 = vmatprep.mubr.msk.f32.mxu1 %vm2353_vm3, %v18314_v13  ;;  %v19009_v13 = vld [vmem:[%s20955_s7 + $0xe0] sm:$0xff] }
 0xc56   :  { %15164 = vmatprep.subr.mxu1 %v18954_v9 }
 0xc57   :  { %15165 = vmatpush3.msra.mxu1 %v18954_v9 }
 0xc58   :  { %15167 = vmatmul.mubr.msk.f32.vlgmr.msra.gmra.mxu1 %vm2353_vm3, %v18323_v14  ;;  %15169 = vmatprep.subr.mxu1 %v18947_v56  ;;  %v19016_v14 = vld [vmem:[%s20955_s7 + $0xd8] sm:$0xff] }
 0xc59   :  { %15170 = vmatpush3.msra.mxu1 %v18947_v56  ;;  %15173 = vmatprep.mubr.msk.f32.mxu1 %vm2353_vm3, %v18332_v41  ;;  %v19023_v41 = vld [vmem:[%s20955_s7 + $0xd0] sm:$0xff] }
 0xc5a   :  { %15171 = vmatprep.subr.mxu1 %v18954_v9 }
 0xc5b   :  { %15172 = vmatpush3.msra.mxu1 %v18954_v9 }
 0xc5c   :  { %15174 = vmatmul.mubr.msk.f32.vlgmr.msra.gmra.mxu1 %vm2353_vm3, %v18341_v11  ;;  %15195 = vmatprep.subr.mxu1 %v18988_v17  ;;  %v19030_v11 = vld [vmem:[%s20955_s7 + $0xc8] sm:$0xff] }
 0xc5d   :  { %15196 = vmatpush3.msra.mxu1 %v18988_v17 }
 0xc5e   :  { %15197 = vmatprep.subr.mxu1 %v18995_v52 }
 0xc5f   :  { %15198 = vmatpush3.msra.mxu1 %v18995_v52 }
 0xc60   :  { %15199 = vmatprep.subr.mxu1 %v19002_v8 }
 0xc61   :  { %15200 = vmatpush3.msra.mxu1 %v19002_v8 }
 0xc62   :  { %15201 = vmatprep.subr.mxu1 %v19009_v13 }
 0xc63   :  { %15202 = vmatpush3.msra.mxu1 %v19009_v13 }
 0xc64   :  { %15203 = vmatprep.subr.mxu1 %v19016_v14 }
 0xc65   :  { %15204 = vmatpush3.msra.mxu1 %v19016_v14 }
 0xc66   :  { %15205 = vmatprep.subr.mxu1 %v19023_v41 }
 0xc67   :  { %15206 = vmatpush3.msra.mxu1 %v19023_v41 }
 0xc68   :  { %15207 = vmatprep.subr.mxu1 %v19030_v11 }
 0xc69   :  { %15208 = vmatpush3.msra.mxu1 %v19030_v11 }
 0xc6a   :  { %15209 = vmatprep.subr.mxu1 %v19037_v30 }
 0xc6b   :  { %15210 = vmatpush3.msra.mxu1 %v19037_v30 }
 0xc6c   :  { %15233 = vmatprep.subr.mxu1 %v19044_v19 }
 0xd10   :  { %v15154_v36 = vpop.f32.mrf.mxu1 }
 0xd12   :  { %v6173_v58 = vpop.f32.mrf.mxu1 }
 0xd13   :  { %15192 = vmatprep.mubr.msk.f32.mxu0 %vm2695_vm4, %v6173_v58  ;;  %v19198_v58 = vld [vmem:[%s21197_s29] sm:$0xff] }
 0xd14   :  { %v19048_v26 = vpop.f32.mrf.mxu1  ;;  %15193 = vmatmul.mubr.msk.f32.vlgmr.msra.gmra.mxu0 %vm2695_vm4, %v15154_v36  ;;  %v19191_v36 = vld [vmem:[%s20955_s7 + $0x98] sm:$0xff] }
 0xd15   :  { %15215 = vmatpush3.msra.mxu0 %v18933_v46  ;;  %21370 = vst [vmem:[#allocation60_spill] sm:$0xff] %v19191_v36 }
 0xd16   :  { %15216 = vmatprep.subr.mxu0 %v19055_v47  ;;  %v6248_v18 = vpop.f32.mrf.mxu1 }
 0xd17   :  { %15217 = vmatpush3.msra.mxu0 %v19055_v47 }
 0xd18   :  { %15218 = vmatprep.subr.mxu0 %v19062_v59  ;;  %v15168_v7 = vpop.f32.mrf.mxu1 }
 0xd19   :  { %15219 = vmatpush3.msra.mxu0 %v19062_v59 }
 0xd1a   :  { %15220 = vmatprep.subr.mxu0 %v19069_v4  ;;  %v6323_v3 = vpop.f32.mrf.mxu1 }
 0xd1b   :  { %15221 = vmatpush3.msra.mxu0 %v19069_v4  ;;  %15211 = vmatprep.mubr.msk.f32.mxu1 %vm2695_vm4, %v6323_v3  ;;  %v19228_v3 = vld [vmem:[%s21200_s2 + $0x78] sm:$0xff] }
 0xd1c   :  { %15222 = vmatprep.subr.mxu0 %v19077_v12  ;;  %15212 = vmatmul.mubr.msk.f32.vlgmr.msra.gmra.mxu1 %vm2695_vm4, %v15168_v7  ;;  %v15175_v48 = vpop.f32.mrf.mxu1  ;;  %v19219_v7 = vld [vmem:[%s20955_s7 + $0x80] sm:$0xff]  ;;  %21374 = vst [vmem:[#allocation64_spill] sm:$0xff] %v19228_v3 }
 0xd1d   :  { %15223 = vmatpush3.msra.mxu0 %v19077_v12  ;;  %15234 = vmatpush3.msra.mxu1 %v19044_v19  ;;  %21373 = vst [vmem:[#allocation63_spill] sm:$0xff] %v19219_v7 }
 0xd1e   :  { %15224 = vmatprep.subr.mxu0 %v19086_v43  ;;  %15235 = vmatprep.subr.mxu1 %v19092_v60  ;;  %v6398_v29 = vpop.f32.mrf.mxu1 }
 0xd1f   :  { %15249 = vmatprep.mubr.msk.f32.mxu1 %vm2695_vm4, %v18954_v9  ;;  %15225 = vmatpush3.msra.mxu0 %v19086_v43  ;;  %v19181_v9 = vld [vmem:[%s20955_s7 + $0xa0] sm:$0xff]  ;;  %v21383_v43 = vld [vmem:[#allocation41_spill] sm:$0xff] }
 0xd20   :  { %15236 = vmatpush3.msra.mxu1 %v19092_v60  ;;  %15226 = vmatprep.subr.mxu0 %v19102_v1  ;;  %21369 = vst [vmem:[#allocation59_spill] sm:$0xff] %v19181_v9 }
 0xd21   :  { %15237 = vmatprep.subr.mxu1 %v19108_v15  ;;  %15227 = vmatpush3.msra.mxu0 %v19102_v1 }
 0xd22   :  { %15238 = vmatpush3.msra.mxu1 %v19108_v15  ;;  %15228 = vmatprep.subr.mxu0 %v19116_v5  ;;  %v21382_v15 = vld [vmem:[#allocation40_spill] sm:$0xff] }
 0xd23   :  { %15230 = vmatprep.mubr.msk.f32.mxu0 %vm2695_vm4, %v6398_v29  ;;  %15239 = vmatprep.subr.mxu1 %v19123_v2  ;;  %v19249_v29 = vld [vmem:[%s21200_s2 + $0x60] sm:$0xff] }
 0xd24   :  { %15229 = vmatpush3.msra.mxu0 %v19116_v5  ;;  %15240 = vmatpush3.msra.mxu1 %v19123_v2  ;;  %21377 = vst [vmem:[#allocation67_spill] sm:$0xff] %v19249_v29 }
 0xd25   :  { %15231 = vmatmul.mubr.msk.f32.vlgmr.msra.gmra.mxu0 %vm2695_vm4, %v15175_v48  ;;  %15241 = vmatprep.subr.mxu1 %v19132_v0  ;;  %v19235_v48 = vld [vmem:[%s21200_s2 + $0x70] sm:$0xff] }
 0xd26   :  { %15252 = vmatprep.subr.mxu0 %v19138_v16  ;;  %15242 = vmatpush3.msra.mxu1 %v19132_v0  ;;  %21375 = vst [vmem:[#allocation65_spill] sm:$0xff] %v19235_v48 }
 0xd27   :  { %15253 = vmatpush3.msra.mxu0 %v19138_v16  ;;  %15268 = vmatprep.mubr.msk.f32.mxu0 %vm2695_vm4, %v6248_v18  ;;  %v19212_v18 = vld [vmem:[%s20955_s7 + $0x88] sm:$0xff] }
 0xd28   :  { %15243 = vmatprep.subr.mxu1 %v19147_v39  ;;  %15254 = vmatprep.subr.mxu0 %v19153_v37  ;;  %21372 = vst [vmem:[#allocation62_spill] sm:$0xff] %v19212_v18 }
 0xd29   :  { %15244 = vmatpush3.msra.mxu1 %v19147_v39  ;;  %15255 = vmatpush3.msra.mxu0 %v19153_v37 }
 0xd2a   :  { %15245 = vmatprep.subr.mxu1 %v19161_v54  ;;  %15256 = vmatprep.subr.mxu0 %v19167_v35 }
 0xd2b   :  { %15246 = vmatpush3.msra.mxu1 %v19161_v54  ;;  %15257 = vmatpush3.msra.mxu0 %v19167_v35 }
 0xd2c   :  { %15247 = vmatprep.subr.mxu1 %v19175_v44  ;;  %15258 = vmatprep.subr.mxu0 %v19181_v9 }
 0xd2d   :  { %15248 = vmatpush3.msra.mxu1 %v19175_v44  ;;  %15259 = vmatpush3.msra.mxu0 %v19181_v9 }
 0xd2e   :  { %15250 = vmatmul.mubr.msk.f32.vlgmr.msra.gmra.mxu1 %vm2695_vm4, %v18947_v56  ;;  %15260 = vmatprep.subr.mxu0 %v19191_v36  ;;  %v19205_v56 = vld [vmem:[%s20955_s7 + $0x90] sm:$0xff] }
 0xd2f   :  { %15261 = vmatpush3.msra.mxu0 %v19191_v36  ;;  %15275 = vmatprep.mubr.msk.f32.mxu1 %vm2353_vm3, %v19198_v58  ;;  %21371 = vst [vmem:[#allocation61_spill] sm:$0xff] %v19205_v56 }
 0xd30   :  { %15262 = vmatprep.subr.mxu0 %v19205_v56 }
 0xd31   :  { %15263 = vmatpush3.msra.mxu0 %v19205_v56 }
 0xd32   :  { %15264 = vmatprep.subr.mxu0 %v19212_v18 }
 0xd33   :  { %15265 = vmatpush3.msra.mxu0 %v19212_v18 }
 0xd34   :  { %15266 = vmatprep.subr.mxu0 %v19219_v7 }
 0xd35   :  { %15267 = vmatpush3.msra.mxu0 %v19219_v7 }
 0xd36   :  { %15269 = vmatmul.mubr.msk.f32.vlgmr.msra.gmra.mxu0 %vm2695_vm4, %v19048_v26  ;;  %15299 = vmatprep.subr.mxu0 %v19228_v3  ;;  %v19242_v26 = vld [vmem:[%s21200_s2 + $0x68] sm:$0xff] }
 0xd37   :  { %15300 = vmatpush3.msra.mxu0 %v19228_v3  ;;  %21376 = vst [vmem:[#allocation66_spill] sm:$0xff] %v19242_v26 }
 0xd38   :  { %15301 = vmatprep.subr.mxu0 %v19235_v48 }
 0xd39   :  { %15302 = vmatpush3.msra.mxu0 %v19235_v48  ;;  %v19256_v48 = vld [vmem:[%s21200_s2 + $0x58] sm:$0xff] }
 0xd3a   :  { %15303 = vmatprep.subr.mxu0 %v19242_v26  ;;  %21378 = vst [vmem:[#allocation68_spill] sm:$0xff] %v19256_v48 }
 0xd3b   :  { %15304 = vmatpush3.msra.mxu0 %v19242_v26  ;;  %v19263_v26 = vld [vmem:[%s21200_s2 + $0x50] sm:$0xff] }
 0xd3c   :  { %15305 = vmatprep.subr.mxu0 %v19249_v29  ;;  %21379 = vst [vmem:[#allocation69_spill] sm:$0xff] %v19263_v26 }
 0xd3d   :  { %15306 = vmatpush3.msra.mxu0 %v19249_v29  ;;  %v19270_v29 = vld [vmem:[%s21200_s2 + $0x48] sm:$0xff] }
 0xd3e   :  { %15307 = vmatprep.subr.mxu0 %v19256_v48  ;;  %21380 = vst [vmem:[#allocation70_spill] sm:$0xff] %v19270_v29 }
 0xd3f   :  { %15308 = vmatpush3.msra.mxu0 %v19256_v48  ;;  %v19277_v48 = vld [vmem:[%s21200_s2 + $0x40] sm:$0xff] }
 0xd40   :  { %15309 = vmatprep.subr.mxu0 %v19263_v26  ;;  %21381 = vst [vmem:[#allocation71_spill] sm:$0xff] %v19277_v48 }
 0xd41   :  { %15310 = vmatpush3.msra.mxu0 %v19263_v26  ;;  %v19284_v26 = vld [vmem:[%s21200_s2 + $0x138] sm:$0xff] }
 0xd42   :  { %15311 = vmatprep.subr.mxu0 %v19270_v29 }
 0xd43   :  { %15312 = vmatpush3.msra.mxu0 %v19270_v29 }
 0xd44   :  { %15313 = vmatprep.subr.mxu0 %v19277_v48 }
 0xd45   :  { %15314 = vmatpush3.msra.mxu0 %v19277_v48 }
 0xd46   :  { %15337 = vmatprep.subr.mxu0 %v19284_v26 }
 0xdd4   :  { %v15194_v3 = vpop.f32.mrf.mxu0 }
 0xdd6   :  { %v6479_v18 = vpop.f32.mrf.mxu0 }
 0xddc   :  { %v15213_v7 = vpop.f32.mrf.mxu1 }
 0xdde   :  { %v6560_v29 = vpop.f32.mrf.mxu1 }
 0xde5   :  { %v15232_v56 = vpop.f32.mrf.mxu0 }
 0xde7   :  { %v6641_v9 = vpop.f32.mrf.mxu0 }
 0xdee   :  { %v15251_v36 = vpop.f32.mrf.mxu1 }
 0xdef   :  { %v6728_v54 = vadd.f32 %v15251_v36, %v15194_v3  ;;  %v19391_v36 = vld [vmem:[%s21200_s2 + $0xe8] sm:$0xff] }
 0xdf0   :  { %v6722_v44 = vpop.f32.mrf.mxu1  ;;  %v19419_v3 = vld [vmem:[%s21200_s2 + $0xc8] sm:$0xff] }
 0xdf1   :  { %v6723_v48 = vadd.f32 %v6722_v44, %v6479_v18  ;;  %v19405_v18 = vld [vmem:[%s21200_s2 + $0xd8] sm:$0xff] }
 0xdf6   :  { %v15270_v35 = vpop.f32.mrf.mxu0 }
 0xdf7   :  { %v6809_v37 = vadd.f32 %v15270_v35, %v15213_v7  ;;  %v6823_v35 = vsub.f32 1.0, %v18943_v10  ;;  %v19412_v7 = vld [vmem:[%s21200_s2 + $0xd0] sm:$0xff] }
 0xdf8   :  { %v6803_v39 = vpop.f32.mrf.mxu0 }
 0xdf9   :  { %v6813_v16 = vadd.f32 %v6809_v37, %v6728_v54  ;;  %v6804_v0 = vadd.f32 %v6803_v39, %v6560_v29  ;;  %v19361_v39 = vld [vmem:[%s21197_s29 + $0x30] sm:$0xff]  ;;  %v19370_v37 = vld [vmem:[%s21197_s29 + $0x38] sm:$0xff] }
 0xdfa   :  { %v19377_v54 = vld [vmem:[%s21200_s2 + $0xf8] sm:$0xff] }
 0xdfb   :  { %v6815_v2 = vadd.f32 %v15232_v56, %v6813_v16  ;;  %v6812_v5 = vadd.f32 %v6804_v0, %v6723_v48  ;;  %v6821_v16 = vmul.f32 %v18943_v10, %v18640_v23  ;;  %v19325_v10 = vld [vmem:[%s21197_s29 + $0x10] sm:$0xff]  ;;  %v19398_v56 = vld [vmem:[%s21200_s2 + $0xe0] sm:$0xff]  ;;  %v19433_v29 = vld [vmem:[%s21200_s2 + $0x38] sm:$0xff] }
 0xdfc   :  { %v19426_v48 = vld [vmem:[%s21200_s2 + $0xc0] sm:$0xff] }
 0xdfd   :  { %v6817_v1 = vadd.f32 %v6815_v2, %v21382_v15  ;;  %v6814_v60 = vadd.f32 %v6812_v5, %v6641_v9  ;;  %v6822_v15 = vsub.f32 1.0, %v18949_v53  ;;  %v19352_v2 = vld [vmem:[%s21197_s29 + $0x28] sm:$0xff]  ;;  %v19384_v9 = vld [vmem:[%s21200_s2 + $0xf0] sm:$0xff] }
 0xdff   :  { %16235 = vtanh.f32 %v6817_v1  ;;  %v6816_v12 = vadd.f32 %v6814_v60, %v21383_v43  ;;  %v19343_v60 = vld [vmem:[%s21197_s29 + $0x20] sm:$0xff] }
 0xe01   :  { %16237 = vtanh.f32 %v6816_v12  ;;  %v6820_v12 = vmul.f32 %v18949_v53, %v18644_v63  ;;  %v19316_v63 = vld [vmem:[%s21197_s29 + $0x8] sm:$0xff]  ;;  %v19334_v53 = vld [vmem:[%s21197_s29 + $0x18] sm:$0xff] }
 0xe0c   :  { %v16236_v4 = vpop.eup %16235 }
 0xe0d   :  { %6828 = vrot.lane.b32.xlu0 %v16236_v4, %s16481_s23 }
 0xe0e   :  { %v16238_v59 = vpop.eup %16237 }
 0xe0f   :  { %6826 = vrot.lane.b32.xlu1 %v16238_v59, %s16481_s23 }
 0xe7f   :  { %v6829_v44 = vpop.permute.xlu0 %6828 }
 0xe80   :  { %v6833_v0 = vmul.f32 %v6829_v44, %v6823_v35 }
 0xe81   :  { %v6827_v5 = vpop.permute.xlu1 %6826 }
 0xe82   :  { %v19295_v1 = vadd.f32 %v6833_v0, %v6821_v16  ;;  %v6832_v43 = vmul.f32 %v6827_v5, %v6822_v15 }
 0xe84   :  { %v19299_v4 = vadd.f32 %v6832_v43, %v6820_v12  ;;  %6840 = vrot.lane.b32.xlu0 %v19295_v1, %s16481_s23 }
 0xe86   :  { %6838 = vrot.lane.b32.xlu1 %v19299_v4, %s16481_s23 }
 0xef6   :  { %v19305_v59 = vpop.permute.xlu0 %6840 }
 0xef7   :  { %15271 = vmatprep.subr.mxu1 %v19305_v59 }
 0xef8   :  { %15272 = vmatpush3.msra.mxu1 %v19305_v59  ;;  %v19309_v23 = vpop.permute.xlu1 %6838 }
 0xef9   :  { %15273 = vmatprep.subr.mxu1 %v19309_v23 }
 0xefa   :  { %15274 = vmatpush3.msra.mxu1 %v19309_v23 }
 0xefb   :  { %15276 = vmatmul.mubr.msk.f32.vlgmr.msra.gmra.mxu1 %vm2353_vm3, %v19316_v63  ;;  %15278 = vmatprep.subr.mxu1 %v19305_v59 }
 0xefc   :  { %15279 = vmatpush3.msra.mxu1 %v19305_v59  ;;  %15282 = vmatprep.mubr.msk.f32.mxu1 %vm2353_vm3, %v19325_v10 }
 0xefd   :  { %15280 = vmatprep.subr.mxu1 %v19309_v23 }
 0xefe   :  { %15281 = vmatpush3.msra.mxu1 %v19309_v23 }
 0xeff   :  { %15283 = vmatmul.mubr.msk.f32.vlgmr.msra.gmra.mxu1 %vm2353_vm3, %v19334_v53  ;;  %15285 = vmatprep.subr.mxu1 %v19305_v59 }
 0xf00   :  { %15286 = vmatpush3.msra.mxu1 %v19305_v59  ;;  %15289 = vmatprep.mubr.msk.f32.mxu1 %vm2353_vm3, %v19343_v60 }
 0xf01   :  { %15287 = vmatprep.subr.mxu1 %v19309_v23 }
 0xf02   :  { %15288 = vmatpush3.msra.mxu1 %v19309_v23 }
 0xf03   :  { %15290 = vmatmul.mubr.msk.f32.vlgmr.msra.gmra.mxu1 %vm2353_vm3, %v19352_v2  ;;  %15292 = vmatprep.subr.mxu1 %v19305_v59 }
 0xf04   :  { %15293 = vmatpush3.msra.mxu1 %v19305_v59  ;;  %15296 = vmatprep.mubr.msk.f32.mxu1 %vm2353_vm3, %v19361_v39 }
 0xf05   :  { %15294 = vmatprep.subr.mxu1 %v19309_v23 }
 0xf06   :  { %15295 = vmatpush3.msra.mxu1 %v19309_v23 }
 0xf07   :  { %15297 = vmatmul.mubr.msk.f32.vlgmr.msra.gmra.mxu1 %vm2353_vm3, %v19370_v37  ;;  %15318 = vmatprep.subr.mxu1 %v19377_v54 }
 0xf08   :  { %15319 = vmatpush3.msra.mxu1 %v19377_v54 }
 0xf09   :  { %15320 = vmatprep.subr.mxu1 %v19384_v9 }
 0xf0a   :  { %15321 = vmatpush3.msra.mxu1 %v19384_v9 }
 0xf0b   :  { %15322 = vmatprep.subr.mxu1 %v19391_v36 }
 0xf0c   :  { %15323 = vmatpush3.msra.mxu1 %v19391_v36 }
 0xf0d   :  { %15324 = vmatprep.subr.mxu1 %v19398_v56 }
 0xf0e   :  { %15325 = vmatpush3.msra.mxu1 %v19398_v56 }
 0xf0f   :  { %15326 = vmatprep.subr.mxu1 %v19405_v18 }
 0xf10   :  { %15327 = vmatpush3.msra.mxu1 %v19405_v18 }
 0xf11   :  { %15328 = vmatprep.subr.mxu1 %v19412_v7 }
 0xf12   :  { %15329 = vmatpush3.msra.mxu1 %v19412_v7 }
 0xf13   :  { %15330 = vmatprep.subr.mxu1 %v19419_v3 }
 0xf14   :  { %15331 = vmatpush3.msra.mxu1 %v19419_v3 }
 0xf15   :  { %15332 = vmatprep.subr.mxu1 %v19426_v48 }
 0xf16   :  { %15333 = vmatpush3.msra.mxu1 %v19426_v48 }
 0xf17   :  { %15356 = vmatprep.subr.mxu1 %v19433_v29 }
 0xfbb   :  { %v15277_v35 = vpop.f32.mrf.mxu1 }
 0xfbd   :  { %v6910_v44 = vpop.f32.mrf.mxu1 }
 0xfbe   :  { %15315 = vmatprep.mubr.msk.f32.mxu0 %vm2695_vm4, %v6910_v44 }
 0xfbf   :  { %v15284_v16 = vpop.f32.mrf.mxu1  ;;  %15316 = vmatmul.mubr.msk.f32.vlgmr.msra.gmra.mxu0 %vm2695_vm4, %v15277_v35 }
 0xfc0   :  { %15338 = vmatpush3.msra.mxu0 %v19284_v26 }
 0xfc1   :  { %15339 = vmatprep.subr.mxu0 %v18709_v62  ;;  %v6985_v0 = vpop.f32.mrf.mxu1 }
 0xfc2   :  { %15340 = vmatpush3.msra.mxu0 %v18709_v62 }
 0xfc3   :  { %15341 = vmatprep.subr.mxu0 %v18716_v21  ;;  %v15291_v15 = vpop.f32.mrf.mxu1 }
 0xfc4   :  { %15342 = vmatpush3.msra.mxu0 %v18716_v21  ;;  %v21384_v21 = vld [vmem:[#allocation34_spill] sm:$0xff] }
 0xfc5   :  { %15343 = vmatprep.subr.mxu0 %v18723_v42  ;;  %v7060_v5 = vpop.f32.mrf.mxu1 }
 0xfc6   :  { %15344 = vmatpush3.msra.mxu0 %v18723_v42  ;;  %15334 = vmatprep.mubr.msk.f32.mxu1 %vm2695_vm4, %v7060_v5  ;;  %v21385_v42 = vld [vmem:[#allocation33_spill] sm:$0xff] }
 0xfc7   :  { %15345 = vmatprep.subr.mxu0 %v18731_v24  ;;  %15335 = vmatmul.mubr.msk.f32.vlgmr.msra.gmra.mxu1 %vm2695_vm4, %v15291_v15  ;;  %v15298_v12 = vpop.f32.mrf.mxu1 }
 0xfc8   :  { %15346 = vmatpush3.msra.mxu0 %v18731_v24  ;;  %15357 = vmatpush3.msra.mxu1 %v19433_v29  ;;  %v21386_v24 = vld [vmem:[#allocation37_spill] sm:$0xff] }
 0xfc9   :  { %15347 = vmatprep.subr.mxu0 %v18740_v40  ;;  %15358 = vmatprep.subr.mxu1 %v18746_v6  ;;  %v7135_v62 = vpop.f32.mrf.mxu1 }
 0xfca   :  { %15372 = vmatprep.mubr.msk.f32.mxu1 %vm2695_vm4, %v19309_v23  ;;  %15348 = vmatpush3.msra.mxu0 %v18740_v40  ;;  %v21387_v40 = vld [vmem:[#allocation36_spill] sm:$0xff] }
 0xfcb   :  { %15359 = vmatpush3.msra.mxu1 %v18746_v6  ;;  %15349 = vmatprep.subr.mxu0 %v18756_v25  ;;  %v21388_v6 = vld [vmem:[#allocation48_spill] sm:$0xff] }
 0xfcc   :  { %15360 = vmatprep.subr.mxu1 %v18762_v61  ;;  %15350 = vmatpush3.msra.mxu0 %v18756_v25  ;;  %v21389_v25 = vld [vmem:[#allocation4_spill] sm:$0xff] }
 0xfcd   :  { %15361 = vmatpush3.msra.mxu1 %v18762_v61  ;;  %15351 = vmatprep.subr.mxu0 %v18770_v51  ;;  %v21390_v61 = vld [vmem:[#allocation19_spill] sm:$0xff] }
 0xfce   :  { %15353 = vmatprep.mubr.msk.f32.mxu0 %vm2695_vm4, %v7135_v62  ;;  %15362 = vmatprep.subr.mxu1 %v18777_v45 }
 0xfcf   :  { %15352 = vmatpush3.msra.mxu0 %v18770_v51  ;;  %15363 = vmatpush3.msra.mxu1 %v18777_v45 }
 0xfd0   :  { %15354 = vmatmul.mubr.msk.f32.vlgmr.msra.gmra.mxu0 %vm2695_vm4, %v15298_v12  ;;  %15364 = vmatprep.subr.mxu1 %v18786_v20 }
 0xfd1   :  { %15375 = vmatprep.subr.mxu0 %v18792_v28  ;;  %15365 = vmatpush3.msra.mxu1 %v18786_v20 }
 0xfd2   :  { %15376 = vmatpush3.msra.mxu0 %v18792_v28  ;;  %15391 = vmatprep.mubr.msk.f32.mxu0 %vm2695_vm4, %v6985_v0  ;;  %v21395_v0 = vld [vmem:[#allocation14_spill] sm:$0xff] }
 0xfd3   :  { %15366 = vmatprep.subr.mxu1 %v18801_v31  ;;  %15377 = vmatprep.subr.mxu0 %v18807_v49 }
 0xfd4   :  { %15367 = vmatpush3.msra.mxu1 %v18801_v31  ;;  %15378 = vmatpush3.msra.mxu0 %v18807_v49  ;;  %v21391_v49 = vld [vmem:[#allocation8_spill] sm:$0xff] }
 0xfd5   :  { %15368 = vmatprep.subr.mxu1 %v18815_v32  ;;  %15379 = vmatprep.subr.mxu0 %v18821_v55 }
 0xfd6   :  { %15369 = vmatpush3.msra.mxu1 %v18815_v32  ;;  %15380 = vmatpush3.msra.mxu0 %v18821_v55  ;;  %v21392_v32 = vld [vmem:[#allocation24_spill] sm:$0xff] }
 0xfd7   :  { %15370 = vmatprep.subr.mxu1 %v18829_v38  ;;  %15381 = vmatprep.subr.mxu0 %v18835_v33  ;;  %v1416_v55 = vadd.f32 %v21392_v32, %v21391_v49 }
 0xfd8   :  { %15371 = vmatpush3.msra.mxu1 %v18829_v38  ;;  %15382 = vmatpush3.msra.mxu0 %v18835_v33  ;;  %v21393_v38 = vld [vmem:[#allocation13_spill] sm:$0xff] }
 0xfd9   :  { %15373 = vmatmul.mubr.msk.f32.vlgmr.msra.gmra.mxu1 %vm2695_vm4, %v19305_v59  ;;  %15383 = vmatprep.subr.mxu0 %v18845_v50  ;;  %v21394_v33 = vld [vmem:[#allocation25_spill] sm:$0xff] }
 0xfda   :  { %15384 = vmatpush3.msra.mxu0 %v18845_v50  ;;  %15398 = vmatprep.mubr.msk.f32.mxu1 %vm2353_vm3, %v19198_v58  ;;  %v1580_v50 = vadd.f32 %v21394_v33, %v21393_v38 }
 0xfdb   :  { %15385 = vmatprep.subr.mxu0 %v18854_v34 }
 0xfdc   :  { %15386 = vmatpush3.msra.mxu0 %v18854_v34 }
 0xfdd   :  { %15387 = vmatprep.subr.mxu0 %v18861_v57 }
 0xfde   :  { %15388 = vmatpush3.msra.mxu0 %v18861_v57 }
 0xfdf   :  { %15389 = vmatprep.subr.mxu0 %v18868_v22 }
 0xfe0   :  { %15390 = vmatpush3.msra.mxu0 %v18868_v22  ;;  %v1614_v22 = vadd.f32 %v1580_v50, %v1416_v55 }
 0xfe1   :  { %15392 = vmatmul.mubr.msk.f32.vlgmr.msra.gmra.mxu0 %vm2695_vm4, %v15284_v16  ;;  %15422 = vmatprep.subr.mxu0 %v18877_v27 }
 0xfe2   :  { %15423 = vmatpush3.msra.mxu0 %v18877_v27  ;;  %v1626_v15 = vadd.f32 %v1614_v22, %v21395_v0  ;;  %v21403_v22 = vld [vmem:[#allocation3_spill] sm:$0xff]  ;;  %v21410_v0 = vld [vmem:[#allocation56_spill] sm:$0xff] }
 0xfe3   :  { %15424 = vmatprep.subr.mxu0 %v21384_v21 }
 0xfe4   :  { %15425 = vmatpush3.msra.mxu0 %v21384_v21 }
 0xfe5   :  { %15426 = vmatprep.subr.mxu0 %v21385_v42 }
 0xfe6   :  { %15427 = vmatpush3.msra.mxu0 %v21385_v42 }
 0xfe7   :  { %15428 = vmatprep.subr.mxu0 %v21386_v24 }
 0xfe8   :  { %15429 = vmatpush3.msra.mxu0 %v21386_v24  ;;  %v19521_v24 = vld [vmem:[%s20953_s8] ss:$0 sm:$0xff] }
 0xfe9   :  { %15430 = vmatprep.subr.mxu0 %v21387_v40 }
 0xfea   :  { %15431 = vmatpush3.msra.mxu0 %v21387_v40  ;;  %v1644_v40 = vadd.f32 %v19521_v24, %v1626_v15  ;;  %v21411_v15 = vld [vmem:[#allocation57_spill] sm:$0xff] }
 0xfeb   :  { %15432 = vmatprep.subr.mxu0 %v21388_v6 }
 0xfec   :  { %15433 = vmatpush3.msra.mxu0 %v21388_v6  ;;  %v21396_v6 = vld [vmem:[#allocation29_spill] sm:$0xff] }
 0xfed   :  { %15434 = vmatprep.subr.mxu0 %v21389_v25 }
 0xfee   :  { %15435 = vmatpush3.msra.mxu0 %v21389_v25 }
 0xfef   :  { %15436 = vmatprep.subr.mxu0 %v21390_v61 }
 0xff0   :  { %15437 = vmatpush3.msra.mxu0 %v21390_v61 }
 0xff1   :  { %15460 = vmatprep.subr.mxu0 %v18933_v46 }
0x107f   :  { %v15317_v51 = vpop.f32.mrf.mxu0 }
0x1081   :  { %v7216_v20 = vpop.f32.mrf.mxu0 }
0x1087   :  { %v15336_v45 = vpop.f32.mrf.mxu1 }
0x1089   :  { %v7297_v28 = vpop.f32.mrf.mxu1 }
0x1090   :  { %v15355_v31 = vpop.f32.mrf.mxu0 }
0x1092   :  { %v7378_v57 = vpop.f32.mrf.mxu0 }
0x1099   :  { %v15374_v34 = vpop.f32.mrf.mxu1 }
0x109a   :  { %v7463_v35 = vadd.f32 %v15374_v34, %v15317_v51  ;;  %v21402_v34 = vld [vmem:[#allocation49_spill] sm:$0xff] }
0x109b   :  { %v7457_v27 = vpop.f32.mrf.mxu1 }
0x109c   :  { %v7458_v5 = vadd.f32 %v7457_v27, %v7216_v20  ;;  %v21405_v27 = vld [vmem:[#allocation51_spill] sm:$0xff] }
0x10a1   :  { %v15393_v43 = vpop.f32.mrf.mxu0 }
0x10a2   :  { %v7544_v44 = vadd.f32 %v15393_v43, %v15336_v45  ;;  %v21406_v43 = vld [vmem:[#allocation52_spill] sm:$0xff] }
0x10a3   :  { %v7538_v16 = vpop.f32.mrf.mxu0 }
0x10a4   :  { %v7548_v12 = vadd.f32 %v7544_v44, %v7463_v35  ;;  %v7539_v62 = vadd.f32 %v7538_v16, %v7297_v28  ;;  %v21407_v35 = vld [vmem:[#allocation53_spill] sm:$0xff]  ;;  %v21408_v44 = vld [vmem:[#allocation54_spill] sm:$0xff]  ;;  %v21409_v16 = vld [vmem:[#allocation55_spill] sm:$0xff] }
0x10a6   :  { %v7550_v21 = vadd.f32 %v15355_v31, %v7548_v12  ;;  %v7547_v42 = vadd.f32 %v7539_v62, %v7458_v5  ;;  %v21412_v5 = vld [vmem:[#allocation58_spill] sm:$0xff]  ;;  %v21413_v12 = vld [vmem:[#allocation59_spill] sm:$0xff]  ;;  %v21414_v62 = vld [vmem:[#allocation60_spill] sm:$0xff] }
0x10a8   :  { %v7552_v25 = vadd.f32 %v7550_v21, %v21396_v6  ;;  %v7549_v61 = vadd.f32 %v7547_v42, %v7378_v57  ;;  %v21415_v21 = vld [vmem:[#allocation61_spill] sm:$0xff]  ;;  %v21416_v42 = vld [vmem:[#allocation62_spill] sm:$0xff]  ;;  %v21418_v6 = vld [vmem:[#allocation64_spill] sm:$0xff] }
0x10aa   :  { %v12879_v51 = vmul.f32 -1.442695, %v7552_v25  ;;  %v7551_v45 = vadd.f32 %v7549_v61, %v1644_v40  ;;  %v21417_v40 = vld [vmem:[#allocation63_spill] sm:$0xff]  ;;  %v21419_v25 = vld [vmem:[#allocation65_spill] sm:$0xff]  ;;  %v21420_v61 = vld [vmem:[#allocation66_spill] sm:$0xff] }
0x10ac   :  { %16239 = vpow2.f32 %v12879_v51  ;;  %v12878_v49 = vmul.f32 -1.442695, %v7551_v45  ;;  %v21421_v51 = vld [vmem:[#allocation67_spill] sm:$0xff]  ;;  %v21422_v45 = vld [vmem:[#allocation68_spill] sm:$0xff] }
0x10ae   :  { %16241 = vpow2.f32 %v12878_v49  ;;  %v21423_v49 = vld [vmem:[#allocation69_spill] sm:$0xff] }
0x10b9   :  { %v16240_v20 = vpop.eup %16239 }
0x10ba   :  { %v7560_v32 = vadd.f32 1.0, %v16240_v20  ;;  %v21424_v20 = vld [vmem:[#allocation70_spill] sm:$0xff] }
0x10bb   :  { %v16242_v28 = vpop.eup %16241 }
0x10bc   :  { %16243 = vrcp.f32 %v7560_v32  ;;  %v7559_v31 = vadd.f32 1.0, %v16242_v28  ;;  %v21425_v32 = vld [vmem:[#allocation71_spill] sm:$0xff] }
0x10be   :  { %16245 = vrcp.f32 %v7559_v31 }
0x10c9   :  { %v19525_v55 = vpop.eup %16243 }
0x10ca   :  { %v19529_v38 = vmul.f32 %v19525_v55, %v19305_v59  ;;  %v21399_v59 = vld [vmem:[#allocation10_spill] sm:$0xff] }
0x10cb   :  { %v19531_v33 = vpop.eup %16245 }
0x10cc   :  { %15394 = vmatprep.subr.mxu1 %v19529_v38  ;;  %v19536_v50 = vmul.f32 %v19531_v33, %v19309_v23  ;;  %v21401_v23 = vld [vmem:[#allocation2_spill] sm:$0xff] }
0x10cd   :  { %15395 = vmatpush3.msra.mxu1 %v19529_v38 }
0x10ce   :  { %15396 = vmatprep.subr.mxu1 %v19536_v50 }
0x10cf   :  { %15397 = vmatpush3.msra.mxu1 %v19536_v50 }
0x10d0   :  { %15399 = vmatmul.mubr.msk.f32.vlgmr.msra.gmra.mxu1 %vm2353_vm3, %v19316_v63  ;;  %15401 = vmatprep.subr.mxu1 %v19529_v38 }
0x10d1   :  { %15402 = vmatpush3.msra.mxu1 %v19529_v38  ;;  %15405 = vmatprep.mubr.msk.f32.mxu1 %vm2353_vm3, %v19325_v10 }
0x10d2   :  { %15403 = vmatprep.subr.mxu1 %v19536_v50 }
0x10d3   :  { %15404 = vmatpush3.msra.mxu1 %v19536_v50 }
0x10d4   :  { %15406 = vmatmul.mubr.msk.f32.vlgmr.msra.gmra.mxu1 %vm2353_vm3, %v19334_v53  ;;  %15408 = vmatprep.subr.mxu1 %v19529_v38 }
0x10d5   :  { %15409 = vmatpush3.msra.mxu1 %v19529_v38  ;;  %15412 = vmatprep.mubr.msk.f32.mxu1 %vm2353_vm3, %v19343_v60 }
0x10d6   :  { %15410 = vmatprep.subr.mxu1 %v19536_v50 }
0x10d7   :  { %15411 = vmatpush3.msra.mxu1 %v19536_v50 }
0x10d8   :  { %15413 = vmatmul.mubr.msk.f32.vlgmr.msra.gmra.mxu1 %vm2353_vm3, %v19352_v2  ;;  %15415 = vmatprep.subr.mxu1 %v19529_v38 }
0x10d9   :  { %15416 = vmatpush3.msra.mxu1 %v19529_v38  ;;  %15419 = vmatprep.mubr.msk.f32.mxu1 %vm2353_vm3, %v19361_v39 }
0x10da   :  { %15417 = vmatprep.subr.mxu1 %v19536_v50 }
0x10db   :  { %15418 = vmatpush3.msra.mxu1 %v19536_v50 }
0x10dc   :  { %15420 = vmatmul.mubr.msk.f32.vlgmr.msra.gmra.mxu1 %vm2353_vm3, %v19370_v37  ;;  %15441 = vmatprep.subr.mxu1 %v18988_v17 }
0x10dd   :  { %15442 = vmatpush3.msra.mxu1 %v18988_v17 }
0x10de   :  { %15443 = vmatprep.subr.mxu1 %v18995_v52 }
0x10df   :  { %15444 = vmatpush3.msra.mxu1 %v18995_v52 }
0x10e0   :  { %15445 = vmatprep.subr.mxu1 %v19002_v8 }
0x10e1   :  { %15446 = vmatpush3.msra.mxu1 %v19002_v8 }
0x10e2   :  { %15447 = vmatprep.subr.mxu1 %v19009_v13 }
0x10e3   :  { %15448 = vmatpush3.msra.mxu1 %v19009_v13 }
0x10e4   :  { %15449 = vmatprep.subr.mxu1 %v19016_v14 }
0x10e5   :  { %15450 = vmatpush3.msra.mxu1 %v19016_v14  ;;  %v21397_v14 = vld [vmem:[#allocation9_spill] sm:$0xff] }
0x10e6   :  { %15451 = vmatprep.subr.mxu1 %v19023_v41 }
0x10e7   :  { %15452 = vmatpush3.msra.mxu1 %v19023_v41 }
0x10e8   :  { %15453 = vmatprep.subr.mxu1 %v19030_v11 }
0x10e9   :  { %15454 = vmatpush3.msra.mxu1 %v19030_v11  ;;  %v21398_v11 = vld [vmem:[#allocation20_spill] sm:$0xff] }
0x10ea   :  { %15455 = vmatprep.subr.mxu1 %v19037_v30 }
0x10eb   :  { %15456 = vmatpush3.msra.mxu1 %v19037_v30 }
0x10ec   :  { %15479 = vmatprep.subr.mxu1 %v19044_v19 }
0x1190   :  { %v15400_v17 = vpop.f32.mrf.mxu1 }
0x1192   :  { %v7633_v52 = vpop.f32.mrf.mxu1 }
0x1193   :  { %15438 = vmatprep.mubr.msk.f32.mxu0 %vm2695_vm4, %v7633_v52 }
0x1194   :  { %v15407_v8 = vpop.f32.mrf.mxu1  ;;  %15439 = vmatmul.mubr.msk.f32.vlgmr.msra.gmra.mxu0 %vm2695_vm4, %v15400_v17 }
0x1195   :  { %15461 = vmatpush3.msra.mxu0 %v18933_v46 }
0x1196   :  { %15462 = vmatprep.subr.mxu0 %v19055_v47  ;;  %v7708_v13 = vpop.f32.mrf.mxu1 }
0x1197   :  { %15463 = vmatpush3.msra.mxu0 %v19055_v47  ;;  %v21400_v47 = vld [vmem:[#allocation23_spill] sm:$0xff] }
0x1198   :  { %15464 = vmatprep.subr.mxu0 %v21397_v14  ;;  %v15414_v41 = vpop.f32.mrf.mxu1 }
0x1199   :  { %15465 = vmatpush3.msra.mxu0 %v21397_v14 }
0x119a   :  { %15466 = vmatprep.subr.mxu0 %v21398_v11  ;;  %v7783_v30 = vpop.f32.mrf.mxu1 }
0x119b   :  { %15467 = vmatpush3.msra.mxu0 %v21398_v11  ;;  %15457 = vmatprep.mubr.msk.f32.mxu1 %vm2695_vm4, %v7783_v30 }
0x119c   :  { %15468 = vmatprep.subr.mxu0 %v21399_v59  ;;  %15458 = vmatmul.mubr.msk.f32.vlgmr.msra.gmra.mxu1 %vm2695_vm4, %v15414_v41  ;;  %v15421_v46 = vpop.f32.mrf.mxu1 }
0x119d   :  { %15469 = vmatpush3.msra.mxu0 %v21399_v59  ;;  %15480 = vmatpush3.msra.mxu1 %v19044_v19  ;;  %v21404_v19 = vld [vmem:[#allocation50_spill] sm:$0xff] }
0x119e   :  { %15470 = vmatprep.subr.mxu0 %v21400_v47  ;;  %15481 = vmatprep.subr.mxu1 %v21401_v23  ;;  %v7858_v57 = vpop.f32.mrf.mxu1 }
0x119f   :  { %15495 = vmatprep.mubr.msk.f32.mxu1 %vm2695_vm4, %v19536_v50  ;;  %15471 = vmatpush3.msra.mxu0 %v21400_v47 }
0x11a0   :  { %15482 = vmatpush3.msra.mxu1 %v21401_v23  ;;  %15472 = vmatprep.subr.mxu0 %v21402_v34 }
0x11a1   :  { %15483 = vmatprep.subr.mxu1 %v21403_v22  ;;  %15473 = vmatpush3.msra.mxu0 %v21402_v34 }
0x11a2   :  { %15484 = vmatpush3.msra.mxu1 %v21403_v22  ;;  %15474 = vmatprep.subr.mxu0 %v21404_v19 }
0x11a3   :  { %15476 = vmatprep.mubr.msk.f32.mxu0 %vm2695_vm4, %v7858_v57  ;;  %15485 = vmatprep.subr.mxu1 %v21405_v27  ;;  %v21426_v57 = vld [vmem:[#allocation42_spill] sm:$0xff] }
0x11a4   :  { %15475 = vmatpush3.msra.mxu0 %v21404_v19  ;;  %15486 = vmatpush3.msra.mxu1 %v21405_v27  ;;  %v21427_v27 = vld [vmem:[#allocation43_spill] sm:$0xff] }
0x11a5   :  { %15477 = vmatmul.mubr.msk.f32.vlgmr.msra.gmra.mxu0 %vm2695_vm4, %v15421_v46  ;;  %15487 = vmatprep.subr.mxu1 %v21406_v43 }
0x11a6   :  { %15498 = vmatprep.subr.mxu0 %v21407_v35  ;;  %15488 = vmatpush3.msra.mxu1 %v21406_v43 }
0x11a7   :  { %15499 = vmatpush3.msra.mxu0 %v21407_v35  ;;  %15514 = vmatprep.mubr.msk.f32.mxu0 %vm2695_vm4, %v7708_v13 }
0x11a8   :  { %15489 = vmatprep.subr.mxu1 %v21408_v44  ;;  %15500 = vmatprep.subr.mxu0 %v21409_v16 }
0x11a9   :  { %15490 = vmatpush3.msra.mxu1 %v21408_v44  ;;  %15501 = vmatpush3.msra.mxu0 %v21409_v16  ;;  %v8283_v16 = vsub.f32 1.0, %v19525_v55 }
0x11aa   :  { %15491 = vmatprep.subr.mxu1 %v21410_v0  ;;  %15502 = vmatprep.subr.mxu0 %v21411_v15 }
0x11ab   :  { %15492 = vmatpush3.msra.mxu1 %v21410_v0  ;;  %15503 = vmatpush3.msra.mxu0 %v21411_v15  ;;  %v8281_v15 = vmul.f32 %v19525_v55, %v19295_v1 }
0x11ac   :  { %15493 = vmatprep.subr.mxu1 %v21412_v5  ;;  %15504 = vmatprep.subr.mxu0 %v21413_v12 }
0x11ad   :  { %15494 = vmatpush3.msra.mxu1 %v21412_v5  ;;  %15505 = vmatpush3.msra.mxu0 %v21413_v12  ;;  %v8282_v12 = vsub.f32 1.0, %v19531_v33 }
0x11ae   :  { %15496 = vmatmul.mubr.msk.f32.vlgmr.msra.gmra.mxu1 %vm2695_vm4, %v19529_v38  ;;  %15506 = vmatprep.subr.mxu0 %v21414_v62 }
0x11af   :  { %15507 = vmatpush3.msra.mxu0 %v21414_v62  ;;  %15521 = vmatprep.mubr.msk.f32.mxu1 %vm2353_vm3, %v19198_v58 }
0x11b0   :  { %15508 = vmatprep.subr.mxu0 %v21415_v21 }
0x11b1   :  { %15509 = vmatpush3.msra.mxu0 %v21415_v21 }
0x11b2   :  { %15510 = vmatprep.subr.mxu0 %v21416_v42 }
0x11b3   :  { %15511 = vmatpush3.msra.mxu0 %v21416_v42  ;;  %v8280_v42 = vmul.f32 %v19531_v33, %v19299_v4  ;;  %v19769_v33 = vld [vmem:[%s21200_s2 + $0x110] sm:$0xff] }
0x11b4   :  { %15512 = vmatprep.subr.mxu0 %v21417_v40 }
0x11b5   :  { %15513 = vmatpush3.msra.mxu0 %v21417_v40 }
0x11b6   :  { %15515 = vmatmul.mubr.msk.f32.vlgmr.msra.gmra.mxu0 %vm2695_vm4, %v15407_v8  ;;  %15545 = vmatprep.subr.mxu0 %v21418_v6 }
0x11b7   :  { %15546 = vmatpush3.msra.mxu0 %v21418_v6 }
0x11b8   :  { %15547 = vmatprep.subr.mxu0 %v21419_v25 }
0x11b9   :  { %15548 = vmatpush3.msra.mxu0 %v21419_v25 }
0x11ba   :  { %15549 = vmatprep.subr.mxu0 %v21420_v61 }
0x11bb   :  { %15550 = vmatpush3.msra.mxu0 %v21420_v61  ;;  %v19775_v61 = vld [vmem:[%s21200_s2 + $0x30] sm:$0xff] }
0x11bc   :  { %15551 = vmatprep.subr.mxu0 %v21421_v51 }
0x11bd   :  { %15552 = vmatpush3.msra.mxu0 %v21421_v51 }
0x11be   :  { %15553 = vmatprep.subr.mxu0 %v21422_v45 }
0x11bf   :  { %15554 = vmatpush3.msra.mxu0 %v21422_v45  ;;  %v19791_v45 = vld [vmem:[%s21200_s2 + $0x28] sm:$0xff] }
0x11c0   :  { %15555 = vmatprep.subr.mxu0 %v21423_v49 }
0x11c1   :  { %15556 = vmatpush3.msra.mxu0 %v21423_v49  ;;  %v19799_v49 = vld [vmem:[%s21200_s2 + $0x100] sm:$0xff] }
0x11c2   :  { %15557 = vmatprep.subr.mxu0 %v21424_v20 }
0x11c3   :  { %15558 = vmatpush3.msra.mxu0 %v21424_v20  ;;  %v19806_v20 = vld [vmem:[%s21200_s2 + $0x20] sm:$0xff] }
0x11c4   :  { %15559 = vmatprep.subr.mxu0 %v21425_v32 }
0x11c5   :  { %15560 = vmatpush3.msra.mxu0 %v21425_v32  ;;  %v19815_v32 = vld [vmem:[%s21200_s2 + $0x18] sm:$0xff] }
0x11c6   :  { %15583 = vmatprep.subr.mxu0 %v19284_v26 }
0x1254   :  { %v15440_v28 = vpop.f32.mrf.mxu0 }
0x1256   :  { %v7939_v38 = vpop.f32.mrf.mxu0 }
0x125c   :  { %v15459_v31 = vpop.f32.mrf.mxu1 }
0x125e   :  { %v8020_v50 = vpop.f32.mrf.mxu1 }
0x1265   :  { %v15478_v17 = vpop.f32.mrf.mxu0 }
0x1267   :  { %v8101_v8 = vpop.f32.mrf.mxu0 }
0x126e   :  { %v15497_v52 = vpop.f32.mrf.mxu1 }
0x126f   :  { %v8188_v41 = vadd.f32 %v15497_v52, %v15440_v28  ;;  %v19821_v28 = vld [vmem:[%s21200_s2 + $0xb8] sm:$0xff]  ;;  %v19858_v52 = vld [vmem:[%s21200_s2] sm:$0xff] }
0x1270   :  { %v8182_v13 = vpop.f32.mrf.mxu1 }
0x1271   :  { %v8183_v59 = vadd.f32 %v8182_v13, %v7939_v38  ;;  %v19836_v38 = vld [vmem:[%s21200_s2 + $0xb0] sm:$0xff]  ;;  %v19874_v13 = vld [vmem:[%s21200_s2 + $0x98] sm:$0xff] }
0x1276   :  { %v15516_v14 = vpop.f32.mrf.mxu0 }
0x1277   :  { %v8269_v11 = vadd.f32 %v15516_v14, %v15459_v31  ;;  %v19830_v31 = vld [vmem:[%s21200_s2 + $0x10] sm:$0xff] }
0x1278   :  { %v8263_v30 = vpop.f32.mrf.mxu0  ;;  %v19883_v14 = vld [vmem:[%s21200_s2 + $0x90] sm:$0xff] }
0x1279   :  { %v8273_v46 = vadd.f32 %v8269_v11, %v8188_v41  ;;  %v8264_v47 = vadd.f32 %v8263_v30, %v8020_v50  ;;  %v19844_v50 = vld [vmem:[%s21200_s2 + $0x8] sm:$0xff]  ;;  %v19906_v11 = vld [vmem:[%s20955_s7 + $0x78] sm:$0xff]  ;;  %v19913_v30 = vld [vmem:[%s20955_s7 + $0x70] sm:$0xff] }
0x127a   :  { %v19890_v41 = vld [vmem:[%s21200_s2 + $0x88] sm:$0xff]  ;;  %21428 = vst [vmem:[#allocation72_spill] sm:$0xff] %v19913_v30 }
0x127b   :  { %v8275_v23 = vadd.f32 %v15478_v17, %v8273_v46  ;;  %v8272_v34 = vadd.f32 %v8264_v47, %v8183_v59  ;;  %v19850_v17 = vld [vmem:[%s21200_s2 + $0xa8] sm:$0xff]  ;;  %v19927_v46 = vld [vmem:[%s20955_s7 + $0x60] sm:$0xff]  ;;  %v19934_v47 = vld [vmem:[%s20955_s7 + $0x58] sm:$0xff] }
0x127c   :  { %v19920_v59 = vld [vmem:[%s20955_s7 + $0x68] sm:$0xff]  ;;  %21430 = vst [vmem:[#allocation74_spill] sm:$0xff] %v19927_v46  ;;  %21431 = vst [vmem:[#allocation75_spill] sm:$0xff] %v19934_v47 }
0x127d   :  { %v8277_v22 = vadd.f32 %v8275_v23, %v21426_v57  ;;  %v8274_v19 = vadd.f32 %v8272_v34, %v8101_v8  ;;  %v19864_v8 = vld [vmem:[%s21200_s2 + $0xa0] sm:$0xff]  ;;  %21429 = vst [vmem:[#allocation73_spill] sm:$0xff] %v19920_v59  ;;  %v19941_v23 = vld [vmem:[%s20955_s7 + $0x50] sm:$0xff]  ;;  %v19948_v34 = vld [vmem:[%s20955_s7 + $0x48] sm:$0xff] }
0x127e   :  { %21432 = vst [vmem:[#allocation76_spill] sm:$0xff] %v19941_v23  ;;  %21433 = vst [vmem:[#allocation77_spill] sm:$0xff] %v19948_v34  ;;  %v19955_v57 = vld [vmem:[%s20955_s7 + $0x40] sm:$0xff] }
0x127f   :  { %16247 = vtanh.f32 %v8277_v22  ;;  %v8276_v43 = vadd.f32 %v8274_v19, %v21427_v27  ;;  %21434 = vst [vmem:[#allocation78_spill] sm:$0xff] %v19955_v57  ;;  %v19962_v22 = vld [vmem:[%s20955_s7 + $0x138] sm:$0xff] }
0x1281   :  { %16249 = vtanh.f32 %v8276_v43 }
0x128c   :  { %v16248_v35 = vpop.eup %16247 }
0x128d   :  { %8288 = vrot.lane.b32.xlu0 %v16248_v35, %s16481_s23 }
0x128e   :  { %v16250_v44 = vpop.eup %16249 }
0x128f   :  { %8286 = vrot.lane.b32.xlu1 %v16250_v44, %s16481_s23 }
0x12ff   :  { %v8289_v0 = vpop.permute.xlu0 %8288 }
0x1300   :  { %v8293_v5 = vmul.f32 %v8289_v0, %v8283_v16  ;;  %v21435_v16 = vld [vmem:[#allocation6_spill] sm:$0xff]  ;;  %v21436_v0 = vld [vmem:[#allocation27_spill] sm:$0xff] }
0x1301   :  { %v8287_v62 = vpop.permute.xlu1 %8286 }
0x1302   :  { %v19669_v21 = vadd.f32 %v8293_v5, %v8281_v15  ;;  %v8292_v40 = vmul.f32 %v8287_v62, %v8282_v12  ;;  %v1426_v15 = vadd.f32 %v21436_v0, %v21435_v16  ;;  %v21437_v5 = vld [vmem:[#allocation15_spill] sm:$0xff]  ;;  %v21438_v12 = vld [vmem:[#allocation28_spill] sm:$0xff] }
0x1303   :  { %v1590_v62 = vadd.f32 %v21438_v12, %v21437_v5  ;;  %v21440_v0 = vld [vmem:[#allocation32_spill] sm:$0xff] }
0x1304   :  { %v19673_v6 = vadd.f32 %v8292_v40, %v8280_v42  ;;  %8300 = vrot.lane.b32.xlu0 %v19669_v21, %s16481_s23 }
0x1306   :  { %8298 = vrot.lane.b32.xlu1 %v19673_v6, %s16481_s23 }
0x1376   :  { %v19679_v25 = vpop.permute.xlu0 %8300 }
0x1377   :  { %15517 = vmatprep.subr.mxu1 %v19679_v25 }
0x1378   :  { %15518 = vmatpush3.msra.mxu1 %v19679_v25  ;;  %v19683_v1 = vpop.permute.xlu1 %8298 }
0x1379   :  { %15519 = vmatprep.subr.mxu1 %v19683_v1 }
0x137a   :  { %15520 = vmatpush3.msra.mxu1 %v19683_v1 }
0x137b   :  { %15522 = vmatmul.mubr.msk.f32.vlgmr.msra.gmra.mxu1 %vm2353_vm3, %v19316_v63  ;;  %15524 = vmatprep.subr.mxu1 %v19679_v25 }
0x137c   :  { %15525 = vmatpush3.msra.mxu1 %v19679_v25  ;;  %15528 = vmatprep.mubr.msk.f32.mxu1 %vm2353_vm3, %v19325_v10 }
0x137d   :  { %15526 = vmatprep.subr.mxu1 %v19683_v1 }
0x137e   :  { %15527 = vmatpush3.msra.mxu1 %v19683_v1 }
0x137f   :  { %15529 = vmatmul.mubr.msk.f32.vlgmr.msra.gmra.mxu1 %vm2353_vm3, %v19334_v53  ;;  %15531 = vmatprep.subr.mxu1 %v19679_v25 }
0x1380   :  { %15532 = vmatpush3.msra.mxu1 %v19679_v25  ;;  %15535 = vmatprep.mubr.msk.f32.mxu1 %vm2353_vm3, %v19343_v60 }
0x1381   :  { %15533 = vmatprep.subr.mxu1 %v19683_v1 }
0x1382   :  { %15534 = vmatpush3.msra.mxu1 %v19683_v1 }
0x1383   :  { %15536 = vmatmul.mubr.msk.f32.vlgmr.msra.gmra.mxu1 %vm2353_vm3, %v19352_v2  ;;  %15538 = vmatprep.subr.mxu1 %v19679_v25 }
0x1384   :  { %15539 = vmatpush3.msra.mxu1 %v19679_v25  ;;  %15542 = vmatprep.mubr.msk.f32.mxu1 %vm2353_vm3, %v19361_v39 }
0x1385   :  { %15540 = vmatprep.subr.mxu1 %v19683_v1 }
0x1386   :  { %15541 = vmatpush3.msra.mxu1 %v19683_v1 }
0x1387   :  { %15543 = vmatmul.mubr.msk.f32.vlgmr.msra.gmra.mxu1 %vm2353_vm3, %v19370_v37  ;;  %15564 = vmatprep.subr.mxu1 %v19377_v54 }
0x1388   :  { %15565 = vmatpush3.msra.mxu1 %v19377_v54 }
0x1389   :  { %15566 = vmatprep.subr.mxu1 %v19384_v9 }
0x138a   :  { %15567 = vmatpush3.msra.mxu1 %v19384_v9 }
0x138b   :  { %15568 = vmatprep.subr.mxu1 %v19391_v36 }
0x138c   :  { %15569 = vmatpush3.msra.mxu1 %v19391_v36  ;;  %v19738_v36 = vld [vmem:[%s21200_s2 + $0x130] sm:$0xff] }
0x138d   :  { %15570 = vmatprep.subr.mxu1 %v19398_v56 }
0x138e   :  { %15571 = vmatpush3.msra.mxu1 %v19398_v56 }
0x138f   :  { %15572 = vmatprep.subr.mxu1 %v19405_v18 }
0x1390   :  { %15573 = vmatpush3.msra.mxu1 %v19405_v18  ;;  %v19745_v18 = vld [vmem:[%s21200_s2 + $0x128] sm:$0xff] }
0x1391   :  { %15574 = vmatprep.subr.mxu1 %v19412_v7 }
0x1392   :  { %15575 = vmatpush3.msra.mxu1 %v19412_v7 }
0x1393   :  { %15576 = vmatprep.subr.mxu1 %v19419_v3 }
0x1394   :  { %15577 = vmatpush3.msra.mxu1 %v19419_v3 }
0x1395   :  { %15578 = vmatprep.subr.mxu1 %v19426_v48 }
0x1396   :  { %15579 = vmatpush3.msra.mxu1 %v19426_v48  ;;  %v19760_v48 = vld [vmem:[%s21200_s2 + $0x118] sm:$0xff] }
0x1397   :  { %15602 = vmatprep.subr.mxu1 %v19433_v29 }
0x143b   :  { %v15523_v4 = vpop.f32.mrf.mxu1 }
0x143d   :  { %v8370_v54 = vpop.f32.mrf.mxu1 }
0x143e   :  { %15561 = vmatprep.mubr.msk.f32.mxu0 %vm2695_vm4, %v8370_v54 }
0x143f   :  { %v19731_v9 = vpop.f32.mrf.mxu1  ;;  %15562 = vmatmul.mubr.msk.f32.vlgmr.msra.gmra.mxu0 %vm2695_vm4, %v15523_v4  ;;  %v1616_v4 = vadd.f32 %v1590_v62, %v1426_v15 }
0x1440   :  { %15584 = vmatpush3.msra.mxu0 %v19284_v26  ;;  %v19752_v26 = vld [vmem:[%s21200_s2 + $0x120] sm:$0xff] }
0x1441   :  { %15585 = vmatprep.subr.mxu0 %v19738_v36  ;;  %v8445_v56 = vpop.f32.mrf.mxu1 }
0x1442   :  { %15586 = vmatpush3.msra.mxu0 %v19738_v36 }
0x1443   :  { %15587 = vmatprep.subr.mxu0 %v19745_v18  ;;  %v15537_v7 = vpop.f32.mrf.mxu1 }
0x1444   :  { %15588 = vmatpush3.msra.mxu0 %v19745_v18 }
0x1445   :  { %15589 = vmatprep.subr.mxu0 %v19752_v26  ;;  %v8520_v3 = vpop.f32.mrf.mxu1 }
0x1446   :  { %15590 = vmatpush3.msra.mxu0 %v19752_v26  ;;  %15580 = vmatprep.mubr.msk.f32.mxu1 %vm2695_vm4, %v8520_v3 }
0x1447   :  { %15591 = vmatprep.subr.mxu0 %v19760_v48  ;;  %15581 = vmatmul.mubr.msk.f32.vlgmr.msra.gmra.mxu1 %vm2695_vm4, %v15537_v7  ;;  %v15544_v55 = vpop.f32.mrf.mxu1 }
0x1448   :  { %15592 = vmatpush3.msra.mxu0 %v19760_v48  ;;  %15603 = vmatpush3.msra.mxu1 %v19433_v29  ;;  %v19785_v29 = vld [vmem:[%s21200_s2 + $0x108] sm:$0xff] }
0x1449   :  { %15593 = vmatprep.subr.mxu0 %v19769_v33  ;;  %15604 = vmatprep.subr.mxu1 %v19775_v61  ;;  %v8595_v51 = vpop.f32.mrf.mxu1 }
0x144a   :  { %15618 = vmatprep.mubr.msk.f32.mxu1 %vm2695_vm4, %v19683_v1  ;;  %15594 = vmatpush3.msra.mxu0 %v19769_v33 }
0x144b   :  { %15605 = vmatpush3.msra.mxu1 %v19775_v61  ;;  %15595 = vmatprep.subr.mxu0 %v19785_v29 }
0x144c   :  { %15606 = vmatprep.subr.mxu1 %v19791_v45  ;;  %15596 = vmatpush3.msra.mxu0 %v19785_v29 }
0x144d   :  { %15607 = vmatpush3.msra.mxu1 %v19791_v45  ;;  %15597 = vmatprep.subr.mxu0 %v19799_v49 }
0x144e   :  { %15599 = vmatprep.mubr.msk.f32.mxu0 %vm2695_vm4, %v8595_v51  ;;  %15608 = vmatprep.subr.mxu1 %v19806_v20 }
0x144f   :  { %15598 = vmatpush3.msra.mxu0 %v19799_v49  ;;  %15609 = vmatpush3.msra.mxu1 %v19806_v20 }
0x1450   :  { %15600 = vmatmul.mubr.msk.f32.vlgmr.msra.gmra.mxu0 %vm2695_vm4, %v15544_v55  ;;  %15610 = vmatprep.subr.mxu1 %v19815_v32  ;;  %v21439_v55 = vld [vmem:[#allocation16_spill] sm:$0xff] }
0x1451   :  { %15621 = vmatprep.subr.mxu0 %v19821_v28  ;;  %15611 = vmatpush3.msra.mxu1 %v19815_v32  ;;  %v1628_v51 = vadd.f32 %v1616_v4, %v21439_v55 }
0x1452   :  { %15622 = vmatpush3.msra.mxu0 %v19821_v28  ;;  %15637 = vmatprep.mubr.msk.f32.mxu0 %vm2695_vm4, %v8445_v56 }
0x1453   :  { %15612 = vmatprep.subr.mxu1 %v19830_v31  ;;  %15623 = vmatprep.subr.mxu0 %v19836_v38  ;;  %v1646_v16 = vadd.f32 %v19521_v24, %v1628_v51  ;;  %v20137_v51 = vld [vmem:[%s20955_s7 + $0x28] sm:$0xff] }
0x1454   :  { %15613 = vmatpush3.msra.mxu1 %v19830_v31  ;;  %15624 = vmatpush3.msra.mxu0 %v19836_v38  ;;  %21447 = vst [vmem:[#allocation85_spill] sm:$0xff] %v20137_v51 }
0x1455   :  { %15614 = vmatprep.subr.mxu1 %v19844_v50  ;;  %15625 = vmatprep.subr.mxu0 %v19850_v17 }
0x1456   :  { %15615 = vmatpush3.msra.mxu1 %v19844_v50  ;;  %15626 = vmatpush3.msra.mxu0 %v19850_v17 }
0x1457   :  { %15616 = vmatprep.subr.mxu1 %v19858_v52  ;;  %15627 = vmatprep.subr.mxu0 %v19864_v8 }
0x1458   :  { %15617 = vmatpush3.msra.mxu1 %v19858_v52  ;;  %15628 = vmatpush3.msra.mxu0 %v19864_v8 }
0x1459   :  { %15619 = vmatmul.mubr.msk.f32.vlgmr.msra.gmra.mxu1 %vm2695_vm4, %v19679_v25  ;;  %15629 = vmatprep.subr.mxu0 %v19874_v13 }
0x145a   :  { %15630 = vmatpush3.msra.mxu0 %v19874_v13  ;;  %15644 = vmatprep.mubr.msk.f32.mxu1 %vm2353_vm3, %v19198_v58  ;;  %v19897_v58 = vld [vmem:[%s21200_s2 + $0x80] sm:$0xff] }
0x145b   :  { %15631 = vmatprep.subr.mxu0 %v19883_v14 }
0x145c   :  { %15632 = vmatpush3.msra.mxu0 %v19883_v14 }
0x145d   :  { %15633 = vmatprep.subr.mxu0 %v19890_v41 }
0x145e   :  { %15634 = vmatpush3.msra.mxu0 %v19890_v41 }
0x145f   :  { %15635 = vmatprep.subr.mxu0 %v19897_v58 }
0x1460   :  { %15636 = vmatpush3.msra.mxu0 %v19897_v58 }
0x1461   :  { %15638 = vmatmul.mubr.msk.f32.vlgmr.msra.gmra.mxu0 %vm2695_vm4, %v19731_v9  ;;  %15668 = vmatprep.subr.mxu0 %v19906_v11 }
0x1462   :  { %15669 = vmatpush3.msra.mxu0 %v19906_v11 }
0x1463   :  { %15670 = vmatprep.subr.mxu0 %v19913_v30 }
0x1464   :  { %15671 = vmatpush3.msra.mxu0 %v19913_v30 }
0x1465   :  { %15672 = vmatprep.subr.mxu0 %v19920_v59 }
0x1466   :  { %15673 = vmatpush3.msra.mxu0 %v19920_v59 }
0x1467   :  { %15674 = vmatprep.subr.mxu0 %v19927_v46 }
0x1468   :  { %15675 = vmatpush3.msra.mxu0 %v19927_v46 }
0x1469   :  { %15676 = vmatprep.subr.mxu0 %v19934_v47 }
0x146a   :  { %15677 = vmatpush3.msra.mxu0 %v19934_v47 }
0x146b   :  { %15678 = vmatprep.subr.mxu0 %v19941_v23 }
0x146c   :  { %15679 = vmatpush3.msra.mxu0 %v19941_v23 }
0x146d   :  { %15680 = vmatprep.subr.mxu0 %v19948_v34 }
0x146e   :  { %15681 = vmatpush3.msra.mxu0 %v19948_v34 }
0x146f   :  { %15682 = vmatprep.subr.mxu0 %v19955_v57 }
0x1470   :  { %15683 = vmatpush3.msra.mxu0 %v19955_v57 }
0x1471   :  { %15706 = vmatprep.subr.mxu0 %v19962_v22 }
0x14ff   :  { %v15563_v19 = vpop.f32.mrf.mxu0 }
0x1501   :  { %v8676_v43 = vpop.f32.mrf.mxu0 }
0x1507   :  { %v15582_v27 = vpop.f32.mrf.mxu1 }
0x1509   :  { %v8757_v35 = vpop.f32.mrf.mxu1 }
0x1510   :  { %v15601_v44 = vpop.f32.mrf.mxu0 }
0x1512   :  { %v8838_v40 = vpop.f32.mrf.mxu0 }
0x1519   :  { %v15620_v42 = vpop.f32.mrf.mxu1 }
0x151a   :  { %v8923_v56 = vadd.f32 %v15620_v42, %v15563_v19 }
0x151b   :  { %v8917_v54 = vpop.f32.mrf.mxu1 }
0x151c   :  { %v8918_v57 = vadd.f32 %v8917_v54, %v8676_v43  ;;  %v20106_v54 = vld [vmem:[%s20955_s7 + $0x118] sm:$0xff] }
0x151d   :  { %21443 = vst [vmem:[#allocation81_spill] sm:$0xff] %v20106_v54 }
0x1521   :  { %v15639_v9 = vpop.f32.mrf.mxu0 }
0x1522   :  { %v9004_v7 = vadd.f32 %v15639_v9, %v15582_v27 }
0x1523   :  { %v8998_v3 = vpop.f32.mrf.mxu0 }
0x1524   :  { %v9008_v34 = vadd.f32 %v9004_v7, %v8923_v56  ;;  %v8999_v23 = vadd.f32 %v8998_v3, %v8757_v35  ;;  %v20091_v35 = vld [vmem:[%s20955_s7 + $0x128] sm:$0xff]  ;;  %v20115_v56 = vld [vmem:[%s20955_s7 + $0x110] sm:$0xff] }
0x1525   :  { %21441 = vst [vmem:[#allocation79_spill] sm:$0xff] %v20091_v35  ;;  %21444 = vst [vmem:[#allocation82_spill] sm:$0xff] %v20115_v56  ;;  %v20121_v7 = vld [vmem:[%s20955_s7 + $0x30] sm:$0xff]  ;;  %v20131_v3 = vld [vmem:[%s20955_s7 + $0x108] sm:$0xff] }
0x1526   :  { %v9010_v47 = vadd.f32 %v15601_v44, %v9008_v34  ;;  %v9007_v46 = vadd.f32 %v8999_v23, %v8918_v57  ;;  %v20084_v34 = vld [vmem:[%s20955_s7 + $0x130] sm:$0xff]  ;;  %21445 = vst [vmem:[#allocation83_spill] sm:$0xff] %v20121_v7  ;;  %21446 = vst [vmem:[#allocation84_spill] sm:$0xff] %v20131_v3 }
0x1528   :  { %v9012_v59 = vadd.f32 %v9010_v47, %v21440_v0  ;;  %v9009_v5 = vadd.f32 %v9007_v46, %v8838_v40  ;;  %v20098_v40 = vld [vmem:[%s20955_s7 + $0x120] sm:$0xff] }
0x1529   :  { %21442 = vst [vmem:[#allocation80_spill] sm:$0xff] %v20098_v40  ;;  %v20152_v0 = vld [vmem:[%s20955_s7 + $0x20] sm:$0xff] }
0x152a   :  { %v12917_v12 = vmul.f32 -1.442695, %v9012_v59  ;;  %v9011_v30 = vadd.f32 %v9009_v5, %v1646_v16  ;;  %v20145_v16 = vld [vmem:[%s20955_s7 + $0x100] sm:$0xff]  ;;  %21449 = vst [vmem:[#allocation39_spill] sm:$0xff] %v20152_v0  ;;  %v20161_v5 = vld [vmem:[%s20955_s7 + $0x18] sm:$0xff] }
0x152b   :  { %21448 = vst [vmem:[#allocation38_spill] sm:$0xff] %v20145_v16  ;;  %21450 = vst [vmem:[#allocation5_spill] sm:$0xff] %v20161_v5 }
0x152c   :  { %16251 = vpow2.f32 %v12917_v12  ;;  %v12916_v15 = vmul.f32 -1.442695, %v9011_v30  ;;  %v20167_v12 = vld [vmem:[%s20955_s7 + $0xb8] sm:$0xff] }
0x152d   :  { %21451 = vst [vmem:[#allocation21_spill] sm:$0xff] %v20167_v12 }
0x152e   :  { %16253 = vpow2.f32 %v12916_v15  ;;  %v20176_v15 = vld [vmem:[%s20955_s7 + $0x10] sm:$0xff] }
0x152f   :  { %21452 = vst [vmem:[#allocation11_spill] sm:$0xff] %v20176_v15 }
0x1539   :  { %v16252_v19 = vpop.eup %16251 }
0x153a   :  { %v9020_v27 = vadd.f32 1.0, %v16252_v19  ;;  %v20182_v19 = vld [vmem:[%s20955_s7 + $0xb0] sm:$0xff] }
0x153b   :  { %v16254_v62 = vpop.eup %16253  ;;  %21453 = vst [vmem:[#allocation22_spill] sm:$0xff] %v20182_v19 }
0x153c   :  { %16255 = vrcp.f32 %v9020_v27  ;;  %v9019_v42 = vadd.f32 1.0, %v16254_v62  ;;  %v20190_v27 = vld [vmem:[%s20955_s7 + $0x8] sm:$0xff] }
0x153d   :  { %21454 = vst [vmem:[#allocation12_spill] sm:$0xff] %v20190_v27  ;;  %v20196_v62 = vld [vmem:[%s20955_s7 + $0xa8] sm:$0xff] }
0x153e   :  { %16257 = vrcp.f32 %v9019_v42  ;;  %21455 = vst [vmem:[#allocation26_spill] sm:$0xff] %v20196_v62  ;;  %v20204_v42 = vld [vmem:[%s20955_s7] sm:$0xff] }
0x153f   :  { %21456 = vst [vmem:[#allocation40_spill] sm:$0xff] %v20204_v42 }
0x1549   :  { %v19972_v43 = vpop.eup %16255 }
0x154a   :  { %v19976_v23 = vmul.f32 %v19972_v43, %v19679_v25  ;;  %v20066_v25 = vld [vmem:[%s20955_s7 + $0xc0] sm:$0xff] }
0x154b   :  { %v19978_v24 = vpop.eup %16257 }
0x154c   :  { %15640 = vmatprep.subr.mxu1 %v19976_v23  ;;  %v19983_v30 = vmul.f32 %v19978_v24, %v19683_v1  ;;  %v20073_v1 = vld [vmem:[%s20955_s7 + $0x38] sm:$0xff] }
0x154d   :  { %15641 = vmatpush3.msra.mxu1 %v19976_v23 }
0x154e   :  { %15642 = vmatprep.subr.mxu1 %v19983_v30 }
0x154f   :  { %15643 = vmatpush3.msra.mxu1 %v19983_v30 }
0x1550   :  { %15645 = vmatmul.mubr.msk.f32.vlgmr.msra.gmra.mxu1 %vm2353_vm3, %v19316_v63  ;;  %15647 = vmatprep.subr.mxu1 %v19976_v23  ;;  %v20017_v63 = vld [vmem:[%s20955_s7 + $0xf8] sm:$0xff] }
0x1551   :  { %15648 = vmatpush3.msra.mxu1 %v19976_v23  ;;  %15651 = vmatprep.mubr.msk.f32.mxu1 %vm2353_vm3, %v19325_v10  ;;  %v20024_v10 = vld [vmem:[%s20955_s7 + $0xf0] sm:$0xff] }
0x1552   :  { %15649 = vmatprep.subr.mxu1 %v19983_v30 }
0x1553   :  { %15650 = vmatpush3.msra.mxu1 %v19983_v30 }
0x1554   :  { %15652 = vmatmul.mubr.msk.f32.vlgmr.msra.gmra.mxu1 %vm2353_vm3, %v19334_v53  ;;  %15654 = vmatprep.subr.mxu1 %v19976_v23  ;;  %v20031_v53 = vld [vmem:[%s20955_s7 + $0xe8] sm:$0xff] }
0x1555   :  { %15655 = vmatpush3.msra.mxu1 %v19976_v23  ;;  %15658 = vmatprep.mubr.msk.f32.mxu1 %vm2353_vm3, %v19343_v60  ;;  %v20038_v60 = vld [vmem:[%s20955_s7 + $0xe0] sm:$0xff] }
0x1556   :  { %15656 = vmatprep.subr.mxu1 %v19983_v30 }
0x1557   :  { %15657 = vmatpush3.msra.mxu1 %v19983_v30 }
0x1558   :  { %15659 = vmatmul.mubr.msk.f32.vlgmr.msra.gmra.mxu1 %vm2353_vm3, %v19352_v2  ;;  %15661 = vmatprep.subr.mxu1 %v19976_v23  ;;  %v20045_v2 = vld [vmem:[%s20955_s7 + $0xd8] sm:$0xff] }
0x1559   :  { %15662 = vmatpush3.msra.mxu1 %v19976_v23  ;;  %15665 = vmatprep.mubr.msk.f32.mxu1 %vm2353_vm3, %v19361_v39  ;;  %v20052_v39 = vld [vmem:[%s20955_s7 + $0xd0] sm:$0xff] }
0x155a   :  { %15663 = vmatprep.subr.mxu1 %v19983_v30 }
0x155b   :  { %15664 = vmatpush3.msra.mxu1 %v19983_v30 }
0x155c   :  { %15666 = vmatmul.mubr.msk.f32.vlgmr.msra.gmra.mxu1 %vm2353_vm3, %v19370_v37  ;;  %15687 = vmatprep.subr.mxu1 %v20017_v63  ;;  %v20059_v37 = vld [vmem:[%s20955_s7 + $0xc8] sm:$0xff] }
0x155d   :  { %15688 = vmatpush3.msra.mxu1 %v20017_v63 }
0x155e   :  { %15689 = vmatprep.subr.mxu1 %v20024_v10 }
0x155f   :  { %15690 = vmatpush3.msra.mxu1 %v20024_v10 }
0x1560   :  { %15691 = vmatprep.subr.mxu1 %v20031_v53 }
0x1561   :  { %15692 = vmatpush3.msra.mxu1 %v20031_v53 }
0x1562   :  { %15693 = vmatprep.subr.mxu1 %v20038_v60 }
0x1563   :  { %15694 = vmatpush3.msra.mxu1 %v20038_v60 }
0x1564   :  { %15695 = vmatprep.subr.mxu1 %v20045_v2 }
0x1565   :  { %15696 = vmatpush3.msra.mxu1 %v20045_v2 }
0x1566   :  { %15697 = vmatprep.subr.mxu1 %v20052_v39 }
0x1567   :  { %15698 = vmatpush3.msra.mxu1 %v20052_v39 }
0x1568   :  { %15699 = vmatprep.subr.mxu1 %v20059_v37 }
0x1569   :  { %15700 = vmatpush3.msra.mxu1 %v20059_v37 }
0x156a   :  { %15701 = vmatprep.subr.mxu1 %v20066_v25 }
0x156b   :  { %15702 = vmatpush3.msra.mxu1 %v20066_v25 }
0x156c   :  { %15725 = vmatprep.subr.mxu1 %v20073_v1 }
0x1610   :  { %v15646_v59 = vpop.f32.mrf.mxu1 }
0x1612   :  { %v9093_v46 = vpop.f32.mrf.mxu1 }
0x1613   :  { %15684 = vmatprep.mubr.msk.f32.mxu0 %vm2695_vm4, %v9093_v46  ;;  %v20227_v46 = vld [vmem:[%s21197_s29] sm:$0xff] }
0x1614   :  { %v20077_v47 = vpop.f32.mrf.mxu1  ;;  %15685 = vmatmul.mubr.msk.f32.vlgmr.msra.gmra.mxu0 %vm2695_vm4, %v15646_v59  ;;  %v20220_v59 = vld [vmem:[%s20955_s7 + $0x98] sm:$0xff] }
0x1615   :  { %15707 = vmatpush3.msra.mxu0 %v19962_v22  ;;  %21458 = vst [vmem:[#allocation34_spill] sm:$0xff] %v20220_v59 }
0x1616   :  { %15708 = vmatprep.subr.mxu0 %v20084_v34  ;;  %v9168_v57 = vpop.f32.mrf.mxu1 }
0x1617   :  { %15709 = vmatpush3.msra.mxu0 %v20084_v34 }
0x1618   :  { %15710 = vmatprep.subr.mxu0 %v20091_v35  ;;  %v15660_v44 = vpop.f32.mrf.mxu1 }
0x1619   :  { %15711 = vmatpush3.msra.mxu0 %v20091_v35 }
0x161a   :  { %15712 = vmatprep.subr.mxu0 %v20098_v40  ;;  %v9243_v4 = vpop.f32.mrf.mxu1 }
0x161b   :  { %15713 = vmatpush3.msra.mxu0 %v20098_v40  ;;  %15703 = vmatprep.mubr.msk.f32.mxu1 %vm2695_vm4, %v9243_v4  ;;  %v16454_v4 = vld [vmem:[%s21200_s2 + $0x78] sm:$0xff] }
0x161c   :  { %15714 = vmatprep.subr.mxu0 %v20106_v54  ;;  %15704 = vmatmul.mubr.msk.f32.vlgmr.msra.gmra.mxu1 %vm2695_vm4, %v15660_v44  ;;  %v15667_v9 = vpop.f32.mrf.mxu1  ;;  %v20248_v44 = vld [vmem:[%s20955_s7 + $0x80] sm:$0xff] }
0x161d   :  { %15715 = vmatpush3.msra.mxu0 %v20106_v54  ;;  %15726 = vmatpush3.msra.mxu1 %v20073_v1  ;;  %21461 = vst [vmem:[#allocation36_spill] sm:$0xff] %v20248_v44 }
0x161e   :  { %15716 = vmatprep.subr.mxu0 %v20115_v56  ;;  %15727 = vmatprep.subr.mxu1 %v20121_v7  ;;  %v9318_v55 = vpop.f32.mrf.mxu1 }
0x161f   :  { %15741 = vmatprep.mubr.msk.f32.mxu1 %vm2695_vm4, %v19983_v30  ;;  %15717 = vmatpush3.msra.mxu0 %v20115_v56  ;;  %v20210_v30 = vld [vmem:[%s20955_s7 + $0xa0] sm:$0xff]  ;;  %v21463_v56 = vld [vmem:[#allocation45_spill] sm:$0xff] }
0x1620   :  { %15728 = vmatpush3.msra.mxu1 %v20121_v7  ;;  %15718 = vmatprep.subr.mxu0 %v20131_v3  ;;  %21457 = vst [vmem:[#allocation41_spill] sm:$0xff] %v20210_v30 }
0x1621   :  { %15729 = vmatprep.subr.mxu1 %v20137_v51  ;;  %15719 = vmatpush3.msra.mxu0 %v20131_v3 }
0x1622   :  { %15730 = vmatpush3.msra.mxu1 %v20137_v51  ;;  %15720 = vmatprep.subr.mxu0 %v20145_v16  ;;  %v21462_v51 = vld [vmem:[#allocation44_spill] sm:$0xff] }
0x1623   :  { %15722 = vmatprep.mubr.msk.f32.mxu0 %vm2695_vm4, %v9318_v55  ;;  %15731 = vmatprep.subr.mxu1 %v20152_v0  ;;  %v16456_v55 = vld [vmem:[%s21200_s2 + $0x68] sm:$0xff] }
0x1624   :  { %15721 = vmatpush3.msra.mxu0 %v20145_v16  ;;  %15732 = vmatpush3.msra.mxu1 %v20152_v0 }
0x1625   :  { %15723 = vmatmul.mubr.msk.f32.vlgmr.msra.gmra.mxu0 %vm2695_vm4, %v15667_v9  ;;  %15733 = vmatprep.subr.mxu1 %v20161_v5  ;;  %v16455_v9 = vld [vmem:[%s21200_s2 + $0x70] sm:$0xff] }
0x1626   :  { %15744 = vmatprep.subr.mxu0 %v20167_v12  ;;  %15734 = vmatpush3.msra.mxu1 %v20161_v5 }
0x1627   :  { %15745 = vmatpush3.msra.mxu0 %v20167_v12  ;;  %15760 = vmatprep.mubr.msk.f32.mxu0 %vm2695_vm4, %v9168_v57  ;;  %v20241_v57 = vld [vmem:[%s20955_s7 + $0x88] sm:$0xff] }
0x1628   :  { %15735 = vmatprep.subr.mxu1 %v20176_v15  ;;  %15746 = vmatprep.subr.mxu0 %v20182_v19  ;;  %21460 = vst [vmem:[#allocation37_spill] sm:$0xff] %v20241_v57 }
0x1629   :  { %15736 = vmatpush3.msra.mxu1 %v20176_v15  ;;  %15747 = vmatpush3.msra.mxu0 %v20182_v19 }
0x162a   :  { %15737 = vmatprep.subr.mxu1 %v20190_v27  ;;  %15748 = vmatprep.subr.mxu0 %v20196_v62 }
0x162b   :  { %15738 = vmatpush3.msra.mxu1 %v20190_v27  ;;  %15749 = vmatpush3.msra.mxu0 %v20196_v62 }
0x162c   :  { %15739 = vmatprep.subr.mxu1 %v20204_v42  ;;  %15750 = vmatprep.subr.mxu0 %v20210_v30 }
0x162d   :  { %15740 = vmatpush3.msra.mxu1 %v20204_v42  ;;  %15751 = vmatpush3.msra.mxu0 %v20210_v30 }
0x162e   :  { %15742 = vmatmul.mubr.msk.f32.vlgmr.msra.gmra.mxu1 %vm2695_vm4, %v19976_v23  ;;  %15752 = vmatprep.subr.mxu0 %v20220_v59  ;;  %v20234_v23 = vld [vmem:[%s20955_s7 + $0x90] sm:$0xff] }
0x162f   :  { %15753 = vmatpush3.msra.mxu0 %v20220_v59  ;;  %15767 = vmatprep.mubr.msk.f32.mxu1 %vm2353_vm3, %v20227_v46  ;;  %21459 = vst [vmem:[#allocation33_spill] sm:$0xff] %v20234_v23 }
0x1630   :  { %15754 = vmatprep.subr.mxu0 %v20234_v23 }
0x1631   :  { %15755 = vmatpush3.msra.mxu0 %v20234_v23 }
0x1632   :  { %15756 = vmatprep.subr.mxu0 %v20241_v57 }
0x1633   :  { %15757 = vmatpush3.msra.mxu0 %v20241_v57 }
0x1634   :  { %15758 = vmatprep.subr.mxu0 %v20248_v44 }
0x1635   :  { %15759 = vmatpush3.msra.mxu0 %v20248_v44 }
0x1636   :  { %15761 = vmatmul.mubr.msk.f32.vlgmr.msra.gmra.mxu0 %vm2695_vm4, %v20077_v47  ;;  %15791 = vmatprep.subr.mxu0 %v16454_v4  ;;  %v16457_v47 = vld [vmem:[%s21200_s2 + $0x60] sm:$0xff] }
0x1637   :  { %15792 = vmatpush3.msra.mxu0 %v16454_v4  ;;  %v16458_v4 = vld [vmem:[%s21200_s2 + $0x58] sm:$0xff] }
0x1638   :  { %15793 = vmatprep.subr.mxu0 %v16455_v9 }
0x1639   :  { %15794 = vmatpush3.msra.mxu0 %v16455_v9  ;;  %v16459_v9 = vld [vmem:[%s21200_s2 + $0x50] sm:$0xff] }
0x163a   :  { %15795 = vmatprep.subr.mxu0 %v16456_v55 }
0x163b   :  { %15796 = vmatpush3.msra.mxu0 %v16456_v55  ;;  %v16460_v55 = vld [vmem:[%s21200_s2 + $0x48] sm:$0xff] }
0x163c   :  { %15797 = vmatprep.subr.mxu0 %v16457_v47 }
0x163d   :  { %15798 = vmatpush3.msra.mxu0 %v16457_v47  ;;  %v16461_v47 = vld [vmem:[%s21200_s2 + $0x40] sm:$0xff] }
0x163e   :  { %15799 = vmatprep.subr.mxu0 %v16458_v4 }
0x163f   :  { %15800 = vmatpush3.msra.mxu0 %v16458_v4  ;;  %v20281_v4 = vld [vmem:[%s21200_s2 + $0x138] sm:$0xff] }
0x1640   :  { %15801 = vmatprep.subr.mxu0 %v16459_v9 }
0x1641   :  { %15802 = vmatpush3.msra.mxu0 %v16459_v9 }
0x1642   :  { %15803 = vmatprep.subr.mxu0 %v16460_v55 }
0x1643   :  { %15804 = vmatpush3.msra.mxu0 %v16460_v55 }
0x1644   :  { %15805 = vmatprep.subr.mxu0 %v16461_v47 }
0x1645   :  { %15806 = vmatpush3.msra.mxu0 %v16461_v47 }
0x1646   :  { %15829 = vmatprep.subr.mxu0 %v20281_v4 }
0x16d4   :  { %v15686_v9 = vpop.f32.mrf.mxu0 }
0x16d6   :  { %v9399_v57 = vpop.f32.mrf.mxu0 }
0x16dc   :  { %v15705_v44 = vpop.f32.mrf.mxu1 }
0x16de   :  { %v9480_v23 = vpop.f32.mrf.mxu1 }
0x16e5   :  { %v15724_v59 = vpop.f32.mrf.mxu0 }
0x16e7   :  { %v9561_v55 = vpop.f32.mrf.mxu0 }
0x16ee   :  { %v15743_v30 = vpop.f32.mrf.mxu1 }
0x16ef   :  { %v9648_v27 = vadd.f32 %v15743_v30, %v15686_v9  ;;  %v16471_v30 = vld [vmem:[%s21200_s2 + $0xf0] sm:$0xff]  ;;  %v16476_v9 = vld [vmem:[%s21200_s2 + $0xc8] sm:$0xff] }
0x16f0   :  { %v9642_v42 = vpop.f32.mrf.mxu1 }
0x16f1   :  { %v9643_v47 = vadd.f32 %v9642_v42, %v9399_v57  ;;  %v16474_v57 = vld [vmem:[%s21200_s2 + $0xd8] sm:$0xff] }
0x16f6   :  { %v15762_v62 = vpop.f32.mrf.mxu0 }
0x16f7   :  { %v9729_v19 = vadd.f32 %v15762_v62, %v15705_v44  ;;  %v9743_v62 = vsub.f32 1.0, %v19972_v43  ;;  %v16475_v44 = vld [vmem:[%s21200_s2 + $0xd0] sm:$0xff] }
0x16f8   :  { %v9723_v15 = vpop.f32.mrf.mxu0 }
0x16f9   :  { %v9733_v12 = vadd.f32 %v9729_v19, %v9648_v27  ;;  %v9724_v5 = vadd.f32 %v9723_v15, %v9480_v23  ;;  %v20358_v15 = vld [vmem:[%s21197_s29 + $0x30] sm:$0xff]  ;;  %v20367_v19 = vld [vmem:[%s21197_s29 + $0x38] sm:$0xff]  ;;  %v16473_v23 = vld [vmem:[%s21200_s2 + $0xe0] sm:$0xff] }
0x16fa   :  { %v16470_v27 = vld [vmem:[%s21200_s2 + $0xf8] sm:$0xff] }
0x16fb   :  { %v9735_v0 = vadd.f32 %v15724_v59, %v9733_v12  ;;  %v9732_v16 = vadd.f32 %v9724_v5, %v9643_v47  ;;  %v9741_v12 = vmul.f32 %v19972_v43, %v19669_v21  ;;  %v20322_v43 = vld [vmem:[%s21197_s29 + $0x10] sm:$0xff]  ;;  %v16472_v59 = vld [vmem:[%s21200_s2 + $0xe8] sm:$0xff]  ;;  %v16478_v47 = vld [vmem:[%s21200_s2 + $0x38] sm:$0xff] }
0x16fd   :  { %v9737_v3 = vadd.f32 %v9735_v0, %v21462_v51  ;;  %v9734_v7 = vadd.f32 %v9732_v16, %v9561_v55  ;;  %v9742_v51 = vsub.f32 1.0, %v19978_v24  ;;  %v20349_v0 = vld [vmem:[%s21197_s29 + $0x28] sm:$0xff]  ;;  %v16477_v55 = vld [vmem:[%s21200_s2 + $0xc0] sm:$0xff] }
0x16ff   :  { %16259 = vtanh.f32 %v9737_v3  ;;  %v9736_v54 = vadd.f32 %v9734_v7, %v21463_v56  ;;  %v20340_v7 = vld [vmem:[%s21197_s29 + $0x20] sm:$0xff] }
0x1701   :  { %16261 = vtanh.f32 %v9736_v54  ;;  %v9740_v54 = vmul.f32 %v19978_v24, %v19673_v6  ;;  %v20313_v6 = vld [vmem:[%s21197_s29 + $0x8] sm:$0xff]  ;;  %v20331_v24 = vld [vmem:[%s21197_s29 + $0x18] sm:$0xff] }
0x170c   :  { %v16260_v40 = vpop.eup %16259 }
0x170d   :  { %9748 = vrot.lane.b32.xlu0 %v16260_v40, %s16481_s23 }
0x170e   :  { %v16262_v35 = vpop.eup %16261 }
0x170f   :  { %9746 = vrot.lane.b32.xlu1 %v16262_v35, %s16481_s23 }
0x177f   :  { %v9749_v42 = vpop.permute.xlu0 %9748 }
0x1780   :  { %v9753_v5 = vmul.f32 %v9749_v42, %v9743_v62 }
0x1781   :  { %v9747_v16 = vpop.permute.xlu1 %9746 }
0x1782   :  { %v20292_v3 = vadd.f32 %v9753_v5, %v9741_v12  ;;  %v9752_v56 = vmul.f32 %v9747_v16, %v9742_v51 }
0x1784   :  { %v20296_v40 = vadd.f32 %v9752_v56, %v9740_v54  ;;  %9760 = vrot.lane.b32.xlu0 %v20292_v3, %s16481_s23 }
0x1786   :  { %9758 = vrot.lane.b32.xlu1 %v20296_v40, %s16481_s23 }
0x17f6   :  { %v20302_v35 = vpop.permute.xlu0 %9760 }
0x17f7   :  { %15763 = vmatprep.subr.mxu1 %v20302_v35 }
0x17f8   :  { %15764 = vmatpush3.msra.mxu1 %v20302_v35  ;;  %v20306_v21 = vpop.permute.xlu1 %9758 }
0x17f9   :  { %15765 = vmatprep.subr.mxu1 %v20306_v21 }
0x17fa   :  { %15766 = vmatpush3.msra.mxu1 %v20306_v21 }
0x17fb   :  { %15768 = vmatmul.mubr.msk.f32.vlgmr.msra.gmra.mxu1 %vm2353_vm3, %v20313_v6  ;;  %15770 = vmatprep.subr.mxu1 %v20302_v35 }
0x17fc   :  { %15771 = vmatpush3.msra.mxu1 %v20302_v35  ;;  %15774 = vmatprep.mubr.msk.f32.mxu1 %vm2353_vm3, %v20322_v43 }
0x17fd   :  { %15772 = vmatprep.subr.mxu1 %v20306_v21 }
0x17fe   :  { %15773 = vmatpush3.msra.mxu1 %v20306_v21 }
0x17ff   :  { %15775 = vmatmul.mubr.msk.f32.vlgmr.msra.gmra.mxu1 %vm2353_vm3, %v20331_v24  ;;  %15777 = vmatprep.subr.mxu1 %v20302_v35 }
0x1800   :  { %15778 = vmatpush3.msra.mxu1 %v20302_v35  ;;  %15781 = vmatprep.mubr.msk.f32.mxu1 %vm2353_vm3, %v20340_v7 }
0x1801   :  { %15779 = vmatprep.subr.mxu1 %v20306_v21 }
0x1802   :  { %15780 = vmatpush3.msra.mxu1 %v20306_v21 }
0x1803   :  { %15782 = vmatmul.mubr.msk.f32.vlgmr.msra.gmra.mxu1 %vm2353_vm3, %v20349_v0  ;;  %15784 = vmatprep.subr.mxu1 %v20302_v35 }
0x1804   :  { %15785 = vmatpush3.msra.mxu1 %v20302_v35  ;;  %15788 = vmatprep.mubr.msk.f32.mxu1 %vm2353_vm3, %v20358_v15 }
0x1805   :  { %15786 = vmatprep.subr.mxu1 %v20306_v21 }
0x1806   :  { %15787 = vmatpush3.msra.mxu1 %v20306_v21 }
0x1807   :  { %15789 = vmatmul.mubr.msk.f32.vlgmr.msra.gmra.mxu1 %vm2353_vm3, %v20367_v19  ;;  %15810 = vmatprep.subr.mxu1 %v16470_v27 }
0x1808   :  { %15811 = vmatpush3.msra.mxu1 %v16470_v27 }
0x1809   :  { %15812 = vmatprep.subr.mxu1 %v16471_v30 }
0x180a   :  { %15813 = vmatpush3.msra.mxu1 %v16471_v30  ;;  %v21475_v30 = vld [vmem:[#allocation18_spill] sm:$0xff] }
0x180b   :  { %15814 = vmatprep.subr.mxu1 %v16472_v59 }
0x180c   :  { %15815 = vmatpush3.msra.mxu1 %v16472_v59 }
0x180d   :  { %15816 = vmatprep.subr.mxu1 %v16473_v23 }
0x180e   :  { %15817 = vmatpush3.msra.mxu1 %v16473_v23 }
0x180f   :  { %15818 = vmatprep.subr.mxu1 %v16474_v57 }
0x1810   :  { %15819 = vmatpush3.msra.mxu1 %v16474_v57 }
0x1811   :  { %15820 = vmatprep.subr.mxu1 %v16475_v44 }
0x1812   :  { %15821 = vmatpush3.msra.mxu1 %v16475_v44 }
0x1813   :  { %15822 = vmatprep.subr.mxu1 %v16476_v9 }
0x1814   :  { %15823 = vmatpush3.msra.mxu1 %v16476_v9 }
0x1815   :  { %15824 = vmatprep.subr.mxu1 %v16477_v55 }
0x1816   :  { %15825 = vmatpush3.msra.mxu1 %v16477_v55 }
0x1817   :  { %15848 = vmatprep.subr.mxu1 %v16478_v47 }
0x18bb   :  { %v15769_v62 = vpop.f32.mrf.mxu1 }
0x18bd   :  { %v9830_v42 = vpop.f32.mrf.mxu1 }
0x18be   :  { %15807 = vmatprep.mubr.msk.f32.mxu0 %vm2695_vm4, %v9830_v42  ;;  %v21476_v42 = vld [vmem:[#allocation35_spill] sm:$0xff] }
0x18bf   :  { %v15776_v12 = vpop.f32.mrf.mxu1  ;;  %15808 = vmatmul.mubr.msk.f32.vlgmr.msra.gmra.mxu0 %vm2695_vm4, %v15769_v62 }
0x18c0   :  { %15830 = vmatpush3.msra.mxu0 %v20281_v4 }
0x18c1   :  { %15831 = vmatprep.subr.mxu0 %v19738_v36  ;;  %v9905_v5 = vpop.f32.mrf.mxu1 }
0x18c2   :  { %15832 = vmatpush3.msra.mxu0 %v19738_v36 }
0x18c3   :  { %15833 = vmatprep.subr.mxu0 %v19745_v18  ;;  %v15783_v51 = vpop.f32.mrf.mxu1 }
0x18c4   :  { %15834 = vmatpush3.msra.mxu0 %v19745_v18  ;;  %v21464_v18 = vld [vmem:[#allocation72_spill] sm:$0xff] }
0x18c5   :  { %15835 = vmatprep.subr.mxu0 %v19752_v26  ;;  %v9980_v16 = vpop.f32.mrf.mxu1 }
0x18c6   :  { %15836 = vmatpush3.msra.mxu0 %v19752_v26  ;;  %15826 = vmatprep.mubr.msk.f32.mxu1 %vm2695_vm4, %v9980_v16  ;;  %v21465_v26 = vld [vmem:[#allocation73_spill] sm:$0xff] }
0x18c7   :  { %15837 = vmatprep.subr.mxu0 %v19760_v48  ;;  %15827 = vmatmul.mubr.msk.f32.vlgmr.msra.gmra.mxu1 %vm2695_vm4, %v15783_v51  ;;  %v15790_v4 = vpop.f32.mrf.mxu1 }
0x18c8   :  { %15838 = vmatpush3.msra.mxu0 %v19760_v48  ;;  %15849 = vmatpush3.msra.mxu1 %v16478_v47  ;;  %v21466_v48 = vld [vmem:[#allocation74_spill] sm:$0xff] }
0x18c9   :  { %15839 = vmatprep.subr.mxu0 %v19769_v33  ;;  %15850 = vmatprep.subr.mxu1 %v19775_v61  ;;  %v10055_v36 = vpop.f32.mrf.mxu1  ;;  %v16479_v47 = vld [vmem:[%s20953_s8] ss:$0 sm:$0xff] }
0x18ca   :  { %15864 = vmatprep.mubr.msk.f32.mxu1 %vm2695_vm4, %v20306_v21  ;;  %15840 = vmatpush3.msra.mxu0 %v19769_v33  ;;  %v21467_v33 = vld [vmem:[#allocation75_spill] sm:$0xff] }
0x18cb   :  { %15851 = vmatpush3.msra.mxu1 %v19775_v61  ;;  %15841 = vmatprep.subr.mxu0 %v19785_v29  ;;  %v21468_v61 = vld [vmem:[#allocation76_spill] sm:$0xff] }
0x18cc   :  { %15852 = vmatprep.subr.mxu1 %v19791_v45  ;;  %15842 = vmatpush3.msra.mxu0 %v19785_v29  ;;  %v21469_v29 = vld [vmem:[#allocation77_spill] sm:$0xff] }
0x18cd   :  { %15853 = vmatpush3.msra.mxu1 %v19791_v45  ;;  %15843 = vmatprep.subr.mxu0 %v19799_v49  ;;  %v21470_v45 = vld [vmem:[#allocation78_spill] sm:$0xff] }
0x18ce   :  { %15845 = vmatprep.mubr.msk.f32.mxu0 %vm2695_vm4, %v10055_v36  ;;  %15854 = vmatprep.subr.mxu1 %v19806_v20 }
0x18cf   :  { %15844 = vmatpush3.msra.mxu0 %v19799_v49  ;;  %15855 = vmatpush3.msra.mxu1 %v19806_v20 }
0x18d0   :  { %15846 = vmatmul.mubr.msk.f32.vlgmr.msra.gmra.mxu0 %vm2695_vm4, %v15790_v4  ;;  %15856 = vmatprep.subr.mxu1 %v19815_v32 }
0x18d1   :  { %15867 = vmatprep.subr.mxu0 %v19821_v28  ;;  %15857 = vmatpush3.msra.mxu1 %v19815_v32 }
0x18d2   :  { %15868 = vmatpush3.msra.mxu0 %v19821_v28  ;;  %15883 = vmatprep.mubr.msk.f32.mxu0 %vm2695_vm4, %v9905_v5 }
0x18d3   :  { %15858 = vmatprep.subr.mxu1 %v19830_v31  ;;  %15869 = vmatprep.subr.mxu0 %v19836_v38 }
0x18d4   :  { %15859 = vmatpush3.msra.mxu1 %v19830_v31  ;;  %15870 = vmatpush3.msra.mxu0 %v19836_v38  ;;  %v21471_v38 = vld [vmem:[#allocation7_spill] sm:$0xff] }
0x18d5   :  { %15860 = vmatprep.subr.mxu1 %v19844_v50  ;;  %15871 = vmatprep.subr.mxu0 %v19850_v17 }
0x18d6   :  { %15861 = vmatpush3.msra.mxu1 %v19844_v50  ;;  %15872 = vmatpush3.msra.mxu0 %v19850_v17  ;;  %v21472_v50 = vld [vmem:[#allocation30_spill] sm:$0xff] }
0x18d7   :  { %15862 = vmatprep.subr.mxu1 %v19858_v52  ;;  %15873 = vmatprep.subr.mxu0 %v19864_v8  ;;  %v1436_v17 = vadd.f32 %v21472_v50, %v21471_v38  ;;  %v21494_v38 = vld [vmem:[#allocation34_spill] sm:$0xff]  ;;  %v21495_v50 = vld [vmem:[#allocation33_spill] sm:$0xff] }
0x18d8   :  { %15863 = vmatpush3.msra.mxu1 %v19858_v52  ;;  %15874 = vmatpush3.msra.mxu0 %v19864_v8  ;;  %v21473_v52 = vld [vmem:[#allocation17_spill] sm:$0xff]  ;;  %v21474_v8 = vld [vmem:[#allocation31_spill] sm:$0xff] }
0x18d9   :  { %15865 = vmatmul.mubr.msk.f32.vlgmr.msra.gmra.mxu1 %vm2695_vm4, %v20302_v35  ;;  %15875 = vmatprep.subr.mxu0 %v19874_v13 }
0x18da   :  { %15876 = vmatpush3.msra.mxu0 %v19874_v13  ;;  %15890 = vmatprep.mubr.msk.f32.mxu1 %vm2353_vm3, %v20227_v46  ;;  %v1600_v13 = vadd.f32 %v21474_v8, %v21473_v52  ;;  %v21497_v52 = vld [vmem:[#allocation36_spill] sm:$0xff] }
0x18db   :  { %15877 = vmatprep.subr.mxu0 %v19883_v14 }
0x18dc   :  { %15878 = vmatpush3.msra.mxu0 %v19883_v14 }
0x18dd   :  { %15879 = vmatprep.subr.mxu0 %v19890_v41 }
0x18de   :  { %15880 = vmatpush3.msra.mxu0 %v19890_v41 }
0x18df   :  { %15881 = vmatprep.subr.mxu0 %v19897_v58 }
0x18e0   :  { %15882 = vmatpush3.msra.mxu0 %v19897_v58  ;;  %v1618_v58 = vadd.f32 %v1600_v13, %v1436_v17  ;;  %v21496_v17 = vld [vmem:[#allocation37_spill] sm:$0xff] }
0x18e1   :  { %15884 = vmatmul.mubr.msk.f32.vlgmr.msra.gmra.mxu0 %vm2695_vm4, %v15776_v12  ;;  %15914 = vmatprep.subr.mxu0 %v19906_v11 }
0x18e2   :  { %15915 = vmatpush3.msra.mxu0 %v19906_v11  ;;  %v1630_v59 = vadd.f32 %v1618_v58, %v21475_v30 }
0x18e3   :  { %15916 = vmatprep.subr.mxu0 %v21464_v18 }
0x18e4   :  { %15917 = vmatpush3.msra.mxu0 %v21464_v18  ;;  %v1648_v62 = vadd.f32 %v16479_v47, %v1630_v59  ;;  %v21498_v47 = vld [vmem:[#allocation46_spill] sm:$0xff] }
0x18e5   :  { %15918 = vmatprep.subr.mxu0 %v21465_v26 }
0x18e6   :  { %15919 = vmatpush3.msra.mxu0 %v21465_v26 }
0x18e7   :  { %15920 = vmatprep.subr.mxu0 %v21466_v48 }
0x18e8   :  { %15921 = vmatpush3.msra.mxu0 %v21466_v48 }
0x18e9   :  { %15922 = vmatprep.subr.mxu0 %v21467_v33 }
0x18ea   :  { %15923 = vmatpush3.msra.mxu0 %v21467_v33 }
0x18eb   :  { %15924 = vmatprep.subr.mxu0 %v21468_v61 }
0x18ec   :  { %15925 = vmatpush3.msra.mxu0 %v21468_v61 }
0x18ed   :  { %15926 = vmatprep.subr.mxu0 %v21469_v29 }
0x18ee   :  { %15927 = vmatpush3.msra.mxu0 %v21469_v29 }
0x18ef   :  { %15928 = vmatprep.subr.mxu0 %v21470_v45 }
0x18f0   :  { %15929 = vmatpush3.msra.mxu0 %v21470_v45 }
0x18f1   :  { %15952 = vmatprep.subr.mxu0 %v19962_v22 }
0x197f   :  { %v15809_v49 = vpop.f32.mrf.mxu0 }
0x1981   :  { %v10136_v32 = vpop.f32.mrf.mxu0 }
0x1987   :  { %v15828_v20 = vpop.f32.mrf.mxu1 }
0x1989   :  { %v10217_v28 = vpop.f32.mrf.mxu1 }
0x1990   :  { %v15847_v31 = vpop.f32.mrf.mxu0 }
0x1992   :  { %v10298_v41 = vpop.f32.mrf.mxu0 }
0x1999   :  { %v15866_v14 = vpop.f32.mrf.mxu1 }
0x199a   :  { %v10383_v54 = vadd.f32 %v15866_v14, %v15809_v49  ;;  %v21489_v49 = vld [vmem:[#allocation22_spill] sm:$0xff] }
0x199b   :  { %v10377_v11 = vpop.f32.mrf.mxu1 }
0x199c   :  { %v10378_v23 = vadd.f32 %v10377_v11, %v10136_v32  ;;  %v21491_v32 = vld [vmem:[#allocation26_spill] sm:$0xff] }
0x19a1   :  { %v15885_v46 = vpop.f32.mrf.mxu0 }
0x19a2   :  { %v10464_v56 = vadd.f32 %v15885_v46, %v15828_v20  ;;  %v21490_v20 = vld [vmem:[#allocation12_spill] sm:$0xff] }
0x19a3   :  { %v10458_v27 = vpop.f32.mrf.mxu0 }
0x19a4   :  { %v10468_v57 = vadd.f32 %v10464_v56, %v10383_v54  ;;  %v10459_v44 = vadd.f32 %v10458_v27, %v10217_v28  ;;  %v21492_v28 = vld [vmem:[#allocation40_spill] sm:$0xff] }
0x19a6   :  { %v10470_v9 = vadd.f32 %v15847_v31, %v10468_v57  ;;  %v10467_v55 = vadd.f32 %v10459_v44, %v10378_v23  ;;  %v21493_v31 = vld [vmem:[#allocation41_spill] sm:$0xff] }
0x19a8   :  { %v10472_v12 = vadd.f32 %v10470_v9, %v21476_v42  ;;  %v10469_v5 = vadd.f32 %v10467_v55, %v10298_v41 }
0x19aa   :  { %v12955_v51 = vmul.f32 -1.442695, %v10472_v12  ;;  %v10471_v16 = vadd.f32 %v10469_v5, %v1648_v62  ;;  %v21499_v12 = vld [vmem:[#allocation47_spill] sm:$0xff] }
0x19ac   :  { %16263 = vpow2.f32 %v12955_v51  ;;  %v12954_v4 = vmul.f32 -1.442695, %v10471_v16  ;;  %v11223_v51 = vld [vmem:[%s20956_s10 + $0x38] sm:$0xff]  ;;  %v11222_v16 = vld [vmem:[%s20956_s10 + $0x30] sm:$0xff] }
0x19ae   :  { %16265 = vpow2.f32 %v12954_v4  ;;  %v11221_v4 = vld [vmem:[%s20956_s10 + $0x28] sm:$0xff] }
0x19b9   :  { %v16264_v36 = vpop.eup %16263 }
0x19ba   :  { %v10480_v18 = vadd.f32 1.0, %v16264_v36  ;;  %v11220_v36 = vld [vmem:[%s20956_s10 + $0x20] sm:$0xff] }
0x19bb   :  { %v16266_v26 = vpop.eup %16265 }
0x19bc   :  { %16267 = vrcp.f32 %v10480_v18  ;;  %v10479_v48 = vadd.f32 1.0, %v16266_v26  ;;  %v11219_v26 = vld [vmem:[%s20956_s10 + $0x18] sm:$0xff] }
0x19be   :  { %16269 = vrcp.f32 %v10479_v48 }
0x19c9   :  { %v20483_v33 = vpop.eup %16267 }
0x19ca   :  { %v20487_v61 = vmul.f32 %v20483_v33, %v20302_v35  ;;  %v21479_v35 = vld [vmem:[#allocation81_spill] sm:$0xff] }
0x19cb   :  { %v20489_v29 = vpop.eup %16269 }
0x19cc   :  { %15886 = vmatprep.subr.mxu1 %v20487_v61  ;;  %v20494_v45 = vmul.f32 %v20489_v29, %v20306_v21  ;;  %v21481_v21 = vld [vmem:[#allocation83_spill] sm:$0xff] }
0x19cd   :  { %15887 = vmatpush3.msra.mxu1 %v20487_v61 }
0x19ce   :  { %15888 = vmatprep.subr.mxu1 %v20494_v45 }
0x19cf   :  { %15889 = vmatpush3.msra.mxu1 %v20494_v45 }
0x19d0   :  { %15891 = vmatmul.mubr.msk.f32.vlgmr.msra.gmra.mxu1 %vm2353_vm3, %v20313_v6  ;;  %15893 = vmatprep.subr.mxu1 %v20487_v61  ;;  %v21482_v6 = vld [vmem:[#allocation84_spill] sm:$0xff] }
0x19d1   :  { %15894 = vmatpush3.msra.mxu1 %v20487_v61  ;;  %15897 = vmatprep.mubr.msk.f32.mxu1 %vm2353_vm3, %v20322_v43  ;;  %v21483_v43 = vld [vmem:[#allocation85_spill] sm:$0xff] }
0x19d2   :  { %15895 = vmatprep.subr.mxu1 %v20494_v45 }
0x19d3   :  { %15896 = vmatpush3.msra.mxu1 %v20494_v45 }
0x19d4   :  { %15898 = vmatmul.mubr.msk.f32.vlgmr.msra.gmra.mxu1 %vm2353_vm3, %v20331_v24  ;;  %15900 = vmatprep.subr.mxu1 %v20487_v61 }
0x19d5   :  { %15901 = vmatpush3.msra.mxu1 %v20487_v61  ;;  %15904 = vmatprep.mubr.msk.f32.mxu1 %vm2353_vm3, %v20340_v7  ;;  %v21485_v7 = vld [vmem:[#allocation39_spill] sm:$0xff] }
0x19d6   :  { %15902 = vmatprep.subr.mxu1 %v20494_v45 }
0x19d7   :  { %15903 = vmatpush3.msra.mxu1 %v20494_v45 }
0x19d8   :  { %15905 = vmatmul.mubr.msk.f32.vlgmr.msra.gmra.mxu1 %vm2353_vm3, %v20349_v0  ;;  %15907 = vmatprep.subr.mxu1 %v20487_v61  ;;  %v21486_v0 = vld [vmem:[#allocation5_spill] sm:$0xff] }
0x19d9   :  { %15908 = vmatpush3.msra.mxu1 %v20487_v61  ;;  %15911 = vmatprep.mubr.msk.f32.mxu1 %vm2353_vm3, %v20358_v15  ;;  %v21487_v15 = vld [vmem:[#allocation21_spill] sm:$0xff] }
0x19da   :  { %15909 = vmatprep.subr.mxu1 %v20494_v45 }
0x19db   :  { %15910 = vmatpush3.msra.mxu1 %v20494_v45 }
0x19dc   :  { %15912 = vmatmul.mubr.msk.f32.vlgmr.msra.gmra.mxu1 %vm2353_vm3, %v20367_v19  ;;  %15933 = vmatprep.subr.mxu1 %v20017_v63  ;;  %v21488_v19 = vld [vmem:[#allocation11_spill] sm:$0xff] }
0x19dd   :  { %15934 = vmatpush3.msra.mxu1 %v20017_v63 }
0x19de   :  { %15935 = vmatprep.subr.mxu1 %v20024_v10 }
0x19df   :  { %15936 = vmatpush3.msra.mxu1 %v20024_v10 }
0x19e0   :  { %15937 = vmatprep.subr.mxu1 %v20031_v53 }
0x19e1   :  { %15938 = vmatpush3.msra.mxu1 %v20031_v53 }
0x19e2   :  { %15939 = vmatprep.subr.mxu1 %v20038_v60 }
0x19e3   :  { %15940 = vmatpush3.msra.mxu1 %v20038_v60 }
0x19e4   :  { %15941 = vmatprep.subr.mxu1 %v20045_v2 }
0x19e5   :  { %15942 = vmatpush3.msra.mxu1 %v20045_v2  ;;  %v21477_v2 = vld [vmem:[#allocation79_spill] sm:$0xff] }
0x19e6   :  { %15943 = vmatprep.subr.mxu1 %v20052_v39 }
0x19e7   :  { %15944 = vmatpush3.msra.mxu1 %v20052_v39 }
0x19e8   :  { %15945 = vmatprep.subr.mxu1 %v20059_v37 }
0x19e9   :  { %15946 = vmatpush3.msra.mxu1 %v20059_v37  ;;  %v21478_v37 = vld [vmem:[#allocation80_spill] sm:$0xff] }
0x19ea   :  { %15947 = vmatprep.subr.mxu1 %v20066_v25 }
0x19eb   :  { %15948 = vmatpush3.msra.mxu1 %v20066_v25 }
0x19ec   :  { %15971 = vmatprep.subr.mxu1 %v20073_v1 }
0x1a90   :  { %v15892_v63 = vpop.f32.mrf.mxu1 }
0x1a92   :  { %v10553_v10 = vpop.f32.mrf.mxu1 }
0x1a93   :  { %15930 = vmatprep.mubr.msk.f32.mxu0 %vm2695_vm4, %v10553_v10  ;;  %v11325_v10 = vld [vmem:[%s20957_s12 + $0x38] sm:$0xff] }
0x1a94   :  { %v15899_v53 = vpop.f32.mrf.mxu1  ;;  %15931 = vmatmul.mubr.msk.f32.vlgmr.msra.gmra.mxu0 %vm2695_vm4, %v15892_v63  ;;  %v11216_v63 = vld [vmem:[%s20956_s10] sm:$0xff] }
0x1a95   :  { %15953 = vmatpush3.msra.mxu0 %v19962_v22 }
0x1a96   :  { %15954 = vmatprep.subr.mxu0 %v20084_v34  ;;  %v10628_v60 = vpop.f32.mrf.mxu1 }
0x1a97   :  { %15955 = vmatpush3.msra.mxu0 %v20084_v34  ;;  %v21480_v34 = vld [vmem:[#allocation82_spill] sm:$0xff] }
0x1a98   :  { %15956 = vmatprep.subr.mxu0 %v21477_v2  ;;  %v15906_v39 = vpop.f32.mrf.mxu1 }
0x1a99   :  { %15957 = vmatpush3.msra.mxu0 %v21477_v2  ;;  %v11203_v2 = vsub.f32 1.0, %v20483_v33 }
0x1a9a   :  { %15958 = vmatprep.subr.mxu0 %v21478_v37  ;;  %v10703_v25 = vpop.f32.mrf.mxu1 }
0x1a9b   :  { %15959 = vmatpush3.msra.mxu0 %v21478_v37  ;;  %15949 = vmatprep.mubr.msk.f32.mxu1 %vm2695_vm4, %v10703_v25  ;;  %v11322_v37 = vld [vmem:[%s20957_s12 + $0x20] sm:$0xff]  ;;  %v11201_v25 = vmul.f32 %v20483_v33, %v20292_v3  ;;  %v11321_v33 = vld [vmem:[%s20957_s12 + $0x18] sm:$0xff] }
0x1a9c   :  { %15960 = vmatprep.subr.mxu0 %v21479_v35  ;;  %15950 = vmatmul.mubr.msk.f32.vlgmr.msra.gmra.mxu1 %vm2695_vm4, %v15906_v39  ;;  %v15913_v22 = vpop.f32.mrf.mxu1 }
0x1a9d   :  { %15961 = vmatpush3.msra.mxu0 %v21479_v35  ;;  %15972 = vmatpush3.msra.mxu1 %v20073_v1  ;;  %v21484_v1 = vld [vmem:[#allocation38_spill] sm:$0xff] }
0x1a9e   :  { %15962 = vmatprep.subr.mxu0 %v21480_v34  ;;  %15973 = vmatprep.subr.mxu1 %v21481_v21  ;;  %v10778_v24 = vpop.f32.mrf.mxu1 }
0x1a9f   :  { %15987 = vmatprep.mubr.msk.f32.mxu1 %vm2695_vm4, %v20494_v45  ;;  %15963 = vmatpush3.msra.mxu0 %v21480_v34  ;;  %v11217_v45 = vld [vmem:[%s20956_s10 + $0x8] sm:$0xff] }
0x1aa0   :  { %15974 = vmatpush3.msra.mxu1 %v21481_v21  ;;  %15964 = vmatprep.subr.mxu0 %v21482_v6 }
0x1aa1   :  { %15975 = vmatprep.subr.mxu1 %v21483_v43  ;;  %15965 = vmatpush3.msra.mxu0 %v21482_v6  ;;  %v11200_v6 = vmul.f32 %v20489_v29, %v20296_v40  ;;  %v11320_v40 = vld [vmem:[%s20957_s12 + $0x10] sm:$0xff] }
0x1aa2   :  { %15976 = vmatpush3.msra.mxu1 %v21483_v43  ;;  %15966 = vmatprep.subr.mxu0 %v21484_v1 }
0x1aa3   :  { %15977 = vmatprep.subr.mxu1 %v21485_v7  ;;  %15967 = vmatpush3.msra.mxu0 %v21484_v1 }
0x1aa4   :  { %15968 = vmatprep.mubr.msk.f32.mxu0 %vm2695_vm4, %v10778_v24  ;;  %15978 = vmatpush3.msra.mxu1 %v21485_v7  ;;  %v11318_v7 = vld [vmem:[%s20957_s12] sm:$0xff] }
0x1aa5   :  { %15969 = vmatmul.mubr.msk.f32.vlgmr.msra.gmra.mxu0 %vm2695_vm4, %v15913_v22  ;;  %15979 = vmatprep.subr.mxu1 %v21486_v0  ;;  %v11202_v22 = vsub.f32 1.0, %v20489_v29  ;;  %v11319_v29 = vld [vmem:[%s20957_s12 + $0x8] sm:$0xff] }
0x1aa6   :  { %15990 = vmatprep.subr.mxu0 %v21487_v15  ;;  %15980 = vmatpush3.msra.mxu1 %v21486_v0  ;;  %v20665_v0 = vld [vmem:[%s20958_s16] sm:$0x7] }
0x1aa7   :  { %15991 = vmatpush3.msra.mxu0 %v21487_v15  ;;  %16006 = vmatprep.mubr.msk.f32.mxu0 %vm2695_vm4, %v10628_v60  ;;  %v11323_v60 = vld [vmem:[%s20957_s12 + $0x28] sm:$0xff]  ;;  %v11425_v15 = vld [vmem:[%s20959_s1] sm:$0xff] }
0x1aa8   :  { %15981 = vmatprep.subr.mxu1 %v21488_v19  ;;  %15992 = vmatprep.subr.mxu0 %v21489_v49 }
0x1aa9   :  { %15982 = vmatpush3.msra.mxu1 %v21488_v19  ;;  %15993 = vmatpush3.msra.mxu0 %v21489_v49  ;;  %v11426_v19 = vld [vmem:[%s20959_s1 + $0x8] sm:$0xff]  ;;  %v11424_v49 = vld [vmem:[%s20960_s14 + $0x38] sm:$0xff] }
0x1aaa   :  { %15983 = vmatprep.subr.mxu1 %v21490_v20  ;;  %15994 = vmatprep.subr.mxu0 %v21491_v32 }
0x1aab   :  { %15984 = vmatpush3.msra.mxu1 %v21490_v20  ;;  %15995 = vmatpush3.msra.mxu0 %v21491_v32  ;;  %v11423_v20 = vld [vmem:[%s20960_s14 + $0x30] sm:$0xff]  ;;  %v11422_v32 = vld [vmem:[%s20960_s14 + $0x28] sm:$0xff] }
0x1aac   :  { %15985 = vmatprep.subr.mxu1 %v21492_v28  ;;  %15996 = vmatprep.subr.mxu0 %v21493_v31 }
0x1aad   :  { %15986 = vmatpush3.msra.mxu1 %v21492_v28  ;;  %15997 = vmatpush3.msra.mxu0 %v21493_v31  ;;  %v11421_v28 = vld [vmem:[%s20960_s14 + $0x20] sm:$0xff] }
0x1aae   :  { %15988 = vmatmul.mubr.msk.f32.vlgmr.msra.gmra.mxu1 %vm2695_vm4, %v20487_v61  ;;  %15998 = vmatprep.subr.mxu0 %v21494_v38  ;;  %v11218_v61 = vld [vmem:[%s20956_s10 + $0x10] sm:$0xff]  ;;  %v12974_v31 = vld [vmem:[%s20961_s11] ss:$0 sm:$0xff] }
0x1aaf   :  { %15999 = vmatpush3.msra.mxu0 %v21494_v38  ;;  %16009 = vmatprep.subr.mxu1 %v11223_v51 }
0x1ab0   :  { %16000 = vmatprep.subr.mxu0 %v21495_v50  ;;  %16010 = vmatpush3.msra.mxu1 %v11223_v51 }
0x1ab1   :  { %16001 = vmatpush3.msra.mxu0 %v21495_v50  ;;  %16011 = vmatprep.subr.mxu1 %v11222_v16 }
0x1ab2   :  { %16002 = vmatprep.subr.mxu0 %v21496_v17  ;;  %16012 = vmatpush3.msra.mxu1 %v11222_v16  ;;  %v13011_v16 = vld [vmem:[%s20959_s1 + $0x20] sm:$0xff] }
0x1ab3   :  { %16003 = vmatpush3.msra.mxu0 %v21496_v17  ;;  %16013 = vmatprep.subr.mxu1 %v11221_v4 }
0x1ab4   :  { %16004 = vmatprep.subr.mxu0 %v21497_v52  ;;  %16014 = vmatpush3.msra.mxu1 %v11221_v4  ;;  %v13010_v4 = vld [vmem:[%s20960_s14 + $0xb8] sm:$0xff] }
0x1ab5   :  { %16005 = vmatpush3.msra.mxu0 %v21497_v52  ;;  %16015 = vmatprep.subr.mxu1 %v11220_v36 }
0x1ab6   :  { %16007 = vmatmul.mubr.msk.f32.vlgmr.msra.gmra.mxu0 %vm2695_vm4, %v15899_v53  ;;  %16016 = vmatpush3.msra.mxu1 %v11220_v36  ;;  %v11324_v53 = vld [vmem:[%s20957_s12 + $0x30] sm:$0xff] }
0x1ab7   :  { %16017 = vmatprep.subr.mxu1 %v11219_v26  ;;  %16028 = vmatprep.subr.mxu0 %v11325_v10  ;;  %v13028_v36 = vld [vmem:[%s20959_s1 + $0x30] sm:$0xff] }
0x1ab8   :  { %16018 = vmatpush3.msra.mxu1 %v11219_v26  ;;  %16029 = vmatpush3.msra.mxu0 %v11325_v10  ;;  %v13012_v26 = vld [vmem:[%s20959_s1 + $0x28] sm:$0xff] }
0x1ab9   :  { %16019 = vmatprep.subr.mxu1 %v11218_v61  ;;  %16030 = vmatprep.subr.mxu0 %v11324_v53  ;;  %v13025_v10 = vld [vmem:[%s20960_s14 + $0xe8] sm:$0xff] }
0x1aba   :  { %16020 = vmatpush3.msra.mxu1 %v11218_v61  ;;  %16031 = vmatpush3.msra.mxu0 %v11324_v53  ;;  %v13009_v61 = vld [vmem:[%s20960_s14 + $0xb0] sm:$0xff]  ;;  %v13007_v53 = vld [vmem:[%s20960_s14 + $0xa0] sm:$0xff] }
0x1abb   :  { %16021 = vmatprep.subr.mxu1 %v11217_v45  ;;  %16032 = vmatprep.subr.mxu0 %v11323_v60 }
0x1abc   :  { %16022 = vmatpush3.msra.mxu1 %v11217_v45  ;;  %16033 = vmatpush3.msra.mxu0 %v11323_v60  ;;  %v13026_v45 = vld [vmem:[%s20960_s14 + $0xf0] sm:$0xff]  ;;  %v13024_v60 = vld [vmem:[%s20960_s14 + $0xe0] sm:$0xff] }
0x1abd   :  { %16023 = vmatprep.subr.mxu1 %v11216_v63  ;;  %16034 = vmatprep.subr.mxu0 %v11322_v37 }
0x1abe   :  { %16024 = vmatpush3.msra.mxu1 %v11216_v63  ;;  %16035 = vmatpush3.msra.mxu0 %v11322_v37  ;;  %v13008_v63 = vld [vmem:[%s20960_s14 + $0xa8] sm:$0xff]  ;;  %v13005_v37 = vld [vmem:[%s20960_s14 + $0x90] sm:$0xff] }
0x1abf   :  { %16036 = vmatprep.subr.mxu0 %v11321_v33  ;;  %16047 = vmatprep.subr.msk.mxu1 %vm11434_vm5, %v20665_v0 }
0x1ac0   :  { %16037 = vmatpush3.msra.mxu0 %v11321_v33  ;;  %v12147_v33 = vld [vmem:[%s20963_s17 + $0x10] sm:$0xff] }
0x1ac1   :  { %16038 = vmatprep.subr.mxu0 %v11320_v40 }
0x1ac2   :  { %16039 = vmatpush3.msra.mxu0 %v11320_v40  ;;  %v12146_v40 = vld [vmem:[%s20963_s17 + $0x8] sm:$0xff] }
0x1ac3   :  { %16040 = vmatprep.subr.mxu0 %v11319_v29 }
0x1ac4   :  { %16041 = vmatpush3.msra.mxu0 %v11319_v29  ;;  %v12145_v29 = vld [vmem:[%s20963_s17] sm:$0xff] }
0x1ac5   :  { %16042 = vmatprep.subr.mxu0 %v11318_v7 }
0x1ac6   :  { %16043 = vmatpush3.msra.mxu0 %v11318_v7  ;;  %v12304_v7 = vld [vmem:[%s20964_s19 + $0x38] sm:$0xff] }
0x1ac7   :  { %16071 = vmatprep.subr.msk.mxu0 %vm11434_vm5, %v20665_v0 }
0x1b54   :  { %v15932_v8 = vpop.f32.mrf.mxu0 }
0x1b56   :  { %v10859_v14 = vpop.f32.mrf.mxu0 }
0x1b5c   :  { %v15951_v13 = vpop.f32.mrf.mxu1 }
0x1b5e   :  { %v10940_v41 = vpop.f32.mrf.mxu1 }
0x1b65   :  { %v15970_v58 = vpop.f32.mrf.mxu0 }
0x1b67   :  { %v11021_v46 = vpop.f32.mrf.mxu0 }
0x1b6e   :  { %v15989_v11 = vpop.f32.mrf.mxu1 }
0x1b6f   :  { %v11108_v27 = vadd.f32 %v15989_v11, %v15932_v8  ;;  %v12992_v11 = vld [vmem:[%s20960_s14 + $0x70] sm:$0xff] }
0x1b70   :  { %v11102_v54 = vpop.f32.mrf.mxu1 }
0x1b71   :  { %v11103_v23 = vadd.f32 %v11102_v54, %v10859_v14  ;;  %v12994_v14 = vld [vmem:[%s20959_s1 + $0x10] sm:$0xff]  ;;  %v12990_v54 = vld [vmem:[%s20960_s14 + $0x60] sm:$0xff] }
0x1b76   :  { %v16008_v56 = vpop.f32.mrf.mxu0 }
0x1b77   :  { %v11189_v30 = vadd.f32 %v16008_v56, %v15951_v13  ;;  %v11420_v56 = vld [vmem:[%s20960_s14 + $0x18] sm:$0xff] }
0x1b78   :  { %v11183_v59 = vpop.f32.mrf.mxu0 }
0x1b79   :  { %v11193_v57 = vadd.f32 %v11189_v30, %v11108_v27  ;;  %v11184_v44 = vadd.f32 %v11183_v59, %v10940_v41  ;;  %v12993_v41 = vld [vmem:[%s20960_s14 + $0x78] sm:$0xff]  ;;  %v11419_v30 = vld [vmem:[%s20960_s14 + $0x10] sm:$0xff] }
0x1b7a   :  { %v12989_v27 = vld [vmem:[%s20960_s14 + $0x58] sm:$0xff]  ;;  %v12988_v59 = vld [vmem:[%s20960_s14 + $0x50] sm:$0xff] }
0x1b7b   :  { %v11195_v9 = vadd.f32 %v15970_v58, %v11193_v57  ;;  %v11192_v55 = vadd.f32 %v11184_v44, %v11103_v23  ;;  %v12995_v58 = vld [vmem:[%s20959_s1 + $0x18] sm:$0xff]  ;;  %v11418_v23 = vld [vmem:[%s20960_s14 + $0x8] sm:$0xff]  ;;  %v11417_v44 = vld [vmem:[%s20960_s14] sm:$0xff] }
0x1b7c   :  { %v12987_v57 = vld [vmem:[%s20960_s14 + $0x48] sm:$0xff] }
0x1b7d   :  { %v11197_v62 = vadd.f32 %v11195_v9, %v21498_v47  ;;  %v11194_v42 = vadd.f32 %v11192_v55, %v11021_v46  ;;  %v12991_v46 = vld [vmem:[%s20960_s14 + $0x68] sm:$0xff]  ;;  %v12986_v9 = vld [vmem:[%s20960_s14 + $0x40] sm:$0xff] }
0x1b7e   :  { %v12977_v55 = vld [vmem:[%s20962_s13] ss:$0 sm:$0xff] }
0x1b7f   :  { %16271 = vtanh.f32 %v11197_v62  ;;  %v11196_v5 = vadd.f32 %v11194_v42, %v21499_v12 }
0x1b81   :  { %16273 = vtanh.f32 %v11196_v5 }
0x1b8c   :  { %v16272_v18 = vpop.eup %16271 }
0x1b8d   :  { %11208 = vrot.lane.b32.xlu1 %v16272_v18, %s16481_s23  ;;  %v13027_v18 = vld [vmem:[%s20960_s14 + $0xf8] sm:$0xff] }
0x1b8e   :  { %v16274_v48 = vpop.eup %16273 }
0x1b8f   :  { %11206 = vrot.lane.b32.xlu0 %v16274_v48, %s16481_s23  ;;  %v13029_v48 = vld [vmem:[%s20959_s1 + $0x38] sm:$0xff] }
0x1bff   :  { %v11209_v39 = vpop.permute.xlu1 %11208 }
0x1c00   :  { %v11213_v35 = vmul.f32 %v11209_v39, %v11203_v2  ;;  %v13006_v2 = vld [vmem:[%s20960_s14 + $0x98] sm:$0xff] }
0x1c01   :  { %v11207_v34 = vpop.permute.xlu0 %11206  ;;  %v13023_v39 = vld [vmem:[%s20960_s14 + $0xd8] sm:$0xff] }
0x1c02   :  { %v11215_v21 = vadd.f32 %v11213_v35, %v11201_v25  ;;  %v11212_v43 = vmul.f32 %v11207_v34, %v11202_v22  ;;  %v13022_v25 = vld [vmem:[%s20960_s14 + $0xd0] sm:$0xff]  ;;  %v13004_v35 = vld [vmem:[%s20960_s14 + $0x88] sm:$0xff]  ;;  %v13003_v34 = vld [vmem:[%s20960_s14 + $0x80] sm:$0xff] }
0x1c03   :  { %v13021_v22 = vld [vmem:[%s20960_s14 + $0xc8] sm:$0xff] }
0x1c04   :  { %v11214_v24 = vadd.f32 %v11212_v43, %v11200_v6  ;;  %11235 = vrot.lane.b32.xlu1 %v11215_v21, %s16481_s23  ;;  %v13020_v21 = vld [vmem:[%s20960_s14 + $0xc0] sm:$0xff]  ;;  %v12152_v6 = vld [vmem:[%s20963_s17 + $0x38] sm:$0xff]  ;;  %v12151_v43 = vld [vmem:[%s20963_s17 + $0x30] sm:$0xff] }
0x1c06   :  { %11233 = vrot.lane.b32.xlu0 %v11214_v24, %s16481_s23  ;;  %v12150_v24 = vld [vmem:[%s20963_s17 + $0x28] sm:$0xff] }
0x1c76   :  { %v11236_v3 = vpop.permute.xlu1 %11235 }
0x1c78   :  { %v11234_v1 = vpop.permute.xlu0 %11233 }
0x1c79   :  { %16025 = vmatprep.mubr.msk.f32.mxu1 %vm2695_vm4, %v11234_v1  ;;  %v12149_v1 = vld [vmem:[%s20963_s17 + $0x20] sm:$0xff] }
0x1c7a   :  { %16026 = vmatmul.mubr.msk.f32.vlgmr.msra.gmra.mxu1 %vm2695_vm4, %v11236_v3  ;;  %v12148_v3 = vld [vmem:[%s20963_s17 + $0x18] sm:$0xff] }
0x1c7b   :  { %16049 = vmatprep.mubr.msk.f32.mxu1 %vm11427_vm6, %v11425_v15  ;;  %16048 = vmatpush3.msk.msra.mxu1 %vm11434_vm5, %v20665_v0  ;;  %v12302_v15 = vld [vmem:[%s20964_s19 + $0x28] sm:$0xff] }
0x1c7c   :  { %16052 = vmatprep.subr.mxu1 %v11424_v49 }
0x1c7e   :  { %16050 = vmatmul.mubr.msk.f32.vlgmr.msra.gmra.mxu1 %vm11427_vm6, %v11426_v19  ;;  %v12301_v19 = vld [vmem:[%s20964_s19 + $0x20] sm:$0xff] }
0x1c7f   :  { %16053 = vmatpush3.msra.mxu1 %v11424_v49 }
0x1c80   :  { %16054 = vmatprep.subr.mxu1 %v11423_v20 }
0x1c81   :  { %16055 = vmatpush3.msra.mxu1 %v11423_v20 }
0x1c82   :  { %16056 = vmatprep.subr.mxu1 %v11422_v32 }
0x1c83   :  { %16057 = vmatpush3.msra.mxu1 %v11422_v32 }
0x1c84   :  { %16058 = vmatprep.subr.mxu1 %v11421_v28 }
0x1c85   :  { %16059 = vmatpush3.msra.mxu1 %v11421_v28 }
0x1c86   :  { %16060 = vmatprep.subr.mxu1 %v11420_v56 }
0x1c87   :  { %16061 = vmatpush3.msra.mxu1 %v11420_v56 }
0x1c88   :  { %16062 = vmatprep.subr.mxu1 %v11419_v30 }
0x1c89   :  { %16063 = vmatpush3.msra.mxu1 %v11419_v30 }
0x1c8a   :  { %16064 = vmatprep.subr.mxu1 %v11418_v23 }
0x1c8b   :  { %16065 = vmatpush3.msra.mxu1 %v11418_v23 }
0x1c8c   :  { %16066 = vmatprep.subr.mxu1 %v11417_v44 }
0x1c8d   :  { %16067 = vmatpush3.msra.mxu1 %v11417_v44 }
0x1c8e   :  { %16095 = vmatprep.subr.msk.mxu1 %vm11434_vm5, %v20665_v0 }
0x1d3a   :  { %v16027_v38 = vpop.f32.mrf.mxu1 }
0x1d3b   :  { %v11313_v50 = vadd.f32 %v16027_v38, %v12974_v31 }
0x1d3c   :  { %v11307_v17 = vpop.f32.mrf.mxu1 }
0x1d3d   :  { %v11308_v52 = vadd.f32 %v12974_v31, %v11307_v17  ;;  %v11317_v13 = vmax.f32 %v11313_v50, 0.0  ;;  %v12985_v17 = vld [vmem:[%s20965_s15] ss:$0 sm:$0xff] }
0x1d3e   :  { %v16051_v49 = vpop.f32.mrf.mxu1 }
0x1d3f   :  { %v11316_v8 = vmax.f32 %v11308_v52, 0.0 }
0x1d40   :  { %v11504_v32 = vpop.f32.mrf.mxu1 }
0x1d41   :  { %16044 = vmatprep.mubr.msk.f32.mxu0 %vm2695_vm4, %v11316_v8 }
0x1d42   :  { %16045 = vmatmul.mubr.msk.f32.vlgmr.msra.gmra.mxu0 %vm2695_vm4, %v11317_v13 }
0x1d43   :  { %16072 = vmatpush3.msk.msra.mxu0 %vm11434_vm5, %v20665_v0  ;;  %16073 = vmatprep.mubr.msk.f32.mxu0 %vm11427_vm6, %v12994_v14 }
0x1d44   :  { %16076 = vmatprep.subr.mxu0 %v12993_v41 }
0x1d46   :  { %16074 = vmatmul.mubr.msk.f32.vlgmr.msra.gmra.mxu0 %vm11427_vm6, %v12995_v58 }
0x1d47   :  { %16077 = vmatpush3.msra.mxu0 %v12993_v41 }
0x1d48   :  { %16078 = vmatprep.subr.mxu0 %v12992_v11 }
0x1d49   :  { %16079 = vmatpush3.msra.mxu0 %v12992_v11  ;;  %v13002_v11 = vld [vmem:[%s20965_s15 + $0x1] ss:$0 sm:$0xff] }
0x1d4a   :  { %16080 = vmatprep.subr.mxu0 %v12991_v46 }
0x1d4b   :  { %16081 = vmatpush3.msra.mxu0 %v12991_v46 }
0x1d4c   :  { %16082 = vmatprep.subr.mxu0 %v12990_v54 }
0x1d4d   :  { %16083 = vmatpush3.msra.mxu0 %v12990_v54 }
0x1d4e   :  { %16084 = vmatprep.subr.mxu0 %v12989_v27 }
0x1d4f   :  { %16085 = vmatpush3.msra.mxu0 %v12989_v27 }
0x1d50   :  { %16086 = vmatprep.subr.mxu0 %v12988_v59 }
0x1d51   :  { %16087 = vmatpush3.msra.mxu0 %v12988_v59 }
0x1d52   :  { %16088 = vmatprep.subr.mxu0 %v12987_v57 }
0x1d53   :  { %16089 = vmatpush3.msra.mxu0 %v12987_v57 }
0x1d54   :  { %16090 = vmatprep.subr.mxu0 %v12986_v9 }
0x1d55   :  { %16091 = vmatpush3.msra.mxu0 %v12986_v9 }
0x1d56   :  { %16119 = vmatprep.subr.msk.mxu0 %vm11434_vm5, %v20665_v0 }
0x1e02   :  { %v16046_v47 = vpop.f32.mrf.mxu0 }
0x1e03   :  { %v11411_v62 = vadd.f32 %v16046_v47, %v12977_v55 }
0x1e04   :  { %v11405_v42 = vpop.f32.mrf.mxu0 }
0x1e05   :  { %v11406_v12 = vadd.f32 %v12977_v55, %v11405_v42  ;;  %v20751_v51 = vmax.f32 %v11411_v62, 0.0 }
0x1e06   :  { %v16075_v20 = vpop.f32.mrf.mxu0 }
0x1e07   :  { %v11414_v5 = vmax.f32 %v11406_v12, 0.0  ;;  %v13019_v12 = vld [vmem:[%s20965_s15 + $0x2] ss:$0 sm:$0xff] }
0x1e08   :  { %v11687_v28 = vpop.f32.mrf.mxu0 }
0x1e09   :  { %16068 = vmatprep.mubr.msk.f32.mxu1 %vm2695_vm4, %v11414_v5  ;;  %16092 = vmatprep.mubr.msk.f32.mxu0 %vm2695_vm4, %v11414_v5 }
0x1e0a   :  { %16069 = vmatmul.mubr.msk.f32.vlgmr.msra.gmra.mxu1 %vm2695_vm4, %v20751_v51  ;;  %16093 = vmatmul.mubr.msk.f32.vlgmr.msra.gmra.mxu0 %vm2695_vm4, %v20751_v51 }
0x1e0b   :  { %16096 = vmatpush3.msk.msra.mxu1 %vm11434_vm5, %v20665_v0  ;;  %16120 = vmatpush3.msk.msra.mxu0 %vm11434_vm5, %v20665_v0  ;;  %v12303_v0 = vld [vmem:[%s20964_s19 + $0x30] sm:$0xff] }
0x1e0c   :  { %16097 = vmatprep.mubr.msk.f32.mxu1 %vm11427_vm6, %v13011_v16  ;;  %16100 = vmatprep.subr.mxu1 %v13010_v4 }
0x1e0d   :  { %16121 = vmatprep.mubr.msk.f32.mxu0 %vm11427_vm6, %v13028_v36  ;;  %16124 = vmatprep.subr.mxu0 %v13027_v18 }
0x1e0e   :  { %16098 = vmatmul.mubr.msk.f32.vlgmr.msra.gmra.mxu1 %vm11427_vm6, %v13012_v26  ;;  %16122 = vmatmul.mubr.msk.f32.vlgmr.msra.gmra.mxu0 %vm11427_vm6, %v13029_v48  ;;  %v13036_v26 = vld [vmem:[%s20965_s15 + $0x3] ss:$0 sm:$0xff] }
0x1e0f   :  { %16101 = vmatpush3.msra.mxu1 %v13010_v4  ;;  %16125 = vmatpush3.msra.mxu0 %v13027_v18 }
0x1e10   :  { %16102 = vmatprep.subr.mxu1 %v13009_v61  ;;  %16116 = vmatprep.mubr.msk.f32.mxu1 %vm2695_vm4, %v11414_v5 }
0x1e11   :  { %16126 = vmatprep.subr.mxu0 %v13026_v45  ;;  %16140 = vmatprep.mubr.msk.f32.mxu0 %vm2695_vm4, %v11414_v5 }
0x1e12   :  { %16103 = vmatpush3.msra.mxu1 %v13009_v61  ;;  %16127 = vmatpush3.msra.mxu0 %v13026_v45 }
0x1e13   :  { %16104 = vmatprep.subr.mxu1 %v13008_v63  ;;  %16128 = vmatprep.subr.mxu0 %v13025_v10 }
0x1e14   :  { %16105 = vmatpush3.msra.mxu1 %v13008_v63  ;;  %16129 = vmatpush3.msra.mxu0 %v13025_v10 }
0x1e15   :  { %16106 = vmatprep.subr.mxu1 %v13007_v53  ;;  %16130 = vmatprep.subr.mxu0 %v13024_v60 }
0x1e16   :  { %16107 = vmatpush3.msra.mxu1 %v13007_v53  ;;  %16131 = vmatpush3.msra.mxu0 %v13024_v60 }
0x1e17   :  { %16108 = vmatprep.subr.mxu1 %v13006_v2  ;;  %16132 = vmatprep.subr.mxu0 %v13023_v39 }
0x1e18   :  { %16109 = vmatpush3.msra.mxu1 %v13006_v2  ;;  %16133 = vmatpush3.msra.mxu0 %v13023_v39  ;;  %v12300_v2 = vld [vmem:[%s20964_s19 + $0x18] sm:$0xff]  ;;  %v12299_v39 = vld [vmem:[%s20964_s19 + $0x10] sm:$0xff] }
0x1e19   :  { %16110 = vmatprep.subr.mxu1 %v13005_v37  ;;  %16134 = vmatprep.subr.mxu0 %v13022_v25 }
0x1e1a   :  { %16111 = vmatpush3.msra.mxu1 %v13005_v37  ;;  %16135 = vmatpush3.msra.mxu0 %v13022_v25  ;;  %v12298_v37 = vld [vmem:[%s20964_s19 + $0x8] sm:$0xff]  ;;  %v12297_v25 = vld [vmem:[%s20964_s19] sm:$0xff] }
0x1e1b   :  { %16112 = vmatprep.subr.mxu1 %v13004_v35  ;;  %16136 = vmatprep.subr.mxu0 %v13021_v22 }
0x1e1c   :  { %16113 = vmatpush3.msra.mxu1 %v13004_v35  ;;  %16137 = vmatpush3.msra.mxu0 %v13021_v22  ;;  %v13037_v35 = vld [vmem:[%s20966_s18] ss:$0 sm:$0xff] }
0x1e1d   :  { %16114 = vmatprep.subr.mxu1 %v13003_v34  ;;  %16138 = vmatprep.subr.mxu0 %v13020_v21 }
0x1e1e   :  { %16115 = vmatpush3.msra.mxu1 %v13003_v34  ;;  %16139 = vmatpush3.msra.mxu0 %v13020_v21 }
0x1e1f   :  { %16117 = vmatmul.mubr.msk.f32.vlgmr.msra.gmra.mxu1 %vm2695_vm4, %v20751_v51  ;;  %16141 = vmatmul.mubr.msk.f32.vlgmr.msra.gmra.mxu0 %vm2695_vm4, %v20751_v51 }
0x1e20   :  { %16143 = vmatprep.subr.mxu1 %v12152_v6  ;;  %16171 = vmatprep.subr.mxu0 %v12304_v7 }
0x1e21   :  { %16144 = vmatpush3.msra.mxu1 %v12152_v6  ;;  %16172 = vmatpush3.msra.mxu0 %v12304_v7 }
0x1e22   :  { %16145 = vmatprep.subr.mxu1 %v12151_v43  ;;  %16173 = vmatprep.subr.mxu0 %v12303_v0 }
0x1e23   :  { %16146 = vmatpush3.msra.mxu1 %v12151_v43  ;;  %16174 = vmatpush3.msra.mxu0 %v12303_v0 }
0x1e24   :  { %16147 = vmatprep.subr.mxu1 %v12150_v24  ;;  %16175 = vmatprep.subr.mxu0 %v12302_v15 }
0x1e25   :  { %16148 = vmatpush3.msra.mxu1 %v12150_v24  ;;  %16176 = vmatpush3.msra.mxu0 %v12302_v15 }
0x1e26   :  { %16149 = vmatprep.subr.mxu1 %v12149_v1  ;;  %16177 = vmatprep.subr.mxu0 %v12301_v19 }
0x1e27   :  { %16150 = vmatpush3.msra.mxu1 %v12149_v1  ;;  %16178 = vmatpush3.msra.mxu0 %v12301_v19 }
0x1e28   :  { %16151 = vmatprep.subr.mxu1 %v12148_v3  ;;  %16179 = vmatprep.subr.mxu0 %v12300_v2 }
0x1e29   :  { %16152 = vmatpush3.msra.mxu1 %v12148_v3  ;;  %16180 = vmatpush3.msra.mxu0 %v12300_v2 }
0x1e2a   :  { %16153 = vmatprep.subr.mxu1 %v12147_v33  ;;  %16181 = vmatprep.subr.mxu0 %v12299_v39 }
0x1e2b   :  { %16154 = vmatpush3.msra.mxu1 %v12147_v33  ;;  %16182 = vmatpush3.msra.mxu0 %v12299_v39 }
0x1e2c   :  { %16155 = vmatprep.subr.mxu1 %v12146_v40  ;;  %16183 = vmatprep.subr.mxu0 %v12298_v37 }
0x1e2d   :  { %16156 = vmatpush3.msra.mxu1 %v12146_v40  ;;  %16184 = vmatpush3.msra.mxu0 %v12298_v37 }
0x1e2e   :  { %16157 = vmatprep.subr.mxu1 %v12145_v29  ;;  %16185 = vmatprep.subr.mxu0 %v12297_v25 }
0x1e2f   :  { %16158 = vmatpush3.msra.mxu1 %v12145_v29  ;;  %16186 = vmatpush3.msra.mxu0 %v12297_v25 }
0x1eca   :  { %v16070_v31 = vpop.f32.mrf.mxu1  ;;  %v16094_v38 = vpop.f32.mrf.mxu0 }
0x1ecb   :  { %v11591_v50 = vadd.f32 %v16070_v31, %v16051_v49  ;;  %v11768_v58 = vadd.f32 %v16094_v38, %v16075_v20 }
0x1ecc   :  { %v11585_v52 = vpop.f32.mrf.mxu1  ;;  %v11762_v8 = vpop.f32.mrf.mxu0 }
0x1ecd   :  { %v11586_v13 = vadd.f32 %v11585_v52, %v11504_v32  ;;  %v11763_v14 = vadd.f32 %v11762_v8, %v11687_v28  ;;  %v11602_v41 = vadd.f32 %v12985_v17, %v11591_v50  ;;  %v11780_v30 = vadd.f32 %v13002_v11, %v11768_v58  ;;  %v13046_v8 = vld [vmem:[%s20967_s20] ss:$0 sm:$0xff] }
0x1ece   :  { %v16099_v57 = vpop.f32.mrf.mxu1  ;;  %v16123_v44 = vpop.f32.mrf.mxu0 }
0x1ecf   :  { %v11601_v46 = vadd.f32 %v12985_v17, %v11586_v13  ;;  %v11779_v54 = vadd.f32 %v13002_v11, %v11763_v14  ;;  %v12138_v27 = vmax.f32 %v11602_v41, 0.0  ;;  %v12140_v23 = vmax.f32 %v11780_v30, 0.0 }
0x1ed0   :  { %v11865_v9 = vpop.f32.mrf.mxu1  ;;  %v12043_v55 = vpop.f32.mrf.mxu0 }
0x1ed1   :  { %v12137_v56 = vmax.f32 %v11601_v46, 0.0  ;;  %v12139_v59 = vmax.f32 %v11779_v54, 0.0 }
0x1ed3   :  { %16159 = vmatprep.mubr.msk.f32.mxu1 %vm2695_vm4, %v12137_v56 }
0x1ed4   :  { %16160 = vmatmul.mubr.msk.f32.vlgmr.msra.gmra.mxu1 %vm2695_vm4, %v12138_v27 }
0x1ed5   :  { %16162 = vmatprep.mubr.msk.f32.mxu1 %vm2695_vm4, %v12139_v59 }
0x1ed8   :  { %16163 = vmatmul.mubr.msk.f32.gmra.mxu1 %vm2695_vm4, %v12140_v23 }
0x1edf   :  { %v16118_v47 = vpop.f32.mrf.mxu1  ;;  %v16142_v62 = vpop.f32.mrf.mxu0 }
0x1ee0   :  { %v11946_v42 = vadd.f32 %v16118_v47, %v16099_v57  ;;  %v12124_v18 = vadd.f32 %v16142_v62, %v16123_v44 }
0x1ee1   :  { %v11940_v5 = vpop.f32.mrf.mxu1  ;;  %v12118_v51 = vpop.f32.mrf.mxu0 }
0x1ee2   :  { %v11941_v16 = vadd.f32 %v11940_v5, %v11865_v9  ;;  %v12119_v4 = vadd.f32 %v12118_v51, %v12043_v55  ;;  %v11958_v36 = vadd.f32 %v13019_v12, %v11946_v42  ;;  %v12136_v10 = vadd.f32 %v13036_v26, %v12124_v18 }
0x1ee4   :  { %v11957_v48 = vadd.f32 %v13019_v12, %v11941_v16  ;;  %v12135_v61 = vadd.f32 %v13036_v26, %v12119_v4  ;;  %v12142_v63 = vmax.f32 %v11958_v36, 0.0  ;;  %v12144_v60 = vmax.f32 %v12136_v10, 0.0 }
0x1ee6   :  { %v12141_v45 = vmax.f32 %v11957_v48, 0.0  ;;  %v12143_v53 = vmax.f32 %v12135_v61, 0.0 }
0x1ee8   :  { %16165 = vmatprep.mubr.msk.f32.mxu1 %vm2695_vm4, %v12141_v45 }
0x1ee9   :  { %16166 = vmatmul.mubr.msk.f32.gmra.mxu1 %vm2695_vm4, %v12142_v63 }
0x1eea   :  { %16168 = vmatprep.mubr.msk.f32.mxu1 %vm2695_vm4, %v12143_v53 }
0x1eed   :  { %16169 = vmatmul.mubr.msk.f32.gmra.mxu1 %vm2695_vm4, %v12144_v60 }
0x1f94   :  { %v16161_v22 = vpop.f32.mrf.mxu1 }
0x1f95   :  { %v12256_v34 = vadd.f32 %v16161_v22, %v13037_v35 }
0x1f96   :  { %v12250_v21 = vpop.f32.mrf.mxu1 }
0x1f97   :  { %v12251_v6 = vadd.f32 %v13037_v35, %v12250_v21  ;;  %v12290_v1 = vmax.f32 %v12256_v34, 0.0 }
0x1f98   :  { %v16164_v43 = vpop.f32.mrf.mxu1 }
0x1f99   :  { %v12289_v24 = vmax.f32 %v12251_v6, 0.0  ;;  %v12266_v3 = vadd.f32 %v16164_v43, %v13037_v35 }
0x1f9a   :  { %v12260_v33 = vpop.f32.mrf.mxu1 }
0x1f9b   :  { %v12261_v40 = vadd.f32 %v13037_v35, %v12260_v33  ;;  %16187 = vmatprep.mubr.msk.f32.mxu0 %vm2695_vm4, %v12289_v24  ;;  %v12292_v7 = vmax.f32 %v12266_v3, 0.0 }
0x1f9c   :  { %16188 = vmatmul.mubr.msk.f32.vlgmr.msra.gmra.mxu0 %vm2695_vm4, %v12290_v1 }
0x1f9d   :  { %v12291_v29 = vmax.f32 %v12261_v40, 0.0 }
0x1f9f   :  { %16190 = vmatprep.mubr.msk.f32.mxu0 %vm2695_vm4, %v12291_v29 }
0x1fa0   :  { %16191 = vmatmul.mubr.msk.f32.gmra.mxu0 %vm2695_vm4, %v12292_v7 }
0x1fa9   :  { %v16167_v0 = vpop.f32.mrf.mxu1 }
0x1faa   :  { %v12276_v15 = vadd.f32 %v16167_v0, %v13037_v35 }
0x1fab   :  { %v12270_v19 = vpop.f32.mrf.mxu1 }
0x1fac   :  { %v12271_v49 = vadd.f32 %v13037_v35, %v12270_v19  ;;  %v12294_v28 = vmax.f32 %v12276_v15, 0.0 }
0x1fad   :  { %v16170_v20 = vpop.f32.mrf.mxu1 }
0x1fae   :  { %v12293_v32 = vmax.f32 %v12271_v49, 0.0  ;;  %v12286_v31 = vadd.f32 %v16170_v20, %v13037_v35 }
0x1faf   :  { %v12280_v38 = vpop.f32.mrf.mxu1 }
0x1fb0   :  { %v12281_v50 = vadd.f32 %v13037_v35, %v12280_v38  ;;  %16193 = vmatprep.mubr.msk.f32.mxu0 %vm2695_vm4, %v12293_v32  ;;  %v12296_v52 = vmax.f32 %v12286_v31, 0.0 }
0x1fb1   :  { %16194 = vmatmul.mubr.msk.f32.gmra.mxu0 %vm2695_vm4, %v12294_v28 }
0x1fb2   :  { %v12295_v17 = vmax.f32 %v12281_v50, 0.0 }
0x1fb4   :  { %16196 = vmatprep.mubr.msk.f32.mxu0 %vm2695_vm4, %v12295_v17 }
0x1fb5   :  { %16197 = vmatmul.mubr.msk.f32.gmra.mxu0 %vm2695_vm4, %v12296_v52 }
0x205c   :  { %v16189_v13 = vpop.f32.mrf.mxu0 }
0x205d   :  { %v12408_v14 = vadd.f32 %v16189_v13, %v13046_v8 }
0x205e   :  { %v12402_v41 = vpop.f32.mrf.mxu0 }
0x205f   :  { %12443 = vst.msk [vmem:[%s20968_s21 + $0x8] sm:$0xff] %vm12441_vm7, %v12408_v14  ;;  %v12403_v58 = vadd.f32 %v13046_v8, %v12402_v41 }
0x2060   :  { %v16192_v11 = vpop.f32.mrf.mxu0 }
0x2061   :  { %12442 = vst.msk [vmem:[%s20968_s21] sm:$0xff] %vm12441_vm7, %v12403_v58  ;;  %v12418_v46 = vadd.f32 %v16192_v11, %v13046_v8 }
0x2062   :  { %v12412_v54 = vpop.f32.mrf.mxu0 }
0x2063   :  { %12445 = vst.msk [vmem:[%s20968_s21 + $0x18] sm:$0xff] %vm12441_vm7, %v12418_v46  ;;  %v12413_v56 = vadd.f32 %v13046_v8, %v12412_v54 }
0x2065   :  { %12444 = vst.msk [vmem:[%s20968_s21 + $0x10] sm:$0xff] %vm12441_vm7, %v12413_v56 }
0x2071   :  { %v16195_v27 = vpop.f32.mrf.mxu0 }
0x2072   :  { %v12428_v30 = vadd.f32 %v16195_v27, %v13046_v8 }
0x2073   :  { %v12422_v59 = vpop.f32.mrf.mxu0 }
0x2074   :  { %12447 = vst.msk [vmem:[%s20968_s21 + $0x28] sm:$0xff] %vm12441_vm7, %v12428_v30  ;;  %v12423_v23 = vadd.f32 %v13046_v8, %v12422_v59 }
0x2075   :  { %v16198_v57 = vpop.f32.mrf.mxu0 }
0x2076   :  { %12446 = vst.msk [vmem:[%s20968_s21 + $0x20] sm:$0xff] %vm12441_vm7, %v12423_v23  ;;  %v12438_v44 = vadd.f32 %v16198_v57, %v13046_v8 }
0x2077   :  { %v12432_v9 = vpop.f32.mrf.mxu0 }
0x2078   :  { %12449 = vst.msk [vmem:[%s20968_s21 + $0x38] sm:$0xff] %vm12441_vm7, %v12438_v44  ;;  %v12433_v55 = vadd.f32 %v13046_v8, %v12432_v9 }
0x207a   :  { %12448 = vst.msk [vmem:[%s20968_s21 + $0x30] sm:$0xff] %vm12441_vm7, %v12433_v55 }

</bundles_post_ra>
